<compile_context>
chip_gen: v5e
topology: v5e:2x2
jax: 0.10.0
libtpu: 0.0.40
codegen_flags: <defaults>
</compile_context>

<pallas_src>
import functools

import jax
import jax.numpy as jnp
from jax import lax
from jax.experimental import pallas as pl
from jax.experimental.pallas import tpu as pltpu

EPS = 1e-5
LANE = 128
_VMEM_LIMIT = 64 * 1024 * 1024


def _round_up(x, m):
    return (x + m - 1) // m * m


# ---------------------------------------------------------------------------
# Kernel 1: BatchNorm batch statistics (tiled reduction over rows)
# ---------------------------------------------------------------------------
def _bn_stats_kernel(x_ref, mean_ref, scale_ref, sum_ref, sq_ref, *, count):
    """Accumulate per-channel sum / sum-of-squares over row tiles; on the last
    grid step emit mean and rsqrt(var + eps) (biased variance, training mode)."""
    @pl.when(pl.program_id(0) == 0)
    def _():
        sum_ref[...] = jnp.zeros_like(sum_ref)
        sq_ref[...] = jnp.zeros_like(sq_ref)

    x = x_ref[...].astype(jnp.float32)
    sum_ref[...] += jnp.sum(x, axis=0, keepdims=True)
    sq_ref[...] += jnp.sum(x * x, axis=0, keepdims=True)

    @pl.when(pl.program_id(0) == pl.num_programs(0) - 1)
    def _():
        inv = 1.0 / count
        m = sum_ref[...] * inv
        v = jnp.maximum(sq_ref[...] * inv - m * m, 0.0)
        mean_ref[...] = m
        scale_ref[...] = lax.rsqrt(v + EPS)


def pallas_bn_stats(x2d, count, tile_m=512):
    m, cip = x2d.shape
    tm = min(tile_m, _round_up(m, 8))
    mp = _round_up(m, tm)
    if mp != m:  # zero rows do not perturb the sums; we divide by the true count
        x2d = jnp.pad(x2d, ((0, mp - m), (0, 0)))
    grid_m = mp // tm
    return pl.pallas_call(
        functools.partial(_bn_stats_kernel, count=float(count)),
        out_shape=(jax.ShapeDtypeStruct((1, cip), jnp.float32),
                   jax.ShapeDtypeStruct((1, cip), jnp.float32)),
        grid=(grid_m,),
        in_specs=[pl.BlockSpec((tm, cip), lambda i: (i, 0))],
        out_specs=(pl.BlockSpec((1, cip), lambda i: (0, 0)),
                   pl.BlockSpec((1, cip), lambda i: (0, 0))),
        scratch_shapes=[pltpu.VMEM((1, cip), jnp.float32),
                        pltpu.VMEM((1, cip), jnp.float32)],
        compiler_params=pltpu.CompilerParams(
            dimension_semantics=("arbitrary",),
            vmem_limit_bytes=_VMEM_LIMIT),
    )(x2d)


# ---------------------------------------------------------------------------
# In-kernel 3x3 conv: zero-pad one image tile into VMEM scratch, then 9
# accumulated MXU matmuls against resident weights (rows ordered (kh, kw, ci)).
# ---------------------------------------------------------------------------
def _conv3x3_acc(pad_ref, x_img, w_ref, h, w, ci, co):
    pad_ref[...] = jnp.zeros_like(pad_ref)
    pad_ref[1:h + 1, 1:w + 1, :] = x_img.astype(pad_ref.dtype)
    acc = jnp.zeros((h * w, co), jnp.float32)
    for kh in range(3):
        for kw in range(3):
            t = 3 * kh + kw
            win = pad_ref[kh:kh + h, kw:kw + w, :].reshape(h * w, ci)
            acc = acc + jnp.dot(win.astype(w_ref.dtype),
                                w_ref[t * ci:(t + 1) * ci, :],
                                preferred_element_type=jnp.float32)
    return acc


# ---------------------------------------------------------------------------
# Kernel 2: fused BatchNorm-apply + conv1 (3x3) + bias + SiLU
# ---------------------------------------------------------------------------
def _bn_conv1_silu_kernel(x_ref, mu_ref, sc_ref, w_ref, b_ref, o_ref, pad_ref):
    _, h, w, ci = x_ref.shape
    co = o_ref.shape[3]
    mu = mu_ref[...].reshape(1, 1, ci)
    sc = sc_ref[...].reshape(1, 1, ci)
    xn = (x_ref[0].astype(jnp.float32) - mu) * sc        # BatchNorm (fused)
    y = _conv3x3_acc(pad_ref, xn, w_ref, h, w, ci, co) + b_ref[...]
    y = y * jax.nn.sigmoid(y)                            # SiLU (f32 epilogue)
    o_ref[0] = y.reshape(h, w, co).astype(o_ref.dtype)


def pallas_bn_conv1_silu(x, mean, scale, w1, b1):
    n, h, w, cip = x.shape
    cop = w1.shape[1]
    return pl.pallas_call(
        _bn_conv1_silu_kernel,
        out_shape=jax.ShapeDtypeStruct((n, h, w, cop), jnp.float32),
        grid=(n,),
        in_specs=[
            pl.BlockSpec((1, h, w, cip), lambda i: (i, 0, 0, 0)),
            pl.BlockSpec((1, cip), lambda i: (0, 0)),
            pl.BlockSpec((1, cip), lambda i: (0, 0)),
            pl.BlockSpec((9 * cip, cop), lambda i: (0, 0)),
            pl.BlockSpec((1, cop), lambda i: (0, 0)),
        ],
        out_specs=pl.BlockSpec((1, h, w, cop), lambda i: (i, 0, 0, 0)),
        scratch_shapes=[pltpu.VMEM((h + 2, w + 2, cip), jnp.float32)],
        compiler_params=pltpu.CompilerParams(
            dimension_semantics=("parallel",),
            vmem_limit_bytes=_VMEM_LIMIT),
    )(x, mean, scale, w1, b1)


# ---------------------------------------------------------------------------
# Kernel 3: conv2 (3x3) + bias + fused residual branch (1x1 conv or identity)
# ---------------------------------------------------------------------------
def _conv2_residual_kernel(hid_ref, x_ref, w_ref, b_ref, wres_ref, bres_ref,
                           o_ref, pad_ref):
    _, h, w, cm = hid_ref.shape
    ci = x_ref.shape[3]
    co = o_ref.shape[3]
    y = _conv3x3_acc(pad_ref, hid_ref[0], w_ref, h, w, cm, co) + b_ref[...]
    xr = x_ref[0].reshape(h * w, ci)
    res = jnp.dot(xr.astype(wres_ref.dtype), wres_ref[...],
                  preferred_element_type=jnp.float32) + bres_ref[...]
    o_ref[0] = (y + res).reshape(h, w, co).astype(o_ref.dtype)


def _conv2_identity_kernel(hid_ref, x_ref, w_ref, b_ref, o_ref, pad_ref):
    _, h, w, cm = hid_ref.shape
    co = o_ref.shape[3]
    y = _conv3x3_acc(pad_ref, hid_ref[0], w_ref, h, w, cm, co) + b_ref[...]
    res = x_ref[0].astype(jnp.float32).reshape(h * w, co)
    o_ref[0] = (y + res).reshape(h, w, co).astype(o_ref.dtype)


def pallas_conv2_residual(hidden, x, w2, b2, wres=None, bres=None):
    n, h, w, cm = hidden.shape
    cip = x.shape[3]
    co = w2.shape[1]
    common = dict(
        out_shape=jax.ShapeDtypeStruct((n, h, w, co), jnp.float32),
        grid=(n,),
        out_specs=pl.BlockSpec((1, h, w, co), lambda i: (i, 0, 0, 0)),
        scratch_shapes=[pltpu.VMEM((h + 2, w + 2, cm), jnp.float32)],
        compiler_params=pltpu.CompilerParams(
            dimension_semantics=("parallel",),
            vmem_limit_bytes=_VMEM_LIMIT),
    )
    hid_spec = pl.BlockSpec((1, h, w, cm), lambda i: (i, 0, 0, 0))
    x_spec = pl.BlockSpec((1, h, w, cip), lambda i: (i, 0, 0, 0))
    w_spec = pl.BlockSpec((9 * cm, co), lambda i: (0, 0))
    b_spec = pl.BlockSpec((1, co), lambda i: (0, 0))
    if wres is not None:
        return pl.pallas_call(
            _conv2_residual_kernel,
            in_specs=[hid_spec, x_spec, w_spec, b_spec,
                      pl.BlockSpec((cip, co), lambda i: (0, 0)), b_spec],
            **common,
        )(hidden, x, w2, b2, wres, bres)
    return pl.pallas_call(
        _conv2_identity_kernel,
        in_specs=[hid_spec, x_spec, w_spec, b_spec],
        **common,
    )(hidden, x, w2, b2)


# ---------------------------------------------------------------------------
# Forward pass (NCHW in / NCHW out, matching the PyTorch module semantics)
# ---------------------------------------------------------------------------
def residual_block_forward(x_nchw, params, mxu_dtype=jnp.float32):
    n, cin, h, w = x_nchw.shape
    width = params["b1"].shape[0]
    cip = _round_up(cin, LANE)
    cop = _round_up(width, LANE)

    # NCHW -> NHWC, channels zero-padded to a multiple of 128 (lane-dense).
    x = jnp.transpose(x_nchw, (0, 2, 3, 1)).astype(jnp.float32)
    if cip != cin:
        x = jnp.pad(x, ((0, 0), (0, 0), (0, 0), (0, cip - cin)))

    # BatchNorm2d(affine=False) training-mode batch statistics.
    # TODO(synk): running_mean / running_var buffer updates are not modeled.
    mean, scale = pallas_bn_stats(x.reshape(n * h * w, cip), count=n * h * w)

    # conv1 weights: HWIO -> (9*Cin_pad, Cout_pad), tap-major row order.
    w1 = jnp.pad(params["w1"],
                 ((0, 0), (0, 0), (0, cip - cin), (0, cop - width)))
    w1 = w1.reshape(9 * cip, cop).astype(mxu_dtype)
    b1 = jnp.pad(params["b1"], (0, cop - width)).reshape(1, cop)

    hidden = pallas_bn_conv1_silu(x, mean, scale, w1, b1)

    w2 = jnp.pad(params["w2"],
                 ((0, 0), (0, 0), (0, cop - width), (0, cop - width)))
    w2 = w2.reshape(9 * cop, cop).astype(mxu_dtype)
    b2 = jnp.pad(params["b2"], (0, cop - width)).reshape(1, cop)

    if "w_res" in params:
        wres = jnp.pad(params["w_res"],
                       ((0, cip - cin), (0, cop - width))).astype(mxu_dtype)
        bres = jnp.pad(params["b_res"], (0, cop - width)).reshape(1, cop)
        out = pallas_conv2_residual(hidden, x, w2, b2, wres, bres)
    else:
        out = pallas_conv2_residual(hidden, x, w2, b2)

    out = out[..., :width]                        # drop channel padding
    return jnp.transpose(out, (0, 3, 1, 2))       # NHWC -> NCHW


# ---------------------------------------------------------------------------
# Parameter init (deterministic, synthetic) and pure-JAX reference
# ---------------------------------------------------------------------------
def init_params(key, input_width, width):
    ks = jax.random.split(key, 6)

    def uni(k, shape, fan_in):
        bound = 1.0 / jnp.sqrt(float(fan_in))
        return jax.random.uniform(k, shape, jnp.float32, -bound, bound)

    params = {
        "w1": uni(ks[0], (3, 3, input_width, width), 9 * input_width),
        "b1": uni(ks[1], (width,), 9 * input_width),
        "w2": uni(ks[2], (3, 3, width, width), 9 * width),
        "b2": uni(ks[3], (width,), 9 * width),
    }
    if input_width != width:
        params["w_res"] = uni(ks[4], (input_width, width), input_width)
        params["b_res"] = uni(ks[5], (width,), input_width)
    return params


def reference_forward(x_nchw, params):
    x = jnp.transpose(x_nchw, (0, 2, 3, 1))               # NHWC
    dn = ("NHWC", "HWIO", "NHWC")
    if "w_res" in params:
        res = lax.conv_general_dilated(
            x, params["w_res"].reshape(1, 1, *params["w_res"].shape),
            (1, 1), "SAME", dimension_numbers=dn) + params["b_res"]
    else:
        res = x
    mean = jnp.mean(x, axis=(0, 1, 2), keepdims=True)
    var = jnp.mean(jnp.square(x - mean), axis=(0, 1, 2), keepdims=True)
    xn = (x - mean) * lax.rsqrt(var + EPS)
    h = lax.conv_general_dilated(xn, params["w1"], (1, 1), "SAME",
                                 dimension_numbers=dn) + params["b1"]
    h = h * jax.nn.sigmoid(h)
    out = lax.conv_general_dilated(h, params["w2"], (1, 1), "SAME",
                                   dimension_numbers=dn) + params["b2"]
    out = out + res
    return jnp.transpose(out, (0, 3, 1, 2))


if __name__ == "__main__":
    key = jax.random.PRNGKey(0)
    k_x, k_p = jax.random.split(key)

    N, INPUT_WIDTH, WIDTH, H, W = 2, 4, 8, 16, 16
    x = jax.random.normal(k_x, (N, INPUT_WIDTH, H, W), jnp.float32)
    params = init_params(k_p, INPUT_WIDTH, WIDTH)

    fwd = jax.jit(residual_block_forward)
    out = jax.block_until_ready(fwd(x, params))

    ref = jax.block_until_ready(reference_forward(x, params))
    assert out.shape == (N, WIDTH, H, W)
    max_err = float(jnp.max(jnp.abs(out - ref)))
    assert jnp.allclose(out, ref, atol=1e-4, rtol=1e-4), max_err

    print("KERNEL_OK")
</pallas_src>

<mosaic_0001>
module attributes {stable_mosaic.version = 11 : i64} {
  func.func @_bn_stats_kernel(%arg0: i32, %arg1: memref<512x128xf32, #tpu.memory_space<vmem>>, %arg2: memref<1x128xf32, #tpu.memory_space<vmem>>, %arg3: memref<1x128xf32, #tpu.memory_space<vmem>>, %arg4: memref<1x128xf32, #tpu.memory_space<vmem>>, %arg5: memref<1x128xf32, #tpu.memory_space<vmem>>) attributes {dimension_semantics = [#tpu.dimension_semantics<arbitrary>], iteration_bounds = array<i64: 1>, scalar_prefetch = 0 : i64, scratch_operands = 2 : i64, tpu.core_type = #tpu.core_type<tc>, window_params = [{transform_indices = @transform_0, window_bounds = array<i64: 512, 128>}, {pipeline_mode = #tpu.pipeline_mode<synchronous>, transform_indices = @transform_1, window_bounds = array<i64: 1, 128>}, {pipeline_mode = #tpu.pipeline_mode<synchronous>, transform_indices = @transform_2, window_bounds = array<i64: 1, 128>}]} {
    %c0_i32 = arith.constant 0 : i32
    %0 = arith.cmpi eq, %arg0, %c0_i32 : i32
    %1 = arith.extui %0 : i1 to i32
    %c0_i32_0 = arith.constant 0 : i32
    %2 = arith.cmpi ne, %1, %c0_i32_0 : i32
    scf.if %2 {
      %cst_13 = arith.constant 0.000000e+00 : f32
      %18 = vector.broadcast %cst_13 : f32 to vector<1x128xf32>
      %c0_14 = arith.constant 0 : index
      %c0_15 = arith.constant 0 : index
      %19 = vector.load %arg4[%c0_14, %c0_15] : memref<1x128xf32, #tpu.memory_space<vmem>>, vector<1x128xf32>
      tpu.vector_store %arg4[%c0_14, %c0_15], %18 {strides = array<i32>} : memref<1x128xf32, #tpu.memory_space<vmem>>, vector<1x128xf32>,
      %cst_16 = arith.constant 0.000000e+00 : f32
      %20 = vector.broadcast %cst_16 : f32 to vector<1x128xf32>
      %c0_17 = arith.constant 0 : index
      %c0_18 = arith.constant 0 : index
      %21 = vector.load %arg5[%c0_17, %c0_18] : memref<1x128xf32, #tpu.memory_space<vmem>>, vector<1x128xf32>
      tpu.vector_store %arg5[%c0_17, %c0_18], %20 {strides = array<i32>} : memref<1x128xf32, #tpu.memory_space<vmem>>, vector<1x128xf32>,
    } else {
    }
    %c0 = arith.constant 0 : index
    %c0_1 = arith.constant 0 : index
    %3 = vector.load %arg1[%c0, %c0_1] : memref<512x128xf32, #tpu.memory_space<vmem>>, vector<512x128xf32>
    %c0_2 = arith.constant 0 : index
    %c0_3 = arith.constant 0 : index
    %4 = vector.load %arg4[%c0_2, %c0_3] : memref<1x128xf32, #tpu.memory_space<vmem>>, vector<1x128xf32>
    %cst = arith.constant dense<0.000000e+00> : vector<128xf32>
    %5 = vector.multi_reduction <add>, %3, %cst [0] : vector<512x128xf32> to vector<128xf32>
    %6 = vector.shape_cast %5 : vector<128xf32> to vector<1x128xf32>
    %7 = arith.addf %4, %6 : vector<1x128xf32>
    %c0_4 = arith.constant 0 : index
    %c0_5 = arith.constant 0 : index
    %8 = vector.load %arg4[%c0_4, %c0_5] : memref<1x128xf32, #tpu.memory_space<vmem>>, vector<1x128xf32>
    tpu.vector_store %arg4[%c0_4, %c0_5], %7 {strides = array<i32>} : memref<1x128xf32, #tpu.memory_space<vmem>>, vector<1x128xf32>,
    %c0_6 = arith.constant 0 : index
    %c0_7 = arith.constant 0 : index
    %9 = vector.load %arg5[%c0_6, %c0_7] : memref<1x128xf32, #tpu.memory_space<vmem>>, vector<1x128xf32>
    %10 = arith.mulf %3, %3 : vector<512x128xf32>
    %cst_8 = arith.constant dense<0.000000e+00> : vector<128xf32>
    %11 = vector.multi_reduction <add>, %10, %cst_8 [0] : vector<512x128xf32> to vector<128xf32>
    %12 = vector.shape_cast %11 : vector<128xf32> to vector<1x128xf32>
    %13 = arith.addf %9, %12 : vector<1x128xf32>
    %c0_9 = arith.constant 0 : index
    %c0_10 = arith.constant 0 : index
    %14 = vector.load %arg5[%c0_9, %c0_10] : memref<1x128xf32, #tpu.memory_space<vmem>>, vector<1x128xf32>
    tpu.vector_store %arg5[%c0_9, %c0_10], %13 {strides = array<i32>} : memref<1x128xf32, #tpu.memory_space<vmem>>, vector<1x128xf32>,
    %c0_i32_11 = arith.constant 0 : i32
    %15 = arith.cmpi eq, %arg0, %c0_i32_11 : i32
    %16 = arith.extui %15 : i1 to i32
    %c0_i32_12 = arith.constant 0 : i32
    %17 = arith.cmpi ne, %16, %c0_i32_12 : i32
    scf.if %17 {
      %c0_13 = arith.constant 0 : index
      %c0_14 = arith.constant 0 : index
      %18 = vector.load %arg4[%c0_13, %c0_14] : memref<1x128xf32, #tpu.memory_space<vmem>>, vector<1x128xf32>
      %cst_15 = arith.constant 0.001953125 : f32
      %19 = vector.broadcast %cst_15 : f32 to vector<1x128xf32>
      %20 = arith.mulf %18, %19 : vector<1x128xf32>
      %c0_16 = arith.constant 0 : index
      %c0_17 = arith.constant 0 : index
      %21 = vector.load %arg5[%c0_16, %c0_17] : memref<1x128xf32, #tpu.memory_space<vmem>>, vector<1x128xf32>
      %cst_18 = arith.constant 0.001953125 : f32
      %22 = vector.broadcast %cst_18 : f32 to vector<1x128xf32>
      %23 = arith.mulf %21, %22 : vector<1x128xf32>
      %24 = arith.mulf %20, %20 : vector<1x128xf32>
      %25 = arith.subf %23, %24 : vector<1x128xf32>
      %cst_19 = arith.constant 0.000000e+00 : f32
      %26 = vector.broadcast %cst_19 : f32 to vector<1x128xf32>
      %27 = arith.maximumf %25, %26 : vector<1x128xf32>
      %c0_20 = arith.constant 0 : index
      %c0_21 = arith.constant 0 : index
      %28 = vector.load %arg2[%c0_20, %c0_21] : memref<1x128xf32, #tpu.memory_space<vmem>>, vector<1x128xf32>
      tpu.vector_store %arg2[%c0_20, %c0_21], %20 {strides = array<i32>} : memref<1x128xf32, #tpu.memory_space<vmem>>, vector<1x128xf32>,
      %cst_22 = arith.constant 9.99999974E-6 : f32
      %29 = vector.broadcast %cst_22 : f32 to vector<1x128xf32>
      %30 = arith.addf %27, %29 : vector<1x128xf32>
      %31 = math.rsqrt %30 : vector<1x128xf32>
      %c0_23 = arith.constant 0 : index
      %c0_24 = arith.constant 0 : index
      %32 = vector.load %arg3[%c0_23, %c0_24] : memref<1x128xf32, #tpu.memory_space<vmem>>, vector<1x128xf32>
      tpu.vector_store %arg3[%c0_23, %c0_24], %31 {strides = array<i32>} : memref<1x128xf32, #tpu.memory_space<vmem>>, vector<1x128xf32>,
    } else {
    }
    return
  }
  func.func @transform_0(%arg0: i32) -> (i32, i32) {
    %c0_i32 = arith.constant 0 : i32
    %c0_i32_0 = arith.constant 0 : i32
    return %arg0, %c0_i32 : i32, i32
  }
  func.func @transform_1(%arg0: i32) -> (i32, i32) {
    %c0_i32 = arith.constant 0 : i32
    %c0_i32_0 = arith.constant 0 : i32
    %c0_i32_1 = arith.constant 0 : i32
    return %c0_i32, %c0_i32_0 : i32, i32
  }
  func.func @transform_2(%arg0: i32) -> (i32, i32) {
    %c0_i32 = arith.constant 0 : i32
    %c0_i32_0 = arith.constant 0 : i32
    %c0_i32_1 = arith.constant 0 : i32
    return %c0_i32, %c0_i32_0 : i32, i32
  }
}

module attributes {stable_mosaic.version = 11 : i64} {
  func.func @_bn_conv1_silu_kernel(%arg0: i32, %arg1: memref<1x16x16x128xf32, #tpu.memory_space<vmem>>, %arg2: memref<1x128xf32, #tpu.memory_space<vmem>>, %arg3: memref<1x128xf32, #tpu.memory_space<vmem>>, %arg4: memref<1152x128xf32, #tpu.memory_space<vmem>>, %arg5: memref<1x128xf32, #tpu.memory_space<vmem>>, %arg6: memref<1x16x16x128xf32, #tpu.memory_space<vmem>>, %arg7: memref<18x18x128xf32, #tpu.memory_space<vmem>>) attributes {dimension_semantics = [#tpu.dimension_semantics<parallel>], iteration_bounds = array<i64: 2>, scalar_prefetch = 0 : i64, scratch_operands = 1 : i64, tpu.core_type = #tpu.core_type<tc>, window_params = [{transform_indices = @transform_0, window_bounds = array<i64: 1, 16, 16, 128>}, {pipeline_mode = #tpu.pipeline_mode<synchronous>, transform_indices = @transform_1, window_bounds = array<i64: 1, 128>}, {pipeline_mode = #tpu.pipeline_mode<synchronous>, transform_indices = @transform_2, window_bounds = array<i64: 1, 128>}, {pipeline_mode = #tpu.pipeline_mode<synchronous>, transform_indices = @transform_3, window_bounds = array<i64: 1152, 128>}, {pipeline_mode = #tpu.pipeline_mode<synchronous>, transform_indices = @transform_4, window_bounds = array<i64: 1, 128>}, {transform_indices = @transform_5, window_bounds = array<i64: 1, 16, 16, 128>}]} {
    %c0 = arith.constant 0 : index
    %c0_0 = arith.constant 0 : index
    %0 = vector.load %arg2[%c0, %c0_0] : memref<1x128xf32, #tpu.memory_space<vmem>>, vector<1x128xf32>
    %1 = vector.shape_cast %0 : vector<1x128xf32> to vector<1x1x128xf32>
    %c0_1 = arith.constant 0 : index
    %c0_2 = arith.constant 0 : index
    %2 = vector.load %arg3[%c0_1, %c0_2] : memref<1x128xf32, #tpu.memory_space<vmem>>, vector<1x128xf32>
    %3 = vector.shape_cast %2 : vector<1x128xf32> to vector<1x1x128xf32>
    %c0_3 = arith.constant 0 : index
    %c0_4 = arith.constant 0 : index
    %c0_5 = arith.constant 0 : index
    %c0_6 = arith.constant 0 : index
    %4 = vector.load %arg1[%c0_3, %c0_4, %c0_5, %c0_6] : memref<1x16x16x128xf32, #tpu.memory_space<vmem>>, vector<1x16x16x128xf32>
    %5 = vector.shape_cast %4 : vector<1x16x16x128xf32> to vector<16x16x128xf32>
    %6 = vector.broadcast %1 : vector<1x1x128xf32> to vector<16x16x128xf32>
    %7 = arith.subf %5, %6 : vector<16x16x128xf32>
    %8 = vector.broadcast %3 : vector<1x1x128xf32> to vector<16x16x128xf32>
    %9 = arith.mulf %7, %8 : vector<16x16x128xf32>
    %cst = arith.constant 0.000000e+00 : f32
    %10 = vector.broadcast %cst : f32 to vector<18x18x128xf32>
    %c0_7 = arith.constant 0 : index
    %c0_8 = arith.constant 0 : index
    %c0_9 = arith.constant 0 : index
    %11 = vector.load %arg7[%c0_7, %c0_8, %c0_9] : memref<18x18x128xf32, #tpu.memory_space<vmem>>, vector<18x18x128xf32>
    tpu.vector_store %arg7[%c0_7, %c0_8, %c0_9], %10 {strides = array<i32>} : memref<18x18x128xf32, #tpu.memory_space<vmem>>, vector<18x18x128xf32>,
    %c1 = arith.constant 1 : index
    %c1_10 = arith.constant 1 : index
    %c0_11 = arith.constant 0 : index
    %12 = vector.load %arg7[%c1, %c1_10, %c0_11] : memref<18x18x128xf32, #tpu.memory_space<vmem>>, vector<16x16x128xf32>
    tpu.vector_store %arg7[%c1, %c1_10, %c0_11], %9 {strides = array<i32>} : memref<18x18x128xf32, #tpu.memory_space<vmem>>, vector<16x16x128xf32>,
    %cst_12 = arith.constant 0.000000e+00 : f32
    %13 = vector.broadcast %cst_12 : f32 to vector<256x128xf32>
    %c0_13 = arith.constant 0 : index
    %c0_14 = arith.constant 0 : index
    %c0_15 = arith.constant 0 : index
    %14 = vector.load %arg7[%c0_13, %c0_14, %c0_15] : memref<18x18x128xf32, #tpu.memory_space<vmem>>, vector<16x16x128xf32>
    %15 = vector.shape_cast %14 : vector<16x16x128xf32> to vector<256x128xf32>
    %c0_16 = arith.constant 0 : index
    %c0_17 = arith.constant 0 : index
    %16 = vector.load %arg4[%c0_16, %c0_17] : memref<1152x128xf32, #tpu.memory_space<vmem>>, vector<128x128xf32>
    %cst_18 = arith.constant dense<0.000000e+00> : vector<256x128xf32>
    %17 = tpu.matmul %15, %16, %cst_18 {dimension_numbers = #tpu.dot_dimension_numbers<[1], [0], [0], [1], [0, 0, 1, 1], [], []>} : vector<256x128xf32>, vector<128x128xf32>, vector<256x128xf32> -> vector<256x128xf32>
    %18 = arith.addf %13, %17 : vector<256x128xf32>
    %c0_19 = arith.constant 0 : index
    %c1_20 = arith.constant 1 : index
    %c0_21 = arith.constant 0 : index
    %19 = vector.load %arg7[%c0_19, %c1_20, %c0_21] : memref<18x18x128xf32, #tpu.memory_space<vmem>>, vector<16x16x128xf32>
    %20 = vector.shape_cast %19 : vector<16x16x128xf32> to vector<256x128xf32>
    %c128 = arith.constant 128 : index
    %c0_22 = arith.constant 0 : index
    %21 = vector.load %arg4[%c128, %c0_22] : memref<1152x128xf32, #tpu.memory_space<vmem>>, vector<128x128xf32>
    %cst_23 = arith.constant dense<0.000000e+00> : vector<256x128xf32>
    %22 = tpu.matmul %20, %21, %cst_23 {dimension_numbers = #tpu.dot_dimension_numbers<[1], [0], [0], [1], [0, 0, 1, 1], [], []>} : vector<256x128xf32>, vector<128x128xf32>, vector<256x128xf32> -> vector<256x128xf32>
    %23 = arith.addf %18, %22 : vector<256x128xf32>
    %c0_24 = arith.constant 0 : index
    %c2 = arith.constant 2 : index
    %c0_25 = arith.constant 0 : index
    %24 = vector.load %arg7[%c0_24, %c2, %c0_25] : memref<18x18x128xf32, #tpu.memory_space<vmem>>, vector<16x16x128xf32>
    %25 = vector.shape_cast %24 : vector<16x16x128xf32> to vector<256x128xf32>
    %c256 = arith.constant 256 : index
    %c0_26 = arith.constant 0 : index
    %26 = vector.load %arg4[%c256, %c0_26] : memref<1152x128xf32, #tpu.memory_space<vmem>>, vector<128x128xf32>
    %cst_27 = arith.constant dense<0.000000e+00> : vector<256x128xf32>
    %27 = tpu.matmul %25, %26, %cst_27 {dimension_numbers = #tpu.dot_dimension_numbers<[1], [0], [0], [1], [0, 0, 1, 1], [], []>} : vector<256x128xf32>, vector<128x128xf32>, vector<256x128xf32> -> vector<256x128xf32>
    %28 = arith.addf %23, %27 : vector<256x128xf32>
    %c1_28 = arith.constant 1 : index
    %c0_29 = arith.constant 0 : index
    %c0_30 = arith.constant 0 : index
    %29 = vector.load %arg7[%c1_28, %c0_29, %c0_30] : memref<18x18x128xf32, #tpu.memory_space<vmem>>, vector<16x16x128xf32>
    %30 = vector.shape_cast %29 : vector<16x16x128xf32> to vector<256x128xf32>
    %c384 = arith.constant 384 : index
    %c0_31 = arith.constant 0 : index
    %31 = vector.load %arg4[%c384, %c0_31] : memref<1152x128xf32, #tpu.memory_space<vmem>>, vector<128x128xf32>
    %cst_32 = arith.constant dense<0.000000e+00> : vector<256x128xf32>
    %32 = tpu.matmul %30, %31, %cst_32 {dimension_numbers = #tpu.dot_dimension_numbers<[1], [0], [0], [1], [0, 0, 1, 1], [], []>} : vector<256x128xf32>, vector<128x128xf32>, vector<256x128xf32> -> vector<256x128xf32>
    %33 = arith.addf %28, %32 : vector<256x128xf32>
    %c1_33 = arith.constant 1 : index
    %c1_34 = arith.constant 1 : index
    %c0_35 = arith.constant 0 : index
    %34 = vector.load %arg7[%c1_33, %c1_34, %c0_35] : memref<18x18x128xf32, #tpu.memory_space<vmem>>, vector<16x16x128xf32>
    %35 = vector.shape_cast %34 : vector<16x16x128xf32> to vector<256x128xf32>
    %c512 = arith.constant 512 : index
    %c0_36 = arith.constant 0 : index
    %36 = vector.load %arg4[%c512, %c0_36] : memref<1152x128xf32, #tpu.memory_space<vmem>>, vector<128x128xf32>
    %cst_37 = arith.constant dense<0.000000e+00> : vector<256x128xf32>
    %37 = tpu.matmul %35, %36, %cst_37 {dimension_numbers = #tpu.dot_dimension_numbers<[1], [0], [0], [1], [0, 0, 1, 1], [], []>} : vector<256x128xf32>, vector<128x128xf32>, vector<256x128xf32> -> vector<256x128xf32>
    %38 = arith.addf %33, %37 : vector<256x128xf32>
    %c1_38 = arith.constant 1 : index
    %c2_39 = arith.constant 2 : index
    %c0_40 = arith.constant 0 : index
    %39 = vector.load %arg7[%c1_38, %c2_39, %c0_40] : memref<18x18x128xf32, #tpu.memory_space<vmem>>, vector<16x16x128xf32>
    %40 = vector.shape_cast %39 : vector<16x16x128xf32> to vector<256x128xf32>
    %c640 = arith.constant 640 : index
    %c0_41 = arith.constant 0 : index
    %41 = vector.load %arg4[%c640, %c0_41] : memref<1152x128xf32, #tpu.memory_space<vmem>>, vector<128x128xf32>
    %cst_42 = arith.constant dense<0.000000e+00> : vector<256x128xf32>
    %42 = tpu.matmul %40, %41, %cst_42 {dimension_numbers = #tpu.dot_dimension_numbers<[1], [0], [0], [1], [0, 0, 1, 1], [], []>} : vector<256x128xf32>, vector<128x128xf32>, vector<256x128xf32> -> vector<256x128xf32>
    %43 = arith.addf %38, %42 : vector<256x128xf32>
    %c2_43 = arith.constant 2 : index
    %c0_44 = arith.constant 0 : index
    %c0_45 = arith.constant 0 : index
    %44 = vector.load %arg7[%c2_43, %c0_44, %c0_45] : memref<18x18x128xf32, #tpu.memory_space<vmem>>, vector<16x16x128xf32>
    %45 = vector.shape_cast %44 : vector<16x16x128xf32> to vector<256x128xf32>
    %c768 = arith.constant 768 : index
    %c0_46 = arith.constant 0 : index
    %46 = vector.load %arg4[%c768, %c0_46] : memref<1152x128xf32, #tpu.memory_space<vmem>>, vector<128x128xf32>
    %cst_47 = arith.constant dense<0.000000e+00> : vector<256x128xf32>
    %47 = tpu.matmul %45, %46, %cst_47 {dimension_numbers = #tpu.dot_dimension_numbers<[1], [0], [0], [1], [0, 0, 1, 1], [], []>} : vector<256x128xf32>, vector<128x128xf32>, vector<256x128xf32> -> vector<256x128xf32>
    %48 = arith.addf %43, %47 : vector<256x128xf32>
    %c2_48 = arith.constant 2 : index
    %c1_49 = arith.constant 1 : index
    %c0_50 = arith.constant 0 : index
    %49 = vector.load %arg7[%c2_48, %c1_49, %c0_50] : memref<18x18x128xf32, #tpu.memory_space<vmem>>, vector<16x16x128xf32>
    %50 = vector.shape_cast %49 : vector<16x16x128xf32> to vector<256x128xf32>
    %c896 = arith.constant 896 : index
    %c0_51 = arith.constant 0 : index
    %51 = vector.load %arg4[%c896, %c0_51] : memref<1152x128xf32, #tpu.memory_space<vmem>>, vector<128x128xf32>
    %cst_52 = arith.constant dense<0.000000e+00> : vector<256x128xf32>
    %52 = tpu.matmul %50, %51, %cst_52 {dimension_numbers = #tpu.dot_dimension_numbers<[1], [0], [0], [1], [0, 0, 1, 1], [], []>} : vector<256x128xf32>, vector<128x128xf32>, vector<256x128xf32> -> vector<256x128xf32>
    %53 = arith.addf %48, %52 : vector<256x128xf32>
    %c2_53 = arith.constant 2 : index
    %c2_54 = arith.constant 2 : index
    %c0_55 = arith.constant 0 : index
    %54 = vector.load %arg7[%c2_53, %c2_54, %c0_55] : memref<18x18x128xf32, #tpu.memory_space<vmem>>, vector<16x16x128xf32>
    %55 = vector.shape_cast %54 : vector<16x16x128xf32> to vector<256x128xf32>
    %c1024 = arith.constant 1024 : index
    %c0_56 = arith.constant 0 : index
    %56 = vector.load %arg4[%c1024, %c0_56] : memref<1152x128xf32, #tpu.memory_space<vmem>>, vector<128x128xf32>
    %cst_57 = arith.constant dense<0.000000e+00> : vector<256x128xf32>
    %57 = tpu.matmul %55, %56, %cst_57 {dimension_numbers = #tpu.dot_dimension_numbers<[1], [0], [0], [1], [0, 0, 1, 1], [], []>} : vector<256x128xf32>, vector<128x128xf32>, vector<256x128xf32> -> vector<256x128xf32>
    %58 = arith.addf %53, %57 : vector<256x128xf32>
    %c0_58 = arith.constant 0 : index
    %c0_59 = arith.constant 0 : index
    %59 = vector.load %arg5[%c0_58, %c0_59] : memref<1x128xf32, #tpu.memory_space<vmem>>, vector<1x128xf32>
    %60 = vector.broadcast %59 : vector<1x128xf32> to vector<256x128xf32>
    %61 = arith.addf %58, %60 : vector<256x128xf32>
    %62 = arith.negf %61 : vector<256x128xf32>
    %63 = math.exp %62 : vector<256x128xf32>
    %cst_60 = arith.constant 1.000000e+00 : f32
    %64 = vector.broadcast %cst_60 : f32 to vector<256x128xf32>
    %65 = arith.addf %64, %63 : vector<256x128xf32>
    %66 = arith.divf %64, %65 : vector<256x128xf32>
    %67 = arith.mulf %61, %66 : vector<256x128xf32>
    %68 = vector.shape_cast %67 : vector<256x128xf32> to vector<16x16x128xf32>
    %c0_61 = arith.constant 0 : index
    %c0_62 = arith.constant 0 : index
    %c0_63 = arith.constant 0 : index
    %c0_64 = arith.constant 0 : index
    %69 = vector.load %arg6[%c0_61, %c0_62, %c0_63, %c0_64] : memref<1x16x16x128xf32, #tpu.memory_space<vmem>>, vector<1x16x16x128xf32>
    %70 = vector.shape_cast %69 : vector<1x16x16x128xf32> to vector<16x16x128xf32>
    %71 = vector.shape_cast %68 : vector<16x16x128xf32> to vector<1x16x16x128xf32>
    tpu.vector_store %arg6[%c0_61, %c0_62, %c0_63, %c0_64], %71 {strides = array<i32>} : memref<1x16x16x128xf32, #tpu.memory_space<vmem>>, vector<1x16x16x128xf32>,
    return
  }
  func.func @transform_0(%arg0: i32) -> (i32, i32, i32, i32) {
    %c0_i32 = arith.constant 0 : i32
    %c0_i32_0 = arith.constant 0 : i32
    %c0_i32_1 = arith.constant 0 : i32
    %c0_i32_2 = arith.constant 0 : i32
    return %arg0, %c0_i32, %c0_i32_0, %c0_i32_1 : i32, i32, i32, i32
  }
  func.func @transform_1(%arg0: i32) -> (i32, i32) {
    %c0_i32 = arith.constant 0 : i32
    %c0_i32_0 = arith.constant 0 : i32
    %c0_i32_1 = arith.constant 0 : i32
    return %c0_i32, %c0_i32_0 : i32, i32
  }
  func.func @transform_2(%arg0: i32) -> (i32, i32) {
    %c0_i32 = arith.constant 0 : i32
    %c0_i32_0 = arith.constant 0 : i32
    %c0_i32_1 = arith.constant 0 : i32
    return %c0_i32, %c0_i32_0 : i32, i32
  }
  func.func @transform_3(%arg0: i32) -> (i32, i32) {
    %c0_i32 = arith.constant 0 : i32
    %c0_i32_0 = arith.constant 0 : i32
    %c0_i32_1 = arith.constant 0 : i32
    return %c0_i32, %c0_i32_0 : i32, i32
  }
  func.func @transform_4(%arg0: i32) -> (i32, i32) {
    %c0_i32 = arith.constant 0 : i32
    %c0_i32_0 = arith.constant 0 : i32
    %c0_i32_1 = arith.constant 0 : i32
    return %c0_i32, %c0_i32_0 : i32, i32
  }
  func.func @transform_5(%arg0: i32) -> (i32, i32, i32, i32) {
    %c0_i32 = arith.constant 0 : i32
    %c0_i32_0 = arith.constant 0 : i32
    %c0_i32_1 = arith.constant 0 : i32
    %c0_i32_2 = arith.constant 0 : i32
    return %arg0, %c0_i32, %c0_i32_0, %c0_i32_1 : i32, i32, i32, i32
  }
}

module attributes {stable_mosaic.version = 11 : i64} {
  func.func @_conv2_residual_kernel(%arg0: i32, %arg1: memref<1x16x16x128xf32, #tpu.memory_space<vmem>>, %arg2: memref<1x16x16x128xf32, #tpu.memory_space<vmem>>, %arg3: memref<1152x128xf32, #tpu.memory_space<vmem>>, %arg4: memref<1x128xf32, #tpu.memory_space<vmem>>, %arg5: memref<128x128xf32, #tpu.memory_space<vmem>>, %arg6: memref<1x128xf32, #tpu.memory_space<vmem>>, %arg7: memref<1x16x16x128xf32, #tpu.memory_space<vmem>>, %arg8: memref<18x18x128xf32, #tpu.memory_space<vmem>>) attributes {dimension_semantics = [#tpu.dimension_semantics<parallel>], iteration_bounds = array<i64: 2>, scalar_prefetch = 0 : i64, scratch_operands = 1 : i64, tpu.core_type = #tpu.core_type<tc>, window_params = [{transform_indices = @transform_0, window_bounds = array<i64: 1, 16, 16, 128>}, {transform_indices = @transform_1, window_bounds = array<i64: 1, 16, 16, 128>}, {pipeline_mode = #tpu.pipeline_mode<synchronous>, transform_indices = @transform_2, window_bounds = array<i64: 1152, 128>}, {pipeline_mode = #tpu.pipeline_mode<synchronous>, transform_indices = @transform_3, window_bounds = array<i64: 1, 128>}, {pipeline_mode = #tpu.pipeline_mode<synchronous>, transform_indices = @transform_4, window_bounds = array<i64: 128, 128>}, {pipeline_mode = #tpu.pipeline_mode<synchronous>, transform_indices = @transform_5, window_bounds = array<i64: 1, 128>}, {transform_indices = @transform_6, window_bounds = array<i64: 1, 16, 16, 128>}]} {
    %c0 = arith.constant 0 : index
    %c0_0 = arith.constant 0 : index
    %c0_1 = arith.constant 0 : index
    %c0_2 = arith.constant 0 : index
    %0 = vector.load %arg1[%c0, %c0_0, %c0_1, %c0_2] : memref<1x16x16x128xf32, #tpu.memory_space<vmem>>, vector<1x16x16x128xf32>
    %1 = vector.shape_cast %0 : vector<1x16x16x128xf32> to vector<16x16x128xf32>
    %cst = arith.constant 0.000000e+00 : f32
    %2 = vector.broadcast %cst : f32 to vector<18x18x128xf32>
    %c0_3 = arith.constant 0 : index
    %c0_4 = arith.constant 0 : index
    %c0_5 = arith.constant 0 : index
    %3 = vector.load %arg8[%c0_3, %c0_4, %c0_5] : memref<18x18x128xf32, #tpu.memory_space<vmem>>, vector<18x18x128xf32>
    tpu.vector_store %arg8[%c0_3, %c0_4, %c0_5], %2 {strides = array<i32>} : memref<18x18x128xf32, #tpu.memory_space<vmem>>, vector<18x18x128xf32>,
    %c1 = arith.constant 1 : index
    %c1_6 = arith.constant 1 : index
    %c0_7 = arith.constant 0 : index
    %4 = vector.load %arg8[%c1, %c1_6, %c0_7] : memref<18x18x128xf32, #tpu.memory_space<vmem>>, vector<16x16x128xf32>
    tpu.vector_store %arg8[%c1, %c1_6, %c0_7], %1 {strides = array<i32>} : memref<18x18x128xf32, #tpu.memory_space<vmem>>, vector<16x16x128xf32>,
    %cst_8 = arith.constant 0.000000e+00 : f32
    %5 = vector.broadcast %cst_8 : f32 to vector<256x128xf32>
    %c0_9 = arith.constant 0 : index
    %c0_10 = arith.constant 0 : index
    %c0_11 = arith.constant 0 : index
    %6 = vector.load %arg8[%c0_9, %c0_10, %c0_11] : memref<18x18x128xf32, #tpu.memory_space<vmem>>, vector<16x16x128xf32>
    %7 = vector.shape_cast %6 : vector<16x16x128xf32> to vector<256x128xf32>
    %c0_12 = arith.constant 0 : index
    %c0_13 = arith.constant 0 : index
    %8 = vector.load %arg3[%c0_12, %c0_13] : memref<1152x128xf32, #tpu.memory_space<vmem>>, vector<128x128xf32>
    %cst_14 = arith.constant dense<0.000000e+00> : vector<256x128xf32>
    %9 = tpu.matmul %7, %8, %cst_14 {dimension_numbers = #tpu.dot_dimension_numbers<[1], [0], [0], [1], [0, 0, 1, 1], [], []>} : vector<256x128xf32>, vector<128x128xf32>, vector<256x128xf32> -> vector<256x128xf32>
    %10 = arith.addf %5, %9 : vector<256x128xf32>
    %c0_15 = arith.constant 0 : index
    %c1_16 = arith.constant 1 : index
    %c0_17 = arith.constant 0 : index
    %11 = vector.load %arg8[%c0_15, %c1_16, %c0_17] : memref<18x18x128xf32, #tpu.memory_space<vmem>>, vector<16x16x128xf32>
    %12 = vector.shape_cast %11 : vector<16x16x128xf32> to vector<256x128xf32>
    %c128 = arith.constant 128 : index
    %c0_18 = arith.constant 0 : index
    %13 = vector.load %arg3[%c128, %c0_18] : memref<1152x128xf32, #tpu.memory_space<vmem>>, vector<128x128xf32>
    %cst_19 = arith.constant dense<0.000000e+00> : vector<256x128xf32>
    %14 = tpu.matmul %12, %13, %cst_19 {dimension_numbers = #tpu.dot_dimension_numbers<[1], [0], [0], [1], [0, 0, 1, 1], [], []>} : vector<256x128xf32>, vector<128x128xf32>, vector<256x128xf32> -> vector<256x128xf32>
    %15 = arith.addf %10, %14 : vector<256x128xf32>
    %c0_20 = arith.constant 0 : index
    %c2 = arith.constant 2 : index
    %c0_21 = arith.constant 0 : index
    %16 = vector.load %arg8[%c0_20, %c2, %c0_21] : memref<18x18x128xf32, #tpu.memory_space<vmem>>, vector<16x16x128xf32>
    %17 = vector.shape_cast %16 : vector<16x16x128xf32> to vector<256x128xf32>
    %c256 = arith.constant 256 : index
    %c0_22 = arith.constant 0 : index
    %18 = vector.load %arg3[%c256, %c0_22] : memref<1152x128xf32, #tpu.memory_space<vmem>>, vector<128x128xf32>
    %cst_23 = arith.constant dense<0.000000e+00> : vector<256x128xf32>
    %19 = tpu.matmul %17, %18, %cst_23 {dimension_numbers = #tpu.dot_dimension_numbers<[1], [0], [0], [1], [0, 0, 1, 1], [], []>} : vector<256x128xf32>, vector<128x128xf32>, vector<256x128xf32> -> vector<256x128xf32>
    %20 = arith.addf %15, %19 : vector<256x128xf32>
    %c1_24 = arith.constant 1 : index
    %c0_25 = arith.constant 0 : index
    %c0_26 = arith.constant 0 : index
    %21 = vector.load %arg8[%c1_24, %c0_25, %c0_26] : memref<18x18x128xf32, #tpu.memory_space<vmem>>, vector<16x16x128xf32>
    %22 = vector.shape_cast %21 : vector<16x16x128xf32> to vector<256x128xf32>
    %c384 = arith.constant 384 : index
    %c0_27 = arith.constant 0 : index
    %23 = vector.load %arg3[%c384, %c0_27] : memref<1152x128xf32, #tpu.memory_space<vmem>>, vector<128x128xf32>
    %cst_28 = arith.constant dense<0.000000e+00> : vector<256x128xf32>
    %24 = tpu.matmul %22, %23, %cst_28 {dimension_numbers = #tpu.dot_dimension_numbers<[1], [0], [0], [1], [0, 0, 1, 1], [], []>} : vector<256x128xf32>, vector<128x128xf32>, vector<256x128xf32> -> vector<256x128xf32>
    %25 = arith.addf %20, %24 : vector<256x128xf32>
    %c1_29 = arith.constant 1 : index
    %c1_30 = arith.constant 1 : index
    %c0_31 = arith.constant 0 : index
    %26 = vector.load %arg8[%c1_29, %c1_30, %c0_31] : memref<18x18x128xf32, #tpu.memory_space<vmem>>, vector<16x16x128xf32>
    %27 = vector.shape_cast %26 : vector<16x16x128xf32> to vector<256x128xf32>
    %c512 = arith.constant 512 : index
    %c0_32 = arith.constant 0 : index
    %28 = vector.load %arg3[%c512, %c0_32] : memref<1152x128xf32, #tpu.memory_space<vmem>>, vector<128x128xf32>
    %cst_33 = arith.constant dense<0.000000e+00> : vector<256x128xf32>
    %29 = tpu.matmul %27, %28, %cst_33 {dimension_numbers = #tpu.dot_dimension_numbers<[1], [0], [0], [1], [0, 0, 1, 1], [], []>} : vector<256x128xf32>, vector<128x128xf32>, vector<256x128xf32> -> vector<256x128xf32>
    %30 = arith.addf %25, %29 : vector<256x128xf32>
    %c1_34 = arith.constant 1 : index
    %c2_35 = arith.constant 2 : index
    %c0_36 = arith.constant 0 : index
    %31 = vector.load %arg8[%c1_34, %c2_35, %c0_36] : memref<18x18x128xf32, #tpu.memory_space<vmem>>, vector<16x16x128xf32>
    %32 = vector.shape_cast %31 : vector<16x16x128xf32> to vector<256x128xf32>
    %c640 = arith.constant 640 : index
    %c0_37 = arith.constant 0 : index
    %33 = vector.load %arg3[%c640, %c0_37] : memref<1152x128xf32, #tpu.memory_space<vmem>>, vector<128x128xf32>
    %cst_38 = arith.constant dense<0.000000e+00> : vector<256x128xf32>
    %34 = tpu.matmul %32, %33, %cst_38 {dimension_numbers = #tpu.dot_dimension_numbers<[1], [0], [0], [1], [0, 0, 1, 1], [], []>} : vector<256x128xf32>, vector<128x128xf32>, vector<256x128xf32> -> vector<256x128xf32>
    %35 = arith.addf %30, %34 : vector<256x128xf32>
    %c2_39 = arith.constant 2 : index
    %c0_40 = arith.constant 0 : index
    %c0_41 = arith.constant 0 : index
    %36 = vector.load %arg8[%c2_39, %c0_40, %c0_41] : memref<18x18x128xf32, #tpu.memory_space<vmem>>, vector<16x16x128xf32>
    %37 = vector.shape_cast %36 : vector<16x16x128xf32> to vector<256x128xf32>
    %c768 = arith.constant 768 : index
    %c0_42 = arith.constant 0 : index
    %38 = vector.load %arg3[%c768, %c0_42] : memref<1152x128xf32, #tpu.memory_space<vmem>>, vector<128x128xf32>
    %cst_43 = arith.constant dense<0.000000e+00> : vector<256x128xf32>
    %39 = tpu.matmul %37, %38, %cst_43 {dimension_numbers = #tpu.dot_dimension_numbers<[1], [0], [0], [1], [0, 0, 1, 1], [], []>} : vector<256x128xf32>, vector<128x128xf32>, vector<256x128xf32> -> vector<256x128xf32>
    %40 = arith.addf %35, %39 : vector<256x128xf32>
    %c2_44 = arith.constant 2 : index
    %c1_45 = arith.constant 1 : index
    %c0_46 = arith.constant 0 : index
    %41 = vector.load %arg8[%c2_44, %c1_45, %c0_46] : memref<18x18x128xf32, #tpu.memory_space<vmem>>, vector<16x16x128xf32>
    %42 = vector.shape_cast %41 : vector<16x16x128xf32> to vector<256x128xf32>
    %c896 = arith.constant 896 : index
    %c0_47 = arith.constant 0 : index
    %43 = vector.load %arg3[%c896, %c0_47] : memref<1152x128xf32, #tpu.memory_space<vmem>>, vector<128x128xf32>
    %cst_48 = arith.constant dense<0.000000e+00> : vector<256x128xf32>
    %44 = tpu.matmul %42, %43, %cst_48 {dimension_numbers = #tpu.dot_dimension_numbers<[1], [0], [0], [1], [0, 0, 1, 1], [], []>} : vector<256x128xf32>, vector<128x128xf32>, vector<256x128xf32> -> vector<256x128xf32>
    %45 = arith.addf %40, %44 : vector<256x128xf32>
    %c2_49 = arith.constant 2 : index
    %c2_50 = arith.constant 2 : index
    %c0_51 = arith.constant 0 : index
    %46 = vector.load %arg8[%c2_49, %c2_50, %c0_51] : memref<18x18x128xf32, #tpu.memory_space<vmem>>, vector<16x16x128xf32>
    %47 = vector.shape_cast %46 : vector<16x16x128xf32> to vector<256x128xf32>
    %c1024 = arith.constant 1024 : index
    %c0_52 = arith.constant 0 : index
    %48 = vector.load %arg3[%c1024, %c0_52] : memref<1152x128xf32, #tpu.memory_space<vmem>>, vector<128x128xf32>
    %cst_53 = arith.constant dense<0.000000e+00> : vector<256x128xf32>
    %49 = tpu.matmul %47, %48, %cst_53 {dimension_numbers = #tpu.dot_dimension_numbers<[1], [0], [0], [1], [0, 0, 1, 1], [], []>} : vector<256x128xf32>, vector<128x128xf32>, vector<256x128xf32> -> vector<256x128xf32>
    %50 = arith.addf %45, %49 : vector<256x128xf32>
    %c0_54 = arith.constant 0 : index
    %c0_55 = arith.constant 0 : index
    %51 = vector.load %arg4[%c0_54, %c0_55] : memref<1x128xf32, #tpu.memory_space<vmem>>, vector<1x128xf32>
    %52 = vector.broadcast %51 : vector<1x128xf32> to vector<256x128xf32>
    %53 = arith.addf %50, %52 : vector<256x128xf32>
    %c0_56 = arith.constant 0 : index
    %c0_57 = arith.constant 0 : index
    %c0_58 = arith.constant 0 : index
    %c0_59 = arith.constant 0 : index
    %54 = vector.load %arg2[%c0_56, %c0_57, %c0_58, %c0_59] : memref<1x16x16x128xf32, #tpu.memory_space<vmem>>, vector<1x16x16x128xf32>
    %55 = vector.shape_cast %54 : vector<1x16x16x128xf32> to vector<16x16x128xf32>
    %56 = vector.shape_cast %55 : vector<16x16x128xf32> to vector<256x128xf32>
    %c0_60 = arith.constant 0 : index
    %c0_61 = arith.constant 0 : index
    %57 = vector.load %arg5[%c0_60, %c0_61] : memref<128x128xf32, #tpu.memory_space<vmem>>, vector<128x128xf32>
    %cst_62 = arith.constant dense<0.000000e+00> : vector<256x128xf32>
    %58 = tpu.matmul %56, %57, %cst_62 {dimension_numbers = #tpu.dot_dimension_numbers<[1], [0], [0], [1], [0, 0, 1, 1], [], []>} : vector<256x128xf32>, vector<128x128xf32>, vector<256x128xf32> -> vector<256x128xf32>
    %c0_63 = arith.constant 0 : index
    %c0_64 = arith.constant 0 : index
    %59 = vector.load %arg6[%c0_63, %c0_64] : memref<1x128xf32, #tpu.memory_space<vmem>>, vector<1x128xf32>
    %60 = vector.broadcast %59 : vector<1x128xf32> to vector<256x128xf32>
    %61 = arith.addf %58, %60 : vector<256x128xf32>
    %62 = arith.addf %53, %61 : vector<256x128xf32>
    %63 = vector.shape_cast %62 : vector<256x128xf32> to vector<16x16x128xf32>
    %c0_65 = arith.constant 0 : index
    %c0_66 = arith.constant 0 : index
    %c0_67 = arith.constant 0 : index
    %c0_68 = arith.constant 0 : index
    %64 = vector.load %arg7[%c0_65, %c0_66, %c0_67, %c0_68] : memref<1x16x16x128xf32, #tpu.memory_space<vmem>>, vector<1x16x16x128xf32>
    %65 = vector.shape_cast %64 : vector<1x16x16x128xf32> to vector<16x16x128xf32>
    %66 = vector.shape_cast %63 : vector<16x16x128xf32> to vector<1x16x16x128xf32>
    tpu.vector_store %arg7[%c0_65, %c0_66, %c0_67, %c0_68], %66 {strides = array<i32>} : memref<1x16x16x128xf32, #tpu.memory_space<vmem>>, vector<1x16x16x128xf32>,
    return
  }
  func.func @transform_0(%arg0: i32) -> (i32, i32, i32, i32) {
    %c0_i32 = arith.constant 0 : i32
    %c0_i32_0 = arith.constant 0 : i32
    %c0_i32_1 = arith.constant 0 : i32
    %c0_i32_2 = arith.constant 0 : i32
    return %arg0, %c0_i32, %c0_i32_0, %c0_i32_1 : i32, i32, i32, i32
  }
  func.func @transform_1(%arg0: i32) -> (i32, i32, i32, i32) {
    %c0_i32 = arith.constant 0 : i32
    %c0_i32_0 = arith.constant 0 : i32
    %c0_i32_1 = arith.constant 0 : i32
    %c0_i32_2 = arith.constant 0 : i32
    return %arg0, %c0_i32, %c0_i32_0, %c0_i32_1 : i32, i32, i32, i32
  }
  func.func @transform_2(%arg0: i32) -> (i32, i32) {
    %c0_i32 = arith.constant 0 : i32
    %c0_i32_0 = arith.constant 0 : i32
    %c0_i32_1 = arith.constant 0 : i32
    return %c0_i32, %c0_i32_0 : i32, i32
  }
  func.func @transform_3(%arg0: i32) -> (i32, i32) {
    %c0_i32 = arith.constant 0 : i32
    %c0_i32_0 = arith.constant 0 : i32
    %c0_i32_1 = arith.constant 0 : i32
    return %c0_i32, %c0_i32_0 : i32, i32
  }
  func.func @transform_4(%arg0: i32) -> (i32, i32) {
    %c0_i32 = arith.constant 0 : i32
    %c0_i32_0 = arith.constant 0 : i32
    %c0_i32_1 = arith.constant 0 : i32
    return %c0_i32, %c0_i32_0 : i32, i32
  }
  func.func @transform_5(%arg0: i32) -> (i32, i32) {
    %c0_i32 = arith.constant 0 : i32
    %c0_i32_0 = arith.constant 0 : i32
    %c0_i32_1 = arith.constant 0 : i32
    return %c0_i32, %c0_i32_0 : i32, i32
  }
  func.func @transform_6(%arg0: i32) -> (i32, i32, i32, i32) {
    %c0_i32 = arith.constant 0 : i32
    %c0_i32_0 = arith.constant 0 : i32
    %c0_i32_1 = arith.constant 0 : i32
    %c0_i32_2 = arith.constant 0 : i32
    return %arg0, %c0_i32, %c0_i32_0, %c0_i32_1 : i32, i32, i32, i32
  }
}

</mosaic_0001>

<bundles_post_ra>
// kernel: residual_block_forward.3
= control target key start
LH: loop header
LB: loop body
LE: loop exit
PB: predicated region body
PF: predicated region fallthrough
CT: control target
= control target key end

     0   :  { %v322_v0 = vmov 0.0   ;;  %s536_s0 = inlined_call_operand.vmem [shape: f32[512,128], index: 0, kind: input, shape index: {}]   ;;  %s537_s1 = inlined_call_operand.vmem [shape: f32[1,128], index: 1, kind: output, shape index: {0}]   ;;  %s538_s2 = inlined_call_operand.vmem [shape: f32[1,128], index: 2, kind: output, shape index: {1}]  }
   0x1   :  { %14 = vst [vmem:[#allocation2] sm:$0x1] %v322_v0  ;;  %v16_v1 = vld [vmem:[%s536_s0] sm:$0xff]  ;;  %v17_v2 = vld [vmem:[%s536_s0 + $0x8] sm:$0xff]  ;;  %v18_v3 = vld [vmem:[%s536_s0 + $0x10] sm:$0xff] }
   0x2   :  { %15 = vst [vmem:[#allocation3] sm:$0x1] %v322_v0  ;;  %v19_v4 = vld [vmem:[%s536_s0 + $0x18] sm:$0xff]  ;;  %v81_v5 = vadd.f32 %v17_v2, %v16_v1  ;;  %v153_v6 = vmul.f32 %v16_v1, %v16_v1  ;;  %v154_v7 = vmul.f32 %v17_v2, %v17_v2  ;;  %v155_v8 = vmul.f32 %v18_v3, %v18_v3  ;;  %v20_v9 = vld [vmem:[%s536_s0 + $0x20] sm:$0xff]  ;;  %v21_v13 = vld [vmem:[%s536_s0 + $0x28] sm:$0xff] }
   0x3   :  { %v156_v11 = vmul.f32 %v19_v4, %v19_v4  ;;  %v157_v15 = vmul.f32 %v20_v9, %v20_v9  ;;  %v22_v17 = vld [vmem:[%s536_s0 + $0x30] sm:$0xff]  ;;  %v158_v19 = vmul.f32 %v21_v13, %v21_v13  ;;  %v23_v21 = vld [vmem:[%s536_s0 + $0x38] sm:$0xff]  ;;  %v24_v25 = vld [vmem:[%s536_s0 + $0x40] sm:$0xff] }
   0x4   :  { %v82_v10 = vadd.f32 %v81_v5, %v18_v3  ;;  %v217_v12 = vadd.f32 %v154_v7, %v153_v6  ;;  %v159_v23 = vmul.f32 %v22_v17, %v22_v17  ;;  %v160_v27 = vmul.f32 %v23_v21, %v23_v21  ;;  %v25_v29 = vld [vmem:[%s536_s0 + $0x48] sm:$0xff]  ;;  %v26_v33 = vld [vmem:[%s536_s0 + $0x50] sm:$0xff]  ;;  %v27_v37 = vld [vmem:[%s536_s0 + $0x58] sm:$0xff] }
   0x5   :  { %v161_v31 = vmul.f32 %v24_v25, %v24_v25  ;;  %v162_v35 = vmul.f32 %v25_v29, %v25_v29  ;;  %v163_v39 = vmul.f32 %v26_v33, %v26_v33  ;;  %v28_v41 = vld [vmem:[%s536_s0 + $0x60] sm:$0xff]  ;;  %v164_v43 = vmul.f32 %v27_v37, %v27_v37  ;;  %v29_v45 = vld [vmem:[%s536_s0 + $0x68] sm:$0xff]  ;;  %v30_v49 = vld [vmem:[%s536_s0 + $0x70] sm:$0xff] }
   0x6   :  { %v83_v14 = vadd.f32 %v82_v10, %v19_v4  ;;  %v218_v16 = vadd.f32 %v217_v12, %v155_v8  ;;  %v165_v47 = vmul.f32 %v28_v41, %v28_v41  ;;  %v166_v51 = vmul.f32 %v29_v45, %v29_v45  ;;  %v31_v53 = vld [vmem:[%s536_s0 + $0x78] sm:$0xff]  ;;  %v32_v57 = vld [vmem:[%s536_s0 + $0x80] sm:$0xff]  ;;  %v33_v61 = vld [vmem:[%s536_s0 + $0x88] sm:$0xff] }
   0x7   :  { %v167_v55 = vmul.f32 %v30_v49, %v30_v49  ;;  %v168_v59 = vmul.f32 %v31_v53, %v31_v53  ;;  %v169_v63 = vmul.f32 %v32_v57, %v32_v57  ;;  %v34_v1 = vld [vmem:[%s536_s0 + $0x90] sm:$0xff]  ;;  %v170_v3 = vmul.f32 %v33_v61, %v33_v61  ;;  %v35_v5 = vld [vmem:[%s536_s0 + $0x98] sm:$0xff] }
   0x8   :  { %v84_v18 = vadd.f32 %v83_v14, %v20_v9  ;;  %v219_v20 = vadd.f32 %v218_v16, %v156_v11  ;;  %v171_v7 = vmul.f32 %v34_v1, %v34_v1  ;;  %v36_v9 = vld [vmem:[%s536_s0 + $0xa0] sm:$0xff]  ;;  %v172_v11 = vmul.f32 %v35_v5, %v35_v5 }
   0xa   :  { %v85_v22 = vadd.f32 %v84_v18, %v21_v13  ;;  %v220_v24 = vadd.f32 %v219_v20, %v157_v15  ;;  %v37_v13 = vld [vmem:[%s536_s0 + $0xa8] sm:$0xff]  ;;  %v173_v15 = vmul.f32 %v36_v9, %v36_v9 }
   0xc   :  { %v86_v26 = vadd.f32 %v85_v22, %v22_v17  ;;  %v221_v28 = vadd.f32 %v220_v24, %v158_v19  ;;  %v38_v17 = vld [vmem:[%s536_s0 + $0xb0] sm:$0xff]  ;;  %v174_v19 = vmul.f32 %v37_v13, %v37_v13 }
   0xe   :  { %v87_v30 = vadd.f32 %v86_v26, %v23_v21  ;;  %v222_v32 = vadd.f32 %v221_v28, %v159_v23  ;;  %v39_v21 = vld [vmem:[%s536_s0 + $0xb8] sm:$0xff]  ;;  %v175_v23 = vmul.f32 %v38_v17, %v38_v17 }
  0x10   :  { %v88_v34 = vadd.f32 %v87_v30, %v24_v25  ;;  %v223_v36 = vadd.f32 %v222_v32, %v160_v27  ;;  %v40_v25 = vld [vmem:[%s536_s0 + $0xc0] sm:$0xff]  ;;  %v176_v27 = vmul.f32 %v39_v21, %v39_v21 }
  0x12   :  { %v89_v38 = vadd.f32 %v88_v34, %v25_v29  ;;  %v224_v40 = vadd.f32 %v223_v36, %v161_v31  ;;  %v41_v29 = vld [vmem:[%s536_s0 + $0xc8] sm:$0xff]  ;;  %v177_v31 = vmul.f32 %v40_v25, %v40_v25 }
  0x14   :  { %v90_v42 = vadd.f32 %v89_v38, %v26_v33  ;;  %v225_v44 = vadd.f32 %v224_v40, %v162_v35  ;;  %v42_v33 = vld [vmem:[%s536_s0 + $0xd0] sm:$0xff]  ;;  %v178_v35 = vmul.f32 %v41_v29, %v41_v29 }
  0x16   :  { %v91_v46 = vadd.f32 %v90_v42, %v27_v37  ;;  %v226_v48 = vadd.f32 %v225_v44, %v163_v39  ;;  %v43_v37 = vld [vmem:[%s536_s0 + $0xd8] sm:$0xff]  ;;  %v179_v39 = vmul.f32 %v42_v33, %v42_v33 }
  0x18   :  { %v92_v50 = vadd.f32 %v91_v46, %v28_v41  ;;  %v227_v52 = vadd.f32 %v226_v48, %v164_v43  ;;  %v44_v41 = vld [vmem:[%s536_s0 + $0xe0] sm:$0xff]  ;;  %v180_v43 = vmul.f32 %v43_v37, %v43_v37 }
  0x1a   :  { %v93_v54 = vadd.f32 %v92_v50, %v29_v45  ;;  %v228_v56 = vadd.f32 %v227_v52, %v165_v47  ;;  %v45_v45 = vld [vmem:[%s536_s0 + $0xe8] sm:$0xff]  ;;  %v181_v47 = vmul.f32 %v44_v41, %v44_v41 }
  0x1c   :  { %v94_v58 = vadd.f32 %v93_v54, %v30_v49  ;;  %v229_v60 = vadd.f32 %v228_v56, %v166_v51  ;;  %v46_v49 = vld [vmem:[%s536_s0 + $0xf0] sm:$0xff]  ;;  %v182_v51 = vmul.f32 %v45_v45, %v45_v45 }
  0x1e   :  { %v95_v62 = vadd.f32 %v94_v58, %v31_v53  ;;  %v230_v0 = vadd.f32 %v229_v60, %v167_v55  ;;  %v47_v53 = vld [vmem:[%s536_s0 + $0xf8] sm:$0xff]  ;;  %v183_v55 = vmul.f32 %v46_v49, %v46_v49 }
  0x20   :  { %v96_v2 = vadd.f32 %v95_v62, %v32_v57  ;;  %v231_v4 = vadd.f32 %v230_v0, %v168_v59  ;;  %v48_v57 = vld [vmem:[%s536_s0 + $0x100] sm:$0xff]  ;;  %v184_v59 = vmul.f32 %v47_v53, %v47_v53 }
  0x22   :  { %v97_v6 = vadd.f32 %v96_v2, %v33_v61  ;;  %v232_v8 = vadd.f32 %v231_v4, %v169_v63  ;;  %v49_v61 = vld [vmem:[%s536_s0 + $0x108] sm:$0xff]  ;;  %v185_v63 = vmul.f32 %v48_v57, %v48_v57 }
  0x24   :  { %v98_v10 = vadd.f32 %v97_v6, %v34_v1  ;;  %v233_v12 = vadd.f32 %v232_v8, %v170_v3  ;;  %v50_v1 = vld [vmem:[%s536_s0 + $0x110] sm:$0xff]  ;;  %v186_v3 = vmul.f32 %v49_v61, %v49_v61 }
  0x26   :  { %v99_v14 = vadd.f32 %v98_v10, %v35_v5  ;;  %v234_v16 = vadd.f32 %v233_v12, %v171_v7  ;;  %v51_v5 = vld [vmem:[%s536_s0 + $0x118] sm:$0xff]  ;;  %v187_v7 = vmul.f32 %v50_v1, %v50_v1 }
  0x28   :  { %v100_v18 = vadd.f32 %v99_v14, %v36_v9  ;;  %v235_v20 = vadd.f32 %v234_v16, %v172_v11  ;;  %v52_v9 = vld [vmem:[%s536_s0 + $0x120] sm:$0xff]  ;;  %v188_v11 = vmul.f32 %v51_v5, %v51_v5 }
  0x2a   :  { %v101_v22 = vadd.f32 %v100_v18, %v37_v13  ;;  %v236_v24 = vadd.f32 %v235_v20, %v173_v15  ;;  %v53_v13 = vld [vmem:[%s536_s0 + $0x128] sm:$0xff]  ;;  %v189_v15 = vmul.f32 %v52_v9, %v52_v9 }
  0x2c   :  { %v102_v26 = vadd.f32 %v101_v22, %v38_v17  ;;  %v237_v28 = vadd.f32 %v236_v24, %v174_v19  ;;  %v54_v17 = vld [vmem:[%s536_s0 + $0x130] sm:$0xff]  ;;  %v190_v19 = vmul.f32 %v53_v13, %v53_v13 }
  0x2e   :  { %v103_v30 = vadd.f32 %v102_v26, %v39_v21  ;;  %v238_v32 = vadd.f32 %v237_v28, %v175_v23  ;;  %v55_v21 = vld [vmem:[%s536_s0 + $0x138] sm:$0xff]  ;;  %v191_v23 = vmul.f32 %v54_v17, %v54_v17 }
  0x30   :  { %v104_v34 = vadd.f32 %v103_v30, %v40_v25  ;;  %v239_v36 = vadd.f32 %v238_v32, %v176_v27  ;;  %v56_v25 = vld [vmem:[%s536_s0 + $0x140] sm:$0xff]  ;;  %v192_v27 = vmul.f32 %v55_v21, %v55_v21 }
  0x32   :  { %v105_v38 = vadd.f32 %v104_v34, %v41_v29  ;;  %v240_v40 = vadd.f32 %v239_v36, %v177_v31  ;;  %v57_v29 = vld [vmem:[%s536_s0 + $0x148] sm:$0xff]  ;;  %v193_v31 = vmul.f32 %v56_v25, %v56_v25 }
  0x34   :  { %v106_v42 = vadd.f32 %v105_v38, %v42_v33  ;;  %v241_v44 = vadd.f32 %v240_v40, %v178_v35  ;;  %v58_v33 = vld [vmem:[%s536_s0 + $0x150] sm:$0xff]  ;;  %v194_v35 = vmul.f32 %v57_v29, %v57_v29 }
  0x36   :  { %v107_v46 = vadd.f32 %v106_v42, %v43_v37  ;;  %v242_v48 = vadd.f32 %v241_v44, %v179_v39  ;;  %v59_v37 = vld [vmem:[%s536_s0 + $0x158] sm:$0xff]  ;;  %v195_v39 = vmul.f32 %v58_v33, %v58_v33 }
  0x38   :  { %v108_v50 = vadd.f32 %v107_v46, %v44_v41  ;;  %v243_v52 = vadd.f32 %v242_v48, %v180_v43  ;;  %v60_v41 = vld [vmem:[%s536_s0 + $0x160] sm:$0xff]  ;;  %v196_v43 = vmul.f32 %v59_v37, %v59_v37 }
  0x3a   :  { %v109_v54 = vadd.f32 %v108_v50, %v45_v45  ;;  %v244_v56 = vadd.f32 %v243_v52, %v181_v47  ;;  %v61_v45 = vld [vmem:[%s536_s0 + $0x168] sm:$0xff]  ;;  %v197_v47 = vmul.f32 %v60_v41, %v60_v41 }
  0x3c   :  { %v110_v58 = vadd.f32 %v109_v54, %v46_v49  ;;  %v245_v60 = vadd.f32 %v244_v56, %v182_v51  ;;  %v62_v49 = vld [vmem:[%s536_s0 + $0x170] sm:$0xff]  ;;  %v198_v51 = vmul.f32 %v61_v45, %v61_v45 }
  0x3e   :  { %v111_v62 = vadd.f32 %v110_v58, %v47_v53  ;;  %v246_v0 = vadd.f32 %v245_v60, %v183_v55  ;;  %v63_v53 = vld [vmem:[%s536_s0 + $0x178] sm:$0xff]  ;;  %v199_v55 = vmul.f32 %v62_v49, %v62_v49 }
  0x40   :  { %v112_v2 = vadd.f32 %v111_v62, %v48_v57  ;;  %v247_v4 = vadd.f32 %v246_v0, %v184_v59  ;;  %v64_v57 = vld [vmem:[%s536_s0 + $0x180] sm:$0xff]  ;;  %v200_v59 = vmul.f32 %v63_v53, %v63_v53 }
  0x42   :  { %v113_v6 = vadd.f32 %v112_v2, %v49_v61  ;;  %v248_v8 = vadd.f32 %v247_v4, %v185_v63  ;;  %v65_v61 = vld [vmem:[%s536_s0 + $0x188] sm:$0xff]  ;;  %v201_v63 = vmul.f32 %v64_v57, %v64_v57 }
  0x44   :  { %v114_v10 = vadd.f32 %v113_v6, %v50_v1  ;;  %v249_v12 = vadd.f32 %v248_v8, %v186_v3  ;;  %v66_v1 = vld [vmem:[%s536_s0 + $0x190] sm:$0xff]  ;;  %v202_v3 = vmul.f32 %v65_v61, %v65_v61 }
  0x46   :  { %v115_v14 = vadd.f32 %v114_v10, %v51_v5  ;;  %v250_v16 = vadd.f32 %v249_v12, %v187_v7  ;;  %v67_v5 = vld [vmem:[%s536_s0 + $0x198] sm:$0xff]  ;;  %v203_v7 = vmul.f32 %v66_v1, %v66_v1 }
  0x48   :  { %v116_v18 = vadd.f32 %v115_v14, %v52_v9  ;;  %v251_v20 = vadd.f32 %v250_v16, %v188_v11  ;;  %v68_v9 = vld [vmem:[%s536_s0 + $0x1a0] sm:$0xff]  ;;  %v204_v11 = vmul.f32 %v67_v5, %v67_v5 }
  0x4a   :  { %v117_v22 = vadd.f32 %v116_v18, %v53_v13  ;;  %v252_v24 = vadd.f32 %v251_v20, %v189_v15  ;;  %v69_v13 = vld [vmem:[%s536_s0 + $0x1a8] sm:$0xff]  ;;  %v205_v15 = vmul.f32 %v68_v9, %v68_v9 }
  0x4c   :  { %v118_v26 = vadd.f32 %v117_v22, %v54_v17  ;;  %v253_v28 = vadd.f32 %v252_v24, %v190_v19  ;;  %v70_v17 = vld [vmem:[%s536_s0 + $0x1b0] sm:$0xff]  ;;  %v206_v19 = vmul.f32 %v69_v13, %v69_v13 }
  0x4e   :  { %v119_v30 = vadd.f32 %v118_v26, %v55_v21  ;;  %v254_v32 = vadd.f32 %v253_v28, %v191_v23  ;;  %v71_v21 = vld [vmem:[%s536_s0 + $0x1b8] sm:$0xff]  ;;  %v207_v23 = vmul.f32 %v70_v17, %v70_v17 }
  0x50   :  { %v120_v34 = vadd.f32 %v119_v30, %v56_v25  ;;  %v255_v36 = vadd.f32 %v254_v32, %v192_v27  ;;  %v72_v25 = vld [vmem:[%s536_s0 + $0x1c0] sm:$0xff]  ;;  %v208_v27 = vmul.f32 %v71_v21, %v71_v21 }
  0x52   :  { %v121_v38 = vadd.f32 %v120_v34, %v57_v29  ;;  %v256_v40 = vadd.f32 %v255_v36, %v193_v31  ;;  %v73_v29 = vld [vmem:[%s536_s0 + $0x1c8] sm:$0xff]  ;;  %v209_v31 = vmul.f32 %v72_v25, %v72_v25 }
  0x54   :  { %v122_v42 = vadd.f32 %v121_v38, %v58_v33  ;;  %v257_v44 = vadd.f32 %v256_v40, %v194_v35  ;;  %v74_v33 = vld [vmem:[%s536_s0 + $0x1d0] sm:$0xff]  ;;  %v210_v35 = vmul.f32 %v73_v29, %v73_v29 }
  0x56   :  { %v123_v46 = vadd.f32 %v122_v42, %v59_v37  ;;  %v258_v48 = vadd.f32 %v257_v44, %v195_v39  ;;  %v75_v37 = vld [vmem:[%s536_s0 + $0x1d8] sm:$0xff]  ;;  %v211_v39 = vmul.f32 %v74_v33, %v74_v33 }
  0x58   :  { %v124_v50 = vadd.f32 %v123_v46, %v60_v41  ;;  %v259_v52 = vadd.f32 %v258_v48, %v196_v43  ;;  %v76_v41 = vld [vmem:[%s536_s0 + $0x1e0] sm:$0xff]  ;;  %v212_v43 = vmul.f32 %v75_v37, %v75_v37 }
  0x5a   :  { %v125_v54 = vadd.f32 %v124_v50, %v61_v45  ;;  %v260_v56 = vadd.f32 %v259_v52, %v197_v47  ;;  %v77_v45 = vld [vmem:[%s536_s0 + $0x1e8] sm:$0xff]  ;;  %v213_v47 = vmul.f32 %v76_v41, %v76_v41 }
  0x5c   :  { %v126_v58 = vadd.f32 %v125_v54, %v62_v49  ;;  %v261_v60 = vadd.f32 %v260_v56, %v198_v51  ;;  %v78_v49 = vld [vmem:[%s536_s0 + $0x1f0] sm:$0xff]  ;;  %v214_v51 = vmul.f32 %v77_v45, %v77_v45 }
  0x5e   :  { %v127_v62 = vadd.f32 %v126_v58, %v63_v53  ;;  %v262_v0 = vadd.f32 %v261_v60, %v199_v55  ;;  %v79_v53 = vld [vmem:[%s536_s0 + $0x1f8] sm:$0xff]  ;;  %v215_v55 = vmul.f32 %v78_v49, %v78_v49 }
  0x5f   :  { %v216_v58 = vmul.f32 %v79_v53, %v79_v53 }
  0x60   :  { %v128_v2 = vadd.f32 %v127_v62, %v64_v57  ;;  %v263_v4 = vadd.f32 %v262_v0, %v200_v59 }
  0x62   :  { %v129_v6 = vadd.f32 %v128_v2, %v65_v61  ;;  %v264_v8 = vadd.f32 %v263_v4, %v201_v63 }
  0x64   :  { %v130_v10 = vadd.f32 %v129_v6, %v66_v1  ;;  %v265_v12 = vadd.f32 %v264_v8, %v202_v3 }
  0x66   :  { %v131_v14 = vadd.f32 %v130_v10, %v67_v5  ;;  %v266_v16 = vadd.f32 %v265_v12, %v203_v7  ;;  %v80_v7 = vld [vmem:[#allocation2] sm:$0x1]  ;;  %v152_v12 = vld [vmem:[#allocation3] sm:$0x1] }
  0x68   :  { %v132_v18 = vadd.f32 %v131_v14, %v68_v9  ;;  %v267_v20 = vadd.f32 %v266_v16, %v204_v11 }
  0x6a   :  { %v133_v22 = vadd.f32 %v132_v18, %v69_v13  ;;  %v268_v24 = vadd.f32 %v267_v20, %v205_v15 }
  0x6c   :  { %v134_v26 = vadd.f32 %v133_v22, %v70_v17  ;;  %v269_v28 = vadd.f32 %v268_v24, %v206_v19 }
  0x6e   :  { %v135_v30 = vadd.f32 %v134_v26, %v71_v21  ;;  %v270_v32 = vadd.f32 %v269_v28, %v207_v23 }
  0x70   :  { %v136_v34 = vadd.f32 %v135_v30, %v72_v25  ;;  %v271_v36 = vadd.f32 %v270_v32, %v208_v27 }
  0x72   :  { %v137_v38 = vadd.f32 %v136_v34, %v73_v29  ;;  %v272_v40 = vadd.f32 %v271_v36, %v209_v31 }
  0x74   :  { %v138_v42 = vadd.f32 %v137_v38, %v74_v33  ;;  %v273_v44 = vadd.f32 %v272_v40, %v210_v35 }
  0x76   :  { %v139_v46 = vadd.f32 %v138_v42, %v75_v37  ;;  %v274_v48 = vadd.f32 %v273_v44, %v211_v39 }
  0x78   :  { %v140_v50 = vadd.f32 %v139_v46, %v76_v41  ;;  %v275_v52 = vadd.f32 %v274_v48, %v212_v43 }
  0x7a   :  { %v141_v54 = vadd.f32 %v140_v50, %v77_v45  ;;  %v276_v56 = vadd.f32 %v275_v52, %v213_v47 }
  0x7c   :  { %v142_v57 = vadd.f32 %v141_v54, %v78_v49  ;;  %v277_v59 = vadd.f32 %v276_v56, %v214_v51 }
  0x7e   :  { %v143_v60 = vadd.f32 %v142_v57, %v79_v53  ;;  %v278_v61 = vadd.f32 %v277_v59, %v215_v55 }
  0x80   :  { %v144_v62 = vrot.slane %v143_v60, 4  ;;  %v279_v63 = vadd.f32 %v278_v61, %v216_v58 }
  0x82   :  { %v145_v0 = vadd.f32 %v144_v62, %v143_v60  ;;  %v280_v1 = vrot.slane %v279_v63, 4 }
  0x84   :  { %v146_v2 = vrot.slane %v145_v0, 2  ;;  %v281_v3 = vadd.f32 %v280_v1, %v279_v63 }
  0x86   :  { %v147_v4 = vadd.f32 %v146_v2, %v145_v0  ;;  %v282_v5 = vrot.slane %v281_v3, 2 }
  0x88   :  { %v148_v6 = vrot.slane %v147_v4, 1  ;;  %v283_v8 = vadd.f32 %v282_v5, %v281_v3 }
  0x8a   :  { %v149_v9 = vadd.f32 %v148_v6, %v147_v4  ;;  %v284_v10 = vrot.slane %v283_v8, 1 }
  0x8c   :  { %v150_v11 = vadd.f32 %v149_v9, %v80_v7  ;;  %v285_v13 = vadd.f32 %v284_v10, %v283_v8 }
  0x8e   :  { %151 = vst [vmem:[#allocation2] sm:$0x1] %v150_v11  ;;  %v286_v14 = vadd.f32 %v285_v13, %v152_v12 }
  0x90   :  { %287 = vst [vmem:[#allocation3] sm:$0x1] %v286_v14 }
  0x95   :  { %v291_v15 = vld [vmem:[#allocation2] sm:$0x1] }
  0x96   :  { %v292_v16 = vmul.f32 0.001953125, %v291_v15 }
  0x97   :  { %v293_v17 = vld [vmem:[#allocation3] sm:$0x1] }
  0x98   :  { %v295_v18 = vmul.f32 %v292_v16, %v292_v16  ;;  %298 = vst [vmem:[%s537_s1] sm:$0x1] %v292_v16  ;;  %v294_v19 = vmul.f32 0.001953125, %v293_v17 }
  0x9a   :  { %v296_v20 = vsub.f32 %v294_v19, %v295_v18 }
  0x9c   :  { %v297_v21 = vmax.f32 %v296_v20, 0.0 }
  0x9e   :  { %v299_v22 = vadd.f32 1e-05, %v297_v21 }
  0xa0   :  { %320 = vrsqrt.f32 %v299_v22  ;;  %vm306_vm1 = vweird.f32 %v299_v22 }
  0xa6   :  { %v321_v23 = vpop.eup %320 }
  0xa7   :  { %v301_v24 = vmul.f32 %v321_v23, %v299_v22  ;;  %vm307_vm0 = vweird.f32 %v321_v23 }
  0xa8   :  { %vm308_vm2 = vmor %vm306_vm1, %vm307_vm0 }
  0xa9   :  { %v302_v25 = vmul.f32 %v321_v23, %v301_v24 }
  0xab   :  { %v303_v26 = vmul.f32 0.5, %v302_v25 }
  0xad   :  { %v304_v27 = vsub.f32 1.5, %v303_v26 }
  0xaf   :  { %v305_v28 = vmul.f32 %v321_v23, %v304_v27 }
  0xb1   :  { %v309_v29 = vsel %vm308_vm2, %v321_v23, %v305_v28 }
  0xb2   :  { %310 = vst [vmem:[%s538_s2] sm:$0x1] %v309_v29 }

// kernel: residual_block_forward.4
= control target key start
LH: loop header
LB: loop body
LE: loop exit
PB: predicated region body
PF: predicated region fallthrough
CT: control target
= control target key end

     0   :  { %s3129_s18 = smov 0   ;;  %s4447_s0 = inlined_call_operand.vmem [shape: f32[2,16,16,128], index: 0, kind: input, shape index: {}]   ;;  %s4448_s1 = inlined_call_operand.vmem [shape: f32[1,128], index: 1, kind: input, shape index: {}]   ;;  %s4449_s2 = inlined_call_operand.vmem [shape: f32[1,128], index: 2, kind: input, shape index: {}]   ;;  %s4450_s3 = inlined_call_operand.vmem [shape: f32[1152,128], index: 3, kind: input, shape index: {}]   ;;  %s4451_s4 = inlined_call_operand.vmem [shape: f32[1,128], index: 4, kind: input, shape index: {}]   ;;  %s4452_s5 = inlined_call_operand.vmem [shape: f32[2,16,16,128], index: 5, kind: output, shape index: {}]  }
   0x1 LB: > { %s2853_s19 = sadd.s32 4294967295, %s3096_s18   ;;  %p2857_p0 = scmp.ge.s32.totalorder %s3096_s18, 1  ;;  %s3096_s18 = sphi %s3129_s18, %s15_s18  }
   0x2   : > { %p187_p1 = scmp.lt.s32.totalorder %s3096_s18, 3 }
   0x4   : > { %p188_p2 = pnand %p2857_p0, %p187_p1 }
   0x5   : > { %p215_p3 = scmp.lt.s32.totalorder (!%p188_p2), %s2853_s19, 1 }
   0x6   : > { %191 = sbr.rel (%p188_p2) target bundleno = 783 (0x30f), region = 40 }
   0xb   : > { %v511_v0 = vld [vmem:[%s4450_s3 + $0xf8] sm:$0xff]  ;;  %v510_v1 = vld [vmem:[%s4450_s3 + $0xf0] sm:$0xff]  ;;  %v3098_v2 = vmov 0.0   ;;  %v509_v3 = vld [vmem:[%s4450_s3 + $0xe8] sm:$0xff]  ;;  %s4454_s19 = smov (!%p215_p3, %s2853_s19), 1 }
   0xc   : > { %2898 = vmatpush.msra.mxu1 %v511_v0  ;;  %2899 = vmatpush.msra.mxu2 %v511_v0  ;;  %341 = vst [vmem:[#allocation2 + $0x60] sm:$0xff] %v3098_v2  ;;  %v508_v4 = vld [vmem:[%s4450_s3 + $0xe0] sm:$0xff]  ;;  %s2896_s28 = sshll.u32 %s4454_s19, 8  ;;  %v507_v5 = vld [vmem:[%s4450_s3 + $0xd8] sm:$0xff]  ;;  %v506_v9 = vld [vmem:[%s4450_s3 + $0xd0] sm:$0xff] }
   0xd   : > { %2900 = vmatpush.msra.mxu3 %v511_v0  ;;  %512 = vmatpush.msra.mxu0 %v511_v0  ;;  %342 = vst [vmem:[#allocation2 + $0x68] sm:$0xff] %v3098_v2  ;;  %s3164_s8 = scalar_lea.vmem %s4447_s0, %s2896_s28  ;;  %v3171_v7 = vld [vmem:[%s4448_s1] ss:$0 sm:$0xff]  ;;  %v505_v11 = vld [vmem:[%s4450_s3 + $0xc8] sm:$0xff]  ;;  %v503_v14 = vld [vmem:[%s4450_s3 + $0xb8] sm:$0xff]  ;;  %s4073_s27 = scalar_lea.vmem %s4452_s5, %s2896_s28 }
   0xe   : > { %2901 = vmatpush.msra.mxu1 %v510_v1  ;;  %2902 = vmatpush.msra.mxu2 %v510_v1  ;;  %329 = vst [vmem:[#allocation2] sm:$0xff] %v3098_v2  ;;  %v233_v6 = vld [vmem:[%s3164_s8 + $0x30] sm:$0xff]  ;;  %v3176_v8 = vld [vmem:[%s4449_s2] ss:$0 sm:$0xff]  ;;  %v501_v16 = vld [vmem:[%s4450_s3 + $0xa8] sm:$0xff] }
   0xf   : > { %2903 = vmatpush.msra.mxu3 %v510_v1  ;;  %513 = vmatpush.msra.mxu0 %v510_v1  ;;  %330 = vst [vmem:[#allocation2 + $0x8] sm:$0xff] %v3098_v2  ;;  %v268_v10 = vsub.f32 %v233_v6, %v3171_v7  ;;  %v504_v13 = vld [vmem:[%s4450_s3 + $0xc0] sm:$0xff]  ;;  %v502_v15 = vld [vmem:[%s4450_s3 + $0xb0] sm:$0xff]  ;;  %v499_v19 = vld [vmem:[%s4450_s3 + $0x98] sm:$0xff] }
  0x10   : > { %2904 = vmatpush.msra.mxu1 %v509_v3  ;;  %2905 = vmatpush.msra.mxu2 %v509_v3  ;;  %332 = vst [vmem:[#allocation2 + $0x18] sm:$0xff] %v3098_v2  ;;  %v500_v17 = vld [vmem:[%s4450_s3 + $0xa0] sm:$0xff]  ;;  %v241_v18 = vld [vmem:[%s3164_s8 + $0x70] sm:$0xff]  ;;  %v497_v23 = vld [vmem:[%s4450_s3 + $0x88] sm:$0xff] }
  0x11   : > { %2906 = vmatpush.msra.mxu3 %v509_v3  ;;  %514 = vmatpush.msra.mxu0 %v509_v3  ;;  %333 = vst [vmem:[#allocation2 + $0x20] sm:$0xff] %v3098_v2  ;;  %v3190_v12 = vmul.f32 %v3176_v8, %v268_v10  ;;  %v249_v20 = vld [vmem:[%s3164_s8 + $0xb0] sm:$0xff]  ;;  %v276_v22 = vsub.f32 %v241_v18, %v3171_v7  ;;  %v496_v25 = vld [vmem:[%s4450_s3 + $0x80] sm:$0xff]  ;;  %v234_v27 = vld [vmem:[%s3164_s8 + $0x38] sm:$0xff] }
  0x12   : > { %2907 = vmatpush.msra.mxu1 %v508_v4  ;;  %2908 = vmatpush.msra.mxu2 %v508_v4  ;;  %331 = vst [vmem:[#allocation2 + $0x10] sm:$0x3] %v3098_v2  ;;  %v498_v21 = vld [vmem:[%s4450_s3 + $0x90] sm:$0xff]  ;;  %v284_v24 = vsub.f32 %v249_v20, %v3171_v7  ;;  %v242_v28 = vld [vmem:[%s3164_s8 + $0x78] sm:$0xff]  ;;  %v269_v35 = vsub.f32 %v234_v27, %v3171_v7  ;;  %v783_v39 = vld [vmem:[%s4450_s3 + $0x168] sm:$0xff] }
  0x13   : > { %2909 = vmatpush.msra.mxu3 %v508_v4  ;;  %515 = vmatpush.msra.mxu0 %v508_v4  ;;  %334 = vst [vmem:[#allocation2 + $0x28] sm:$0x3] %v3098_v2  ;;  %v3243_v26 = vmul.f32 %v3176_v8, %v276_v22  ;;  %v785_v29 = vld [vmem:[%s4450_s3 + $0x178] sm:$0xff]  ;;  %v784_v34 = vld [vmem:[%s4450_s3 + $0x170] sm:$0xff]  ;;  %v277_v36 = vsub.f32 %v242_v28, %v3171_v7  ;;  %v461_v42 = vld [vmem:[%s4450_s3 + $0x68] sm:$0xff] }
  0x14   : > { %2910 = vmatpush.msra.mxu1 %v507_v5  ;;  %2911 = vmatpush.msra.mxu2 %v507_v5  ;;  %335 = vst [vmem:[#allocation2 + $0x30] sm:$0xff] %v3098_v2  ;;  %v3253_v30 = vmul.f32 %v3176_v8, %v284_v24  ;;  %v463_v31 = vld [vmem:[%s4450_s3 + $0x78] sm:$0xff]  ;;  %v462_v37 = vld [vmem:[%s4450_s3 + $0x70] sm:$0xff]  ;;  %v3290_v43 = vmul.f32 %v3176_v8, %v269_v35  ;;  %v976_v45 = vld [vmem:[%s4450_s3 + $0x1e8] sm:$0xff] }
  0x15   : > { %2912 = vmatpush.msra.mxu3 %v507_v5  ;;  %516 = vmatpush.msra.mxu0 %v507_v5  ;;  %336 = vst [vmem:[#allocation2 + $0x38] sm:$0xff] %v3098_v2  ;;  %v250_v32 = vld [vmem:[%s3164_s8 + $0xb8] sm:$0xff]  ;;  %v977_v38 = vld [vmem:[%s4450_s3 + $0x1f0] sm:$0xff]  ;;  %v3293_v44 = vmul.f32 %v3176_v8, %v277_v36  ;;  %v235_v47 = vld [vmem:[%s3164_s8 + $0x40] sm:$0xff] }
  0x16   : > { %2913 = vmatpush.msra.mxu1 %v506_v9  ;;  %2914 = vmatpush.msra.mxu2 %v506_v9  ;;  %337 = vst [vmem:[#allocation2 + $0x40] sm:$0x3] %v3098_v2  ;;  %v978_v33 = vld [vmem:[%s4450_s3 + $0x1f8] sm:$0xff]  ;;  %v285_v40 = vsub.f32 %v250_v32, %v3171_v7  ;;  %v464_v41 = vld [vmem:[#allocation2 + $0x1] sm:$0xff]  ;;  %v1170_v52 = vld [vmem:[%s4450_s3 + $0x270] sm:$0xff]  ;;  %v270_v54 = vsub.f32 %v235_v47, %v3171_v7 }
  0x17   : > { %2915 = vmatpush.msra.mxu3 %v506_v9  ;;  %517 = vmatpush.msra.mxu0 %v506_v9  ;;  %390 = vst [vmem:[#allocation2 + $0x61] sm:$0xff] %v3190_v12  ;;  %v1171_v46 = vld [vmem:[%s4450_s3 + $0x278] sm:$0xff]  ;;  %v243_v48 = vld [vmem:[%s3164_s8 + $0x80] sm:$0xff]  ;;  %v1169_v59 = vld [vmem:[%s4450_s3 + $0x268] sm:$0xff] }
  0x18   : > { %2916 = vmatpush.msra.mxu1 %v505_v11  ;;  %2917 = vmatpush.msra.mxu2 %v505_v11  ;;  %338 = vst [vmem:[#allocation2 + $0x48] sm:$0xff] %v3098_v2  ;;  %v3306_v49 = vmul.f32 %v3176_v8, %v285_v40  ;;  %v782_v50 = vld [vmem:[%s4450_s3 + $0x160] sm:$0xff]  ;;  %v278_v55 = vsub.f32 %v243_v48, %v3171_v7  ;;  %v781_v57 = vld [vmem:[%s4450_s3 + $0x158] sm:$0xff]  ;;  %v780_v62 = vld [vmem:[%s4450_s3 + $0x150] sm:$0xff] }
  0x19   : > { %2918 = vmatpush.msra.mxu3 %v505_v11  ;;  %518 = vmatpush.msra.mxu0 %v505_v11  ;;  %339 = vst [vmem:[#allocation2 + $0x50] sm:$0xff] %v3098_v2  ;;  %v975_v51 = vld [vmem:[%s4450_s3 + $0x1e0] sm:$0xff]  ;;  %v974_v58 = vld [vmem:[%s4450_s3 + $0x1d8] sm:$0xff]  ;;  %v465_v63 = vld [vmem:[#allocation2 + $0x9] sm:$0xff]  ;;  %v3353_v3 = vmul.f32 %v3176_v8, %v270_v54 }
  0x1a   : > { %2919 = vmatpush.msra.mxu1 %v504_v13  ;;  %2920 = vmatpush.msra.mxu2 %v504_v13  ;;  %340 = vst [vmem:[#allocation2 + $0x58] sm:$0x3] %v3098_v2  ;;  %v251_v53 = vld [vmem:[%s3164_s8 + $0xc0] sm:$0xff]  ;;  %v459_v61 = vld [vmem:[%s4450_s3 + $0x58] sm:$0xff]  ;;  %v973_v0 = vld [vmem:[%s4450_s3 + $0x1d0] sm:$0xff]  ;;  %v3356_v4 = vmul.f32 %v3176_v8, %v278_v55 }
  0x1b   : > { %2921 = vmatpush.msra.mxu3 %v504_v13  ;;  %519 = vmatpush.msra.mxu0 %v504_v13  ;;  %343 = vst [vmem:[#allocation2 + $0x70] sm:$0x3] %v3098_v2  ;;  %v460_v56 = vld [vmem:[%s4450_s3 + $0x60] sm:$0xff]  ;;  %v286_v60 = vsub.f32 %v251_v53, %v3171_v7  ;;  %v458_v6 = vld [vmem:[%s4450_s3 + $0x50] sm:$0xff]  ;;  %v236_v9 = vld [vmem:[%s3164_s8 + $0x48] sm:$0xff] }
  0x1c   : > { %2922 = vmatpush.msra.mxu1 %v503_v14  ;;  %2923 = vmatpush.msra.mxu2 %v503_v14  ;;  %344 = vst [vmem:[#allocation2 + $0x78] sm:$0xff] %v3098_v2  ;;  %v227_v1 = vld [vmem:[%s3164_s8] sm:$0xff]  ;;  %v244_v10 = vld [vmem:[%s3164_s8 + $0x88] sm:$0xff]  ;;  %v271_v18 = vsub.f32 %v236_v9, %v3171_v7  ;;  %v777_v28 = vld [vmem:[%s4450_s3 + $0x138] sm:$0xff] }
  0x1d   : > { %2924 = vmatpush.msra.mxu3 %v503_v14  ;;  %520 = vmatpush.msra.mxu0 %v503_v14  ;;  %345 = vst [vmem:[#allocation2 + $0x80] sm:$0xff] %v3098_v2  ;;  %v1168_v5 = vld [vmem:[%s4450_s3 + $0x260] sm:$0xff]  ;;  %v3369_v11 = vmul.f32 %v3176_v8, %v286_v60  ;;  %v779_v13 = vld [vmem:[%s4450_s3 + $0x148] sm:$0xff]  ;;  %v262_v14 = vsub.f32 %v227_v1, %v3171_v7  ;;  %v455_v35 = vld [vmem:[%s4450_s3 + $0x38] sm:$0xff] }
  0x1e   : > { %2925 = vmatpush.msra.mxu1 %v502_v15  ;;  %2926 = vmatpush.msra.mxu2 %v502_v15  ;;  %346 = vst [vmem:[#allocation2 + $0x88] sm:$0x3] %v3098_v2  ;;  %v457_v20 = vld [vmem:[%s4450_s3 + $0x48] sm:$0xff]  ;;  %v971_v22 = vld [vmem:[%s4450_s3 + $0x1c0] sm:$0xff]  ;;  %v3420_v32 = vmul.f32 %v3176_v8, %v271_v18  ;;  %v237_v36 = vld [vmem:[%s3164_s8 + $0x50] sm:$0xff] }
  0x1f   : > { %2927 = vmatpush.msra.mxu3 %v502_v15  ;;  %521 = vmatpush.msra.mxu0 %v502_v15  ;;  %347 = vst [vmem:[#allocation2 + $0x90] sm:$0xff] %v3098_v2  ;;  %v972_v15 = vld [vmem:[%s4450_s3 + $0x1c8] sm:$0xff]  ;;  %v3404_v24 = vmul.f32 %v3176_v8, %v262_v14  ;;  %v456_v27 = vld [vmem:[%s4450_s3 + $0x40] sm:$0xff]  ;;  %v776_v40 = vld [vmem:[%s4450_s3 + $0x130] sm:$0xff] }
  0x20   : > { %2928 = vmatpush.msra.mxu1 %v501_v16  ;;  %2929 = vmatpush.msra.mxu2 %v501_v16  ;;  %348 = vst [vmem:[#allocation2 + $0x98] sm:$0xff] %v3098_v2  ;;  %v454_v48 = vld [vmem:[%s4450_s3 + $0x30] sm:$0xff]  ;;  %v774_v54 = vld [vmem:[%s4450_s3 + $0x120] sm:$0xff]  ;;  %v966_v1 = vld [vmem:[%s4450_s3 + $0x198] sm:$0xff] }
  0x21   : > { %2930 = vmatpush.msra.mxu3 %v501_v16  ;;  %522 = vmatpush.msra.mxu0 %v501_v16  ;;  %349 = vst [vmem:[#allocation2 + $0xa0] sm:$0x3] %v3098_v2  ;;  %v252_v16 = vld [vmem:[%s3164_s8 + $0xc8] sm:$0xff]  ;;  %v229_v55 = vld [vmem:[%s3164_s8 + $0x10] sm:$0xff]  ;;  %v452_v60 = vld [vmem:[%s4450_s3 + $0x20] sm:$0xff] }
  0x22   : > { %2931 = vmatpush.msra.mxu1 %v500_v17  ;;  %2932 = vmatpush.msra.mxu2 %v500_v17  ;;  %350 = vst [vmem:[#allocation2 + $0xa8] sm:$0xff] %v3098_v2  ;;  %v965_v14 = vld [vmem:[%s4450_s3 + $0x190] sm:$0xff] }
  0x23   : > { %2933 = vmatpush.msra.mxu3 %v500_v17  ;;  %351 = vst [vmem:[#allocation2 + $0xb0] sm:$0xff] %v3098_v2  ;;  %523 = vmatpush.msra.mxu0 %v500_v17  ;;  %v1167_v17 = vld [vmem:[%s4450_s3 + $0x258] sm:$0xff]  ;;  %v450_v18 = vld [vmem:[%s4450_s3 + $0x10] sm:$0xff] }
  0x24   : > { %2934 = vmatpush.msra.mxu1 %v499_v19  ;;  %2935 = vmatpush.msra.mxu2 %v499_v19  ;;  %352 = vst [vmem:[#allocation2 + $0xb8] sm:$0x3] %v3098_v2 }
  0x25   : > { %2936 = vmatpush.msra.mxu3 %v499_v19  ;;  %353 = vst [vmem:[#allocation2 + $0xc0] sm:$0xff] %v3098_v2  ;;  %524 = vmatpush.msra.mxu0 %v499_v19  ;;  %v279_v19 = vsub.f32 %v244_v10, %v3171_v7 }
  0x26   : > { %2937 = vmatpush.msra.mxu1 %v498_v21  ;;  %2938 = vmatpush.msra.mxu2 %v498_v21  ;;  %354 = vst [vmem:[#allocation2 + $0xc8] sm:$0xff] %v3098_v2 }
  0x27   : > { %2939 = vmatpush.msra.mxu3 %v498_v21  ;;  %355 = vst [vmem:[#allocation2 + $0xd0] sm:$0x3] %v3098_v2  ;;  %525 = vmatpush.msra.mxu0 %v498_v21  ;;  %v778_v21 = vld [vmem:[%s4450_s3 + $0x140] sm:$0xff] }
  0x28   : > { %2940 = vmatpush.msra.mxu1 %v497_v23  ;;  %2941 = vmatpush.msra.mxu2 %v497_v23  ;;  %356 = vst [vmem:[#allocation2 + $0xd8] sm:$0xff] %v3098_v2 }
  0x29   : > { %2942 = vmatpush.msra.mxu3 %v497_v23  ;;  %357 = vst [vmem:[#allocation2 + $0xe0] sm:$0xff] %v3098_v2  ;;  %526 = vmatpush.msra.mxu0 %v497_v23  ;;  %v1166_v23 = vld [vmem:[%s4450_s3 + $0x250] sm:$0xff] }
  0x2a   : > { %2943 = vmatpush.msra.mxu1 %v496_v25  ;;  %2944 = vmatpush.msra.mxu2 %v496_v25  ;;  %358 = vst [vmem:[#allocation2 + $0xe8] sm:$0x3] %v3098_v2 }
  0x2b   : > { %552 = vmatmul.f32.vlgmr.msra.gmra.mxu1 %v3190_v12  ;;  %359 = vst [vmem:[#allocation2 + $0xf0] sm:$0xff] %v3098_v2  ;;  %576 = vmatmul.f32.vlgmr.msra.gmra.mxu2 %v3243_v26 }
  0x2c   : > { %360 = vst [vmem:[#allocation2 + $0xf8] sm:$0xff] %v3098_v2  ;;  %786 = vmatpush.msrb.mxu2 %v785_v29  ;;  %2945 = vmatpush.msra.mxu3 %v496_v25  ;;  %v228_v29 = vld [vmem:[%s3164_s8 + $0x8] sm:$0xff] }
  0x2d   : > { %361 = vst [vmem:[#allocation2 + $0x100] sm:$0x3] %v3098_v2  ;;  %600 = vmatmul.f32.vlgmr.msra.gmra.mxu3 %v3253_v30  ;;  %625 = vmatpush.msrb.mxu1 %v463_v31  ;;  %v970_v31 = vld [vmem:[%s4450_s3 + $0x1b8] sm:$0xff] }
  0x2e   : > { %362 = vst [vmem:[#allocation2 + $0x108] sm:$0xff] %v3098_v2  ;;  %979 = vmatpush.msrb.mxu3 %v978_v33  ;;  %787 = vmatpush.msrb.mxu2 %v784_v34  ;;  %v3423_v33 = vmul.f32 %v3176_v8, %v279_v19  ;;  %v1165_v34 = vld [vmem:[%s4450_s3 + $0x248] sm:$0xff] }
  0x2f   : > { %363 = vst [vmem:[#allocation2 + $0x110] sm:$0xff] %v3098_v2  ;;  %626 = vmatpush.msrb.mxu1 %v462_v37  ;;  %527 = vmatpush.msra.mxu0 %v496_v25  ;;  %v287_v25 = vsub.f32 %v252_v16, %v3171_v7  ;;  %v245_v37 = vld [vmem:[%s3164_s8 + $0x90] sm:$0xff]  ;;  %v771_v19 = vld [vmem:[%s4450_s3 + $0x108] sm:$0xff] }
  0x30   : > { %364 = vst [vmem:[#allocation2 + $0x118] sm:$0x3] %v3098_v2  ;;  %980 = vmatpush.msrb.mxu3 %v977_v38  ;;  %788 = vmatpush.msrb.mxu2 %v783_v39  ;;  %v263_v39 = vsub.f32 %v228_v29, %v3171_v7  ;;  %v280_v47 = vsub.f32 %v245_v37, %v3171_v7  ;;  %v449_v29 = vld [vmem:[%s4450_s3 + $0x8] sm:$0xff]  ;;  %v770_v37 = vld [vmem:[%s4450_s3 + $0x100] sm:$0xff] }
  0x31   : > { %365 = vst [vmem:[#allocation2 + $0x120] sm:$0xff] %v3098_v2  ;;  %528 = vmatmul.f32.vlgmr.msra.gmra.mxu0 %v464_v41  ;;  %627 = vmatpush.msrb.mxu1 %v461_v42  ;;  %v3437_v38 = vmul.f32 %v3176_v8, %v287_v25  ;;  %v969_v41 = vld [vmem:[%s4450_s3 + $0x1b0] sm:$0xff] }
  0x32   : > { %366 = vst [vmem:[#allocation2 + $0x128] sm:$0xff] %v3098_v2  ;;  %981 = vmatpush.msrb.mxu3 %v976_v45  ;;  %1172 = vmatpush.msrb.mxu0 %v1171_v46  ;;  %v253_v42 = vld [vmem:[%s3164_s8 + $0xd0] sm:$0xff]  ;;  %v1164_v45 = vld [vmem:[%s4450_s3 + $0x240] sm:$0xff]  ;;  %v272_v46 = vsub.f32 %v237_v36, %v3171_v7 }
  0x33   : > { %367 = vst [vmem:[#allocation2 + $0x130] sm:$0x3] %v3098_v2  ;;  %555 = vmatmul.f32.gmra.mxu1 %v3290_v43  ;;  %579 = vmatmul.f32.gmra.mxu2 %v3293_v44  ;;  %v288_v53 = vsub.f32 %v253_v42, %v3171_v7  ;;  %v255_v36 = vld [vmem:[%s3164_s8 + $0xe0] sm:$0xff]  ;;  %v248_v42 = vld [vmem:[%s3164_s8 + $0xa8] sm:$0xff] }
  0x34   : > { %368 = vst [vmem:[#allocation2 + $0x138] sm:$0xff] %v3098_v2  ;;  %789 = vmatpush.msrb.mxu2 %v782_v50  ;;  %982 = vmatpush.msrb.mxu3 %v975_v51  ;;  %v775_v50 = vld [vmem:[%s4450_s3 + $0x128] sm:$0xff]  ;;  %v1163_v51 = vld [vmem:[%s4450_s3 + $0x238] sm:$0xff] }
  0x35   : > { %369 = vst [vmem:[#allocation2 + $0x140] sm:$0xff] %v3098_v2  ;;  %603 = vmatmul.f32.gmra.mxu3 %v3306_v49  ;;  %1173 = vmatpush.msrb.mxu0 %v1170_v52  ;;  %v3472_v52 = vmul.f32 %v3176_v8, %v263_v39 }
  0x36   : > { %370 = vst [vmem:[#allocation2 + $0x148] sm:$0x3] %v3098_v2  ;;  %628 = vmatpush.msrb.mxu1 %v460_v56  ;;  %790 = vmatpush.msrb.mxu2 %v781_v57  ;;  %v967_v56 = vld [vmem:[%s4450_s3 + $0x1a0] sm:$0xff]  ;;  %v3488_v57 = vmul.f32 %v3176_v8, %v272_v46  ;;  %v1558_v46 = vld [vmem:[%s4450_s3 + $0x378] sm:$0xff] }
  0x37   : > { %371 = vst [vmem:[#allocation2 + $0x150] sm:$0xff] %v3098_v2  ;;  %983 = vmatpush.msrb.mxu3 %v974_v58  ;;  %1174 = vmatpush.msrb.mxu0 %v1169_v59  ;;  %v3491_v58 = vmul.f32 %v3176_v8, %v280_v47  ;;  %v1162_v59 = vld [vmem:[%s4450_s3 + $0x230] sm:$0xff]  ;;  %v290_v47 = vsub.f32 %v255_v36, %v3171_v7 }
  0x38   : > { %372 = vst [vmem:[#allocation2 + $0x158] sm:$0xff] %v3098_v2  ;;  %629 = vmatpush.msrb.mxu1 %v459_v61  ;;  %791 = vmatpush.msrb.mxu2 %v780_v62  ;;  %v246_v61 = vld [vmem:[%s3164_s8 + $0x98] sm:$0xff]  ;;  %v323_v62 = vmul.f32 %v3176_v8, %v288_v53 }
  0x39   : > { %373 = vst [vmem:[#allocation2 + $0x160] sm:$0x3] %v3098_v2  ;;  %531 = vmatmul.f32.gmra.mxu0 %v465_v63  ;;  %984 = vmatpush.msrb.mxu3 %v973_v0  ;;  %v264_v63 = vsub.f32 %v229_v55, %v3171_v7  ;;  %v773_v0 = vld [vmem:[%s4450_s3 + $0x118] sm:$0xff]  ;;  %v281_v10 = vsub.f32 %v246_v61, %v3171_v7  ;;  %v1156_v61 = vld [vmem:[%s4450_s3 + $0x200] sm:$0xff] }
  0x3a   : > { %374 = vst [vmem:[#allocation2 + $0x168] sm:$0xff] %v3098_v2  ;;  %1175 = vmatpush.msrb.mxu0 %v1168_v5  ;;  %630 = vmatpush.msrb.mxu1 %v458_v6  ;;  %v254_v5 = vld [vmem:[%s3164_s8 + $0xd8] sm:$0xff]  ;;  %v1161_v6 = vld [vmem:[%s4450_s3 + $0x228] sm:$0xff] }
  0x3b   : > { %375 = vst [vmem:[#allocation2 + $0x170] sm:$0xff] %v3098_v2  ;;  %558 = vmatmul.f32.gmra.mxu1 %v3353_v3  ;;  %582 = vmatmul.f32.gmra.mxu2 %v3356_v4  ;;  %v3537_v16 = vmul.f32 %v3176_v8, %v264_v63  ;;  %v3557_v25 = vmul.f32 %v3176_v8, %v281_v10  ;;  %v1364_v55 = vld [vmem:[%s4450_s3 + $0x2f8] sm:$0xff] }
  0x3c   : > { %376 = vst [vmem:[#allocation2 + $0x178] sm:$0x3] %v3098_v2  ;;  %792 = vmatpush.msrb.mxu2 %v779_v13  ;;  %985 = vmatpush.msrb.mxu3 %v972_v15  ;;  %v772_v13 = vld [vmem:[%s4450_s3 + $0x110] sm:$0xff]  ;;  %v1160_v15 = vld [vmem:[%s4450_s3 + $0x220] sm:$0xff] }
  0x3d   : > { %377 = vst [vmem:[#allocation2 + $0x180] sm:$0xff] %v3098_v2  ;;  %606 = vmatmul.f32.gmra.mxu3 %v3369_v11  ;;  %1176 = vmatpush.msrb.mxu0 %v1167_v17  ;;  %v289_v17 = vsub.f32 %v254_v5, %v3171_v7  ;;  %v1944_v5 = vld [vmem:[%s4450_s3 + $0x478] sm:$0xff] }
  0x3e   : > { %378 = vst [vmem:[#allocation2 + $0x188] sm:$0xff] %v3098_v2  ;;  %631 = vmatpush.msrb.mxu1 %v457_v20  ;;  %793 = vmatpush.msrb.mxu2 %v778_v21  ;;  %v239_v20 = vld [vmem:[%s3164_s8 + $0x60] sm:$0xff]  ;;  %v230_v21 = vld [vmem:[%s3164_s8 + $0x18] sm:$0xff] }
  0x3f   : > { %379 = vst [vmem:[#allocation2 + $0x190] sm:$0x3] %v3098_v2  ;;  %986 = vmatpush.msrb.mxu3 %v971_v22  ;;  %1177 = vmatpush.msrb.mxu0 %v1166_v23  ;;  %v964_v22 = vld [vmem:[%s4450_s3 + $0x188] sm:$0xff] }
  0x40   : > { %380 = vst [vmem:[#allocation2 + $0x198] sm:$0xff] %v3098_v2  ;;  %632 = vmatpush.msrb.mxu1 %v456_v27  ;;  %794 = vmatpush.msrb.mxu2 %v777_v28  ;;  %v247_v27 = vld [vmem:[%s3164_s8 + $0xa0] sm:$0xff]  ;;  %v1159_v28 = vld [vmem:[%s4450_s3 + $0x218] sm:$0xff] }
  0x41   : > { %381 = vst [vmem:[#allocation2 + $0x1a0] sm:$0xff] %v3098_v2  ;;  %534 = vmatmul.f32.gmra.mxu0 %v3404_v24  ;;  %987 = vmatpush.msrb.mxu3 %v970_v31  ;;  %v324_v31 = vmul.f32 %v3176_v8, %v289_v17  ;;  %v282_v39 = vsub.f32 %v247_v27, %v3171_v7  ;;  %v1942_v27 = vld [vmem:[%s4450_s3 + $0x468] sm:$0xff] }
  0x42   : > { %382 = vst [vmem:[#allocation2 + $0x1a8] sm:$0x3] %v3098_v2  ;;  %1178 = vmatpush.msrb.mxu0 %v1165_v34  ;;  %633 = vmatpush.msrb.mxu1 %v455_v35  ;;  %v274_v34 = vsub.f32 %v239_v20, %v3171_v7  ;;  %v265_v35 = vsub.f32 %v230_v21, %v3171_v7  ;;  %v1362_v20 = vld [vmem:[%s4450_s3 + $0x2e8] sm:$0xff] }
  0x43   : > { %398 = vst [vmem:[#allocation2 + $0xc1] sm:$0xff] %v3243_v26  ;;  %561 = vmatmul.f32.gmra.mxu1 %v3420_v32  ;;  %585 = vmatmul.f32.gmra.mxu2 %v3423_v33  ;;  %v968_v26 = vld [vmem:[%s4450_s3 + $0x1a8] sm:$0xff] }
  0x44   : > { %406 = vst [vmem:[#allocation2 + $0x121] sm:$0xff] %v3253_v30  ;;  %795 = vmatpush.msrb.mxu2 %v776_v40  ;;  %988 = vmatpush.msrb.mxu3 %v969_v41  ;;  %v453_v30 = vld [vmem:[%s4450_s3 + $0x28] sm:$0xff]  ;;  %v1158_v41 = vld [vmem:[%s4450_s3 + $0x210] sm:$0xff]  ;;  %v3608_v53 = vmul.f32 %v3176_v8, %v265_v35  ;;  %v1941_v35 = vld [vmem:[%s4450_s3 + $0x460] sm:$0xff] }
  0x45   : > { %391 = vst [vmem:[#allocation2 + $0x69] sm:$0xff] %v3290_v43  ;;  %609 = vmatmul.f32.gmra.mxu3 %v3437_v38  ;;  %1179 = vmatpush.msrb.mxu0 %v1164_v45  ;;  %v240_v40 = vld [vmem:[%s3164_s8 + $0x68] sm:$0xff]  ;;  %v448_v45 = vld [vmem:[%s4450_s3] sm:$0xff] }
  0x46   : > { %399 = vst [vmem:[#allocation2 + $0xc9] sm:$0xff] %v3293_v44  ;;  %634 = vmatpush.msrb.mxu1 %v454_v48  ;;  %796 = vmatpush.msrb.mxu2 %v775_v50  ;;  %v231_v48 = vld [vmem:[%s3164_s8 + $0x20] sm:$0xff]  ;;  %v1157_v50 = vld [vmem:[%s4450_s3 + $0x208] sm:$0xff] }
  0x47   : > { %407 = vst [vmem:[#allocation2 + $0x129] sm:$0xff] %v3306_v49  ;;  %989 = vmatpush.msrb.mxu3 %v968_v26  ;;  %1180 = vmatpush.msrb.mxu0 %v1163_v51  ;;  %v238_v49 = vld [vmem:[%s3164_s8 + $0x58] sm:$0xff]  ;;  %v3605_v51 = vmul.f32 %v3176_v8, %v274_v34  ;;  %v739_v21 = vld [vmem:[#allocation2 + $0xa] sm:$0xff] }
  0x48   : > { %392 = vst [vmem:[#allocation2 + $0x79] sm:$0xff] %v3353_v3  ;;  %635 = vmatpush.msrb.mxu1 %v453_v30  ;;  %797 = vmatpush.msrb.mxu2 %v774_v54  ;;  %v273_v9 = vsub.f32 %v238_v49, %v3171_v7  ;;  %v1751_v26 = vld [vmem:[%s4450_s3 + $0x3f8] sm:$0xff]  ;;  %v275_v30 = vsub.f32 %v240_v40, %v3171_v7  ;;  %v256_v54 = vld [vmem:[%s3164_s8 + $0xe8] sm:$0xff] }
  0x49   : > { %400 = vst [vmem:[#allocation2 + $0xd9] sm:$0xff] %v3356_v4  ;;  %537 = vmatmul.f32.gmra.mxu0 %v3472_v52  ;;  %990 = vmatpush.msrb.mxu3 %v967_v56  ;;  %v3616_v56 = vmul.f32 %v3176_v8, %v282_v39  ;;  %v266_v49 = vsub.f32 %v231_v48, %v3171_v7  ;;  %v1360_v39 = vld [vmem:[%s4450_s3 + $0x2d8] sm:$0xff]  ;;  %v1746_v48 = vld [vmem:[%s4450_s3 + $0x3d0] sm:$0xff] }
  0x4a   : > { %408 = vst [vmem:[#allocation2 + $0x139] sm:$0xff] %v3369_v11  ;;  %1181 = vmatpush.msrb.mxu0 %v1162_v59  ;;  %636 = vmatpush.msrb.mxu1 %v452_v60  ;;  %v451_v11 = vld [vmem:[%s4450_s3 + $0x18] sm:$0xff]  ;;  %v3554_v23 = vmul.f32 %v3176_v8, %v273_v9  ;;  %v283_v59 = vsub.f32 %v248_v42, %v3171_v7  ;;  %v232_v60 = vld [vmem:[%s3164_s8 + $0x28] sm:$0xff] }
  0x4b   : > { %393 = vst [vmem:[#allocation2 + $0x81] sm:$0xff] %v3420_v32  ;;  %564 = vmatmul.f32.gmra.mxu1 %v3488_v57  ;;  %588 = vmatmul.f32.gmra.mxu2 %v3491_v58  ;;  %v291_v63 = vsub.f32 %v256_v54, %v3171_v7  ;;  %v3644_v9 = vmul.f32 %v3176_v8, %v266_v49  ;;  %v1940_v42 = vld [vmem:[%s4450_s3 + $0x458] sm:$0xff] }
  0x4c   : > { %401 = vst [vmem:[#allocation2 + $0xe1] sm:$0xff] %v3423_v33  ;;  %798 = vmatpush.msrb.mxu2 %v773_v0  ;;  %991 = vmatpush.msrb.mxu3 %v966_v1  ;;  %v3631_v0 = vmul.f32 %v3176_v8, %v275_v30  ;;  %v267_v1 = vsub.f32 %v232_v60, %v3171_v7  ;;  %v1557_v7 = vld [vmem:[%s4450_s3 + $0x370] sm:$0xff]  ;;  %v1745_v60 = vld [vmem:[%s4450_s3 + $0x3c8] sm:$0xff] }
  0x4d   : > { %384 = vst [vmem:[#allocation2 + $0x19] sm:$0xff] %v3404_v24  ;;  %612 = vmatmul.f32.gmra.mxu3 %v323_v62  ;;  %1182 = vmatpush.msrb.mxu0 %v1161_v6  ;;  %v3638_v6 = vmul.f32 %v3176_v8, %v283_v59  ;;  %v326_v10 = vmul.f32 %v3176_v8, %v291_v63  ;;  %v1939_v30 = vld [vmem:[%s4450_s3 + $0x450] sm:$0xff] }
  0x4e   : > { %409 = vst [vmem:[#allocation2 + $0x141] sm:$0xff] %v3437_v38  ;;  %637 = vmatpush.msrb.mxu1 %v451_v11  ;;  %799 = vmatpush.msrb.mxu2 %v772_v13  ;;  %v963_v38 = vld [vmem:[%s4450_s3 + $0x180] sm:$0xff]  ;;  %v3653_v11 = vmul.f32 %v3176_v8, %v267_v1  ;;  %v1750_v13 = vld [vmem:[%s4450_s3 + $0x3f0] sm:$0xff] }
  0x4f   : > { %394 = vst [vmem:[#allocation2 + $0x91] sm:$0xff] %v3488_v57  ;;  %992 = vmatpush.msrb.mxu3 %v965_v14  ;;  %1183 = vmatpush.msrb.mxu0 %v1160_v15  ;;  %v1363_v14 = vld [vmem:[%s4450_s3 + $0x2f0] sm:$0xff]  ;;  %v738_v15 = vld [vmem:[#allocation2 + $0x2] sm:$0xff]  ;;  %v939_v59 = vld [vmem:[#allocation2 + $0x78] sm:$0xff] }
  0x50   : > { %402 = vst [vmem:[#allocation2 + $0xf1] sm:$0xff] %v3491_v58  ;;  %638 = vmatpush.msrb.mxu1 %v450_v18  ;;  %800 = vmatpush.msrb.mxu2 %v771_v19  ;;  %v1556_v18 = vld [vmem:[%s4450_s3 + $0x368] sm:$0xff] }
  0x51   : > { %385 = vst [vmem:[#allocation2 + $0x21] sm:$0xff] %v3472_v52  ;;  %540 = vmatmul.f32.gmra.mxu0 %v3537_v16  ;;  %993 = vmatpush.msrb.mxu3 %v964_v22  ;;  %v1749_v19 = vld [vmem:[%s4450_s3 + $0x3e8] sm:$0xff] }
  0x52   : > { %410 = vst [vmem:[#allocation2 + $0x151] sm:$0xff] %v323_v62  ;;  %1184 = vmatpush.msrb.mxu0 %v1159_v28  ;;  %639 = vmatpush.msrb.mxu1 %v449_v29  ;;  %v325_v62 = vmul.f32 %v3176_v8, %v290_v47  ;;  %v1943_v8 = vld [vmem:[%s4450_s3 + $0x470] sm:$0xff] }
  0x53   : > { %395 = vst [vmem:[#allocation2 + $0x99] sm:$0xff] %v3554_v23  ;;  %567 = vmatmul.f32.gmra.mxu1 %v3554_v23  ;;  %591 = vmatmul.f32.gmra.mxu2 %v3557_v25  ;;  %v1553_v47 = vld [vmem:[%s4450_s3 + $0x350] sm:$0xff] }
  0x54   : > { %403 = vst [vmem:[#allocation2 + $0xf9] sm:$0xff] %v3557_v25  ;;  %801 = vmatpush.msrb.mxu2 %v770_v37  ;;  %994 = vmatpush.msrb.mxu3 %v963_v38  ;;  %v931_v17 = vld [vmem:[#allocation2 + $0x18] sm:$0xff]  ;;  %v747_v1 = vld [vmem:[#allocation2 + $0x6a] sm:$0xff] }
  0x55   : > { %386 = vst [vmem:[#allocation2 + $0x31] sm:$0xff] %v3537_v16  ;;  %615 = vmatmul.f32.gmra.mxu3 %v324_v31  ;;  %1185 = vmatpush.msrb.mxu0 %v1158_v41  ;;  %v1554_v38 = vld [vmem:[%s4450_s3 + $0x358] sm:$0xff] }
  0x56   : > { %411 = vst [vmem:[#allocation2 + $0x159] sm:$0xff] %v324_v31  ;;  %640 = vmatpush.msrb.mxu1 %v448_v45  ;;  %1559 = vmatpush.msra.mxu2 %v1558_v46  ;;  %v1361_v31 = vld [vmem:[%s4450_s3 + $0x2e0] sm:$0xff] }
  0x57   : > { %396 = vst [vmem:[#allocation2 + $0xa9] sm:$0xff] %v3605_v51  ;;  %1186 = vmatpush.msrb.mxu0 %v1157_v50  ;;  %1752 = vmatpush.msra.mxu3 %v1751_v26  ;;  %v937_v46 = vld [vmem:[#allocation2 + $0x60] sm:$0xff]  ;;  %v1359_v50 = vld [vmem:[%s4450_s3 + $0x2d0] sm:$0xff] }
  0x58   : > { %404 = vst [vmem:[#allocation2 + $0x109] sm:$0xff] %v3616_v56  ;;  %1365 = vmatpush.msra.mxu1 %v1364_v55  ;;  %1560 = vmatpush.msra.mxu2 %v1557_v7  ;;  %v932_v22 = vld [vmem:[#allocation2 + $0x20] sm:$0xff] }
  0x59   : > { %387 = vst [vmem:[#allocation2 + $0x39] sm:$0xff] %v3608_v53  ;;  %543 = vmatmul.f32.gmra.mxu0 %v3608_v53  ;;  %1753 = vmatpush.msra.mxu3 %v1750_v13  ;;  %v740_v28 = vld [vmem:[#allocation2 + $0x1a] sm:$0xff]  ;;  %v746_v55 = vld [vmem:[#allocation2 + $0x62] sm:$0xff] }
  0x5a   : > { %412 = vst [vmem:[#allocation2 + $0x169] sm:$0xff] %v325_v62  ;;  %1187 = vmatpush.msrb.mxu0 %v1156_v61  ;;  %1366 = vmatpush.msra.mxu1 %v1363_v14  ;;  %v748_v14 = vld [vmem:[#allocation2 + $0x7a] sm:$0xff] }
  0x5b   : > { %570 = vmatmul.f32.gmra.mxu1 %v3605_v51  ;;  %594 = vmatmul.f32.gmra.mxu2 %v3616_v56  ;;  %397 = vst [vmem:[#allocation2 + $0xb1] sm:$0xff] %v3631_v0 }
  0x5c   : > { %405 = vst [vmem:[#allocation2 + $0x111] sm:$0xff] %v3638_v6  ;;  %1945 = vmatpush.msra.mxu0 %v1944_v5  ;;  %1561 = vmatpush.msra.mxu2 %v1556_v18  ;;  %v933_v29 = vld [vmem:[#allocation2 + $0x30] sm:$0xff]  ;;  %v940_v5 = vld [vmem:[#allocation2 + $0x80] sm:$0xff] }
  0x5d   : > { %618 = vmatmul.f32.gmra.mxu3 %v325_v62  ;;  %388 = vst [vmem:[#allocation2 + $0x49] sm:$0xff] %v3644_v9  ;;  %1367 = vmatpush.msra.mxu1 %v1362_v20 }
  0x5e   : > { %413 = vst [vmem:[#allocation2 + $0x171] sm:$0xff] %v326_v10  ;;  %1946 = vmatpush.msra.mxu0 %v1943_v8  ;;  %1754 = vmatpush.msra.mxu3 %v1749_v19  ;;  %v1551_v8 = vld [vmem:[%s4450_s3 + $0x340] sm:$0xff] }
  0x5f   : > { %389 = vst [vmem:[#allocation2 + $0x51] sm:$0xff] %v3653_v11  ;;  %1368 = vmatpush.msra.mxu1 %v1361_v31  ;;  %v750_v31 = vld [vmem:[#allocation2 + $0x92] sm:$0xff] }
  0x60   : > { %1947 = vmatpush.msra.mxu0 %v1942_v27  ;;  %v934_v34 = vld [vmem:[#allocation2 + $0x38] sm:$0xff]  ;;  %v1937_v27 = vld [vmem:[%s4450_s3 + $0x440] sm:$0xff] }
  0x61   : > { %546 = vmatmul.f32.gmra.mxu0 %v3644_v9  ;;  %v742_v36 = vld [vmem:[#allocation2 + $0x32] sm:$0xff]  ;;  %1369 = vmatpush.msra.mxu1 %v1360_v39  ;;  %v743_v40 = vld [vmem:[#allocation2 + $0x3a] sm:$0xff] }
  0x62   : > { %1948 = vmatpush.msra.mxu0 %v1941_v35  ;;  %v944_v39 = vld [vmem:[#allocation2 + $0xb0] sm:$0xff] }
  0x63   : > { %573 = vmatmul.f32.gmra.mxu1 %v3631_v0  ;;  %597 = vmatmul.f32.gmra.mxu2 %v3638_v6 }
  0x64   : > { %v935_v37 = vld [vmem:[#allocation2 + $0x48] sm:$0xff]  ;;  %1949 = vmatpush.msra.mxu0 %v1940_v42  ;;  %1370 = vmatpush.msra.mxu1 %v1359_v50  ;;  %v1742_v50 = vld [vmem:[%s4450_s3 + $0x3b0] sm:$0xff] }
  0x65   : > { %621 = vmatmul.f32.gmra.mxu3 %v326_v10 }
  0x66   : > { %v936_v41 = vld [vmem:[#allocation2 + $0x50] sm:$0xff]  ;;  %1950 = vmatpush.msra.mxu0 %v1939_v30  ;;  %v1138_v30 = vld [vmem:[#allocation2 + $0xc1] sm:$0xff] }
  0x67   : > { %v744_v45 = vld [vmem:[#allocation2 + $0x4a] sm:$0xff]  ;;  %v745_v26 = vld [vmem:[#allocation2 + $0x52] sm:$0xff] }
  0x69   : > { %549 = vmatmul.f32.gmra.mxu0 %v3653_v11 }
  0x6b   : > { %641 = vmatmul.f32.vlgmr.msrb.gmra.mxu1 %v3098_v2  ;;  %802 = vmatmul.f32.vlgmr.msrb.gmra.mxu2 %v738_v15  ;;  %v1744_v15 = vld [vmem:[%s4450_s3 + $0x3c0] sm:$0xff] }
  0x6d   : > { %995 = vmatmul.f32.vlgmr.msrb.gmra.mxu3 %v931_v17 }
  0x71   : > { %1188 = vmatmul.f32.vlgmr.msrb.gmra.mxu0 %v3404_v24  ;;  %v1555_v24 = vld [vmem:[%s4450_s3 + $0x360] sm:$0xff] }
  0x72   : > { %1562 = vmatpush.msra.mxu2 %v1555_v24 }
  0x73   : > { %644 = vmatmul.f32.gmra.mxu1 %v3098_v2  ;;  %805 = vmatmul.f32.gmra.mxu2 %v739_v21  ;;  %v1748_v2 = vld [vmem:[%s4450_s3 + $0x3e0] sm:$0xff] }
  0x74   : > { %1755 = vmatpush.msra.mxu3 %v1748_v2  ;;  %1563 = vmatpush.msra.mxu2 %v1554_v38  ;;  %v749_v21 = vld [vmem:[#allocation2 + $0x82] sm:$0xff] }
  0x75   : > { %998 = vmatmul.f32.gmra.mxu3 %v932_v22 }
  0x76   : > { %1564 = vmatpush.msra.mxu2 %v1553_v47  ;;  %v752_v47 = vld [vmem:[#allocation2 + $0xaa] sm:$0xff] }
  0x79   : > { %1191 = vmatmul.f32.gmra.mxu0 %v3472_v52  ;;  %v741_v52 = vld [vmem:[#allocation2 + $0x22] sm:$0xff] }
  0x7b   : > { %647 = vmatmul.f32.gmra.mxu1 %v931_v17  ;;  %808 = vmatmul.f32.gmra.mxu2 %v740_v28 }
  0x7d   : > { %1001 = vmatmul.f32.gmra.mxu3 %v933_v29 }
  0x81   : > { %1194 = vmatmul.f32.gmra.mxu0 %v3537_v16  ;;  %v1747_v16 = vld [vmem:[%s4450_s3 + $0x3d8] sm:$0xff] }
  0x82   : > { %1756 = vmatpush.msra.mxu3 %v1747_v16  ;;  %v751_v16 = vld [vmem:[#allocation2 + $0x9a] sm:$0xff] }
  0x83   : > { %650 = vmatmul.f32.gmra.mxu1 %v932_v22  ;;  %811 = vmatmul.f32.gmra.mxu2 %v741_v52  ;;  %v942_v22 = vld [vmem:[#allocation2 + $0x98] sm:$0xff] }
  0x84   : > { %1757 = vmatpush.msra.mxu3 %v1746_v48  ;;  %v1550_v52 = vld [vmem:[%s4450_s3 + $0x338] sm:$0xff]  ;;  %v1549_v48 = vld [vmem:[%s4450_s3 + $0x330] sm:$0xff] }
  0x85   : > { %1004 = vmatmul.f32.gmra.mxu3 %v934_v34 }
  0x86   : > { %1758 = vmatpush.msra.mxu3 %v1745_v60  ;;  %v946_v60 = vld [vmem:[#allocation2 + $0xc8] sm:$0xff] }
  0x88   : > { %1759 = vmatpush.msra.mxu3 %v1744_v15  ;;  %v1548_v15 = vld [vmem:[%s4450_s3 + $0x328] sm:$0xff] }
  0x89   : > { %1197 = vmatmul.f32.gmra.mxu0 %v3608_v53  ;;  %v938_v53 = vld [vmem:[#allocation2 + $0x68] sm:$0xff] }
  0x8b   : > { %653 = vmatmul.f32.gmra.mxu1 %v933_v29  ;;  %814 = vmatmul.f32.gmra.mxu2 %v742_v36 }
  0x8d   : > { %1007 = vmatmul.f32.gmra.mxu3 %v935_v37 }
  0x91   : > { %1200 = vmatmul.f32.gmra.mxu0 %v3644_v9  ;;  %v1938_v9 = vld [vmem:[%s4450_s3 + $0x448] sm:$0xff] }
  0x92   : > { %1951 = vmatpush.msra.mxu0 %v1938_v9 }
  0x93   : > { %656 = vmatmul.f32.gmra.mxu1 %v934_v34  ;;  %817 = vmatmul.f32.gmra.mxu2 %v743_v40  ;;  %v1743_v34 = vld [vmem:[%s4450_s3 + $0x3b8] sm:$0xff] }
  0x94   : > { %1952 = vmatpush.msra.mxu0 %v1937_v27  ;;  %1760 = vmatpush.msra.mxu3 %v1743_v34  ;;  %v1936_v40 = vld [vmem:[%s4450_s3 + $0x438] sm:$0xff]  ;;  %v755_v34 = vld [vmem:[#allocation2 + $0xca] sm:$0xff] }
  0x95   : > { %1010 = vmatmul.f32.gmra.mxu3 %v936_v41 }
  0x96   : > { %1953 = vmatpush.msra.mxu0 %v1936_v40  ;;  %1761 = vmatpush.msra.mxu3 %v1742_v50  ;;  %v1934_v40 = vld [vmem:[%s4450_s3 + $0x428] sm:$0xff] }
  0x99   : > { %1203 = vmatmul.f32.gmra.mxu0 %v3653_v11 }
  0x9b   : > { %659 = vmatmul.f32.gmra.mxu1 %v935_v37  ;;  %820 = vmatmul.f32.gmra.mxu2 %v744_v45 }
  0x9d   : > { %1013 = vmatmul.f32.gmra.mxu3 %v937_v46 }
  0xa1   : > { %1206 = vmatmul.f32.gmra.mxu0 %v3190_v12  ;;  %v1552_v12 = vld [vmem:[%s4450_s3 + $0x348] sm:$0xff] }
  0xa2   : > { %1565 = vmatpush.msra.mxu2 %v1552_v12  ;;  %v753_v12 = vld [vmem:[#allocation2 + $0xb2] sm:$0xff] }
  0xa3   : > { %662 = vmatmul.f32.gmra.mxu1 %v936_v41  ;;  %823 = vmatmul.f32.gmra.mxu2 %v745_v26 }
  0xa4   : > { %1566 = vmatpush.msra.mxu2 %v1551_v8  ;;  %v947_v8 = vld [vmem:[#allocation2 + $0xd8] sm:$0xff] }
  0xa5   : > { %1016 = vmatmul.f32.gmra.mxu3 %v938_v53 }
  0xa6   : > { %1567 = vmatpush.msra.mxu2 %v1550_v52 }
  0xa8   : > { %v3726_v54 = vpop.f32.mrf.mxu1  ;;  %1568 = vmatpush.msra.mxu2 %v1549_v48 }
  0xa9   : > { %1209 = vmatmul.f32.gmra.mxu0 %v3290_v43  ;;  %v1358_v43 = vld [vmem:[%s4450_s3 + $0x2c8] sm:$0xff] }
  0xaa   : > { %1371 = vmatpush.msra.mxu1 %v1358_v43  ;;  %v1935_v43 = vld [vmem:[%s4450_s3 + $0x430] sm:$0xff]  ;;  %1569 = vmatpush.msra.mxu2 %v1548_v15 }
  0xab   : > { %665 = vmatmul.f32.gmra.mxu1 %v937_v46  ;;  %826 = vmatmul.f32.gmra.mxu2 %v746_v55 }
  0xac   : > { %1954 = vmatpush.msra.mxu0 %v1935_v43 }
  0xad   : > { %1019 = vmatmul.f32.gmra.mxu3 %v939_v59 }
  0xae   : > { %v3735_v49 = vpop.f32.mrf.mxu2  ;;  %v3737_v61 = vpop.f32.mrf.mxu0  ;;  %1955 = vmatpush.msra.mxu0 %v1934_v40 }
  0xb0   : > { %v3742_v62 = vpop.f32.mrf.mxu1  ;;  %v3744_v63 = vpop.f32.mrf.mxu3 }
  0xb1   : > { %1212 = vmatmul.f32.gmra.mxu0 %v3353_v3  ;;  %v941_v3 = vld [vmem:[#allocation2 + $0x90] sm:$0xff] }
  0xb3   : > { %668 = vmatmul.f32.gmra.mxu1 %v938_v53  ;;  %829 = vmatmul.f32.gmra.mxu2 %v747_v1 }
  0xb5   : > { %1022 = vmatmul.f32.gmra.mxu3 %v940_v5 }
  0xb6   : > { %v3750_v7 = vpop.f32.mrf.mxu2  ;;  %v3752_v10 = vpop.f32.mrf.mxu0 }
  0xb8   : > { %v3754_v11 = vpop.f32.mrf.mxu1  ;;  %v3756_v13 = vpop.f32.mrf.mxu3 }
  0xb9   : > { %1215 = vmatmul.f32.gmra.mxu0 %v3420_v32  ;;  %v1357_v32 = vld [vmem:[%s4450_s3 + $0x2c0] sm:$0xff] }
  0xba   : > { %1372 = vmatpush.msra.mxu1 %v1357_v32 }
  0xbb   : > { %671 = vmatmul.f32.gmra.mxu1 %v939_v59  ;;  %832 = vmatmul.f32.gmra.mxu2 %v748_v14 }
  0xbd   : > { %1025 = vmatmul.f32.gmra.mxu3 %v941_v3 }
  0xbe   : > { %v3765_v17 = vpop.f32.mrf.mxu2  ;;  %v3767_v18 = vpop.f32.mrf.mxu0 }
  0xc0   : > { %v3772_v19 = vpop.f32.mrf.mxu1  ;;  %v3774_v20 = vpop.f32.mrf.mxu3 }
  0xc1   : > { %1218 = vmatmul.f32.gmra.mxu0 %v3488_v57  ;;  %v943_v57 = vld [vmem:[#allocation2 + $0xa8] sm:$0xff] }
  0xc3   : > { %674 = vmatmul.f32.gmra.mxu1 %v940_v5  ;;  %835 = vmatmul.f32.gmra.mxu2 %v749_v21  ;;  %v1741_v21 = vld [vmem:[%s4450_s3 + $0x3a8] sm:$0xff] }
  0xc4   : > { %1762 = vmatpush.msra.mxu3 %v1741_v21 }
  0xc5   : > { %1028 = vmatmul.f32.gmra.mxu3 %v942_v22 }
  0xc6   : > { %v3780_v28 = vpop.f32.mrf.mxu2  ;;  %v3782_v29 = vpop.f32.mrf.mxu0 }
  0xc8   : > { %v3784_v24 = vpop.f32.mrf.mxu1  ;;  %v3786_v2 = vpop.f32.mrf.mxu3 }
  0xc9   : > { %1221 = vmatmul.f32.gmra.mxu0 %v3554_v23  ;;  %v1356_v23 = vld [vmem:[%s4450_s3 + $0x2b8] sm:$0xff] }
  0xca   : > { %1373 = vmatpush.msra.mxu1 %v1356_v23 }
  0xcb   : > { %677 = vmatmul.f32.gmra.mxu1 %v941_v3  ;;  %838 = vmatmul.f32.gmra.mxu2 %v750_v31  ;;  %v754_v3 = vld [vmem:[#allocation2 + $0xc2] sm:$0xff] }
  0xcd   : > { %1031 = vmatmul.f32.gmra.mxu3 %v943_v57 }
  0xce   : > { %v3795_v35 = vpop.f32.mrf.mxu2  ;;  %v3797_v36 = vpop.f32.mrf.mxu0 }
  0xd0   : > { %v3802_v37 = vpop.f32.mrf.mxu1  ;;  %v3804_v38 = vpop.f32.mrf.mxu3 }
  0xd1   : > { %1224 = vmatmul.f32.gmra.mxu0 %v3605_v51  ;;  %v945_v51 = vld [vmem:[#allocation2 + $0xc0] sm:$0xff] }
  0xd3   : > { %680 = vmatmul.f32.gmra.mxu1 %v942_v22  ;;  %841 = vmatmul.f32.gmra.mxu2 %v751_v16 }
  0xd5   : > { %1034 = vmatmul.f32.gmra.mxu3 %v944_v39 }
  0xd6   : > { %v3810_v41 = vpop.f32.mrf.mxu2  ;;  %v3812_v42 = vpop.f32.mrf.mxu0 }
  0xd8   : > { %v3814_v45 = vpop.f32.mrf.mxu1  ;;  %v3816_v46 = vpop.f32.mrf.mxu3 }
  0xd9   : > { %1227 = vmatmul.f32.gmra.mxu0 %v3631_v0  ;;  %v1355_v0 = vld [vmem:[%s4450_s3 + $0x2b0] sm:$0xff] }
  0xda   : > { %1374 = vmatpush.msra.mxu1 %v1355_v0  ;;  %v756_v0 = vld [vmem:[#allocation2 + $0xda] sm:$0xff] }
  0xdb   : > { %683 = vmatmul.f32.gmra.mxu1 %v943_v57  ;;  %844 = vmatmul.f32.gmra.mxu2 %v752_v47 }
  0xdd   : > { %1037 = vmatmul.f32.gmra.mxu3 %v945_v51 }
  0xde   : > { %v3825_v26 = vpop.f32.mrf.mxu2  ;;  %v3827_v53 = vpop.f32.mrf.mxu0 }
  0xe0   : > { %v3832_v55 = vpop.f32.mrf.mxu1  ;;  %v3834_v59 = vpop.f32.mrf.mxu3 }
  0xe1   : > { %1230 = vmatmul.f32.gmra.mxu0 %v1138_v30 }
  0xe3   : > { %686 = vmatmul.f32.gmra.mxu1 %v944_v39  ;;  %847 = vmatmul.f32.gmra.mxu2 %v753_v12  ;;  %v949_v12 = vld [vmem:[#allocation2 + $0xf0] sm:$0xff] }
  0xe5   : > { %1040 = vmatmul.f32.gmra.mxu3 %v946_v60 }
  0xe6   : > { %v3839_v1 = vpop.f32.mrf.mxu2  ;;  %v3841_v5 = vpop.f32.mrf.mxu0 }
  0xe8   : > { %v3843_v9 = vpop.f32.mrf.mxu3  ;;  %v642_v14 = vpop.f32.mrf.mxu1 }
  0xe9   : > { %1233 = vmatmul.f32.gmra.mxu0 %v3293_v44  ;;  %v643_v32 = vadd.f32 %v642_v14, %v3737_v61  ;;  %v1354_v44 = vld [vmem:[%s4450_s3 + $0x2a8] sm:$0xff]  ;;  %v948_v61 = vld [vmem:[#allocation2 + $0xe0] sm:$0xff] }
  0xea   : > { %1375 = vmatpush.msra.mxu1 %v1354_v44  ;;  %v1740_v14 = vld [vmem:[%s4450_s3 + $0x3a0] sm:$0xff] }
  0xeb   : > { %689 = vmatmul.f32.gmra.mxu1 %v945_v51  ;;  %850 = vmatmul.f32.gmra.mxu2 %v754_v3 }
  0xec   : > { %1763 = vmatpush.msra.mxu3 %v1740_v14 }
  0xed   : > { %1043 = vmatmul.f32.gmra.mxu3 %v947_v8 }
  0xee   : > { %v803_v22 = vpop.f32.mrf.mxu2  ;;  %v1189_v27 = vpop.f32.mrf.mxu0 }
  0xef   : > { %v899_v31 = vadd.f32 %v803_v22, %v643_v32  ;;  %v757_v22 = vld [vmem:[#allocation2 + $0xe2] sm:$0xff] }
  0xf0   : > { %v645_v57 = vpop.f32.mrf.mxu1  ;;  %v996_v52 = vpop.f32.mrf.mxu3 }
  0xf1   : > { %v1092_v23 = vadd.f32 %v996_v52, %v899_v31  ;;  %1236 = vmatmul.f32.gmra.mxu0 %v3356_v4  ;;  %v646_v39 = vadd.f32 %v645_v57, %v3752_v10  ;;  %v1547_v10 = vld [vmem:[%s4450_s3 + $0x320] sm:$0xff] }
  0xf2   : > { %1570 = vmatpush.msra.mxu2 %v1547_v10  ;;  %v1933_v57 = vld [vmem:[%s4450_s3 + $0x420] sm:$0xff] }
  0xf3   : > { %v3857_v16 = vadd.f32 %v1189_v27, %v1092_v23  ;;  %692 = vmatmul.f32.gmra.mxu1 %v946_v60  ;;  %853 = vmatmul.f32.gmra.mxu2 %v755_v34 }
  0xf4   : > { %1956 = vmatpush.msra.mxu0 %v1933_v57  ;;  %v953_v57 = vld [vmem:[#allocation2 + $0x120] sm:$0xff] }
  0xf5   : > { %1046 = vmatmul.f32.gmra.mxu3 %v948_v61 }
  0xf6   : > { %v806_v47 = vpop.f32.mrf.mxu2  ;;  %v1192_v51 = vpop.f32.mrf.mxu0 }
  0xf7   : > { %v900_v48 = vadd.f32 %v806_v47, %v646_v39  ;;  %v758_v47 = vld [vmem:[#allocation2 + $0xf2] sm:$0xff] }
  0xf8   : > { %v648_v50 = vpop.f32.mrf.mxu1  ;;  %v999_v30 = vpop.f32.mrf.mxu3 }
  0xf9   : > { %v1093_v4 = vadd.f32 %v999_v30, %v900_v48  ;;  %1239 = vmatmul.f32.gmra.mxu0 %v3423_v33  ;;  %v649_v43 = vadd.f32 %v648_v50, %v3767_v18  ;;  %v950_v18 = vld [vmem:[#allocation2 + $0xf8] sm:$0xff] }
  0xfa   : > { %v1739_v50 = vld [vmem:[%s4450_s3 + $0x398] sm:$0xff] }
  0xfb   : > { %v3864_v60 = vadd.f32 %v1192_v51, %v1093_v4  ;;  %695 = vmatmul.f32.gmra.mxu1 %v947_v8  ;;  %856 = vmatmul.f32.gmra.mxu2 %v756_v0  ;;  %v1353_v8 = vld [vmem:[%s4450_s3 + $0x2a0] sm:$0xff]  ;;  %v951_v51 = vld [vmem:[#allocation2 + $0x108] sm:$0xff]  ;;  %v1352_v4 = vld [vmem:[%s4450_s3 + $0x298] sm:$0xff] }
  0xfc   : > { %1376 = vmatpush.msra.mxu1 %v1353_v8  ;;  %1764 = vmatpush.msra.mxu3 %v1739_v50 }
  0xfd   : > { %1049 = vmatmul.f32.gmra.mxu3 %v949_v12 }
  0xfe   : > { %v809_v3 = vpop.f32.mrf.mxu2  ;;  %v1195_v15 = vpop.f32.mrf.mxu0  ;;  %1377 = vmatpush.msra.mxu1 %v1352_v4 }
  0xff   : > { %v901_v33 = vadd.f32 %v809_v3, %v649_v43  ;;  %v759_v43 = vld [vmem:[#allocation2 + $0xfa] sm:$0xff] }
 0x100   : > { %v651_v32 = vpop.f32.mrf.mxu1  ;;  %v1002_v21 = vpop.f32.mrf.mxu3 }
 0x101   : > { %v1094_v27 = vadd.f32 %v1002_v21, %v901_v33  ;;  %1242 = vmatmul.f32.gmra.mxu0 %v3491_v58  ;;  %v652_v44 = vadd.f32 %v651_v32, %v3782_v29  ;;  %v1546_v29 = vld [vmem:[%s4450_s3 + $0x318] sm:$0xff] }
 0x102   : > { %1571 = vmatpush.msra.mxu2 %v1546_v29  ;;  %v1932_v33 = vld [vmem:[%s4450_s3 + $0x418] sm:$0xff] }
 0x103   : > { %v3877_v31 = vadd.f32 %v1195_v15, %v1094_v27  ;;  %698 = vmatmul.f32.gmra.mxu1 %v948_v61  ;;  %859 = vmatmul.f32.gmra.mxu2 %v757_v22  ;;  %v761_v29 = vld [vmem:[#allocation2 + $0x112] sm:$0xff] }
 0x104   : > { %1957 = vmatpush.msra.mxu0 %v1932_v33 }
 0x105   : > { %1052 = vmatmul.f32.gmra.mxu3 %v950_v18 }
 0x106   : > { %v812_v52 = vpop.f32.mrf.mxu2  ;;  %v1198_v34 = vpop.f32.mrf.mxu0 }
 0x107   : > { %v902_v23 = vadd.f32 %v812_v52, %v652_v44  ;;  %v760_v44 = vld [vmem:[#allocation2 + $0x10a] sm:$0xff] }
 0x108   : > { %v654_v39 = vpop.f32.mrf.mxu1  ;;  %v1005_v40 = vpop.f32.mrf.mxu3 }
 0x109   : > { %v1095_v58 = vadd.f32 %v1005_v40, %v902_v23  ;;  %1245 = vmatmul.f32.gmra.mxu0 %v3557_v25  ;;  %v655_v48 = vadd.f32 %v654_v39, %v3797_v36  ;;  %v952_v36 = vld [vmem:[#allocation2 + $0x110] sm:$0xff] }
 0x10b   : > { %v3884_v61 = vadd.f32 %v1198_v34, %v1095_v58  ;;  %701 = vmatmul.f32.gmra.mxu1 %v949_v12  ;;  %862 = vmatmul.f32.gmra.mxu2 %v758_v47  ;;  %v1738_v34 = vld [vmem:[%s4450_s3 + $0x390] sm:$0xff] }
 0x10c   : > { %1765 = vmatpush.msra.mxu3 %v1738_v34  ;;  %v1351_v47 = vld [vmem:[%s4450_s3 + $0x290] sm:$0xff] }
 0x10d   : > { %1055 = vmatmul.f32.gmra.mxu3 %v951_v51  ;;  %1378 = vmatpush.msra.mxu1 %v1351_v47  ;;  %v763_v34 = vld [vmem:[#allocation2 + $0x12a] sm:$0xff] }
 0x10e   : > { %v815_v30 = vpop.f32.mrf.mxu2  ;;  %v1201_v0 = vpop.f32.mrf.mxu0 }
 0x10f   : > { %v903_v25 = vadd.f32 %v815_v30, %v655_v48 }
 0x110   : > { %v657_v12 = vpop.f32.mrf.mxu1  ;;  %v1008_v10 = vpop.f32.mrf.mxu3 }
 0x111   : > { %v1096_v14 = vadd.f32 %v1008_v10, %v903_v25  ;;  %1248 = vmatmul.f32.gmra.mxu0 %v3616_v56  ;;  %v658_v15 = vadd.f32 %v657_v12, %v3812_v42  ;;  %v1545_v42 = vld [vmem:[%s4450_s3 + $0x310] sm:$0xff] }
 0x112   : > { %1572 = vmatpush.msra.mxu2 %v1545_v42  ;;  %v1147_v12 = vld [vmem:[#allocation2 + $0x129] sm:$0xff] }
 0x113   : > { %v3897_v3 = vadd.f32 %v1201_v0, %v1096_v14  ;;  %704 = vmatmul.f32.gmra.mxu1 %v950_v18  ;;  %865 = vmatmul.f32.gmra.mxu2 %v759_v43  ;;  %v1931_v0 = vld [vmem:[%s4450_s3 + $0x410] sm:$0xff] }
 0x114   : > { %1958 = vmatpush.msra.mxu0 %v1931_v0 }
 0x115   : > { %1058 = vmatmul.f32.gmra.mxu3 %v952_v36 }
 0x116   : > { %v818_v8 = vpop.f32.mrf.mxu2  ;;  %v1204_v32 = vpop.f32.mrf.mxu0 }
 0x117   : > { %v904_v21 = vadd.f32 %v818_v8, %v658_v15  ;;  %v762_v15 = vld [vmem:[#allocation2 + $0x122] sm:$0xff]  ;;  %v955_v8 = vld [vmem:[#allocation2 + $0x138] sm:$0xff] }
 0x118   : > { %v660_v22 = vpop.f32.mrf.mxu1  ;;  %v1011_v27 = vpop.f32.mrf.mxu3 }
 0x119   : > { %v1097_v56 = vadd.f32 %v1011_v27, %v904_v21  ;;  %1251 = vmatmul.f32.gmra.mxu0 %v3638_v6  ;;  %v661_v52 = vadd.f32 %v660_v22, %v3827_v53  ;;  %v1146_v6 = vld [vmem:[#allocation2 + $0x121] sm:$0xff] }
 0x11a   : > { %v954_v53 = vld [vmem:[#allocation2 + $0x128] sm:$0xff] }
 0x11b   : > { %v3904_v18 = vadd.f32 %v1204_v32, %v1097_v56  ;;  %707 = vmatmul.f32.gmra.mxu1 %v951_v51  ;;  %868 = vmatmul.f32.gmra.mxu2 %v760_v44  ;;  %v1737_v21 = vld [vmem:[%s4450_s3 + $0x388] sm:$0xff]  ;;  %v1148_v44 = vld [vmem:[#allocation2 + $0x139] sm:$0xff] }
 0x11c   : > { %1766 = vmatpush.msra.mxu3 %v1737_v21 }
 0x11d   : > { %1061 = vmatmul.f32.gmra.mxu3 %v953_v57 }
 0x11e   : > { %v821_v23 = vpop.f32.mrf.mxu2  ;;  %v1207_v39 = vpop.f32.mrf.mxu0 }
 0x11f   : > { %v905_v40 = vadd.f32 %v821_v23, %v661_v52  ;;  %v257_v23 = vld [vmem:[%s3164_s8 + $0xf0] sm:$0xff] }
 0x120   : > { %v663_v58 = vpop.f32.mrf.mxu1  ;;  %v1014_v51 = vpop.f32.mrf.mxu3 }
 0x121   : > { %v1098_v48 = vadd.f32 %v1014_v51, %v905_v40  ;;  %1254 = vmatmul.f32.gmra.mxu0 %v1146_v6  ;;  %v664_v30 = vadd.f32 %v663_v58, %v3841_v5  ;;  %v1544_v5 = vld [vmem:[%s4450_s3 + $0x308] sm:$0xff]  ;;  %v956_v40 = vld [vmem:[#allocation2 + $0x140] sm:$0xff] }
 0x122   : > { %1573 = vmatpush.msra.mxu2 %v1544_v5  ;;  %v3087_v58 = vld [vmem:[%s4449_s2] ss:$0 sm:$0xff] }
 0x123   : > { %v3916_v50 = vadd.f32 %v1207_v39, %v1098_v48  ;;  %710 = vmatmul.f32.gmra.mxu1 %v952_v36  ;;  %871 = vmatmul.f32.gmra.mxu2 %v761_v29  ;;  %v3086_v39 = vld [vmem:[%s4448_s1] ss:$0 sm:$0xff]  ;;  %v1930_v48 = vld [vmem:[%s4450_s3 + $0x408] sm:$0xff] }
 0x124   : > { %v292_v6 = vsub.f32 %v257_v23, %v3086_v39  ;;  %1959 = vmatpush.msra.mxu0 %v1930_v48  ;;  %v1543_v5 = vld [vmem:[%s4450_s3 + $0x300] sm:$0xff]  ;;  %v958_v23 = vld [vmem:[#allocation2 + $0x158] sm:$0xff] }
 0x125   : > { %1064 = vmatmul.f32.gmra.mxu3 %v954_v53  ;;  %1574 = vmatpush.msra.mxu2 %v1543_v5  ;;  %v1151_v48 = vld [vmem:[#allocation2 + $0x159] sm:$0xff] }
 0x126   : > { %v824_v25 = vpop.f32.mrf.mxu2  ;;  %v1210_v4 = vpop.f32.mrf.mxu0  ;;  %v3943_v51 = vmul.f32 %v3087_v58, %v292_v6  ;;  %v1929_v6 = vld [vmem:[%s4450_s3 + $0x400] sm:$0xff] }
 0x127   : > { %v906_v10 = vadd.f32 %v824_v25, %v664_v30  ;;  %1960 = vmatpush.msra.mxu0 %v1929_v6 }
 0x128   : > { %v666_v43 = vpop.f32.mrf.mxu1  ;;  %v1017_v14 = vpop.f32.mrf.mxu3  ;;  %414 = vst [vmem:[#allocation2 + $0x181] sm:$0xff] %v3943_v51 }
 0x129   : > { %v1099_v33 = vadd.f32 %v1017_v14, %v906_v10  ;;  %1257 = vmatmul.f32.gmra.mxu0 %v1147_v12  ;;  %v667_v32 = vadd.f32 %v666_v43, %v3726_v54  ;;  %v764_v10 = vld [vmem:[#allocation2 + $0x13a] sm:$0xff] }
 0x12a   : > { %v258_v43 = vld [vmem:[%s3164_s8 + $0xf8] sm:$0xff] }
 0x12b   : > { %v3922_v36 = vadd.f32 %v1210_v4, %v1099_v33  ;;  %713 = vmatmul.f32.gmra.mxu1 %v953_v57  ;;  %874 = vmatmul.f32.gmra.mxu2 %v762_v15  ;;  %v1350_v57 = vld [vmem:[%s4450_s3 + $0x288] sm:$0xff]  ;;  %v293_v15 = vsub.f32 %v258_v43, %v3086_v39 }
 0x12c   : > { %1379 = vmatpush.msra.mxu1 %v1350_v57  ;;  %v1349_v57 = vld [vmem:[%s4450_s3 + $0x280] sm:$0xff] }
 0x12d   : > { %1067 = vmatmul.f32.gmra.mxu3 %v955_v8 }
 0x12e   : > { %v827_v22 = vpop.f32.mrf.mxu2  ;;  %v1213_v27 = vpop.f32.mrf.mxu0  ;;  %1380 = vmatpush.msra.mxu1 %v1349_v57  ;;  %v1153_v57 = vld [vmem:[#allocation2 + $0x171] sm:$0xff] }
 0x12f   : > { %v907_v56 = vadd.f32 %v827_v22, %v667_v32  ;;  %v3956_v32 = vmul.f32 %v3087_v58, %v293_v15  ;;  %v1736_v22 = vld [vmem:[%s4450_s3 + $0x380] sm:$0xff] }
 0x130   : > { %v669_v42 = vpop.f32.mrf.mxu1  ;;  %v1020_v52 = vpop.f32.mrf.mxu3  ;;  %1767 = vmatpush.msra.mxu3 %v1736_v22  ;;  %v767_v22 = vld [vmem:[#allocation2 + $0x15a] sm:$0xff] }
 0x131   : > { %v1100_v54 = vadd.f32 %v1020_v52, %v907_v56  ;;  %1260 = vmatmul.f32.gmra.mxu0 %v1148_v44  ;;  %v670_v29 = vadd.f32 %v669_v42, %v3742_v62  ;;  %v957_v62 = vld [vmem:[#allocation2 + $0x150] sm:$0xff]  ;;  %415 = vst [vmem:[#allocation2 + $0x189] sm:$0xff] %v3956_v32  ;;  %v961_v6 = vld [vmem:[#allocation2 + $0x180] sm:$0xff] }
 0x133   : > { %v3938_v47 = vadd.f32 %v1213_v27, %v1100_v54  ;;  %716 = vmatmul.f32.gmra.mxu1 %v954_v53  ;;  %877 = vmatmul.f32.gmra.mxu2 %v763_v34  ;;  %v1149_v53 = vld [vmem:[#allocation2 + $0x141] sm:$0xff] }
 0x134   : > { %v765_v34 = vld [vmem:[#allocation2 + $0x142] sm:$0xff] }
 0x135   : > { %1070 = vmatmul.f32.gmra.mxu3 %v956_v40 }
 0x136   : > { %v830_v30 = vpop.f32.mrf.mxu2  ;;  %v1216_v0 = vpop.f32.mrf.mxu0 }
 0x137   : > { %v908_v25 = vadd.f32 %v830_v30, %v670_v29 }
 0x138   : > { %v672_v4 = vpop.f32.mrf.mxu1  ;;  %v1023_v12 = vpop.f32.mrf.mxu3 }
 0x139   : > { %v1101_v14 = vadd.f32 %v1023_v12, %v908_v25  ;;  %1263 = vmatmul.f32.gmra.mxu0 %v1149_v53  ;;  %v673_v21 = vadd.f32 %v672_v4, %v3754_v11  ;;  %v766_v25 = vld [vmem:[#allocation2 + $0x152] sm:$0xff]  ;;  %v959_v12 = vld [vmem:[#allocation2 + $0x168] sm:$0xff] }
 0x13b   : > { %v3951_v33 = vadd.f32 %v1216_v0, %v1101_v14  ;;  %719 = vmatmul.f32.gmra.mxu1 %v955_v8  ;;  %880 = vmatmul.f32.gmra.mxu2 %v764_v10  ;;  %v1150_v8 = vld [vmem:[#allocation2 + $0x151] sm:$0xff]  ;;  %v1152_v14 = vld [vmem:[#allocation2 + $0x169] sm:$0xff] }
 0x13d   : > { %1073 = vmatmul.f32.gmra.mxu3 %v957_v62 }
 0x13e   : > { %v833_v27 = vpop.f32.mrf.mxu2  ;;  %v1219_v44 = vpop.f32.mrf.mxu0 }
 0x13f   : > { %v909_v56 = vadd.f32 %v833_v27, %v673_v21 }
 0x140   : > { %v675_v42 = vpop.f32.mrf.mxu1  ;;  %v1026_v52 = vpop.f32.mrf.mxu3 }
 0x141   : > { %v1102_v11 = vadd.f32 %v1026_v52, %v909_v56  ;;  %1266 = vmatmul.f32.gmra.mxu0 %v1150_v8  ;;  %v676_v39 = vadd.f32 %v675_v42, %v3772_v19 }
 0x143   : > { %v3966_v54 = vadd.f32 %v1219_v44, %v1102_v11  ;;  %722 = vmatmul.f32.gmra.mxu1 %v956_v40  ;;  %883 = vmatmul.f32.gmra.mxu2 %v765_v34  ;;  %v960_v44 = vld [vmem:[#allocation2 + $0x170] sm:$0xff] }
 0x144   : > { %v768_v11 = vld [vmem:[#allocation2 + $0x16a] sm:$0xff] }
 0x145   : > { %1076 = vmatmul.f32.gmra.mxu3 %v958_v23 }
 0x146   : > { %v836_v58 = vpop.f32.mrf.mxu2  ;;  %v1222_v29 = vpop.f32.mrf.mxu0 }
 0x147   : > { %v910_v30 = vadd.f32 %v836_v58, %v676_v39 }
 0x148   : > { %v678_v0 = vpop.f32.mrf.mxu1  ;;  %v1029_v53 = vpop.f32.mrf.mxu3 }
 0x149   : > { %v1103_v4 = vadd.f32 %v1029_v53, %v910_v30  ;;  %1269 = vmatmul.f32.gmra.mxu0 %v1151_v48  ;;  %v679_v19 = vadd.f32 %v678_v0, %v3784_v24  ;;  %v769_v53 = vld [vmem:[#allocation2 + $0x172] sm:$0xff] }
 0x14b   : > { %v3972_v40 = vadd.f32 %v1222_v29, %v1103_v4  ;;  %725 = vmatmul.f32.gmra.mxu1 %v957_v62  ;;  %886 = vmatmul.f32.gmra.mxu2 %v766_v25  ;;  %v962_v4 = vld [vmem:[#allocation2 + $0x188] sm:$0xff] }
 0x14d   : > { %1079 = vmatmul.f32.gmra.mxu3 %v959_v12 }
 0x14e   : > { %v839_v10 = vpop.f32.mrf.mxu2  ;;  %v1225_v43 = vpop.f32.mrf.mxu0 }
 0x14f   : > { %v911_v15 = vadd.f32 %v839_v10, %v679_v19 }
 0x150   : > { %v681_v5 = vpop.f32.mrf.mxu1  ;;  %v1032_v21 = vpop.f32.mrf.mxu3 }
 0x151   : > { %v1104_v27 = vadd.f32 %v1032_v21, %v911_v15  ;;  %1272 = vmatmul.f32.gmra.mxu0 %v1152_v14  ;;  %v682_v62 = vadd.f32 %v681_v5, %v3802_v37  ;;  %v1317_v5 = vld [vmem:[#allocation2 + $0x1a] sm:$0xff]  ;;  %v1511_v21 = vld [vmem:[#allocation2 + $0x30] sm:$0xff] }
 0x153   : > { %v3975_v8 = vadd.f32 %v1225_v43, %v1104_v27  ;;  %728 = vmatmul.f32.gmra.mxu1 %v958_v23  ;;  %889 = vmatmul.f32.gmra.mxu2 %v767_v22  ;;  %v1704_v27 = vld [vmem:[#allocation2 + $0x31] sm:$0xff] }
 0x155   : > { %1082 = vmatmul.f32.gmra.mxu3 %v960_v44 }
 0x156   : > { %v842_v56 = vpop.f32.mrf.mxu2  ;;  %v1228_v24 = vpop.f32.mrf.mxu0 }
 0x157   : > { %v912_v42 = vadd.f32 %v842_v56, %v682_v62  ;;  %v1897_v56 = vld [vmem:[#allocation2 + $0x32] sm:$0xff] }
 0x158   : > { %v684_v52 = vpop.f32.mrf.mxu1  ;;  %v1035_v34 = vpop.f32.mrf.mxu3 }
 0x159   : > { %v1105_v39 = vadd.f32 %v1035_v34, %v912_v42  ;;  %1275 = vmatmul.f32.gmra.mxu0 %v1153_v57  ;;  %v685_v23 = vadd.f32 %v684_v52, %v3814_v45  ;;  %v1318_v52 = vld [vmem:[#allocation2 + $0x22] sm:$0xff]  ;;  %v1512_v34 = vld [vmem:[#allocation2 + $0x38] sm:$0xff] }
 0x15b   : > { %v3978_v58 = vadd.f32 %v1228_v24, %v1105_v39  ;;  %731 = vmatmul.f32.gmra.mxu1 %v959_v12  ;;  %892 = vmatmul.f32.gmra.mxu2 %v768_v11  ;;  %v1705_v39 = vld [vmem:[#allocation2 + $0x39] sm:$0xff] }
 0x15d   : > { %1085 = vmatmul.f32.gmra.mxu3 %v961_v6 }
 0x15e   : > { %v845_v29 = vpop.f32.mrf.mxu2  ;;  %v1231_v37 = vpop.f32.mrf.mxu0 }
 0x15f   : > { %v913_v48 = vadd.f32 %v845_v29, %v685_v23  ;;  %v1898_v29 = vld [vmem:[#allocation2 + $0x3a] sm:$0xff] }
 0x160   : > { %v687_v30 = vpop.f32.mrf.mxu1  ;;  %v1038_v0 = vpop.f32.mrf.mxu3 }
 0x161   : > { %v1106_v25 = vadd.f32 %v1038_v0, %v913_v48  ;;  %1278 = vmatmul.f32.gmra.mxu0 %v3943_v51  ;;  %v688_v12 = vadd.f32 %v687_v30, %v3832_v55  ;;  %v1513_v0 = vld [vmem:[#allocation2 + $0x48] sm:$0xff] }
 0x163   : > { %v3982_v19 = vadd.f32 %v1231_v37, %v1106_v25  ;;  %734 = vmatmul.f32.gmra.mxu1 %v960_v44  ;;  %895 = vmatmul.f32.gmra.mxu2 %v769_v53  ;;  %v1706_v25 = vld [vmem:[#allocation2 + $0x49] sm:$0xff] }
 0x165   : > { %1088 = vmatmul.f32.gmra.mxu3 %v962_v4 }
 0x166   : > { %v848_v10 = vpop.f32.mrf.mxu2  ;;  %v1234_v45 = vpop.f32.mrf.mxu0 }
 0x167   : > { %v914_v43 = vadd.f32 %v848_v10, %v688_v12 }
 0x168   : > { %v690_v14 = vpop.f32.mrf.mxu1  ;;  %v1041_v15 = vpop.f32.mrf.mxu3 }
 0x169   : > { %v1107_v22 = vadd.f32 %v1041_v15, %v914_v43  ;;  %1281 = vmatmul.f32.gmra.mxu0 %v3956_v32  ;;  %v691_v44 = vadd.f32 %v690_v14, %v3735_v49 }
 0x16b   : > { %v3986_v51 = vadd.f32 %v1234_v45, %v1107_v22  ;;  %1381 = vmatmul.f32.vlgmr.msra.gmra.mxu1 %v1317_v5  ;;  %1575 = vmatmul.f32.vlgmr.msra.gmra.mxu2 %v1511_v21  ;;  %v1899_v45 = vld [vmem:[#allocation2 + $0x4a] sm:$0xff] }
 0x16c   : > { %v1514_v5 = vld [vmem:[#allocation2 + $0x50] sm:$0xff] }
 0x16d   : > { %1768 = vmatmul.f32.vlgmr.msra.gmra.mxu3 %v1704_v27  ;;  %v1707_v22 = vld [vmem:[#allocation2 + $0x51] sm:$0xff] }
 0x16e   : > { %v851_v55 = vpop.f32.mrf.mxu2  ;;  %v1237_v62 = vpop.f32.mrf.mxu0 }
 0x16f   : > { %v915_v24 = vadd.f32 %v851_v55, %v691_v44 }
 0x170   : > { %v693_v57 = vpop.f32.mrf.mxu1  ;;  %v1044_v42 = vpop.f32.mrf.mxu3 }
 0x171   : > { %v1108_v11 = vadd.f32 %v1044_v42, %v915_v24  ;;  %1961 = vmatmul.f32.vlgmr.msra.gmra.mxu0 %v1897_v56  ;;  %v694_v6 = vadd.f32 %v693_v57, %v3750_v7  ;;  %v1515_v42 = vld [vmem:[#allocation2 + $0x60] sm:$0xff] }
 0x173   : > { %v3989_v32 = vadd.f32 %v1237_v62, %v1108_v11  ;;  %1384 = vmatmul.f32.gmra.mxu1 %v1318_v52  ;;  %1578 = vmatmul.f32.gmra.mxu2 %v1512_v34  ;;  %v1900_v62 = vld [vmem:[#allocation2 + $0x52] sm:$0xff]  ;;  %v1708_v34 = vld [vmem:[#allocation2 + $0x61] sm:$0xff] }
 0x175   : > { %1771 = vmatmul.f32.gmra.mxu3 %v1705_v39 }
 0x176   : > { %v854_v49 = vpop.f32.mrf.mxu2  ;;  %v1240_v23 = vpop.f32.mrf.mxu0 }
 0x177   : > { %v916_v37 = vadd.f32 %v854_v49, %v694_v6  ;;  %v1901_v49 = vld [vmem:[#allocation2 + $0x62] sm:$0xff] }
 0x178   : > { %v696_v48 = vpop.f32.mrf.mxu1  ;;  %v1047_v30 = vpop.f32.mrf.mxu3 }
 0x179   : > { %v1109_v53 = vadd.f32 %v1047_v30, %v916_v37  ;;  %1964 = vmatmul.f32.gmra.mxu0 %v1898_v29  ;;  %v697_v12 = vadd.f32 %v696_v48, %v3765_v17  ;;  %v1516_v48 = vld [vmem:[#allocation2 + $0x68] sm:$0xff] }
 0x17b   : > { %v3992_v4 = vadd.f32 %v1240_v23, %v1109_v53  ;;  %1387 = vmatmul.f32.gmra.mxu1 %v1897_v56  ;;  %1581 = vmatmul.f32.gmra.mxu2 %v1513_v0  ;;  %v1709_v0 = vld [vmem:[#allocation2 + $0x69] sm:$0xff] }
 0x17d   : > { %1774 = vmatmul.f32.gmra.mxu3 %v1706_v25 }
 0x17e   : > { %v857_v10 = vpop.f32.mrf.mxu2  ;;  %v1243_v7 = vpop.f32.mrf.mxu0 }
 0x17f   : > { %v917_v43 = vadd.f32 %v857_v10, %v697_v12  ;;  %v1902_v10 = vld [vmem:[#allocation2 + $0x6a] sm:$0xff] }
 0x180   : > { %v699_v14 = vpop.f32.mrf.mxu1  ;;  %v1050_v15 = vpop.f32.mrf.mxu3 }
 0x181   : > { %v1110_v21 = vadd.f32 %v1050_v15, %v917_v43  ;;  %1967 = vmatmul.f32.gmra.mxu0 %v1899_v45  ;;  %v700_v44 = vadd.f32 %v699_v14, %v3780_v28  ;;  %v1517_v14 = vld [vmem:[#allocation2 + $0x78] sm:$0xff] }
 0x183   : > { %v3995_v27 = vadd.f32 %v1243_v7, %v1110_v21  ;;  %1390 = vmatmul.f32.gmra.mxu1 %v1898_v29  ;;  %1584 = vmatmul.f32.gmra.mxu2 %v1514_v5  ;;  %v1710_v5 = vld [vmem:[#allocation2 + $0x79] sm:$0xff] }
 0x185   : > { %1777 = vmatmul.f32.gmra.mxu3 %v1707_v22 }
 0x186   : > { %v860_v55 = vpop.f32.mrf.mxu2  ;;  %v1246_v17 = vpop.f32.mrf.mxu0 }
 0x187   : > { %v918_v56 = vadd.f32 %v860_v55, %v700_v44  ;;  %v1903_v55 = vld [vmem:[#allocation2 + $0x7a] sm:$0xff] }
 0x188   : > { %v702_v24 = vpop.f32.mrf.mxu1  ;;  %v1053_v57 = vpop.f32.mrf.mxu3 }
 0x189   : > { %v1111_v52 = vadd.f32 %v1053_v57, %v918_v56  ;;  %1970 = vmatmul.f32.gmra.mxu0 %v1900_v62  ;;  %v703_v39 = vadd.f32 %v702_v24, %v3795_v35  ;;  %v1518_v24 = vld [vmem:[#allocation2 + $0x80] sm:$0xff] }
 0x18b   : > { %v3998_v11 = vadd.f32 %v1246_v17, %v1111_v52  ;;  %1393 = vmatmul.f32.gmra.mxu1 %v1899_v45  ;;  %1587 = vmatmul.f32.gmra.mxu2 %v1515_v42  ;;  %v1711_v42 = vld [vmem:[#allocation2 + $0x81] sm:$0xff] }
 0x18d   : > { %1780 = vmatmul.f32.gmra.mxu3 %v1708_v34 }
 0x18e   : > { %v863_v6 = vpop.f32.mrf.mxu2  ;;  %v1249_v28 = vpop.f32.mrf.mxu0 }
 0x18f   : > { %v919_v23 = vadd.f32 %v863_v6, %v703_v39  ;;  %v1904_v6 = vld [vmem:[#allocation2 + $0x82] sm:$0xff] }
 0x190   : > { %v705_v29 = vpop.f32.mrf.mxu1  ;;  %v1056_v37 = vpop.f32.mrf.mxu3 }
 0x191   : > { %v1112_v30 = vadd.f32 %v1056_v37, %v919_v23  ;;  %1973 = vmatmul.f32.gmra.mxu0 %v1901_v49  ;;  %v706_v25 = vadd.f32 %v705_v29, %v3810_v41  ;;  %v1519_v29 = vld [vmem:[#allocation2 + $0x90] sm:$0xff] }
 0x193   : > { %v4001_v53 = vadd.f32 %v1249_v28, %v1112_v30  ;;  %1396 = vmatmul.f32.gmra.mxu1 %v1900_v62  ;;  %1590 = vmatmul.f32.gmra.mxu2 %v1516_v48  ;;  %v1712_v48 = vld [vmem:[#allocation2 + $0x91] sm:$0xff] }
 0x195   : > { %1783 = vmatmul.f32.gmra.mxu3 %v1709_v0 }
 0x196   : > { %v866_v12 = vpop.f32.mrf.mxu2  ;;  %v1252_v35 = vpop.f32.mrf.mxu0 }
 0x197   : > { %v920_v7 = vadd.f32 %v866_v12, %v706_v25  ;;  %v1905_v12 = vld [vmem:[#allocation2 + $0x92] sm:$0xff] }
 0x198   : > { %v708_v45 = vpop.f32.mrf.mxu1  ;;  %v1059_v43 = vpop.f32.mrf.mxu3 }
 0x199   : > { %v1113_v15 = vadd.f32 %v1059_v43, %v920_v7  ;;  %1976 = vmatmul.f32.gmra.mxu0 %v1902_v10  ;;  %v709_v22 = vadd.f32 %v708_v45, %v3825_v26  ;;  %v1520_v45 = vld [vmem:[#allocation2 + $0x98] sm:$0xff] }
 0x19b   : > { %v4004_v21 = vadd.f32 %v1252_v35, %v1113_v15  ;;  %1399 = vmatmul.f32.gmra.mxu1 %v1901_v49  ;;  %1593 = vmatmul.f32.gmra.mxu2 %v1517_v14  ;;  %v1713_v14 = vld [vmem:[#allocation2 + $0x99] sm:$0xff] }
 0x19d   : > { %1786 = vmatmul.f32.gmra.mxu3 %v1710_v5 }
 0x19e   : > { %v869_v44 = vpop.f32.mrf.mxu2  ;;  %v1255_v41 = vpop.f32.mrf.mxu0 }
 0x19f   : > { %v921_v17 = vadd.f32 %v869_v44, %v709_v22  ;;  %v1906_v44 = vld [vmem:[#allocation2 + $0x9a] sm:$0xff] }
 0x1a0   : > { %v711_v62 = vpop.f32.mrf.mxu1  ;;  %v1062_v56 = vpop.f32.mrf.mxu3 }
 0x1a1   : > { %v1114_v57 = vadd.f32 %v1062_v56, %v921_v17  ;;  %1979 = vmatmul.f32.gmra.mxu0 %v1903_v55  ;;  %v712_v34 = vadd.f32 %v711_v62, %v3839_v1  ;;  %v1521_v62 = vld [vmem:[#allocation2 + $0xa8] sm:$0xff] }
 0x1a3   : > { %v4007_v52 = vadd.f32 %v1255_v41, %v1114_v57  ;;  %1402 = vmatmul.f32.gmra.mxu1 %v1902_v10  ;;  %1596 = vmatmul.f32.gmra.mxu2 %v1518_v24  ;;  %v1714_v24 = vld [vmem:[#allocation2 + $0xa9] sm:$0xff] }
 0x1a5   : > { %1789 = vmatmul.f32.gmra.mxu3 %v1711_v42 }
 0x1a6   : > { %v872_v39 = vpop.f32.mrf.mxu2  ;;  %v1258_v26 = vpop.f32.mrf.mxu0 }
 0x1a7   : > { %v922_v28 = vadd.f32 %v872_v39, %v712_v34  ;;  %v1907_v39 = vld [vmem:[#allocation2 + $0xaa] sm:$0xff] }
 0x1a8   : > { %v714_v49 = vpop.f32.mrf.mxu1  ;;  %v1065_v23 = vpop.f32.mrf.mxu3 }
 0x1a9   : > { %v1115_v37 = vadd.f32 %v1065_v23, %v922_v28  ;;  %1982 = vmatmul.f32.gmra.mxu0 %v1904_v6  ;;  %v715_v0 = vadd.f32 %v714_v49, %v3744_v63  ;;  %v1522_v49 = vld [vmem:[#allocation2 + $0xb0] sm:$0xff] }
 0x1ab   : > { %v4010_v30 = vadd.f32 %v1258_v26, %v1115_v37  ;;  %1405 = vmatmul.f32.gmra.mxu1 %v1903_v55  ;;  %1599 = vmatmul.f32.gmra.mxu2 %v1519_v29  ;;  %v1715_v29 = vld [vmem:[#allocation2 + $0xb1] sm:$0xff] }
 0x1ad   : > { %1792 = vmatmul.f32.gmra.mxu3 %v1712_v48 }
 0x1ae   : > { %v875_v25 = vpop.f32.mrf.mxu2  ;;  %v1261_v1 = vpop.f32.mrf.mxu0 }
 0x1af   : > { %v923_v35 = vadd.f32 %v875_v25, %v715_v0  ;;  %v1908_v25 = vld [vmem:[#allocation2 + $0xb2] sm:$0xff] }
 0x1b0   : > { %v717_v10 = vpop.f32.mrf.mxu1  ;;  %v1068_v7 = vpop.f32.mrf.mxu3 }
 0x1b1   : > { %v1116_v43 = vadd.f32 %v1068_v7, %v923_v35  ;;  %1985 = vmatmul.f32.gmra.mxu0 %v1905_v12  ;;  %v718_v5 = vadd.f32 %v717_v10, %v3756_v13  ;;  %v1523_v10 = vld [vmem:[#allocation2 + $0xc0] sm:$0xff] }
 0x1b3   : > { %v4013_v15 = vadd.f32 %v1261_v1, %v1116_v43  ;;  %1408 = vmatmul.f32.gmra.mxu1 %v1904_v6  ;;  %1602 = vmatmul.f32.gmra.mxu2 %v1520_v45  ;;  %v1716_v45 = vld [vmem:[#allocation2 + $0xc1] sm:$0xff] }
 0x1b5   : > { %1795 = vmatmul.f32.gmra.mxu3 %v1713_v14 }
 0x1b6   : > { %v878_v22 = vpop.f32.mrf.mxu2  ;;  %v1264_v63 = vpop.f32.mrf.mxu0 }
 0x1b7   : > { %v924_v41 = vadd.f32 %v878_v22, %v718_v5  ;;  %v1909_v22 = vld [vmem:[#allocation2 + $0xc2] sm:$0xff] }
 0x1b8   : > { %v720_v55 = vpop.f32.mrf.mxu1  ;;  %v1071_v17 = vpop.f32.mrf.mxu3 }
 0x1b9   : > { %v1117_v56 = vadd.f32 %v1071_v17, %v924_v41  ;;  %1988 = vmatmul.f32.gmra.mxu0 %v1906_v44  ;;  %v721_v42 = vadd.f32 %v720_v55, %v3774_v20  ;;  %v1524_v55 = vld [vmem:[#allocation2 + $0xc8] sm:$0xff] }
 0x1bb   : > { %v4016_v57 = vadd.f32 %v1264_v63, %v1117_v56  ;;  %1411 = vmatmul.f32.gmra.mxu1 %v1905_v12  ;;  %1605 = vmatmul.f32.gmra.mxu2 %v1521_v62  ;;  %v1717_v62 = vld [vmem:[#allocation2 + $0xc9] sm:$0xff] }
 0x1bd   : > { %1798 = vmatmul.f32.gmra.mxu3 %v1714_v24 }
 0x1be   : > { %v881_v34 = vpop.f32.mrf.mxu2  ;;  %v1267_v13 = vpop.f32.mrf.mxu0 }
 0x1bf   : > { %v925_v26 = vadd.f32 %v881_v34, %v721_v42  ;;  %v1910_v34 = vld [vmem:[#allocation2 + $0xca] sm:$0xff] }
 0x1c0   : > { %v723_v6 = vpop.f32.mrf.mxu1  ;;  %v1074_v28 = vpop.f32.mrf.mxu3 }
 0x1c1   : > { %v1118_v23 = vadd.f32 %v1074_v28, %v925_v26  ;;  %1991 = vmatmul.f32.gmra.mxu0 %v1907_v39  ;;  %v724_v48 = vadd.f32 %v723_v6, %v3786_v2  ;;  %v1525_v6 = vld [vmem:[#allocation2 + $0xd8] sm:$0xff] }
 0x1c3   : > { %v4019_v37 = vadd.f32 %v1267_v13, %v1118_v23  ;;  %1414 = vmatmul.f32.gmra.mxu1 %v1906_v44  ;;  %1608 = vmatmul.f32.gmra.mxu2 %v1522_v49  ;;  %v1718_v49 = vld [vmem:[#allocation2 + $0xd9] sm:$0xff] }
 0x1c5   : > { %1801 = vmatmul.f32.gmra.mxu3 %v1715_v29 }
 0x1c6   : > { %v884_v0 = vpop.f32.mrf.mxu2  ;;  %v1270_v20 = vpop.f32.mrf.mxu0 }
 0x1c7   : > { %v926_v1 = vadd.f32 %v884_v0, %v724_v48  ;;  %v1911_v0 = vld [vmem:[#allocation2 + $0xda] sm:$0xff] }
 0x1c8   : > { %v726_v12 = vpop.f32.mrf.mxu1  ;;  %v1077_v35 = vpop.f32.mrf.mxu3 }
 0x1c9   : > { %v1119_v7 = vadd.f32 %v1077_v35, %v926_v1  ;;  %1994 = vmatmul.f32.gmra.mxu0 %v1908_v25  ;;  %v727_v14 = vadd.f32 %v726_v12, %v3804_v38  ;;  %v1526_v12 = vld [vmem:[#allocation2 + $0xe0] sm:$0xff] }
 0x1cb   : > { %v4022_v43 = vadd.f32 %v1270_v20, %v1119_v7  ;;  %1417 = vmatmul.f32.gmra.mxu1 %v1907_v39  ;;  %1611 = vmatmul.f32.gmra.mxu2 %v1523_v10  ;;  %v1719_v10 = vld [vmem:[#allocation2 + $0xe1] sm:$0xff] }
 0x1cd   : > { %1804 = vmatmul.f32.gmra.mxu3 %v1716_v45 }
 0x1ce   : > { %v887_v5 = vpop.f32.mrf.mxu2  ;;  %v1273_v2 = vpop.f32.mrf.mxu0 }
 0x1cf   : > { %v927_v63 = vadd.f32 %v887_v5, %v727_v14  ;;  %v1912_v5 = vld [vmem:[#allocation2 + $0xe2] sm:$0xff] }
 0x1d0   : > { %v729_v44 = vpop.f32.mrf.mxu1  ;;  %v1080_v41 = vpop.f32.mrf.mxu3 }
 0x1d1   : > { %v1120_v17 = vadd.f32 %v1080_v41, %v927_v63  ;;  %1997 = vmatmul.f32.gmra.mxu0 %v1909_v22  ;;  %v730_v24 = vadd.f32 %v729_v44, %v3816_v46  ;;  %v1527_v44 = vld [vmem:[#allocation2 + $0xf0] sm:$0xff] }
 0x1d3   : > { %v4025_v56 = vadd.f32 %v1273_v2, %v1120_v17  ;;  %1420 = vmatmul.f32.gmra.mxu1 %v1908_v25  ;;  %1614 = vmatmul.f32.gmra.mxu2 %v1524_v55  ;;  %v1720_v55 = vld [vmem:[#allocation2 + $0xf1] sm:$0xff] }
 0x1d5   : > { %1807 = vmatmul.f32.gmra.mxu3 %v1717_v62 }
 0x1d6   : > { %v890_v42 = vpop.f32.mrf.mxu2  ;;  %v1276_v38 = vpop.f32.mrf.mxu0 }
 0x1d7   : > { %v928_v13 = vadd.f32 %v890_v42, %v730_v24  ;;  %v1913_v42 = vld [vmem:[#allocation2 + $0xf2] sm:$0xff] }
 0x1d8   : > { %v732_v39 = vpop.f32.mrf.mxu1  ;;  %v1083_v26 = vpop.f32.mrf.mxu3 }
 0x1d9   : > { %v1121_v28 = vadd.f32 %v1083_v26, %v928_v13  ;;  %2000 = vmatmul.f32.gmra.mxu0 %v1910_v34  ;;  %v733_v29 = vadd.f32 %v732_v39, %v3834_v59  ;;  %v1528_v39 = vld [vmem:[#allocation2 + $0xf8] sm:$0xff] }
 0x1db   : > { %v4028_v23 = vadd.f32 %v1276_v38, %v1121_v28  ;;  %1423 = vmatmul.f32.gmra.mxu1 %v1909_v22  ;;  %1617 = vmatmul.f32.gmra.mxu2 %v1525_v6  ;;  %v4040_v6 = vld [vmem:[%s4451_s4] ss:$0 sm:$0xff] }
 0x1dc   : > { %v1721_v28 = vld [vmem:[#allocation2 + $0xf9] sm:$0xff] }
 0x1dd   : > { %1810 = vmatmul.f32.gmra.mxu3 %v1718_v49 }
 0x1de   : > { %v893_v48 = vpop.f32.mrf.mxu2  ;;  %v1279_v46 = vpop.f32.mrf.mxu0 }
 0x1df   : > { %v929_v20 = vadd.f32 %v893_v48, %v733_v29 }
 0x1e0   : > { %v735_v25 = vpop.f32.mrf.mxu1  ;;  %v1086_v1 = vpop.f32.mrf.mxu3 }
 0x1e1   : > { %v1122_v35 = vadd.f32 %v1086_v1, %v929_v20  ;;  %2003 = vmatmul.f32.gmra.mxu0 %v1911_v0  ;;  %v736_v45 = vadd.f32 %v735_v25, %v3843_v9 }
 0x1e3   : > { %v4031_v7 = vadd.f32 %v1279_v46, %v1122_v35  ;;  %1426 = vmatmul.f32.gmra.mxu1 %v1910_v34  ;;  %1620 = vmatmul.f32.gmra.mxu2 %v1526_v12  ;;  %v1529_v35 = vld [vmem:[#allocation2 + $0x108] sm:$0xff] }
 0x1e5   : > { %1813 = vmatmul.f32.gmra.mxu3 %v1719_v10 }
 0x1e6   : > { %v896_v14 = vpop.f32.mrf.mxu2  ;;  %v1282_v59 = vpop.f32.mrf.mxu0 }
 0x1e7   : > { %v930_v2 = vadd.f32 %v896_v14, %v736_v45  ;;  %v1722_v45 = vld [vmem:[#allocation2 + $0x109] sm:$0xff] }
 0x1e8   : > { %v1089_v22 = vpop.f32.mrf.mxu3  ;;  %v1382_v63 = vpop.f32.mrf.mxu1 }
 0x1e9   : > { %v1123_v41 = vadd.f32 %v1089_v22, %v930_v2  ;;  %2006 = vmatmul.f32.gmra.mxu0 %v1912_v5  ;;  %v1478_v62 = vadd.f32 %v1382_v63, %v3857_v16  ;;  %v1915_v22 = vld [vmem:[#allocation2 + $0x10a] sm:$0xff] }
 0x1eb   : > { %v4034_v17 = vadd.f32 %v1282_v59, %v1123_v41  ;;  %1429 = vmatmul.f32.gmra.mxu1 %v1911_v0  ;;  %1623 = vmatmul.f32.gmra.mxu2 %v1527_v44  ;;  %v1914_v0 = vld [vmem:[#allocation2 + $0xfa] sm:$0xff] }
 0x1ed   : > { %1816 = vmatmul.f32.gmra.mxu3 %v1720_v55 }
 0x1ee   : > { %v1576_v24 = vpop.f32.mrf.mxu2  ;;  %v1962_v9 = vpop.f32.mrf.mxu0 }
 0x1ef   : > { %v1672_v38 = vadd.f32 %v1576_v24, %v1478_v62 }
 0x1f0   : > { %v1385_v34 = vpop.f32.mrf.mxu1  ;;  %v1769_v13 = vpop.f32.mrf.mxu3 }
 0x1f1   : > { %v1865_v26 = vadd.f32 %v1769_v13, %v1672_v38  ;;  %2009 = vmatmul.f32.gmra.mxu0 %v1913_v42  ;;  %v1479_v16 = vadd.f32 %v1385_v34, %v3864_v60 }
 0x1f3   : > { %v2058_v49 = vadd.f32 %v1962_v9, %v1865_v26  ;;  %1432 = vmatmul.f32.gmra.mxu1 %v1912_v5  ;;  %1626 = vmatmul.f32.gmra.mxu2 %v1528_v39  ;;  %v1530_v9 = vld [vmem:[#allocation2 + $0x110] sm:$0xff] }
 0x1f5   : > { %v4044_v29 = vadd.f32 %v4040_v6, %v2058_v49  ;;  %1819 = vmatmul.f32.gmra.mxu3 %v1721_v28  ;;  %v1916_v28 = vld [vmem:[#allocation2 + $0x112] sm:$0xff] }
 0x1f6   : > { %v1579_v48 = vpop.f32.mrf.mxu2  ;;  %v1965_v46 = vpop.f32.mrf.mxu0 }
 0x1f7   : > { %v2862_v20 = vmul.f32 -1.442695, %v4044_v29  ;;  %v1673_v25 = vadd.f32 %v1579_v48, %v1479_v16 }
 0x1f8   : > { %v1388_v1 = vpop.f32.mrf.mxu1  ;;  %v1772_v12 = vpop.f32.mrf.mxu3 }
 0x1f9   : > { %2958 = vpow2.f32 %v2862_v20  ;;  %v1866_v10 = vadd.f32 %v1772_v12, %v1673_v25  ;;  %2012 = vmatmul.f32.gmra.mxu0 %v1914_v0  ;;  %v1480_v60 = vadd.f32 %v1388_v1, %v3877_v31  ;;  %v1723_v31 = vld [vmem:[#allocation2 + $0x111] sm:$0xff] }
 0x1fb   : > { %v2059_v14 = vadd.f32 %v1965_v46, %v1866_v10  ;;  %1435 = vmatmul.f32.gmra.mxu1 %v1913_v42  ;;  %1629 = vmatmul.f32.gmra.mxu2 %v1529_v35 }
 0x1fd   : > { %v4049_v59 = vadd.f32 %v4040_v6, %v2059_v14  ;;  %1822 = vmatmul.f32.gmra.mxu3 %v1722_v45 }
 0x1fe   : > { %v1582_v5 = vpop.f32.mrf.mxu2  ;;  %v1968_v2 = vpop.f32.mrf.mxu0 }
 0x1ff   : > { %v2959_v63 = vpop.eup %2958  ;;  %v2863_v44 = vmul.f32 -1.442695, %v4049_v59  ;;  %v1674_v41 = vadd.f32 %v1582_v5, %v1480_v60 }
 0x200   : > { %v2222_v55 = vadd.f32 1.0, %v2959_v63  ;;  %v1391_v62 = vpop.f32.mrf.mxu1  ;;  %v1775_v24 = vpop.f32.mrf.mxu3 }
 0x201   : > { %2960 = vpow2.f32 %v2863_v44  ;;  %v1867_v42 = vadd.f32 %v1775_v24, %v1674_v41  ;;  %2015 = vmatmul.f32.gmra.mxu0 %v1915_v22  ;;  %v1481_v34 = vadd.f32 %v1391_v62, %v3884_v61  ;;  %v1724_v61 = vld [vmem:[#allocation2 + $0x121] sm:$0xff] }
 0x202   : > { %2962 = vrcp.f32 %v2222_v55  ;;  %v2265_v45 = vand.u32 2147483648, %v2222_v55  ;;  %v2263_v60 = vand.u32 2147483647, %v2222_v55  ;;  %v1917_v41 = vld [vmem:[#allocation2 + $0x122] sm:$0xff]  ;;  %vm2259_vm1 = vweird.f32 %v2222_v55 }
 0x203   : > { %v2060_v38 = vadd.f32 %v1968_v2, %v1867_v42  ;;  %1438 = vmatmul.f32.gmra.mxu1 %v1914_v0  ;;  %1632 = vmatmul.f32.gmra.mxu2 %v1530_v9  ;;  %v1531_v0 = vld [vmem:[#allocation2 + $0x120] sm:$0xff] }
 0x204   : > { %v2266_v42 = vor.u32 1.1754944e-38, %v2265_v45  ;;  %vm2264_vm3 = vcmp.eq.f32.partialorder %v2263_v60, 8.507059e+37  ;;  %v1918_v60 = vld [vmem:[#allocation2 + $0x12a] sm:$0xff] }
 0x205   : > { %v4054_v13 = vadd.f32 %v4040_v6, %v2060_v38  ;;  %1825 = vmatmul.f32.gmra.mxu3 %v1723_v31 }
 0x206   : > { %v1585_v39 = vpop.f32.mrf.mxu2  ;;  %v1971_v26 = vpop.f32.mrf.mxu0 }
 0x207   : > { %v2961_v49 = vpop.eup %2960  ;;  %v2864_v16 = vmul.f32 -1.442695, %v4054_v13  ;;  %v1675_v48 = vadd.f32 %v1585_v39, %v1481_v34 }
 0x208   : > { %v2963_v46 = vpop.eup %2962  ;;  %v4057_v20 = vadd.f32 1.0, %v2961_v49  ;;  %v1394_v25 = vpop.f32.mrf.mxu1 }
 0x209   : > { %v1778_v1 = vpop.f32.mrf.mxu3  ;;  %v2255_v12 = vmul.f32 %v2963_v46, %v2222_v55  ;;  %2964 = vpow2.f32 %v2864_v16  ;;  %2018 = vmatmul.f32.gmra.mxu0 %v1916_v28  ;;  %vm2260_vm0 = vweird.f32 %v2963_v46  ;;  %v1482_v2 = vadd.f32 %v1394_v25, %v3897_v3 }
 0x20a   : > { %2966 = vrcp.f32 %v4057_v20  ;;  %v1868_v10 = vadd.f32 %v1778_v1, %v1675_v48  ;;  %vm2261_vm2 = vmor %vm2259_vm1, %vm2260_vm0  ;;  %v1725_v48 = vld [vmem:[#allocation2 + $0x129] sm:$0xff]  ;;  %v2280_v1 = vand.u32 2147483648, %v4057_v20  ;;  %vm2274_vm5 = vweird.f32 %v4057_v20 }
 0x20b   : > { %v2256_v35 = vsub.f32 1.0, %v2255_v12  ;;  %1441 = vmatmul.f32.gmra.mxu1 %v1915_v22  ;;  %1635 = vmatmul.f32.gmra.mxu2 %v1531_v0 }
 0x20c   : > { %v2061_v5 = vadd.f32 %v1971_v26, %v1868_v10  ;;  %v1532_v26 = vld [vmem:[#allocation2 + $0x128] sm:$0xff] }
 0x20d   : > { %v2257_v14 = vmul.f32 %v2963_v46, %v2256_v35  ;;  %1828 = vmatmul.f32.gmra.mxu3 %v1724_v61  ;;  %v2278_v61 = vand.u32 2147483647, %v4057_v20 }
 0x20e   : > { %v1588_v63 = vpop.f32.mrf.mxu2  ;;  %v1974_v44 = vpop.f32.mrf.mxu0  ;;  %v4062_v9 = vadd.f32 %v4040_v6, %v2061_v5 }
 0x20f   : > { %v2965_v62 = vpop.eup %2964  ;;  %v2258_v24 = vadd.f32 %v2963_v46, %v2257_v14  ;;  %v1676_v38 = vadd.f32 %v1588_v63, %v1482_v2  ;;  %v2281_v2 = vor.u32 1.1754944e-38, %v2280_v1  ;;  %vm2279_vm7 = vcmp.eq.f32.partialorder %v2278_v61, 8.507059e+37 }
 0x210   : > { %v2967_v22 = vpop.eup %2966  ;;  %v4064_v31 = vadd.f32 1.0, %v2965_v62  ;;  %v1397_v34 = vpop.f32.mrf.mxu1  ;;  %v2865_v16 = vmul.f32 -1.442695, %v4062_v9 }
 0x211   : > { %v1781_v39 = vpop.f32.mrf.mxu3  ;;  %v2262_v3 = vsel %vm2261_vm2, %v2963_v46, %v2258_v24  ;;  %v2270_v49 = vmul.f32 %v2967_v22, %v4057_v20  ;;  %2021 = vmatmul.f32.gmra.mxu0 %v1917_v41  ;;  %vm2275_vm4 = vweird.f32 %v2967_v22  ;;  %v1483_v35 = vadd.f32 %v1397_v34, %v3904_v18 }
 0x212   : > { %v2267_v55 = vsel %vm2264_vm3, %v2266_v42, %v2262_v3  ;;  %2968 = vrcp.f32 %v4064_v31  ;;  %v1869_v0 = vadd.f32 %v1781_v39, %v1676_v38  ;;  %vm2276_vm6 = vmor %vm2274_vm5, %vm2275_vm4  ;;  %v1533_v42 = vld [vmem:[#allocation2 + $0x138] sm:$0xff]  ;;  %vm2289_vm9 = vweird.f32 %v4064_v31 }
 0x213   : > { %v2734_v25 = vmul.f32 %v2267_v55, %v4044_v29  ;;  %v2271_v46 = vsub.f32 1.0, %v2270_v49  ;;  %2970 = vpow2.f32 %v2865_v16  ;;  %1444 = vmatmul.f32.gmra.mxu1 %v1916_v28  ;;  %1638 = vmatmul.f32.gmra.mxu2 %v1532_v26  ;;  %v1726_v3 = vld [vmem:[#allocation2 + $0x139] sm:$0xff]  ;;  %v2295_v55 = vand.u32 2147483648, %v4064_v31 }
 0x214   : > { %v2062_v10 = vadd.f32 %v1974_v44, %v1869_v0 }
 0x215   : > { %2766 = vst [vmem:[%s4073_s27] sm:$0xff] %v2734_v25  ;;  %v2272_v12 = vmul.f32 %v2967_v22, %v2271_v46  ;;  %1831 = vmatmul.f32.gmra.mxu3 %v1725_v48 }
 0x216   : > { %v1591_v45 = vpop.f32.mrf.mxu2  ;;  %v1977_v14 = vpop.f32.mrf.mxu0  ;;  %v4083_v63 = vadd.f32 %v4040_v6, %v2062_v10 }
 0x217   : > { %v2273_v29 = vadd.f32 %v2967_v22, %v2272_v12  ;;  %v1677_v28 = vadd.f32 %v1591_v45, %v1483_v35  ;;  %v2296_v35 = vor.u32 1.1754944e-38, %v2295_v55 }
 0x218   : > { %v2969_v5 = vpop.eup %2968  ;;  %v1400_v62 = vpop.f32.mrf.mxu1  ;;  %v2866_v20 = vmul.f32 -1.442695, %v4083_v63 }
 0x219   : > { %v1784_v24 = vpop.f32.mrf.mxu3  ;;  %v2971_v38 = vpop.eup %2970  ;;  %v2277_v18 = vsel %vm2276_vm6, %v2967_v22, %v2273_v29  ;;  %v2285_v44 = vmul.f32 %v2969_v5, %v4064_v31  ;;  %2024 = vmatmul.f32.gmra.mxu0 %v1918_v60  ;;  %vm2290_vm8 = vweird.f32 %v2969_v5  ;;  %v2293_v22 = vand.u32 2147483647, %v4064_v31  ;;  %v1534_v29 = vld [vmem:[#allocation2 + $0x140] sm:$0xff] }
 0x21a   : > { %v2282_v34 = vsel %vm2279_vm7, %v2281_v2, %v2277_v18  ;;  %v4086_v39 = vadd.f32 1.0, %v2971_v38  ;;  %v1870_v26 = vadd.f32 %v1784_v24, %v1677_v28  ;;  %v1484_v25 = vadd.f32 %v1400_v62, %v3916_v50  ;;  %vm2291_vm10 = vmor %vm2289_vm9, %vm2290_vm8  ;;  %v1727_v31 = vld [vmem:[#allocation2 + $0x141] sm:$0xff] }
 0x21b   : > { %v2735_v49 = vmul.f32 %v2282_v34, %v4049_v59  ;;  %v2286_v16 = vsub.f32 1.0, %v2285_v44  ;;  %1447 = vmatmul.f32.gmra.mxu1 %v1917_v41  ;;  %1641 = vmatmul.f32.gmra.mxu2 %v1533_v42  ;;  %v1919_v59 = vld [vmem:[#allocation2 + $0x13a] sm:$0xff]  ;;  %vm2294_vm11 = vcmp.eq.f32.partialorder %v2293_v22, 8.507059e+37 }
 0x21c   : > { %2972 = vrcp.f32 %v4086_v39  ;;  %v2063_v46 = vadd.f32 %v1977_v14, %v1870_v26  ;;  %v2310_v26 = vand.u32 2147483648, %v4086_v39  ;;  %vm2304_vm13 = vweird.f32 %v4086_v39 }
 0x21d   : > { %2767 = vst [vmem:[%s4073_s27 + $0x8] sm:$0xff] %v2735_v49  ;;  %v2287_v48 = vmul.f32 %v2969_v5, %v2286_v16  ;;  %2974 = vpow2.f32 %v2866_v20  ;;  %1834 = vmatmul.f32.gmra.mxu3 %v1726_v3  ;;  %v2308_v20 = vand.u32 2147483647, %v4086_v39  ;;  %v1920_v49 = vld [vmem:[#allocation2 + $0x142] sm:$0xff] }
 0x21e   : > { %v1594_v1 = vpop.f32.mrf.mxu2  ;;  %v1980_v0 = vpop.f32.mrf.mxu0  ;;  %v4097_v41 = vadd.f32 %v4040_v6, %v2063_v46 }
 0x21f   : > { %v2288_v12 = vadd.f32 %v2969_v5, %v2287_v48  ;;  %v1678_v61 = vadd.f32 %v1594_v1, %v1484_v25  ;;  %v1535_v25 = vld [vmem:[#allocation2 + $0x150] sm:$0xff]  ;;  %vm2309_vm15 = vcmp.eq.f32.partialorder %v2308_v20, 8.507059e+37 }
 0x220   : > { %v1403_v10 = vpop.f32.mrf.mxu1  ;;  %v2867_v50 = vmul.f32 -1.442695, %v4097_v41 }
 0x221   : > { %v1787_v45 = vpop.f32.mrf.mxu3  ;;  %v2292_v28 = vsel %vm2291_vm10, %v2969_v5, %v2288_v12  ;;  %2027 = vmatmul.f32.gmra.mxu0 %v1919_v59  ;;  %v1485_v34 = vadd.f32 %v1403_v10, %v3922_v36  ;;  %v2311_v12 = vor.u32 1.1754944e-38, %v2310_v26 }
 0x222   : > { %v1871_v14 = vadd.f32 %v1787_v45, %v1678_v61  ;;  %v2973_v2 = vpop.eup %2972  ;;  %v2297_v62 = vsel %vm2294_vm11, %v2296_v35, %v2292_v28  ;;  %2976 = vpow2.f32 %v2867_v50  ;;  %v1728_v35 = vld [vmem:[#allocation2 + $0x151] sm:$0xff] }
 0x223   : > { %v2975_v24 = vpop.eup %2974  ;;  %v2736_v42 = vmul.f32 %v2297_v62, %v4054_v13  ;;  %v2300_v38 = vmul.f32 %v2973_v2, %v4086_v39  ;;  %1450 = vmatmul.f32.gmra.mxu1 %v1918_v60  ;;  %1644 = vmatmul.f32.gmra.mxu2 %v1534_v29  ;;  %vm2305_vm12 = vweird.f32 %v2973_v2 }
 0x224   : > { %v4103_v18 = vadd.f32 1.0, %v2975_v24  ;;  %v2064_v5 = vadd.f32 %v1980_v0, %v1871_v14  ;;  %vm2306_vm14 = vmor %vm2304_vm13, %vm2305_vm12  ;;  %v4124_v24 = vld [vmem:[#allocation2 + $0x152] sm:$0xff] }
 0x225   : > { %2768 = vst [vmem:[%s4073_s27 + $0x10] sm:$0xff] %v2736_v42  ;;  %v2301_v44 = vsub.f32 1.0, %v2300_v38  ;;  %1837 = vmatmul.f32.gmra.mxu3 %v1727_v31 }
 0x226   : > { %2978 = vrcp.f32 %v4103_v18  ;;  %v1597_v13 = vpop.f32.mrf.mxu2  ;;  %v1983_v3 = vpop.f32.mrf.mxu0  ;;  %v4111_v60 = vadd.f32 %v4040_v6, %v2064_v5  ;;  %v2323_v38 = vand.u32 2147483647, %v4103_v18  ;;  %v2325_v5 = vand.u32 2147483648, %v4103_v18 }
 0x227   : > { %v2302_v16 = vmul.f32 %v2973_v2, %v2301_v44  ;;  %v1679_v22 = vadd.f32 %v1597_v13, %v1485_v34  ;;  %vm2319_vm1 = vweird.f32 %v4103_v18 }
 0x228   : > { %v1406_v55 = vpop.f32.mrf.mxu1  ;;  %v2977_v36 = vpop.eup %2976  ;;  %v2868_v1 = vmul.f32 -1.442695, %v4111_v60  ;;  %vm2324_vm3 = vcmp.eq.f32.partialorder %v2323_v38, 8.507059e+37 }
 0x229   : > { %v1790_v48 = vpop.f32.mrf.mxu3  ;;  %v2303_v46 = vadd.f32 %v2973_v2, %v2302_v16  ;;  %2030 = vmatmul.f32.gmra.mxu0 %v1920_v49  ;;  %v4115_v61 = vadd.f32 1.0, %v2977_v36  ;;  %v1486_v14 = vadd.f32 %v1406_v55, %v3938_v47  ;;  %v1536_v47 = vld [vmem:[#allocation2 + $0x158] sm:$0xff]  ;;  %v2326_v36 = vor.u32 1.1754944e-38, %v2325_v5 }
 0x22a   : > { %v1872_v0 = vadd.f32 %v1790_v48, %v1679_v22  ;;  %2980 = vpow2.f32 %v2868_v1  ;;  %v1729_v22 = vld [vmem:[#allocation2 + $0x159] sm:$0xff] }
 0x22b   : > { %v2307_v10 = vsel %vm2306_vm14, %v2973_v2, %v2303_v46  ;;  %1453 = vmatmul.f32.gmra.mxu1 %v1919_v59  ;;  %1647 = vmatmul.f32.gmra.mxu2 %v1535_v25  ;;  %2982 = vrcp.f32 %v4115_v61  ;;  %vm2334_vm5 = vweird.f32 %v4115_v61 }
 0x22c   : > { %v2065_v45 = vadd.f32 %v1983_v3, %v1872_v0  ;;  %v2979_v29 = vpop.eup %2978  ;;  %v2312_v28 = vsel %vm2309_vm15, %v2311_v12, %v2307_v10 }
 0x22d   : > { %v2737_v39 = vmul.f32 %v2312_v28, %v4062_v9  ;;  %v2315_v50 = vmul.f32 %v2979_v29, %v4103_v18  ;;  %1840 = vmatmul.f32.gmra.mxu3 %v1728_v35  ;;  %vm2320_vm0 = vweird.f32 %v2979_v29  ;;  %v2338_v35 = vand.u32 2147483647, %v4115_v61  ;;  %v1922_v28 = vld [vmem:[#allocation2 + $0x15a] sm:$0xff] }
 0x22e   : > { %v4122_v62 = vadd.f32 %v4040_v6, %v2065_v45  ;;  %v1600_v2 = vpop.f32.mrf.mxu2  ;;  %v1986_v31 = vpop.f32.mrf.mxu0  ;;  %vm2321_vm2 = vmor %vm2319_vm1, %vm2320_vm0 }
 0x22f   : > { %2769 = vst [vmem:[%s4073_s27 + $0x18] sm:$0xff] %v2737_v39  ;;  %v2316_v59 = vsub.f32 1.0, %v2315_v50  ;;  %v1680_v42 = vadd.f32 %v1600_v2, %v1486_v14  ;;  %vm2339_vm7 = vcmp.eq.f32.partialorder %v2338_v35, 8.507059e+37  ;;  %v1538_v35 = vld [vmem:[#allocation2 + $0x170] sm:$0xff] }
 0x230   : > { %v2869_v9 = vmul.f32 -1.442695, %v4122_v62  ;;  %v1409_v44 = vpop.f32.mrf.mxu1  ;;  %v2981_v20 = vpop.eup %2980 }
 0x231   : > { %v1793_v34 = vpop.f32.mrf.mxu3  ;;  %v2317_v26 = vmul.f32 %v2979_v29, %v2316_v59  ;;  %2033 = vmatmul.f32.gmra.mxu0 %v4124_v24  ;;  %v2983_v3 = vpop.eup %2982  ;;  %v4131_v16 = vadd.f32 1.0, %v2981_v20  ;;  %v1487_v0 = vadd.f32 %v1409_v44, %v3951_v33  ;;  %v1537_v59 = vld [vmem:[#allocation2 + $0x168] sm:$0xff] }
 0x232   : > { %v1873_v13 = vadd.f32 %v1793_v34, %v1680_v42  ;;  %2984 = vpow2.f32 %v2869_v9  ;;  %v2330_v48 = vmul.f32 %v2983_v3, %v4115_v61  ;;  %vm2335_vm4 = vweird.f32 %v2983_v3  ;;  %v1730_v44 = vld [vmem:[#allocation2 + $0x169] sm:$0xff] }
 0x233   : > { %v2318_v55 = vadd.f32 %v2979_v29, %v2317_v26  ;;  %1456 = vmatmul.f32.gmra.mxu1 %v1920_v49  ;;  %1650 = vmatmul.f32.gmra.mxu2 %v1536_v47  ;;  %2986 = vrcp.f32 %v4131_v16  ;;  %v2340_v49 = vand.u32 2147483648, %v4115_v61  ;;  %vm2336_vm6 = vmor %vm2334_vm5, %vm2335_vm4  ;;  %vm2349_vm9 = vweird.f32 %v4131_v16 }
 0x234   : > { %v2066_v25 = vadd.f32 %v1986_v31, %v1873_v13  ;;  %v2331_v1 = vsub.f32 1.0, %v2330_v48 }
 0x235   : > { %v2322_v46 = vsel %vm2321_vm2, %v2979_v29, %v2318_v55  ;;  %1843 = vmatmul.f32.gmra.mxu3 %v1729_v22  ;;  %v2353_v55 = vand.u32 2147483647, %v4131_v16 }
 0x236   : > { %v4138_v12 = vadd.f32 %v4040_v6, %v2066_v25  ;;  %v2327_v18 = vsel %vm2324_vm3, %v2326_v36, %v2322_v46  ;;  %v1603_v10 = vpop.f32.mrf.mxu2  ;;  %v1989_v45 = vpop.f32.mrf.mxu0  ;;  %v2332_v29 = vmul.f32 %v2983_v3, %v2331_v1  ;;  %v4156_v36 = vld [vmem:[#allocation2 + $0x16a] sm:$0xff] }
 0x237   : > { %v2738_v39 = vmul.f32 %v2327_v18, %v4083_v63  ;;  %v1681_v33 = vadd.f32 %v1603_v10, %v1487_v0  ;;  %v2341_v63 = vor.u32 1.1754944e-38, %v2340_v49  ;;  %vm2354_vm11 = vcmp.eq.f32.partialorder %v2353_v55, 8.507059e+37 }
 0x238   : > { %v2870_v50 = vmul.f32 -1.442695, %v4138_v12  ;;  %v2985_v14 = vpop.eup %2984  ;;  %v1412_v2 = vpop.f32.mrf.mxu1  ;;  %v2333_v42 = vadd.f32 %v2983_v3, %v2332_v29 }
 0x239   : > { %v1796_v31 = vpop.f32.mrf.mxu3  ;;  %2770 = vst [vmem:[%s4073_s27 + $0x20] sm:$0xff] %v2738_v39  ;;  %v4146_v38 = vadd.f32 1.0, %v2985_v14  ;;  %2036 = vmatmul.f32.gmra.mxu0 %v1922_v28  ;;  %v2987_v5 = vpop.eup %2986  ;;  %v1488_v13 = vadd.f32 %v1412_v2, %v3966_v54 }
 0x23a   : > { %2988 = vpow2.f32 %v2870_v50  ;;  %v1874_v9 = vadd.f32 %v1796_v31, %v1681_v33  ;;  %v2337_v34 = vsel %vm2336_vm6, %v2983_v3, %v2333_v42  ;;  %v2345_v47 = vmul.f32 %v2987_v5, %v4131_v16  ;;  %v1731_v33 = vld [vmem:[#allocation2 + $0x171] sm:$0xff] }
 0x23b   : > { %2990 = vrcp.f32 %v4146_v38  ;;  %1459 = vmatmul.f32.gmra.mxu1 %v4124_v24  ;;  %1653 = vmatmul.f32.gmra.mxu2 %v1537_v59  ;;  %v2342_v61 = vsel %vm2339_vm7, %v2341_v63, %v2337_v34  ;;  %v2355_v3 = vand.u32 2147483648, %v4131_v16  ;;  %vm2350_vm8 = vweird.f32 %v2987_v5 }
 0x23c   : > { %v2739_v20 = vmul.f32 %v2342_v61, %v4097_v41  ;;  %v2346_v26 = vsub.f32 1.0, %v2345_v47  ;;  %v2067_v22 = vadd.f32 %v1989_v45, %v1874_v9  ;;  %vm2351_vm10 = vmor %vm2349_vm9, %vm2350_vm8  ;;  %v2370_v42 = vand.u32 2147483648, %v4146_v38  ;;  %v1924_v47 = vld [vmem:[#allocation2 + $0x172] sm:$0xff] }
 0x23d   : > { %1846 = vmatmul.f32.gmra.mxu3 %v1730_v44  ;;  %v2356_v29 = vor.u32 1.1754944e-38, %v2355_v3  ;;  %v2368_v44 = vand.u32 2147483647, %v4146_v38  ;;  %vm2364_vm13 = vweird.f32 %v4146_v38 }
 0x23e   : > { %v1606_v48 = vpop.f32.mrf.mxu2  ;;  %v1992_v25 = vpop.f32.mrf.mxu0  ;;  %2771 = vst [vmem:[%s4073_s27 + $0x28] sm:$0xff] %v2739_v20  ;;  %v2347_v24 = vmul.f32 %v2987_v5, %v2346_v26  ;;  %v4160_v1 = vadd.f32 %v4040_v6, %v2067_v22  ;;  %v1539_v22 = vld [vmem:[#allocation2 + $0x180] sm:$0xff]  ;;  %v2371_v3 = vor.u32 1.1754944e-38, %v2370_v42 }
 0x23f   : > { %v1682_v41 = vadd.f32 %v1606_v48, %v1488_v13  ;;  %vm2369_vm15 = vcmp.eq.f32.partialorder %v2368_v44, 8.507059e+37 }
 0x240   : > { %v2989_v46 = vpop.eup %2988  ;;  %v1415_v54 = vpop.f32.mrf.mxu1  ;;  %v2348_v10 = vadd.f32 %v2987_v5, %v2347_v24  ;;  %v2871_v45 = vmul.f32 -1.442695, %v4160_v1 }
 0x241   : > { %v4162_v0 = vadd.f32 1.0, %v2989_v46  ;;  %v1799_v18 = vpop.f32.mrf.mxu3  ;;  %v2991_v49 = vpop.eup %2990  ;;  %2039 = vmatmul.f32.gmra.mxu0 %v4156_v36  ;;  %v1489_v63 = vadd.f32 %v1415_v54, %v3972_v40 }
 0x242   : > { %v1875_v39 = vadd.f32 %v1799_v18, %v1682_v41  ;;  %v2360_v50 = vmul.f32 %v2991_v49, %v4146_v38  ;;  %v2352_v14 = vsel %vm2351_vm10, %v2987_v5, %v2348_v10  ;;  %vm2365_vm12 = vweird.f32 %v2991_v49  ;;  %v1732_v38 = vld [vmem:[#allocation2 + $0x181] sm:$0xff] }
 0x243   : > { %2992 = vrcp.f32 %v4162_v0  ;;  %1462 = vmatmul.f32.gmra.mxu1 %v1922_v28  ;;  %1656 = vmatmul.f32.gmra.mxu2 %v1538_v35  ;;  %v2357_v2 = vsel %vm2354_vm11, %v2356_v29, %v2352_v14  ;;  %vm2366_vm14 = vmor %vm2364_vm13, %vm2365_vm12  ;;  %v2383_v10 = vand.u32 2147483647, %v4162_v0  ;;  %vm2379_vm1 = vweird.f32 %v4162_v0 }
 0x244   : > { %2994 = vpow2.f32 %v2871_v45  ;;  %v2361_v16 = vsub.f32 1.0, %v2360_v50  ;;  %v2068_v31 = vadd.f32 %v1992_v25, %v1875_v39  ;;  %v2740_v59 = vmul.f32 %v2357_v2, %v4111_v60 }
 0x245   : > { %1849 = vmatmul.f32.gmra.mxu3 %v1731_v33  ;;  %v2385_v45 = vand.u32 2147483648, %v4162_v0  ;;  %v1925_v33 = vld [vmem:[#allocation2 + $0x182] sm:$0xff]  ;;  %vm2384_vm3 = vcmp.eq.f32.partialorder %v2383_v10, 8.507059e+37 }
 0x246   : > { %v2362_v9 = vmul.f32 %v2991_v49, %v2361_v16  ;;  %v4174_v5 = vadd.f32 %v4040_v6, %v2068_v31  ;;  %v1609_v28 = vpop.f32.mrf.mxu2  ;;  %v1995_v34 = vpop.f32.mrf.mxu0  ;;  %2772 = vst [vmem:[%s4073_s27 + $0x30] sm:$0xff] %v2740_v59 }
 0x247   : > { %v1683_v61 = vadd.f32 %v1609_v28, %v1489_v63  ;;  %v2386_v31 = vor.u32 1.1754944e-38, %v2385_v45 }
 0x248   : > { %v2363_v26 = vadd.f32 %v2991_v49, %v2362_v9  ;;  %v2872_v60 = vmul.f32 -1.442695, %v4174_v5  ;;  %v1418_v40 = vpop.f32.mrf.mxu1 }
 0x249   : > { %v2993_v20 = vpop.eup %2992  ;;  %v1802_v13 = vpop.f32.mrf.mxu3  ;;  %2042 = vmatmul.f32.gmra.mxu0 %v1924_v47  ;;  %v1490_v39 = vadd.f32 %v1418_v40, %v3975_v8  ;;  %v1540_v8 = vld [vmem:[#allocation2 + $0x188] sm:$0xff] }
 0x24a   : > { %v2995_v55 = vpop.eup %2994  ;;  %v2375_v48 = vmul.f32 %v2993_v20, %v4162_v0  ;;  %v1876_v25 = vadd.f32 %v1802_v13, %v1683_v61  ;;  %v2367_v46 = vsel %vm2366_vm14, %v2991_v49, %v2363_v26  ;;  %2996 = vpow2.f32 %v2872_v60  ;;  %v1733_v0 = vld [vmem:[#allocation2 + $0x189] sm:$0xff] }
 0x24b   : > { %v4181_v24 = vadd.f32 1.0, %v2995_v55  ;;  %v2372_v41 = vsel %vm2369_vm15, %v2371_v3, %v2367_v46  ;;  %1465 = vmatmul.f32.gmra.mxu1 %v4156_v36  ;;  %1659 = vmatmul.f32.gmra.mxu2 %v1539_v22  ;;  %vm2380_vm0 = vweird.f32 %v2993_v20 }
 0x24c   : > { %v2376_v54 = vsub.f32 1.0, %v2375_v48  ;;  %v2069_v18 = vadd.f32 %v1995_v34, %v1876_v25  ;;  %v2741_v35 = vmul.f32 %v2372_v41, %v4122_v62  ;;  %vm2381_vm2 = vmor %vm2379_vm1, %vm2380_vm0 }
 0x24d   : > { %2998 = vrcp.f32 %v4181_v24  ;;  %1852 = vmatmul.f32.gmra.mxu3 %v1732_v38  ;;  %v2400_v13 = vand.u32 2147483648, %v4181_v24  ;;  %vm2394_vm5 = vweird.f32 %v4181_v24 }
 0x24e   : > { %v2377_v49 = vmul.f32 %v2993_v20, %v2376_v54  ;;  %v4190_v29 = vadd.f32 %v4040_v6, %v2069_v18  ;;  %2773 = vst [vmem:[%s4073_s27 + $0x38] sm:$0xff] %v2741_v35  ;;  %v1612_v50 = vpop.f32.mrf.mxu2  ;;  %v1998_v36 = vpop.f32.mrf.mxu0 }
 0x24f   : > { %v1684_v2 = vadd.f32 %v1612_v50, %v1490_v39  ;;  %v2401_v45 = vor.u32 1.1754944e-38, %v2400_v13  ;;  %v1734_v39 = vld [vmem:[#allocation2 + $0x199] sm:$0xff] }
 0x250   : > { %v2378_v14 = vadd.f32 %v2993_v20, %v2377_v49  ;;  %v2873_v62 = vmul.f32 -1.442695, %v4190_v29  ;;  %v2997_v16 = vpop.eup %2996  ;;  %v1421_v59 = vpop.f32.mrf.mxu1 }
 0x251   : > { %v1805_v42 = vpop.f32.mrf.mxu3  ;;  %v4195_v9 = vadd.f32 1.0, %v2997_v16  ;;  %2045 = vmatmul.f32.gmra.mxu0 %v1925_v33  ;;  %v1491_v40 = vadd.f32 %v1421_v59, %v3978_v58 }
 0x252   : > { %v2382_v63 = vsel %vm2381_vm2, %v2993_v20, %v2378_v14  ;;  %3000 = vpow2.f32 %v2873_v62  ;;  %v1877_v34 = vadd.f32 %v1805_v42, %v1684_v2 }
 0x253   : > { %v2999_v44 = vpop.eup %2998  ;;  %v2387_v28 = vsel %vm2384_vm3, %v2386_v31, %v2382_v63  ;;  %3002 = vrcp.f32 %v4195_v9  ;;  %1468 = vmatmul.f32.gmra.mxu1 %v1924_v47  ;;  %1662 = vmatmul.f32.gmra.mxu2 %v1540_v8  ;;  %v2398_v47 = vand.u32 2147483647, %v4181_v24  ;;  %v2415_v16 = vand.u32 2147483648, %v4195_v9 }
 0x254   : > { %v2742_v61 = vmul.f32 %v2387_v28, %v4138_v12  ;;  %v2390_v26 = vmul.f32 %v2999_v44, %v4181_v24  ;;  %v2070_v60 = vadd.f32 %v1998_v36, %v1877_v34  ;;  %v1926_v12 = vld [vmem:[#allocation2 + $0x18a] sm:$0xff]  ;;  %vm2395_vm4 = vweird.f32 %v2999_v44  ;;  %v3088_v36 = vld [vmem:[#allocation2] sm:$0xff] }
 0x255   : > { %1855 = vmatmul.f32.gmra.mxu3 %v1733_v0  ;;  %vm2396_vm6 = vmor %vm2394_vm5, %vm2395_vm4  ;;  %vm2399_vm7 = vcmp.eq.f32.partialorder %v2398_v47, 8.507059e+37  ;;  %v2413_v42 = vand.u32 2147483647, %v4195_v9  ;;  %vm2409_vm9 = vweird.f32 %v4195_v9 }
 0x256   : > { %2774 = vst [vmem:[%s4073_s27 + $0x40] sm:$0xff] %v2742_v61  ;;  %v2391_v20 = vsub.f32 1.0, %v2390_v26  ;;  %v4204_v22 = vadd.f32 %v4040_v6, %v2070_v60  ;;  %v1615_v55 = vpop.f32.mrf.mxu2  ;;  %v2001_v3 = vpop.f32.mrf.mxu0  ;;  %v2416_v60 = vor.u32 1.1754944e-38, %v2415_v16 }
 0x257   : > { %v1685_v46 = vadd.f32 %v1615_v55, %v1491_v40  ;;  %vm2414_vm11 = vcmp.eq.f32.partialorder %v2413_v42, 8.507059e+37 }
 0x258   : > { %v3001_v48 = vpop.eup %3000  ;;  %v2392_v25 = vmul.f32 %v2999_v44, %v2391_v20  ;;  %v2874_v41 = vmul.f32 -1.442695, %v4204_v22  ;;  %v1424_v58 = vpop.f32.mrf.mxu1 }
 0x259   : > { %v4207_v38 = vadd.f32 1.0, %v3001_v48  ;;  %v1808_v54 = vpop.f32.mrf.mxu3  ;;  %v3003_v18 = vpop.eup %3002  ;;  %2048 = vmatmul.f32.gmra.mxu0 %v1926_v12  ;;  %v1492_v31 = vadd.f32 %v1424_v58, %v3982_v19 }
 0x25a   : > { %v2393_v35 = vadd.f32 %v2999_v44, %v2392_v25  ;;  %v1878_v10 = vadd.f32 %v1808_v54, %v1685_v46  ;;  %v2405_v49 = vmul.f32 %v3003_v18, %v4195_v9  ;;  %vm2410_vm8 = vweird.f32 %v3003_v18 }
 0x25b   : > { %3004 = vrcp.f32 %v4207_v38  ;;  %1471 = vmatmul.f32.gmra.mxu1 %v1925_v33  ;;  %1665 = vmatmul.f32.gmra.mxu2 %v3088_v36  ;;  %vm2411_vm10 = vmor %vm2409_vm9, %vm2410_vm8  ;;  %v2428_v46 = vand.u32 2147483647, %v4207_v38  ;;  %vm2424_vm13 = vweird.f32 %v4207_v38 }
 0x25c   : > { %v2397_v50 = vsel %vm2396_vm6, %v2999_v44, %v2393_v35  ;;  %3006 = vpow2.f32 %v2874_v41  ;;  %v2406_v62 = vsub.f32 1.0, %v2405_v49  ;;  %v2071_v2 = vadd.f32 %v2001_v3, %v1878_v10  ;;  %v1927_v44 = vld [vmem:[#allocation2 + $0x19a] sm:$0xff]  ;;  %v1928_v10 = vld [vmem:[#allocation2 + $0x1a2] sm:$0xff] }
 0x25d   : > { %v2402_v14 = vsel %vm2399_vm7, %v2401_v45, %v2397_v50  ;;  %1858 = vmatmul.f32.gmra.mxu3 %v1734_v39  ;;  %v1735_v3 = vld [vmem:[#allocation2 + $0x1a1] sm:$0xff]  ;;  %v2430_v41 = vand.u32 2147483648, %v4207_v38  ;;  %vm2429_vm15 = vcmp.eq.f32.partialorder %v2428_v46, 8.507059e+37 }
 0x25e   : > { %v2743_v24 = vmul.f32 %v2402_v14, %v4160_v1  ;;  %v2407_v59 = vmul.f32 %v3003_v18, %v2406_v62  ;;  %v4218_v8 = vadd.f32 %v4040_v6, %v2071_v2  ;;  %v1618_v33 = vpop.f32.mrf.mxu2  ;;  %v2004_v63 = vpop.f32.mrf.mxu0 }
 0x25f   : > { %v1686_v28 = vadd.f32 %v1618_v33, %v1492_v31  ;;  %v2431_v50 = vor.u32 1.1754944e-38, %v2430_v41 }
 0x260   : > { %2775 = vst [vmem:[%s4073_s27 + $0x48] sm:$0xff] %v2743_v24  ;;  %v2408_v0 = vadd.f32 %v3003_v18, %v2407_v59  ;;  %v2875_v1 = vmul.f32 -1.442695, %v4218_v8  ;;  %v1427_v19 = vpop.f32.mrf.mxu1 }
 0x261   : > { %v3005_v34 = vpop.eup %3004  ;;  %v1811_v61 = vpop.f32.mrf.mxu3  ;;  %2051 = vmatmul.f32.gmra.mxu0 %v1927_v44  ;;  %v1493_v54 = vadd.f32 %v1427_v19, %v3986_v51 }
 0x262   : > { %v3007_v26 = vpop.eup %3006  ;;  %v2420_v20 = vmul.f32 %v3005_v34, %v4207_v38  ;;  %v1879_v40 = vadd.f32 %v1811_v61, %v1686_v28  ;;  %v2412_v13 = vsel %vm2411_vm10, %v3003_v18, %v2408_v0  ;;  %3008 = vpow2.f32 %v2875_v1 }
 0x263   : > { %v4225_v55 = vadd.f32 1.0, %v3007_v26  ;;  %v2417_v9 = vsel %vm2414_vm11, %v2416_v60, %v2412_v13  ;;  %1474 = vmatmul.f32.gmra.mxu1 %v1926_v12  ;;  %1668 = vmatmul.f32.gmra.mxu2 %v3088_v36  ;;  %vm2425_vm12 = vweird.f32 %v3005_v34 }
 0x264   : > { %v2421_v48 = vsub.f32 1.0, %v2420_v20  ;;  %v2072_v25 = vadd.f32 %v2004_v63, %v1879_v40  ;;  %v2744_v47 = vmul.f32 %v2417_v9, %v4174_v5  ;;  %vm2426_vm14 = vmor %vm2424_vm13, %vm2425_vm12 }
 0x265   : > { %3010 = vrcp.f32 %v4225_v55  ;;  %1861 = vmatmul.f32.gmra.mxu3 %v1735_v3  ;;  %v2445_v63 = vand.u32 2147483648, %v4225_v55  ;;  %vm2439_vm1 = vweird.f32 %v4225_v55 }
 0x266   : > { %v2422_v58 = vmul.f32 %v3005_v34, %v2421_v48  ;;  %v4233_v18 = vadd.f32 %v4040_v6, %v2072_v25  ;;  %2776 = vst [vmem:[%s4073_s27 + $0x50] sm:$0xff] %v2744_v47  ;;  %v1621_v35 = vpop.f32.mrf.mxu2  ;;  %v2007_v12 = vpop.f32.mrf.mxu0 }
 0x267   : > { %v1687_v49 = vadd.f32 %v1621_v35, %v1493_v54  ;;  %v2446_v13 = vor.u32 1.1754944e-38, %v2445_v63  ;;  %v4263_v35 = vld [vmem:[%s4451_s4] ss:$0 sm:$0xff] }
 0x268   : > { %v2423_v45 = vadd.f32 %v3005_v34, %v2422_v58  ;;  %v2876_v5 = vmul.f32 -1.442695, %v4233_v18  ;;  %v3009_v39 = vpop.eup %3008  ;;  %v1430_v36 = vpop.f32.mrf.mxu1 }
 0x269   : > { %v1814_v51 = vpop.f32.mrf.mxu3  ;;  %v4238_v62 = vadd.f32 1.0, %v3009_v39  ;;  %2054 = vmatmul.f32.gmra.mxu0 %v1928_v10  ;;  %v1494_v33 = vadd.f32 %v1430_v36, %v3989_v32 }
 0x26a   : > { %v2427_v14 = vsel %vm2426_vm14, %v3005_v34, %v2423_v45  ;;  %3012 = vpow2.f32 %v2876_v5  ;;  %v1880_v16 = vadd.f32 %v1814_v51, %v1687_v49 }
 0x26b   : > { %v3011_v2 = vpop.eup %3010  ;;  %v2432_v24 = vsel %vm2429_vm15, %v2431_v50, %v2427_v14  ;;  %3014 = vrcp.f32 %v4238_v62  ;;  %v2460_v41 = vand.u32 2147483648, %v4238_v62  ;;  %v2458_v54 = vand.u32 2147483647, %v4238_v62 }
 0x26c   : > { %v2745_v38 = vmul.f32 %v2432_v24, %v4190_v29  ;;  %v2435_v31 = vmul.f32 %v3011_v2, %v4225_v55  ;;  %v2073_v59 = vadd.f32 %v2007_v12, %v1880_v16  ;;  %vm2440_vm0 = vweird.f32 %v3011_v2 }
 0x26d   : > { %v2443_v29 = vand.u32 2147483647, %v4225_v55  ;;  %vm2441_vm2 = vmor %vm2439_vm1, %vm2440_vm0  ;;  %vm2454_vm5 = vweird.f32 %v4238_v62  ;;  %v2461_v51 = vor.u32 1.1754944e-38, %v2460_v41  ;;  %vm2459_vm7 = vcmp.eq.f32.partialorder %v2458_v54, 8.507059e+37 }
 0x26e   : > { %2777 = vst [vmem:[%s4073_s27 + $0x58] sm:$0xff] %v2745_v38  ;;  %v2436_v42 = vsub.f32 1.0, %v2435_v31  ;;  %v4247_v44 = vadd.f32 %v4040_v6, %v2073_v59  ;;  %v1624_v28 = vpop.f32.mrf.mxu2  ;;  %v2010_v34 = vpop.f32.mrf.mxu0 }
 0x26f   : > { %v1688_v19 = vadd.f32 %v1624_v28, %v1494_v33  ;;  %vm2444_vm3 = vcmp.eq.f32.partialorder %v2443_v29, 8.507059e+37 }
 0x270   : > { %v3013_v0 = vpop.eup %3012  ;;  %v2437_v1 = vmul.f32 %v3011_v2, %v2436_v42  ;;  %v2877_v26 = vmul.f32 -1.442695, %v4247_v44  ;;  %v1433_v60 = vpop.f32.mrf.mxu1 }
 0x271   : > { %v4250_v61 = vadd.f32 1.0, %v3013_v0  ;;  %v1817_v20 = vpop.f32.mrf.mxu3  ;;  %v3015_v32 = vpop.eup %3014  ;;  %v1495_v55 = vadd.f32 %v1433_v60, %v3992_v4 }
 0x272   : > { %v2438_v40 = vadd.f32 %v3011_v2, %v2437_v1  ;;  %v1881_v6 = vadd.f32 %v1817_v20, %v1688_v19  ;;  %v2450_v3 = vmul.f32 %v3015_v32, %v4238_v62  ;;  %vm2455_vm4 = vweird.f32 %v3015_v32 }
 0x273   : > { %3016 = vrcp.f32 %v4250_v61  ;;  %vm2456_vm6 = vmor %vm2454_vm5, %vm2455_vm4  ;;  %v2473_v42 = vand.u32 2147483647, %v4250_v61  ;;  %v2475_v33 = vand.u32 2147483648, %v4250_v61  ;;  %vm2469_vm9 = vweird.f32 %v4250_v61 }
 0x274   : > { %v2442_v9 = vsel %vm2441_vm2, %v3011_v2, %v2438_v40  ;;  %3018 = vpow2.f32 %v2877_v26  ;;  %v2451_v25 = vsub.f32 1.0, %v2450_v3  ;;  %v2074_v47 = vadd.f32 %v2010_v34, %v1881_v6 }
 0x275   : > { %v2447_v48 = vsel %vm2444_vm3, %v2446_v13, %v2442_v9  ;;  %v2476_v60 = vor.u32 1.1754944e-38, %v2475_v33  ;;  %vm2474_vm11 = vcmp.eq.f32.partialorder %v2473_v42, 8.507059e+37 }
 0x276   : > { %v2746_v46 = vmul.f32 %v2447_v48, %v4204_v22  ;;  %v2452_v58 = vmul.f32 %v3015_v32, %v2451_v25  ;;  %v4266_v12 = vadd.f32 %v4263_v35, %v2074_v47  ;;  %v1627_v10 = vpop.f32.mrf.mxu2  ;;  %v2013_v45 = vpop.f32.mrf.mxu0 }
 0x277   : > { %v1689_v22 = vadd.f32 %v1627_v10, %v1495_v55 }
 0x278   : > { %2778 = vst [vmem:[%s4073_s27 + $0x60] sm:$0xff] %v2746_v46  ;;  %v2453_v49 = vadd.f32 %v3015_v32, %v2452_v58  ;;  %v2878_v4 = vmul.f32 -1.442695, %v4266_v12  ;;  %v1436_v39 = vpop.f32.mrf.mxu1 }
 0x279   : > { %v3017_v5 = vpop.eup %3016  ;;  %v1820_v50 = vpop.f32.mrf.mxu3  ;;  %v1496_v28 = vadd.f32 %v1436_v39, %v3995_v27 }
 0x27a   : > { %v3019_v36 = vpop.eup %3018  ;;  %v2465_v14 = vmul.f32 %v3017_v5, %v4250_v61  ;;  %v1882_v2 = vadd.f32 %v1820_v50, %v1689_v22  ;;  %v2457_v24 = vsel %vm2456_vm6, %v3015_v32, %v2453_v49  ;;  %3020 = vpow2.f32 %v2878_v4 }
 0x27b   : > { %v2237_v16 = vadd.f32 1.0, %v3019_v36  ;;  %v2462_v38 = vsel %vm2459_vm7, %v2461_v51, %v2457_v24  ;;  %vm2470_vm8 = vweird.f32 %v3017_v5 }
 0x27c   : > { %v2466_v31 = vsub.f32 1.0, %v2465_v14  ;;  %v2075_v59 = vadd.f32 %v2013_v45, %v1882_v2  ;;  %v2747_v62 = vmul.f32 %v2462_v38, %v4218_v8  ;;  %vm2471_vm10 = vmor %vm2469_vm9, %vm2470_vm8 }
 0x27d   : > { %3022 = vrcp.f32 %v2237_v16  ;;  %v2490_v46 = vand.u32 2147483648, %v2237_v16  ;;  %v2488_v45 = vand.u32 2147483647, %v2237_v16  ;;  %vm2484_vm13 = vweird.f32 %v2237_v16 }
 0x27e   : > { %v2467_v63 = vmul.f32 %v3017_v5, %v2466_v31  ;;  %v4278_v34 = vadd.f32 %v4263_v35, %v2075_v59  ;;  %2779 = vst [vmem:[%s4073_s27 + $0x68] sm:$0xff] %v2747_v62  ;;  %v1630_v0 = vpop.f32.mrf.mxu2  ;;  %v2016_v1 = vpop.f32.mrf.mxu0 }
 0x27f   : > { %v1690_v19 = vadd.f32 %v1630_v0, %v1496_v28  ;;  %v2491_v36 = vor.u32 1.1754944e-38, %v2490_v46  ;;  %vm2489_vm15 = vcmp.eq.f32.partialorder %v2488_v45, 8.507059e+37 }
 0x280   : > { %v2468_v29 = vadd.f32 %v3017_v5, %v2467_v63  ;;  %v2879_v8 = vmul.f32 -1.442695, %v4278_v34  ;;  %v3021_v26 = vpop.eup %3020  ;;  %v1439_v20 = vpop.f32.mrf.mxu1 }
 0x281   : > { %v1823_v32 = vpop.f32.mrf.mxu3  ;;  %v4283_v27 = vadd.f32 1.0, %v3021_v26  ;;  %v1497_v47 = vadd.f32 %v1439_v20, %v3998_v11 }
 0x282   : > { %v2472_v40 = vsel %vm2471_vm10, %v3017_v5, %v2468_v29  ;;  %3024 = vpow2.f32 %v2879_v8  ;;  %v1883_v3 = vadd.f32 %v1823_v32, %v1690_v19 }
 0x283   : > { %v3023_v6 = vpop.eup %3022  ;;  %v2477_v13 = vsel %vm2474_vm11, %v2476_v60, %v2472_v40  ;;  %3026 = vrcp.f32 %v4283_v27  ;;  %v2505_v59 = vand.u32 2147483648, %v4283_v27  ;;  %v2503_v42 = vand.u32 2147483647, %v4283_v27 }
 0x284   : > { %v2748_v9 = vmul.f32 %v2477_v13, %v4233_v18  ;;  %v2480_v61 = vmul.f32 %v3023_v6, %v2237_v16  ;;  %v2076_v48 = vadd.f32 %v2016_v1, %v1883_v3  ;;  %vm2485_vm12 = vweird.f32 %v3023_v6 }
 0x285   : > { %vm2486_vm14 = vmor %vm2484_vm13, %vm2485_vm12  ;;  %vm2499_vm1 = vweird.f32 %v4283_v27  ;;  %v2506_v26 = vor.u32 1.1754944e-38, %v2505_v59  ;;  %vm2504_vm3 = vcmp.eq.f32.partialorder %v2503_v42, 8.507059e+37 }
 0x286   : > { %2780 = vst [vmem:[%s4073_s27 + $0x70] sm:$0xff] %v2748_v9  ;;  %v2481_v25 = vsub.f32 1.0, %v2480_v61  ;;  %v4290_v41 = vadd.f32 %v4263_v35, %v2076_v48  ;;  %v1633_v55 = vpop.f32.mrf.mxu2  ;;  %v2019_v58 = vpop.f32.mrf.mxu0 }
 0x287   : > { %v1691_v22 = vadd.f32 %v1633_v55, %v1497_v47 }
 0x288   : > { %v3025_v54 = vpop.eup %3024  ;;  %v2482_v10 = vmul.f32 %v3023_v6, %v2481_v25  ;;  %v2880_v5 = vmul.f32 -1.442695, %v4290_v41  ;;  %v1442_v49 = vpop.f32.mrf.mxu1 }
 0x289   : > { %v4292_v18 = vadd.f32 1.0, %v3025_v54  ;;  %v1826_v4 = vpop.f32.mrf.mxu3  ;;  %v3027_v39 = vpop.eup %3026  ;;  %v1498_v16 = vadd.f32 %v1442_v49, %v4001_v53 }
 0x28a   : > { %v2483_v50 = vadd.f32 %v3023_v6, %v2482_v10  ;;  %v1884_v11 = vadd.f32 %v1826_v4, %v1691_v22  ;;  %v2495_v51 = vmul.f32 %v3027_v39, %v4283_v27  ;;  %vm2500_vm0 = vweird.f32 %v3027_v39 }
 0x28b   : > { %3028 = vrcp.f32 %v4292_v18  ;;  %vm2501_vm2 = vmor %vm2499_vm1, %vm2500_vm0  ;;  %v2518_v9 = vand.u32 2147483647, %v4292_v18  ;;  %v2520_v61 = vand.u32 2147483648, %v4292_v18  ;;  %vm2514_vm5 = vweird.f32 %v4292_v18 }
 0x28c   : > { %v2487_v14 = vsel %vm2486_vm14, %v3023_v6, %v2483_v50  ;;  %3030 = vpow2.f32 %v2880_v5  ;;  %v2496_v24 = vsub.f32 1.0, %v2495_v51  ;;  %v2077_v38 = vadd.f32 %v2019_v58, %v1884_v11 }
 0x28d   : > { %v2492_v2 = vsel %vm2489_vm15, %v2491_v36, %v2487_v14  ;;  %v2521_v45 = vor.u32 1.1754944e-38, %v2520_v61  ;;  %vm2519_vm7 = vcmp.eq.f32.partialorder %v2518_v9, 8.507059e+37 }
 0x28e   : > { %v2749_v31 = vmul.f32 %v2492_v2, %v4247_v44  ;;  %v2497_v62 = vmul.f32 %v3027_v39, %v2496_v24  ;;  %v4302_v33 = vadd.f32 %v4263_v35, %v2077_v38  ;;  %v1636_v63 = vpop.f32.mrf.mxu2  ;;  %v2022_v28 = vpop.f32.mrf.mxu0 }
 0x28f   : > { %v1692_v0 = vadd.f32 %v1636_v63, %v1498_v16 }
 0x290   : > { %2781 = vst [vmem:[%s4073_s27 + $0x78] sm:$0xff] %v2749_v31  ;;  %v2498_v29 = vadd.f32 %v3027_v39, %v2497_v62  ;;  %v2881_v44 = vmul.f32 -1.442695, %v4302_v33  ;;  %v1445_v8 = vpop.f32.mrf.mxu1 }
 0x291   : > { %v3029_v1 = vpop.eup %3028  ;;  %v1829_v19 = vpop.f32.mrf.mxu3  ;;  %v1499_v25 = vadd.f32 %v1445_v8, %v4004_v21 }
 0x292   : > { %v3031_v53 = vpop.eup %3030  ;;  %v2510_v60 = vmul.f32 %v3029_v1, %v4292_v18  ;;  %v1885_v20 = vadd.f32 %v1829_v19, %v1692_v0  ;;  %v2502_v32 = vsel %vm2501_vm2, %v3027_v39, %v2498_v29  ;;  %3032 = vpow2.f32 %v2881_v44 }
 0x293   : > { %v2240_v40 = vadd.f32 1.0, %v3031_v53  ;;  %v2507_v6 = vsel %vm2504_vm3, %v2506_v26, %v2502_v32  ;;  %vm2515_vm4 = vweird.f32 %v3029_v1 }
 0x294   : > { %v2511_v13 = vsub.f32 1.0, %v2510_v60  ;;  %v2078_v3 = vadd.f32 %v2022_v28, %v1885_v20  ;;  %v2750_v27 = vmul.f32 %v2507_v6, %v4266_v12  ;;  %vm2516_vm6 = vmor %vm2514_vm5, %vm2515_vm4 }
 0x295   : > { %3034 = vrcp.f32 %v2240_v40  ;;  %v2535_v2 = vand.u32 2147483648, %v2240_v40  ;;  %v2533_v62 = vand.u32 2147483647, %v2240_v40  ;;  %vm2529_vm9 = vweird.f32 %v2240_v40 }
 0x296   : > { %v2512_v48 = vmul.f32 %v3029_v1, %v2511_v13  ;;  %v4313_v47 = vadd.f32 %v4263_v35, %v2078_v3  ;;  %2782 = vst [vmem:[%s4073_s27 + $0x80] sm:$0xff] %v2750_v27  ;;  %v1639_v46 = vpop.f32.mrf.mxu2  ;;  %v2025_v55 = vpop.f32.mrf.mxu0 }
 0x297   : > { %v1693_v54 = vadd.f32 %v1639_v46, %v1499_v25  ;;  %v2536_v44 = vor.u32 1.1754944e-38, %v2535_v2  ;;  %vm2534_vm11 = vcmp.eq.f32.partialorder %v2533_v62, 8.507059e+37 }
 0x298   : > { %v2513_v58 = vadd.f32 %v3029_v1, %v2512_v48  ;;  %v2882_v12 = vmul.f32 -1.442695, %v4313_v47  ;;  %v3033_v10 = vpop.eup %3032  ;;  %v1448_v22 = vpop.f32.mrf.mxu1 }
 0x299   : > { %v1832_v5 = vpop.f32.mrf.mxu3  ;;  %v4318_v21 = vadd.f32 1.0, %v3033_v10  ;;  %v1500_v14 = vadd.f32 %v1448_v22, %v4007_v52 }
 0x29a   : > { %v2517_v49 = vsel %vm2516_vm6, %v3029_v1, %v2513_v58  ;;  %3036 = vpow2.f32 %v2882_v12  ;;  %v1886_v50 = vadd.f32 %v1832_v5, %v1693_v54 }
 0x29b   : > { %v3035_v4 = vpop.eup %3034  ;;  %v2522_v39 = vsel %vm2519_vm7, %v2521_v45, %v2517_v49  ;;  %3038 = vrcp.f32 %v4318_v21  ;;  %v2550_v32 = vand.u32 2147483648, %v4318_v21  ;;  %v2548_v13 = vand.u32 2147483647, %v4318_v21 }
 0x29c   : > { %v2751_v11 = vmul.f32 %v2522_v39, %v4278_v34  ;;  %v2525_v18 = vmul.f32 %v3035_v4, %v2240_v40  ;;  %v2079_v36 = vadd.f32 %v2025_v55, %v1886_v50  ;;  %vm2530_vm8 = vweird.f32 %v3035_v4 }
 0x29d   : > { %vm2531_vm10 = vmor %vm2529_vm9, %vm2530_vm8  ;;  %vm2544_vm13 = vweird.f32 %v4318_v21  ;;  %v2551_v58 = vor.u32 1.1754944e-38, %v2550_v32  ;;  %vm2549_vm15 = vcmp.eq.f32.partialorder %v2548_v13, 8.507059e+37 }
 0x29e   : > { %2783 = vst [vmem:[%s4073_s27 + $0x88] sm:$0xff] %v2751_v11  ;;  %v2526_v51 = vsub.f32 1.0, %v2525_v18  ;;  %v4325_v24 = vadd.f32 %v4263_v35, %v2079_v36  ;;  %v1642_v38 = vpop.f32.mrf.mxu2  ;;  %v2028_v31 = vpop.f32.mrf.mxu0 }
 0x29f   : > { %v1694_v42 = vadd.f32 %v1642_v38, %v1500_v14 }
 0x2a0   : > { %v3037_v59 = vpop.eup %3036  ;;  %v2527_v16 = vmul.f32 %v3035_v4, %v2526_v51  ;;  %v2883_v63 = vmul.f32 -1.442695, %v4325_v24  ;;  %v1451_v28 = vpop.f32.mrf.mxu1 }
 0x2a1   : > { %v4327_v34 = vadd.f32 1.0, %v3037_v59  ;;  %v1835_v0 = vpop.f32.mrf.mxu3  ;;  %v3039_v1 = vpop.eup %3038  ;;  %v1501_v40 = vadd.f32 %v1451_v28, %v4010_v30 }
 0x2a2   : > { %v2528_v29 = vadd.f32 %v3035_v4, %v2527_v16  ;;  %v1887_v52 = vadd.f32 %v1835_v0, %v1694_v42  ;;  %v2540_v8 = vmul.f32 %v3039_v1, %v4318_v21  ;;  %vm2545_vm12 = vweird.f32 %v3039_v1 }
 0x2a3   : > { %3040 = vrcp.f32 %v4327_v34  ;;  %vm2546_vm14 = vmor %vm2544_vm13, %vm2545_vm12  ;;  %v2565_v39 = vand.u32 2147483648, %v4327_v34  ;;  %vm2559_vm1 = vweird.f32 %v4327_v34 }
 0x2a4   : > { %v2532_v19 = vsel %vm2531_vm10, %v3035_v4, %v2528_v29  ;;  %3042 = vpow2.f32 %v2883_v63  ;;  %v2541_v26 = vsub.f32 1.0, %v2540_v8  ;;  %v2080_v60 = vadd.f32 %v2028_v31, %v1887_v52 }
 0x2a5   : > { %v2537_v53 = vsel %vm2534_vm11, %v2536_v44, %v2532_v19  ;;  %v2563_v4 = vand.u32 2147483647, %v4327_v34  ;;  %v2566_v31 = vor.u32 1.1754944e-38, %v2565_v39 }
 0x2a6   : > { %v2752_v20 = vmul.f32 %v2537_v53, %v4290_v41  ;;  %v2542_v6 = vmul.f32 %v3039_v1, %v2541_v26  ;;  %v4337_v3 = vadd.f32 %v4263_v35, %v2080_v60  ;;  %v1645_v27 = vpop.f32.mrf.mxu2  ;;  %v2031_v9 = vpop.f32.mrf.mxu0 }
 0x2a7   : > { %v1695_v61 = vadd.f32 %v1645_v27, %v1501_v40  ;;  %vm2564_vm3 = vcmp.eq.f32.partialorder %v2563_v4, 8.507059e+37 }
 0x2a8   : > { %2784 = vst [vmem:[%s4073_s27 + $0x90] sm:$0xff] %v2752_v20  ;;  %v2543_v25 = vadd.f32 %v3039_v1, %v2542_v6  ;;  %v2884_v41 = vmul.f32 -1.442695, %v4337_v3  ;;  %v1454_v46 = vpop.f32.mrf.mxu1 }
 0x2a9   : > { %v3041_v48 = vpop.eup %3040  ;;  %v1838_v55 = vpop.f32.mrf.mxu3  ;;  %v1502_v11 = vadd.f32 %v1454_v46, %v4013_v15 }
 0x2aa   : > { %v3043_v30 = vpop.eup %3042  ;;  %v2555_v12 = vmul.f32 %v3041_v48, %v4327_v34  ;;  %v1888_v54 = vadd.f32 %v1838_v55, %v1695_v61  ;;  %v2547_v10 = vsel %vm2546_vm14, %v3039_v1, %v2543_v25  ;;  %3044 = vpow2.f32 %v2884_v41 }
 0x2ab   : > { %v2243_v45 = vadd.f32 1.0, %v3043_v30  ;;  %v2552_v22 = vsel %vm2549_vm15, %v2551_v58, %v2547_v10  ;;  %vm2560_vm0 = vweird.f32 %v3041_v48 }
 0x2ac   : > { %v2556_v5 = vsub.f32 1.0, %v2555_v12  ;;  %v2081_v49 = vadd.f32 %v2031_v9, %v1888_v54  ;;  %v2753_v21 = vmul.f32 %v2552_v22, %v4302_v33  ;;  %vm2561_vm2 = vmor %vm2559_vm1, %vm2560_vm0 }
 0x2ad   : > { %3046 = vrcp.f32 %v2243_v45  ;;  %v2580_v44 = vand.u32 2147483648, %v2243_v45  ;;  %v2578_v20 = vand.u32 2147483647, %v2243_v45  ;;  %vm2574_vm5 = vweird.f32 %v2243_v45 }
 0x2ae   : > { %v2557_v50 = vmul.f32 %v3041_v48, %v2556_v5  ;;  %v4348_v18 = vadd.f32 %v4263_v35, %v2081_v49  ;;  %2785 = vst [vmem:[%s4073_s27 + $0x98] sm:$0xff] %v2753_v21  ;;  %v1648_v36 = vpop.f32.mrf.mxu2  ;;  %v2034_v51 = vpop.f32.mrf.mxu0 }
 0x2af   : > { %v1696_v2 = vadd.f32 %v1648_v36, %v1502_v11  ;;  %v2581_v61 = vor.u32 1.1754944e-38, %v2580_v44  ;;  %vm2579_vm7 = vcmp.eq.f32.partialorder %v2578_v20, 8.507059e+37 }
 0x2b0   : > { %v2558_v14 = vadd.f32 %v3041_v48, %v2557_v50  ;;  %v2885_v33 = vmul.f32 -1.442695, %v4348_v18  ;;  %v3045_v38 = vpop.eup %3044  ;;  %v1457_v59 = vpop.f32.mrf.mxu1 }
 0x2b1   : > { %v1841_v16 = vpop.f32.mrf.mxu3  ;;  %v4353_v15 = vadd.f32 1.0, %v3045_v38  ;;  %v1503_v52 = vadd.f32 %v1457_v59, %v4016_v57 }
 0x2b2   : > { %v2562_v62 = vsel %vm2561_vm2, %v3041_v48, %v2558_v14  ;;  %3048 = vpow2.f32 %v2885_v33  ;;  %v1889_v28 = vadd.f32 %v1841_v16, %v1696_v2 }
 0x2b3   : > { %v3047_v42 = vpop.eup %3046  ;;  %v2567_v63 = vsel %vm2564_vm3, %v2566_v31, %v2562_v62  ;;  %3050 = vrcp.f32 %v4353_v15  ;;  %v2595_v58 = vand.u32 2147483648, %v4353_v15  ;;  %v2593_v10 = vand.u32 2147483647, %v4353_v15 }
 0x2b4   : > { %v2754_v0 = vmul.f32 %v2567_v63, %v4313_v47  ;;  %v2570_v34 = vmul.f32 %v3047_v42, %v2243_v45  ;;  %v2082_v1 = vadd.f32 %v2034_v51, %v1889_v28  ;;  %vm2575_vm4 = vweird.f32 %v3047_v42 }
 0x2b5   : > { %vm2576_vm6 = vmor %vm2574_vm5, %vm2575_vm4  ;;  %vm2589_vm9 = vweird.f32 %v4353_v15  ;;  %v2596_v11 = vor.u32 1.1754944e-38, %v2595_v58  ;;  %vm2594_vm11 = vcmp.eq.f32.partialorder %v2593_v10, 8.507059e+37 }
 0x2b6   : > { %2786 = vst [vmem:[%s4073_s27 + $0xa0] sm:$0xff] %v2754_v0  ;;  %v2571_v29 = vsub.f32 1.0, %v2570_v34  ;;  %v4360_v8 = vadd.f32 %v4263_v35, %v2082_v1  ;;  %v1651_v19 = vpop.f32.mrf.mxu2  ;;  %v2037_v53 = vpop.f32.mrf.mxu0 }
 0x2b7   : > { %v1697_v32 = vadd.f32 %v1651_v19, %v1503_v52 }
 0x2b8   : > { %v3049_v26 = vpop.eup %3048  ;;  %v2572_v60 = vmul.f32 %v3047_v42, %v2571_v29  ;;  %v2886_v40 = vmul.f32 -1.442695, %v4360_v8  ;;  %v1460_v6 = vpop.f32.mrf.mxu1 }
 0x2b9   : > { %v4362_v47 = vadd.f32 1.0, %v3049_v26  ;;  %v1844_v13 = vpop.f32.mrf.mxu3  ;;  %v3051_v27 = vpop.eup %3050  ;;  %v1504_v12 = vadd.f32 %v1460_v6, %v4019_v37 }
 0x2ba   : > { %v2573_v9 = vadd.f32 %v3047_v42, %v2572_v60  ;;  %v1890_v57 = vadd.f32 %v1844_v13, %v1697_v32  ;;  %v2585_v48 = vmul.f32 %v3051_v27, %v4353_v15  ;;  %vm2590_vm8 = vweird.f32 %v3051_v27 }
 0x2bb   : > { %3052 = vrcp.f32 %v4362_v47  ;;  %vm2591_vm10 = vmor %vm2589_vm9, %vm2590_vm8  ;;  %v2608_v16 = vand.u32 2147483647, %v4362_v47  ;;  %v2610_v62 = vand.u32 2147483648, %v4362_v47  ;;  %vm2604_vm13 = vweird.f32 %v4362_v47 }
 0x2bc   : > { %v2577_v25 = vsel %vm2576_vm6, %v3047_v42, %v2573_v9  ;;  %3054 = vpow2.f32 %v2886_v40  ;;  %v2586_v46 = vsub.f32 1.0, %v2585_v48  ;;  %v2083_v55 = vadd.f32 %v2037_v53, %v1890_v57 }
 0x2bd   : > { %v2582_v41 = vsel %vm2579_vm7, %v2581_v61, %v2577_v25  ;;  %v2611_v52 = vor.u32 1.1754944e-38, %v2610_v62  ;;  %vm2609_vm15 = vcmp.eq.f32.partialorder %v2608_v16, 8.507059e+37 }
 0x2be   : > { %v2755_v30 = vmul.f32 %v2582_v41, %v4325_v24  ;;  %v2587_v54 = vmul.f32 %v3051_v27, %v2586_v46  ;;  %v4372_v45 = vadd.f32 %v4263_v35, %v2083_v55  ;;  %v1654_v22 = vpop.f32.mrf.mxu2  ;;  %v2040_v5 = vpop.f32.mrf.mxu0 }
 0x2bf   : > { %v1698_v49 = vadd.f32 %v1654_v22, %v1504_v12 }
 0x2c0   : > { %2787 = vst [vmem:[%s4073_s27 + $0xa8] sm:$0xff] %v2755_v30  ;;  %v2588_v4 = vadd.f32 %v3051_v27, %v2587_v54  ;;  %v2887_v24 = vmul.f32 -1.442695, %v4372_v45  ;;  %v1463_v39 = vpop.f32.mrf.mxu1 }
 0x2c1   : > { %v3053_v21 = vpop.eup %3052  ;;  %v1847_v50 = vpop.f32.mrf.mxu3  ;;  %v1505_v42 = vadd.f32 %v1463_v39, %v4022_v43 }
 0x2c2   : > { %v3055_v37 = vpop.eup %3054  ;;  %v2600_v36 = vmul.f32 %v3053_v21, %v4362_v47  ;;  %v1891_v51 = vadd.f32 %v1847_v50, %v1698_v49  ;;  %v2592_v14 = vsel %vm2591_vm10, %v3051_v27, %v2588_v4  ;;  %3056 = vpow2.f32 %v2887_v24 }
 0x2c3   : > { %v2246_v33 = vadd.f32 1.0, %v3055_v37  ;;  %v2597_v2 = vsel %vm2594_vm11, %v2596_v11, %v2592_v14  ;;  %vm2605_vm12 = vweird.f32 %v3053_v21 }
 0x2c4   : > { %v2601_v38 = vsub.f32 1.0, %v2600_v36  ;;  %v2084_v31 = vadd.f32 %v2040_v5, %v1891_v51  ;;  %v2756_v59 = vmul.f32 %v2597_v2, %v4337_v3  ;;  %vm2606_vm14 = vmor %vm2604_vm13, %vm2605_vm12 }
 0x2c5   : > { %3058 = vrcp.f32 %v2246_v33  ;;  %v2625_v27 = vand.u32 2147483648, %v2246_v33  ;;  %v2623_v41 = vand.u32 2147483647, %v2246_v33  ;;  %vm2619_vm1 = vweird.f32 %v2246_v33 }
 0x2c6   : > { %v2602_v15 = vmul.f32 %v3053_v21, %v2601_v38  ;;  %v4383_v63 = vadd.f32 %v4263_v35, %v2084_v31  ;;  %2788 = vst [vmem:[%s4073_s27 + $0xb0] sm:$0xff] %v2756_v59  ;;  %v1657_v28 = vpop.f32.mrf.mxu2  ;;  %v2043_v0 = vpop.f32.mrf.mxu0 }
 0x2c7   : > { %v1699_v1 = vadd.f32 %v1657_v28, %v1505_v42  ;;  %v2626_v10 = vor.u32 1.1754944e-38, %v2625_v27  ;;  %vm2624_vm3 = vcmp.eq.f32.partialorder %v2623_v41, 8.507059e+37 }
 0x2c8   : > { %v2603_v34 = vadd.f32 %v3053_v21, %v2602_v15  ;;  %v2888_v3 = vmul.f32 -1.442695, %v4383_v63  ;;  %v3057_v29 = vpop.eup %3056  ;;  %v1466_v44 = vpop.f32.mrf.mxu1 }
 0x2c9   : > { %v1850_v19 = vpop.f32.mrf.mxu3  ;;  %v4388_v43 = vadd.f32 1.0, %v3057_v29  ;;  %v1506_v13 = vadd.f32 %v1466_v44, %v4025_v56 }
 0x2ca   : > { %v2607_v53 = vsel %vm2606_vm14, %v3053_v21, %v2603_v34  ;;  %3060 = vpow2.f32 %v2888_v3  ;;  %v1892_v20 = vadd.f32 %v1850_v19, %v1699_v1 }
 0x2cb   : > { %v3059_v26 = vpop.eup %3058  ;;  %v2612_v60 = vsel %vm2609_vm15, %v2611_v52, %v2607_v53  ;;  %3062 = vrcp.f32 %v4388_v43  ;;  %v2640_v39 = vand.u32 2147483648, %v4388_v43  ;;  %v2638_v11 = vand.u32 2147483647, %v4388_v43 }
 0x2cc   : > { %v2757_v32 = vmul.f32 %v2612_v60, %v4348_v18  ;;  %v2615_v47 = vmul.f32 %v3059_v26, %v2246_v33  ;;  %v2085_v40 = vadd.f32 %v2043_v0, %v1892_v20  ;;  %vm2620_vm0 = vweird.f32 %v3059_v26 }
 0x2cd   : > { %vm2621_vm2 = vmor %vm2619_vm1, %vm2620_vm0  ;;  %vm2634_vm5 = vweird.f32 %v4388_v43  ;;  %v2641_v16 = vor.u32 1.1754944e-38, %v2640_v39  ;;  %vm2639_vm7 = vcmp.eq.f32.partialorder %v2638_v11, 8.507059e+37 }
 0x2ce   : > { %2789 = vst [vmem:[%s4073_s27 + $0xb8] sm:$0xff] %v2757_v32  ;;  %v2616_v6 = vsub.f32 1.0, %v2615_v47  ;;  %v4395_v9 = vadd.f32 %v4263_v35, %v2085_v40  ;;  %v1660_v57 = vpop.f32.mrf.mxu2  ;;  %v2046_v61 = vpop.f32.mrf.mxu0 }
 0x2cf   : > { %v1700_v46 = vadd.f32 %v1660_v57, %v1506_v13 }
 0x2d0   : > { %v3061_v48 = vpop.eup %3060  ;;  %v2617_v25 = vmul.f32 %v3059_v26, %v2616_v6  ;;  %v2889_v55 = vmul.f32 -1.442695, %v4395_v9  ;;  %v1469_v30 = vpop.f32.mrf.mxu1 }
 0x2d1   : > { %v4397_v18 = vadd.f32 1.0, %v3061_v48  ;;  %v1853_v58 = vpop.f32.mrf.mxu3  ;;  %v3063_v12 = vpop.eup %3062  ;;  %v1507_v50 = vadd.f32 %v1469_v30, %v4028_v23 }
 0x2d2   : > { %v2618_v54 = vadd.f32 %v3059_v26, %v2617_v25  ;;  %v1893_v56 = vadd.f32 %v1853_v58, %v1700_v46  ;;  %v2630_v22 = vmul.f32 %v3063_v12, %v4388_v43  ;;  %vm2635_vm4 = vweird.f32 %v3063_v12 }
 0x2d3   : > { %3064 = vrcp.f32 %v4397_v18  ;;  %vm2636_vm6 = vmor %vm2634_vm5, %vm2635_vm4  ;;  %v2653_v29 = vand.u32 2147483647, %v4397_v18  ;;  %v2655_v52 = vand.u32 2147483648, %v4397_v18  ;;  %vm2649_vm9 = vweird.f32 %v4397_v18 }
 0x2d4   : > { %v2622_v5 = vsel %vm2621_vm2, %v3059_v26, %v2618_v54  ;;  %3066 = vpow2.f32 %v2889_v55  ;;  %v2631_v21 = vsub.f32 1.0, %v2630_v22  ;;  %v2086_v4 = vadd.f32 %v2046_v61, %v1893_v56 }
 0x2d5   : > { %v2627_v49 = vsel %vm2624_vm3, %v2626_v10, %v2622_v5  ;;  %v2656_v47 = vor.u32 1.1754944e-38, %v2655_v52  ;;  %vm2654_vm11 = vcmp.eq.f32.partialorder %v2653_v29, 8.507059e+37 }
 0x2d6   : > { %v2758_v24 = vmul.f32 %v2627_v49, %v4360_v8  ;;  %v2632_v37 = vmul.f32 %v3063_v12, %v2631_v21  ;;  %v4407_v36 = vadd.f32 %v4263_v35, %v2086_v4  ;;  %v1663_v51 = vpop.f32.mrf.mxu2  ;;  %v2049_v14 = vpop.f32.mrf.mxu0 }
 0x2d7   : > { %v1701_v33 = vadd.f32 %v1663_v51, %v1507_v50 }
 0x2d8   : > { %2790 = vst [vmem:[%s4073_s27 + $0xc0] sm:$0xff] %v2758_v24  ;;  %v2633_v38 = vadd.f32 %v3063_v12, %v2632_v37  ;;  %v2890_v8 = vmul.f32 -1.442695, %v4407_v36  ;;  %v1472_v31 = vpop.f32.mrf.mxu1 }
 0x2d9   : > { %v3065_v2 = vpop.eup %3064  ;;  %v1856_v59 = vpop.f32.mrf.mxu3  ;;  %v1508_v19 = vadd.f32 %v1472_v31, %v4031_v7 }
 0x2da   : > { %v3067_v23 = vpop.eup %3066  ;;  %v2645_v62 = vmul.f32 %v3065_v2, %v4397_v18  ;;  %v1894_v15 = vadd.f32 %v1856_v59, %v1701_v33  ;;  %v2637_v42 = vsel %vm2636_vm6, %v3063_v12, %v2633_v38  ;;  %3068 = vpow2.f32 %v2890_v8 }
 0x2db   : > { %v2249_v28 = vadd.f32 1.0, %v3067_v23  ;;  %v2642_v0 = vsel %vm2639_vm7, %v2641_v16, %v2637_v42  ;;  %vm2650_vm8 = vweird.f32 %v3065_v2 }
 0x2dc   : > { %v2646_v34 = vsub.f32 1.0, %v2645_v62  ;;  %v2087_v3 = vadd.f32 %v2049_v14, %v1894_v15  ;;  %v2759_v1 = vmul.f32 %v2642_v0, %v4372_v45  ;;  %vm2651_vm10 = vmor %vm2649_vm9, %vm2650_vm8 }
 0x2dd   : > { %3070 = vrcp.f32 %v2249_v28  ;;  %v2670_v55 = vand.u32 2147483648, %v2249_v28  ;;  %v2668_v56 = vand.u32 2147483647, %v2249_v28  ;;  %vm2664_vm13 = vweird.f32 %v2249_v28 }
 0x2de   : > { %v2647_v44 = vmul.f32 %v3065_v2, %v2646_v34  ;;  %v4418_v53 = vadd.f32 %v4263_v35, %v2087_v3  ;;  %2791 = vst [vmem:[%s4073_s27 + $0xc8] sm:$0xff] %v2759_v1  ;;  %v1666_v43 = vpop.f32.mrf.mxu2  ;;  %v2052_v20 = vpop.f32.mrf.mxu0 }
 0x2df   : > { %v1702_v45 = vadd.f32 %v1666_v43, %v1508_v19  ;;  %vm2669_vm15 = vcmp.eq.f32.partialorder %v2668_v56, 8.507059e+37 }
 0x2e0   : > { %v2648_v26 = vadd.f32 %v3065_v2, %v2647_v44  ;;  %v2891_v60 = vmul.f32 -1.442695, %v4418_v53  ;;  %v3069_v32 = vpop.eup %3068  ;;  %v1475_v57 = vpop.f32.mrf.mxu1 }
 0x2e1   : > { %v1859_v40 = vpop.f32.mrf.mxu3  ;;  %v2250_v7 = vadd.f32 1.0, %v3069_v32  ;;  %v1509_v18 = vadd.f32 %v1475_v57, %v4034_v17  ;;  %v2671_v17 = vor.u32 1.1754944e-38, %v2670_v55 }
 0x2e2   : > { %v2652_v6 = vsel %vm2651_vm10, %v3065_v2, %v2648_v26  ;;  %3072 = vpow2.f32 %v2891_v60  ;;  %v1895_v61 = vadd.f32 %v1859_v40, %v1702_v45 }
 0x2e3   : > { %v3071_v13 = vpop.eup %3070  ;;  %v2657_v27 = vsel %vm2654_vm11, %v2656_v47, %v2652_v6  ;;  %3074 = vrcp.f32 %v2250_v7  ;;  %v2685_v33 = vand.u32 2147483648, %v2250_v7  ;;  %v2683_v38 = vand.u32 2147483647, %v2250_v7 }
 0x2e4   : > { %v2760_v48 = vmul.f32 %v2657_v27, %v4383_v63  ;;  %v2660_v25 = vmul.f32 %v3071_v13, %v2249_v28  ;;  %v2088_v41 = vadd.f32 %v2052_v20, %v1895_v61  ;;  %vm2665_vm12 = vweird.f32 %v3071_v13 }
 0x2e5   : > { %vm2666_vm14 = vmor %vm2664_vm13, %vm2665_vm12  ;;  %vm2679_vm1 = vweird.f32 %v2250_v7  ;;  %v2686_v62 = vor.u32 1.1754944e-38, %v2685_v33  ;;  %vm2684_vm3 = vcmp.eq.f32.partialorder %v2683_v38, 8.507059e+37 }
 0x2e6   : > { %2792 = vst [vmem:[%s4073_s27 + $0xd0] sm:$0xff] %v2760_v48  ;;  %v2661_v46 = vsub.f32 1.0, %v2660_v25  ;;  %v4427_v30 = vadd.f32 %v4263_v35, %v2088_v41  ;;  %v1669_v58 = vpop.f32.mrf.mxu2  ;;  %v2055_v24 = vpop.f32.mrf.mxu0 }
 0x2e7   : > { %v1703_v10 = vadd.f32 %v1669_v58, %v1509_v18 }
 0x2e8   : > { %v3073_v12 = vpop.eup %3072  ;;  %v2662_v54 = vmul.f32 %v3071_v13, %v2661_v46  ;;  %v2892_v63 = vmul.f32 -1.442695, %v4427_v30 }
 0x2e9   : > { %v2251_v22 = vadd.f32 1.0, %v3073_v12  ;;  %v1862_v5 = vpop.f32.mrf.mxu3  ;;  %v3075_v49 = vpop.eup %3074 }
 0x2ea   : > { %v2663_v21 = vadd.f32 %v3071_v13, %v2662_v54  ;;  %v1896_v4 = vadd.f32 %v1862_v5, %v1703_v10  ;;  %v2675_v39 = vmul.f32 %v3075_v49, %v2250_v7  ;;  %vm2680_vm0 = vweird.f32 %v3075_v49 }
 0x2eb   : > { %3076 = vrcp.f32 %v2251_v22  ;;  %vm2681_vm2 = vmor %vm2679_vm1, %vm2680_vm0  ;;  %v2700_v34 = vand.u32 2147483648, %v2251_v22  ;;  %v2698_v1 = vand.u32 2147483647, %v2251_v22  ;;  %vm2694_vm5 = vweird.f32 %v2251_v22 }
 0x2ec   : > { %v2667_v50 = vsel %vm2666_vm14, %v3071_v13, %v2663_v21  ;;  %3078 = vpow2.f32 %v2892_v63  ;;  %v2676_v11 = vsub.f32 1.0, %v2675_v39  ;;  %v2089_v51 = vadd.f32 %v2055_v24, %v1896_v4 }
 0x2ed   : > { %v2672_v37 = vsel %vm2669_vm15, %v2671_v17, %v2667_v50  ;;  %v2701_v44 = vor.u32 1.1754944e-38, %v2700_v34  ;;  %vm2699_vm7 = vcmp.eq.f32.partialorder %v2698_v1, 8.507059e+37 }
 0x2ee   : > { %v2761_v14 = vmul.f32 %v2672_v37, %v4395_v9  ;;  %v2677_v2 = vmul.f32 %v3075_v49, %v2676_v11  ;;  %v4432_v8 = vadd.f32 %v4263_v35, %v2089_v51 }
 0x2f0   : > { %2793 = vst [vmem:[%s4073_s27 + $0xd8] sm:$0xff] %v2761_v14  ;;  %v2678_v59 = vadd.f32 %v3075_v49, %v2677_v2  ;;  %v2893_v23 = vmul.f32 -1.442695, %v4432_v8 }
 0x2f1   : > { %v3077_v31 = vpop.eup %3076 }
 0x2f2   : > { %v3079_v16 = vpop.eup %3078  ;;  %v2690_v15 = vmul.f32 %v3077_v31, %v2251_v22  ;;  %v2682_v42 = vsel %vm2681_vm2, %v3075_v49, %v2678_v59  ;;  %3080 = vpow2.f32 %v2893_v23  ;;  %vm2695_vm4 = vweird.f32 %v3077_v31 }
 0x2f3   : > { %v2252_v9 = vadd.f32 1.0, %v3079_v16  ;;  %v2687_v28 = vsel %vm2684_vm3, %v2686_v62, %v2682_v42  ;;  %vm2696_vm6 = vmor %vm2694_vm5, %vm2695_vm4 }
 0x2f4   : > { %v2691_v0 = vsub.f32 1.0, %v2690_v15  ;;  %v2762_v35 = vmul.f32 %v2687_v28, %v4407_v36 }
 0x2f5   : > { %3082 = vrcp.f32 %v2252_v9  ;;  %v2715_v32 = vand.u32 2147483648, %v2252_v9  ;;  %v2713_v40 = vand.u32 2147483647, %v2252_v9  ;;  %vm2709_vm9 = vweird.f32 %v2252_v9 }
 0x2f6   : > { %v2692_v3 = vmul.f32 %v3077_v31, %v2691_v0  ;;  %2794 = vst [vmem:[%s4073_s27 + $0xe0] sm:$0xff] %v2762_v35 }
 0x2f7   : > { %v2716_v13 = vor.u32 1.1754944e-38, %v2715_v32  ;;  %vm2714_vm11 = vcmp.eq.f32.partialorder %v2713_v40, 8.507059e+37 }
 0x2f8   : > { %v2693_v29 = vadd.f32 %v3077_v31, %v2692_v3  ;;  %v3081_v52 = vpop.eup %3080 }
 0x2f9   : > { %v2253_v43 = vadd.f32 1.0, %v3081_v52 }
 0x2fa   : > { %v2697_v19 = vsel %vm2696_vm6, %v3077_v31, %v2693_v29 }
 0x2fb   : > { %v3083_v26 = vpop.eup %3082  ;;  %v2702_v60 = vsel %vm2699_vm7, %v2701_v44, %v2697_v19  ;;  %3084 = vrcp.f32 %v2253_v43  ;;  %v2730_v25 = vand.u32 2147483648, %v2253_v43  ;;  %v2728_v46 = vand.u32 2147483647, %v2253_v43 }
 0x2fc   : > { %v2763_v45 = vmul.f32 %v2702_v60, %v4418_v53  ;;  %v2705_v36 = vmul.f32 %v3083_v26, %v2252_v9  ;;  %vm2710_vm8 = vweird.f32 %v3083_v26  ;;  %vm2724_vm13 = vweird.f32 %v2253_v43 }
 0x2fd   : > { %vm2711_vm10 = vmor %vm2709_vm9, %vm2710_vm8  ;;  %v2731_v55 = vor.u32 1.1754944e-38, %v2730_v25  ;;  %vm2729_vm15 = vcmp.eq.f32.partialorder %v2728_v46, 8.507059e+37 }
 0x2fe   : > { %2795 = vst [vmem:[%s4073_s27 + $0xe8] sm:$0xff] %v2763_v45  ;;  %v2706_v20 = vsub.f32 1.0, %v2705_v36 }
 0x300   : > { %v2707_v47 = vmul.f32 %v3083_v26, %v2706_v20 }
 0x301   : > { %v3085_v6 = vpop.eup %3084 }
 0x302   : > { %v2708_v7 = vadd.f32 %v3083_v26, %v2707_v47  ;;  %v2720_v27 = vmul.f32 %v3085_v6, %v2253_v43  ;;  %vm2725_vm12 = vweird.f32 %v3085_v6 }
 0x303   : > { %vm2726_vm14 = vmor %vm2724_vm13, %vm2725_vm12 }
 0x304   : > { %v2712_v57 = vsel %vm2711_vm10, %v3083_v26, %v2708_v7  ;;  %v2721_v53 = vsub.f32 1.0, %v2720_v27 }
 0x305   : > { %v2717_v61 = vsel %vm2714_vm11, %v2716_v13, %v2712_v57 }
 0x306   : > { %v2764_v48 = vmul.f32 %v2717_v61, %v4427_v30  ;;  %v2722_v41 = vmul.f32 %v3085_v6, %v2721_v53 }
 0x308   : > { %2796 = vst [vmem:[%s4073_s27 + $0xf0] sm:$0xff] %v2764_v48  ;;  %v2723_v18 = vadd.f32 %v3085_v6, %v2722_v41 }
 0x30a   : > { %v2727_v58 = vsel %vm2726_vm14, %v3085_v6, %v2723_v18 }
 0x30b   : > { %v2732_v12 = vsel %vm2729_vm15, %v2731_v55, %v2727_v58 }
 0x30c   : > { %v2765_v54 = vmul.f32 %v2732_v12, %v4432_v8 }
 0x30e   : > { %2797 = vst [vmem:[%s4073_s27 + $0xf8] sm:$0xff] %v2765_v54 }
 0x30f PF: > { %s15_s18 = sadd.s32 1, %s3096_s18  }
 0x310   : > { %p12_p4 = scmp.ge.s32.totalorder %s15_s18, 4  }
 0x312   :  { %14 = sbr.rel (!%p12_p4) target bundleno = 1 (0x1), region = 72 }

// kernel: residual_block_forward.5
= control target key start
LH: loop header
LB: loop body
LE: loop exit
PB: predicated region body
PF: predicated region fallthrough
CT: control target
= control target key end

     0   :  { %s2502_s21 = smov 0   ;;  %s3693_s0 = inlined_call_operand.vmem [shape: f32[2,16,16,128], index: 0, kind: input, shape index: {}]   ;;  %s3694_s1 = inlined_call_operand.vmem [shape: f32[2,16,16,128], index: 1, kind: input, shape index: {}]   ;;  %s3695_s2 = inlined_call_operand.vmem [shape: f32[1152,128], index: 2, kind: input, shape index: {}]   ;;  %s3696_s3 = inlined_call_operand.vmem [shape: f32[1,128], index: 3, kind: input, shape index: {}]   ;;  %s3697_s4 = inlined_call_operand.vmem [shape: f32[128,128], index: 4, kind: input, shape index: {}]   ;;  %s3698_s5 = inlined_call_operand.vmem [shape: f32[1,128], index: 5, kind: input, shape index: {}]   ;;  %s3699_s6 = inlined_call_operand.vmem [shape: f32[2,16,16,128], index: 6, kind: output, shape index: {}]  }
   0x1 LB: > { %s2397_s22 = sadd.s32 4294967295, %s2464_s21   ;;  %p2401_p0 = scmp.ge.s32.totalorder %s2464_s21, 1  ;;  %s2464_s21 = sphi %s2502_s21, %s16_s21  }
   0x2   : > { %p222_p1 = scmp.lt.s32.totalorder %s2464_s21, 3 }
   0x4   : > { %p223_p2 = pnand %p2401_p0, %p222_p1 }
   0x6   : > { %226 = sbr.rel (%p223_p2) target bundleno = 840 (0x348), region = 44 }
   0xb   : > { %v486_v0 = vld [vmem:[%s3695_s2 + $0xf8] sm:$0xff]  ;;  %v485_v2 = vld [vmem:[%s3695_s2 + $0xf0] sm:$0xff]  ;;  %p257_p3 = scmp.lt.s32.totalorder %s2397_s22, 1  ;;  %v2466_v4 = vmov 0.0   ;;  %v484_v5 = vld [vmem:[%s3695_s2 + $0xe8] sm:$0xff] }
   0xc   : > { %v438_v1 = vld [vmem:[%s3695_s2 + $0x78] sm:$0xff]  ;;  %2413 = vmatpush.msra.mxu2 %v486_v0  ;;  %v437_v3 = vld [vmem:[%s3695_s2 + $0x70] sm:$0xff]  ;;  %328 = vst [vmem:[#allocation2 + $0xc0] sm:$0xff] %v2466_v4  ;;  %v436_v6 = vld [vmem:[%s3695_s2 + $0x68] sm:$0xff]  ;;  %487 = vmatpush.msra.mxu0 %v486_v0 }
   0xd   : > { %2429 = vmatpush.msra.mxu3 %v438_v1  ;;  %600 = vmatpush.msra.mxu1 %v438_v1  ;;  %s3709_s22 = smov (!%p257_p3, %s2397_s22), 1  ;;  %329 = vst [vmem:[#allocation2 + $0xc8] sm:$0xff] %v2466_v4  ;;  %v483_v7 = vld [vmem:[%s3695_s2 + $0xe0] sm:$0xff]  ;;  %v482_v9 = vld [vmem:[%s3695_s2 + $0xd8] sm:$0xff]  ;;  %v481_v11 = vld [vmem:[%s3695_s2 + $0xd0] sm:$0xff] }
   0xe   : > { %2414 = vmatpush.msra.mxu2 %v485_v2  ;;  %304 = vst [vmem:[#allocation2] sm:$0xff] %v2466_v4  ;;  %v435_v8 = vld [vmem:[%s3695_s2 + $0x60] sm:$0xff]  ;;  %488 = vmatpush.msra.mxu0 %v485_v2  ;;  %s2537_s15 = sshll.u32 %s3709_s22, 8  ;;  %v434_v10 = vld [vmem:[%s3695_s2 + $0x58] sm:$0xff]  ;;  %v433_v12 = vld [vmem:[%s3695_s2 + $0x50] sm:$0xff] }
   0xf   : > { %2430 = vmatpush.msra.mxu3 %v437_v3  ;;  %601 = vmatpush.msra.mxu1 %v437_v3  ;;  %305 = vst [vmem:[#allocation2 + $0x8] sm:$0xff] %v2466_v4  ;;  %s2552_s23 = scalar_lea.vmem %s3693_s0, %s2537_s15  ;;  %v480_v13 = vld [vmem:[%s3695_s2 + $0xc8] sm:$0xff]  ;;  %v479_v16 = vld [vmem:[%s3695_s2 + $0xc0] sm:$0xff]  ;;  %v478_v18 = vld [vmem:[%s3695_s2 + $0xb8] sm:$0xff]  ;;  %s3428_s7 = scalar_lea.vmem %s3694_s1, %s2537_s15 }
  0x10   : > { %2415 = vmatpush.msra.mxu2 %v484_v5  ;;  %306 = vst [vmem:[#allocation2 + $0x10] sm:$0x3] %v2466_v4  ;;  %489 = vmatpush.msra.mxu0 %v484_v5  ;;  %v432_v14 = vld [vmem:[%s3695_s2 + $0x48] sm:$0xff]  ;;  %v2570_v15 = vld [vmem:[%s2552_s23 + $0x70] sm:$0xff]  ;;  %v431_v17 = vld [vmem:[%s3695_s2 + $0x40] sm:$0xff]  ;;  %s3524_s14 = scalar_lea.vmem %s3699_s6, %s2537_s15 }
  0x11   : > { %2431 = vmatpush.msra.mxu3 %v436_v6  ;;  %602 = vmatpush.msra.mxu1 %v436_v6  ;;  %307 = vst [vmem:[#allocation2 + $0x18] sm:$0xff] %v2466_v4  ;;  %v430_v19 = vld [vmem:[%s3695_s2 + $0x38] sm:$0xff]  ;;  %v477_v20 = vld [vmem:[%s3695_s2 + $0xb0] sm:$0xff]  ;;  %v476_v22 = vld [vmem:[%s3695_s2 + $0xa8] sm:$0xff] }
  0x12   : > { %2416 = vmatpush.msra.mxu2 %v483_v7  ;;  %308 = vst [vmem:[#allocation2 + $0x20] sm:$0xff] %v2466_v4  ;;  %490 = vmatpush.msra.mxu0 %v483_v7  ;;  %v429_v21 = vld [vmem:[%s3695_s2 + $0x30] sm:$0xff]  ;;  %v428_v23 = vld [vmem:[%s3695_s2 + $0x28] sm:$0xff]  ;;  %v475_v24 = vld [vmem:[%s3695_s2 + $0xa0] sm:$0xff] }
  0x13   : > { %2432 = vmatpush.msra.mxu3 %v435_v8  ;;  %603 = vmatpush.msra.mxu1 %v435_v8  ;;  %309 = vst [vmem:[#allocation2 + $0x28] sm:$0x3] %v2466_v4  ;;  %v427_v25 = vld [vmem:[%s3695_s2 + $0x20] sm:$0xff]  ;;  %v474_v26 = vld [vmem:[%s3695_s2 + $0x98] sm:$0xff]  ;;  %v473_v28 = vld [vmem:[%s3695_s2 + $0x90] sm:$0xff] }
  0x14   : > { %2417 = vmatpush.msra.mxu2 %v482_v9  ;;  %310 = vst [vmem:[#allocation2 + $0x30] sm:$0xff] %v2466_v4  ;;  %491 = vmatpush.msra.mxu0 %v482_v9  ;;  %v426_v27 = vld [vmem:[%s3695_s2 + $0x18] sm:$0xff]  ;;  %v425_v29 = vld [vmem:[%s3695_s2 + $0x10] sm:$0xff]  ;;  %v472_v30 = vld [vmem:[%s3695_s2 + $0x88] sm:$0xff] }
  0x15   : > { %2433 = vmatpush.msra.mxu3 %v434_v10  ;;  %604 = vmatpush.msra.mxu1 %v434_v10  ;;  %311 = vst [vmem:[#allocation2 + $0x38] sm:$0xff] %v2466_v4  ;;  %v424_v31 = vld [vmem:[%s3695_s2 + $0x8] sm:$0xff]  ;;  %v471_v32 = vld [vmem:[%s3695_s2 + $0x80] sm:$0xff]  ;;  %v760_v35 = vld [vmem:[%s3695_s2 + $0x178] sm:$0xff] }
  0x16   : > { %2418 = vmatpush.msra.mxu2 %v481_v11  ;;  %373 = vst [vmem:[#allocation2 + $0xc1] sm:$0xff] %v2570_v15  ;;  %492 = vmatpush.msra.mxu0 %v481_v11  ;;  %v423_v33 = vld [vmem:[%s3695_s2] sm:$0xff]  ;;  %v953_v36 = vld [vmem:[%s3695_s2 + $0x1f8] sm:$0xff]  ;;  %v759_v37 = vld [vmem:[%s3695_s2 + $0x170] sm:$0xff] }
  0x17   : > { %2434 = vmatpush.msra.mxu3 %v433_v12  ;;  %605 = vmatpush.msra.mxu1 %v433_v12  ;;  %312 = vst [vmem:[#allocation2 + $0x40] sm:$0x3] %v2466_v4  ;;  %v439_v38 = vld [vmem:[#allocation2 + $0x1] sm:$0xff]  ;;  %v952_v39 = vld [vmem:[%s3695_s2 + $0x1f0] sm:$0xff]  ;;  %v1146_v40 = vld [vmem:[%s3695_s2 + $0x278] sm:$0xff] }
  0x18   : > { %2419 = vmatpush.msra.mxu2 %v480_v13  ;;  %313 = vst [vmem:[#allocation2 + $0x48] sm:$0xff] %v2466_v4  ;;  %493 = vmatpush.msra.mxu0 %v480_v13  ;;  %v1339_v41 = vld [vmem:[%s3695_s2 + $0x2f8] sm:$0xff]  ;;  %v758_v43 = vld [vmem:[%s3695_s2 + $0x168] sm:$0xff]  ;;  %v1145_v46 = vld [vmem:[%s3695_s2 + $0x270] sm:$0xff] }
  0x19   : > { %2435 = vmatpush.msra.mxu3 %v432_v14  ;;  %606 = vmatpush.msra.mxu1 %v432_v14  ;;  %314 = vst [vmem:[#allocation2 + $0x50] sm:$0xff] %v2466_v4  ;;  %v287_v42 = vld [vmem:[%s2552_s23 + $0x78] sm:$0xff]  ;;  %v440_v44 = vld [vmem:[#allocation2 + $0x9] sm:$0xff]  ;;  %v288_v48 = vld [vmem:[%s2552_s23 + $0x80] sm:$0xff] }
  0x1a   : > { %2420 = vmatpush.msra.mxu2 %v479_v16  ;;  %315 = vst [vmem:[#allocation2 + $0x58] sm:$0x3] %v2466_v4  ;;  %494 = vmatpush.msra.mxu0 %v479_v16  ;;  %v951_v45 = vld [vmem:[%s3695_s2 + $0x1e8] sm:$0xff]  ;;  %v1338_v47 = vld [vmem:[%s3695_s2 + $0x2f0] sm:$0xff]  ;;  %v757_v49 = vld [vmem:[%s3695_s2 + $0x160] sm:$0xff] }
  0x1b   : > { %2436 = vmatpush.msra.mxu3 %v431_v17  ;;  %607 = vmatpush.msra.mxu1 %v431_v17  ;;  %316 = vst [vmem:[#allocation2 + $0x60] sm:$0xff] %v2466_v4  ;;  %v950_v50 = vld [vmem:[%s3695_s2 + $0x1e0] sm:$0xff]  ;;  %v1144_v51 = vld [vmem:[%s3695_s2 + $0x268] sm:$0xff]  ;;  %v756_v55 = vld [vmem:[%s3695_s2 + $0x158] sm:$0xff] }
  0x1c   : > { %2421 = vmatpush.msra.mxu2 %v478_v18  ;;  %317 = vst [vmem:[#allocation2 + $0x68] sm:$0xff] %v2466_v4  ;;  %495 = vmatpush.msra.mxu0 %v478_v18  ;;  %v1337_v52 = vld [vmem:[%s3695_s2 + $0x2e8] sm:$0xff]  ;;  %v2715_v53 = vld [vmem:[%s2552_s23] sm:$0xff]  ;;  %v949_v56 = vld [vmem:[%s3695_s2 + $0x1d8] sm:$0xff] }
  0x1d   : > { %2437 = vmatpush.msra.mxu3 %v430_v19  ;;  %608 = vmatpush.msra.mxu1 %v430_v19  ;;  %318 = vst [vmem:[#allocation2 + $0x70] sm:$0x3] %v2466_v4  ;;  %v407_v34 = vld [vmem:[#allocation2 + $0xc0] sm:$0xff]  ;;  %v289_v54 = vld [vmem:[%s2552_s23 + $0x88] sm:$0xff]  ;;  %v290_v58 = vld [vmem:[%s2552_s23 + $0x90] sm:$0xff] }
  0x1e   : > { %2422 = vmatpush.msra.mxu2 %v477_v20  ;;  %319 = vst [vmem:[#allocation2 + $0x78] sm:$0xff] %v2466_v4  ;;  %496 = vmatpush.msra.mxu0 %v477_v20  ;;  %v1143_v57 = vld [vmem:[%s3695_s2 + $0x260] sm:$0xff]  ;;  %v2738_v60 = vld [vmem:[%s2552_s23 + $0x8] sm:$0xff]  ;;  %v291_v61 = vld [vmem:[%s2552_s23 + $0x98] sm:$0xff] }
  0x1f   : > { %2438 = vmatpush.msra.mxu3 %v429_v21  ;;  %609 = vmatpush.msra.mxu1 %v429_v21  ;;  %320 = vst [vmem:[#allocation2 + $0x80] sm:$0xff] %v2466_v4  ;;  %v1336_v59 = vld [vmem:[%s3695_s2 + $0x2e0] sm:$0xff]  ;;  %v2744_v62 = vld [vmem:[%s2552_s23 + $0x10] sm:$0xff]  ;;  %v1142_v3 = vld [vmem:[%s3695_s2 + $0x258] sm:$0xff] }
  0x20   : > { %2423 = vmatpush.msra.mxu2 %v476_v22  ;;  %321 = vst [vmem:[#allocation2 + $0x88] sm:$0x3] %v2466_v4  ;;  %497 = vmatpush.msra.mxu0 %v476_v22  ;;  %v292_v0 = vld [vmem:[%s2552_s23 + $0xa0] sm:$0xff]  ;;  %v755_v1 = vld [vmem:[%s3695_s2 + $0x150] sm:$0xff]  ;;  %v2764_v6 = vld [vmem:[%s2552_s23 + $0x18] sm:$0xff] }
  0x21   : > { %2439 = vmatpush.msra.mxu3 %v428_v23  ;;  %610 = vmatpush.msra.mxu1 %v428_v23  ;;  %322 = vst [vmem:[#allocation2 + $0x90] sm:$0xff] %v2466_v4  ;;  %v948_v2 = vld [vmem:[%s3695_s2 + $0x1d0] sm:$0xff]  ;;  %v293_v9 = vld [vmem:[%s2552_s23 + $0xa8] sm:$0xff]  ;;  %v2785_v14 = vld [vmem:[%s2552_s23 + $0x20] sm:$0xff] }
  0x22   : > { %2424 = vmatpush.msra.mxu2 %v475_v24  ;;  %323 = vst [vmem:[#allocation2 + $0x98] sm:$0xff] %v2466_v4  ;;  %498 = vmatpush.msra.mxu0 %v475_v24  ;;  %v754_v10 = vld [vmem:[%s3695_s2 + $0x148] sm:$0xff]  ;;  %v1141_v12 = vld [vmem:[%s3695_s2 + $0x250] sm:$0xff]  ;;  %v753_v18 = vld [vmem:[%s3695_s2 + $0x140] sm:$0xff] }
  0x23   : > { %2440 = vmatpush.msra.mxu3 %v427_v25  ;;  %324 = vst [vmem:[#allocation2 + $0xa0] sm:$0x3] %v2466_v4  ;;  %611 = vmatpush.msra.mxu1 %v427_v25  ;;  %v947_v11 = vld [vmem:[%s3695_s2 + $0x1c8] sm:$0xff]  ;;  %v1334_v13 = vld [vmem:[%s3695_s2 + $0x2d0] sm:$0xff]  ;;  %v946_v19 = vld [vmem:[%s3695_s2 + $0x1c0] sm:$0xff] }
  0x24   : > { %2425 = vmatpush.msra.mxu2 %v474_v26  ;;  %325 = vst [vmem:[#allocation2 + $0xa8] sm:$0xff] %v2466_v4  ;;  %499 = vmatpush.msra.mxu0 %v474_v26  ;;  %v294_v17 = vld [vmem:[%s2552_s23 + $0xb0] sm:$0xff]  ;;  %v1140_v20 = vld [vmem:[%s3695_s2 + $0x248] sm:$0xff]  ;;  %v295_v25 = vld [vmem:[%s2552_s23 + $0xb8] sm:$0xff] }
  0x25   : > { %2441 = vmatpush.msra.mxu3 %v426_v27  ;;  %326 = vst [vmem:[#allocation2 + $0xb0] sm:$0xff] %v2466_v4  ;;  %612 = vmatpush.msra.mxu1 %v426_v27  ;;  %v1333_v21 = vld [vmem:[%s3695_s2 + $0x2c8] sm:$0xff]  ;;  %v752_v26 = vld [vmem:[%s3695_s2 + $0x138] sm:$0xff] }
  0x26   : > { %2426 = vmatpush.msra.mxu2 %v473_v28  ;;  %327 = vst [vmem:[#allocation2 + $0xb8] sm:$0x3] %v2466_v4  ;;  %500 = vmatpush.msra.mxu0 %v473_v28  ;;  %v2806_v22 = vld [vmem:[%s2552_s23 + $0x28] sm:$0xff]  ;;  %v945_v27 = vld [vmem:[%s3695_s2 + $0x1b8] sm:$0xff]  ;;  %v1139_v28 = vld [vmem:[%s3695_s2 + $0x240] sm:$0xff] }
  0x27   : > { %2442 = vmatpush.msra.mxu3 %v425_v29  ;;  %330 = vst [vmem:[#allocation2 + $0xd0] sm:$0x3] %v2466_v4  ;;  %613 = vmatpush.msra.mxu1 %v425_v29  ;;  %v1332_v29 = vld [vmem:[%s3695_s2 + $0x2c0] sm:$0xff] }
  0x28   : > { %2427 = vmatpush.msra.mxu2 %v472_v30  ;;  %331 = vst [vmem:[#allocation2 + $0xd8] sm:$0xff] %v2466_v4  ;;  %501 = vmatpush.msra.mxu0 %v472_v30  ;;  %v2827_v30 = vld [vmem:[%s2552_s23 + $0x30] sm:$0xff] }
  0x29   : > { %2443 = vmatpush.msra.mxu3 %v424_v31  ;;  %332 = vst [vmem:[#allocation2 + $0xe0] sm:$0xff] %v2466_v4  ;;  %614 = vmatpush.msra.mxu1 %v424_v31 }
  0x2a   : > { %2428 = vmatpush.msra.mxu2 %v471_v32  ;;  %333 = vst [vmem:[#allocation2 + $0xe8] sm:$0x3] %v2466_v4  ;;  %502 = vmatpush.msra.mxu0 %v471_v32 }
  0x2b   : > { %2444 = vmatpush.msra.mxu3 %v423_v33  ;;  %551 = vmatmul.f32.vlgmr.msra.gmra.mxu2 %v2570_v15  ;;  %334 = vst [vmem:[#allocation2 + $0xf0] sm:$0xff] %v2466_v4 }
  0x2c   : > { %664 = vmatmul.f32.vlgmr.msra.gmra.mxu3 %v407_v34  ;;  %335 = vst [vmem:[#allocation2 + $0xf8] sm:$0xff] %v2466_v4  ;;  %761 = vmatpush.msrb.mxu2 %v760_v35  ;;  %v751_v34 = vld [vmem:[%s3695_s2 + $0x130] sm:$0xff] }
  0x2d   : > { %954 = vmatpush.msrb.mxu3 %v953_v36  ;;  %336 = vst [vmem:[#allocation2 + $0x100] sm:$0x3] %v2466_v4  ;;  %615 = vmatpush.msra.mxu1 %v423_v33  ;;  %v296_v33 = vld [vmem:[%s2552_s23 + $0xc0] sm:$0xff]  ;;  %v944_v35 = vld [vmem:[%s3695_s2 + $0x1b0] sm:$0xff]  ;;  %v1138_v36 = vld [vmem:[%s3695_s2 + $0x238] sm:$0xff] }
  0x2e   : > { %337 = vst [vmem:[#allocation2 + $0x108] sm:$0xff] %v2466_v4  ;;  %762 = vmatpush.msrb.mxu2 %v759_v37  ;;  %503 = vmatmul.f32.vlgmr.msra.gmra.mxu0 %v439_v38  ;;  %v1331_v37 = vld [vmem:[%s3695_s2 + $0x2b8] sm:$0xff] }
  0x2f   : > { %338 = vst [vmem:[#allocation2 + $0x110] sm:$0xff] %v2466_v4  ;;  %616 = vmatmul.f32.vlgmr.msra.gmra.mxu1 %v2466_v4  ;;  %955 = vmatpush.msrb.mxu3 %v952_v39  ;;  %v2848_v38 = vld [vmem:[%s2552_s23 + $0x38] sm:$0xff] }
  0x30   : > { %339 = vst [vmem:[#allocation2 + $0x118] sm:$0x3] %v2466_v4  ;;  %1147 = vmatpush.msrb.mxu0 %v1146_v40  ;;  %1340 = vmatpush.msrb.mxu1 %v1339_v41  ;;  %v297_v41 = vld [vmem:[%s2552_s23 + $0xc8] sm:$0xff] }
  0x31   : > { %340 = vst [vmem:[#allocation2 + $0x120] sm:$0xff] %v2466_v4  ;;  %763 = vmatpush.msrb.mxu2 %v758_v43  ;;  %956 = vmatpush.msrb.mxu3 %v951_v45  ;;  %v943_v43 = vld [vmem:[%s3695_s2 + $0x1a8] sm:$0xff]  ;;  %v1330_v45 = vld [vmem:[%s3695_s2 + $0x2b0] sm:$0xff] }
  0x32   : > { %341 = vst [vmem:[#allocation2 + $0x128] sm:$0xff] %v2466_v4  ;;  %1148 = vmatpush.msrb.mxu0 %v1145_v46  ;;  %1341 = vmatpush.msrb.mxu1 %v1338_v47  ;;  %v2869_v46 = vld [vmem:[%s2552_s23 + $0x40] sm:$0xff] }
  0x33   : > { %342 = vst [vmem:[#allocation2 + $0x130] sm:$0x3] %v2466_v4  ;;  %554 = vmatmul.f32.gmra.mxu2 %v287_v42  ;;  %957 = vmatpush.msrb.mxu3 %v950_v50  ;;  %v749_v50 = vld [vmem:[%s3695_s2 + $0x120] sm:$0xff] }
  0x34   : > { %343 = vst [vmem:[#allocation2 + $0x138] sm:$0xff] %v2466_v4  ;;  %764 = vmatpush.msrb.mxu2 %v757_v49  ;;  %1149 = vmatpush.msrb.mxu0 %v1144_v51  ;;  %v298_v49 = vld [vmem:[%s2552_s23 + $0xd0] sm:$0xff]  ;;  %v942_v51 = vld [vmem:[%s3695_s2 + $0x1a0] sm:$0xff] }
  0x35   : > { %344 = vst [vmem:[#allocation2 + $0x140] sm:$0xff] %v2466_v4  ;;  %1342 = vmatpush.msrb.mxu1 %v1337_v52  ;;  %958 = vmatpush.msrb.mxu3 %v949_v56  ;;  %v1136_v52 = vld [vmem:[%s3695_s2 + $0x228] sm:$0xff] }
  0x36   : > { %345 = vst [vmem:[#allocation2 + $0x148] sm:$0x3] %v2466_v4  ;;  %506 = vmatmul.f32.gmra.mxu0 %v440_v44  ;;  %765 = vmatpush.msrb.mxu2 %v756_v55  ;;  %v1137_v44 = vld [vmem:[%s3695_s2 + $0x230] sm:$0xff]  ;;  %v2890_v55 = vld [vmem:[%s2552_s23 + $0x48] sm:$0xff] }
  0x37   : > { %346 = vst [vmem:[#allocation2 + $0x150] sm:$0xff] %v2466_v4  ;;  %619 = vmatmul.f32.gmra.mxu1 %v2466_v4  ;;  %1150 = vmatpush.msrb.mxu0 %v1143_v57 }
  0x38   : > { %347 = vst [vmem:[#allocation2 + $0x158] sm:$0xff] %v2466_v4  ;;  %1343 = vmatpush.msrb.mxu1 %v1336_v59  ;;  %766 = vmatpush.msrb.mxu2 %v755_v1  ;;  %v748_v59 = vld [vmem:[%s3695_s2 + $0x118] sm:$0xff]  ;;  %v2911_v1 = vld [vmem:[%s2552_s23 + $0x50] sm:$0xff] }
  0x39   : > { %348 = vst [vmem:[#allocation2 + $0x160] sm:$0x3] %v2466_v4  ;;  %959 = vmatpush.msrb.mxu3 %v948_v2  ;;  %1151 = vmatpush.msrb.mxu0 %v1142_v3 }
  0x3a   : > { %349 = vst [vmem:[#allocation2 + $0x168] sm:$0xff] %v2466_v4  ;;  %767 = vmatpush.msrb.mxu2 %v754_v10  ;;  %v1134_v10 = vld [vmem:[%s3695_s2 + $0x218] sm:$0xff] }
  0x3b   : > { %350 = vst [vmem:[#allocation2 + $0x170] sm:$0xff] %v2466_v4  ;;  %557 = vmatmul.f32.gmra.mxu2 %v288_v48  ;;  %960 = vmatpush.msrb.mxu3 %v947_v11  ;;  %v1327_v11 = vld [vmem:[%s3695_s2 + $0x298] sm:$0xff] }
  0x3c   : > { %351 = vst [vmem:[#allocation2 + $0x178] sm:$0x3] %v2466_v4  ;;  %1152 = vmatpush.msrb.mxu0 %v1141_v12  ;;  %768 = vmatpush.msrb.mxu2 %v753_v18  ;;  %v2932_v12 = vld [vmem:[%s2552_s23 + $0x58] sm:$0xff]  ;;  %v746_v18 = vld [vmem:[%s3695_s2 + $0x108] sm:$0xff] }
  0x3d   : > { %352 = vst [vmem:[#allocation2 + $0x180] sm:$0xff] %v2466_v4  ;;  %961 = vmatpush.msrb.mxu3 %v946_v19  ;;  %v939_v19 = vld [vmem:[%s3695_s2 + $0x188] sm:$0xff] }
  0x3e   : > { %353 = vst [vmem:[#allocation2 + $0x188] sm:$0xff] %v2466_v4  ;;  %509 = vmatmul.f32.gmra.mxu0 %v2715_v53  ;;  %769 = vmatpush.msrb.mxu2 %v752_v26 }
  0x3f   : > { %354 = vst [vmem:[#allocation2 + $0x190] sm:$0x3] %v2466_v4  ;;  %1153 = vmatpush.msrb.mxu0 %v1140_v20  ;;  %962 = vmatpush.msrb.mxu3 %v945_v27  ;;  %v1133_v20 = vld [vmem:[%s3695_s2 + $0x210] sm:$0xff]  ;;  %v745_v27 = vld [vmem:[%s3695_s2 + $0x100] sm:$0xff] }
  0x40   : > { %355 = vst [vmem:[#allocation2 + $0x198] sm:$0xff] %v2466_v4  ;;  %770 = vmatpush.msrb.mxu2 %v751_v34  ;;  %v2976_v34 = vld [vmem:[%s2552_s23 + $0x68] sm:$0xff] }
  0x41   : > { %356 = vst [vmem:[#allocation2 + $0x1a0] sm:$0xff] %v2466_v4  ;;  %1154 = vmatpush.msrb.mxu0 %v1139_v28  ;;  %963 = vmatpush.msrb.mxu3 %v944_v35  ;;  %v938_v28 = vld [vmem:[%s3695_s2 + $0x180] sm:$0xff] }
  0x42   : > { %357 = vst [vmem:[#allocation2 + $0x1a8] sm:$0x3] %v2466_v4  ;;  %v1335_v4 = vld [vmem:[%s3695_s2 + $0x2d8] sm:$0xff] }
  0x43   : > { %374 = vst [vmem:[#allocation2 + $0xc9] sm:$0xff] %v287_v42  ;;  %560 = vmatmul.f32.gmra.mxu2 %v289_v54  ;;  %1344 = vmatpush.msrb.mxu1 %v1335_v4  ;;  %v750_v42 = vld [vmem:[%s3695_s2 + $0x128] sm:$0xff]  ;;  %v300_v4 = vld [vmem:[%s2552_s23 + $0xe0] sm:$0xff] }
  0x44   : > { %375 = vst [vmem:[#allocation2 + $0xd9] sm:$0xff] %v288_v48  ;;  %1155 = vmatpush.msrb.mxu0 %v1138_v36  ;;  %771 = vmatpush.msrb.mxu2 %v750_v42 }
  0x45   : > { %376 = vst [vmem:[#allocation2 + $0xe1] sm:$0xff] %v289_v54  ;;  %1345 = vmatpush.msrb.mxu1 %v1334_v13  ;;  %964 = vmatpush.msrb.mxu3 %v943_v43  ;;  %v1329_v54 = vld [vmem:[%s3695_s2 + $0x2a8] sm:$0xff] }
  0x46   : > { %359 = vst [vmem:[#allocation2 + $0x19] sm:$0xff] %v2715_v53  ;;  %512 = vmatmul.f32.gmra.mxu0 %v2738_v60  ;;  %772 = vmatpush.msrb.mxu2 %v749_v50  ;;  %v713_v43 = vld [vmem:[#allocation2 + $0x2] sm:$0xff]  ;;  %v2148_v50 = vld [vmem:[%s3697_s4 + $0x78] sm:$0xff] }
  0x47   : > { %377 = vst [vmem:[#allocation2 + $0xf1] sm:$0xff] %v290_v58  ;;  %1346 = vmatpush.msrb.mxu1 %v1333_v21  ;;  %1156 = vmatpush.msrb.mxu0 %v1137_v44  ;;  %v1326_v21 = vld [vmem:[%s3695_s2 + $0x290] sm:$0xff] }
  0x48   : > { %360 = vst [vmem:[#allocation2 + $0x21] sm:$0xff] %v2738_v60  ;;  %965 = vmatpush.msrb.mxu3 %v942_v51  ;;  %773 = vmatpush.msrb.mxu2 %v748_v59  ;;  %v1532_v51 = vld [vmem:[%s3695_s2 + $0x370] sm:$0xff] }
  0x49   : > { %378 = vst [vmem:[#allocation2 + $0xf9] sm:$0xff] %v291_v61  ;;  %1347 = vmatpush.msrb.mxu1 %v1332_v29  ;;  %1157 = vmatpush.msrb.mxu0 %v1136_v52  ;;  %v1132_v29 = vld [vmem:[%s3695_s2 + $0x208] sm:$0xff] }
  0x4a   : > { %v408_v63 = vld [vmem:[#allocation2 + $0xc8] sm:$0xff]  ;;  %361 = vst [vmem:[#allocation2 + $0x31] sm:$0xff] %v2744_v62 }
  0x4b   : > { %667 = vmatmul.f32.gmra.mxu3 %v408_v63  ;;  %563 = vmatmul.f32.gmra.mxu2 %v290_v58  ;;  %379 = vst [vmem:[#allocation2 + $0x109] sm:$0xff] %v292_v0  ;;  %v409_v7 = vld [vmem:[#allocation2 + $0xd8] sm:$0xff]  ;;  %v1135_v63 = vld [vmem:[%s3695_s2 + $0x220] sm:$0xff] }
  0x4c   : > { %362 = vst [vmem:[#allocation2 + $0x39] sm:$0xff] %v2764_v6  ;;  %v410_v15 = vld [vmem:[#allocation2 + $0xe0] sm:$0xff]  ;;  %1348 = vmatpush.msrb.mxu1 %v1331_v37  ;;  %v299_v58 = vld [vmem:[%s2552_s23 + $0xd8] sm:$0xff]  ;;  %1158 = vmatpush.msrb.mxu0 %v1135_v63 }
  0x4d   : > { %v2761_v5 = vld [vmem:[#allocation2 + $0x18] sm:$0xff]  ;;  %380 = vst [vmem:[#allocation2 + $0x111] sm:$0xff] %v293_v9  ;;  %v1131_v37 = vld [vmem:[%s3695_s2 + $0x200] sm:$0xff] }
  0x4e   : > { %622 = vmatmul.f32.gmra.mxu1 %v2761_v5  ;;  %515 = vmatmul.f32.gmra.mxu0 %v2744_v62  ;;  %363 = vst [vmem:[#allocation2 + $0x49] sm:$0xff] %v2785_v14  ;;  %v411_v23 = vld [vmem:[#allocation2 + $0xf0] sm:$0xff] }
  0x4f   : > { %v2769_v8 = vld [vmem:[#allocation2 + $0x20] sm:$0xff]  ;;  %381 = vst [vmem:[#allocation2 + $0x121] sm:$0xff] %v294_v17  ;;  %1349 = vmatpush.msrb.mxu1 %v1330_v45  ;;  %1159 = vmatpush.msrb.mxu0 %v1134_v10 }
  0x50   : > { %364 = vst [vmem:[#allocation2 + $0x51] sm:$0xff] %v2806_v22  ;;  %v412_v31 = vld [vmem:[#allocation2 + $0xf8] sm:$0xff] }
  0x51   : > { %v2790_v16 = vld [vmem:[#allocation2 + $0x30] sm:$0xff]  ;;  %382 = vst [vmem:[#allocation2 + $0x129] sm:$0xff] %v295_v25  ;;  %1350 = vmatpush.msrb.mxu1 %v1329_v54  ;;  %1160 = vmatpush.msrb.mxu0 %v1133_v20 }
  0x52   : > { %365 = vst [vmem:[#allocation2 + $0x61] sm:$0xff] %v2827_v30  ;;  %v413_v39 = vld [vmem:[#allocation2 + $0x108] sm:$0xff] }
  0x53   : > { %670 = vmatmul.f32.gmra.mxu3 %v409_v7  ;;  %566 = vmatmul.f32.gmra.mxu2 %v291_v61  ;;  %v2811_v24 = vld [vmem:[#allocation2 + $0x38] sm:$0xff]  ;;  %383 = vst [vmem:[#allocation2 + $0x139] sm:$0xff] %v296_v33  ;;  %v747_v7 = vld [vmem:[%s3695_s2 + $0x110] sm:$0xff] }
  0x54   : > { %366 = vst [vmem:[#allocation2 + $0x69] sm:$0xff] %v2848_v38  ;;  %v414_v47 = vld [vmem:[#allocation2 + $0x110] sm:$0xff]  ;;  %v941_v61 = vld [vmem:[%s3695_s2 + $0x198] sm:$0xff]  ;;  %774 = vmatpush.msrb.mxu2 %v747_v7  ;;  %1161 = vmatpush.msrb.mxu0 %v1132_v29 }
  0x55   : > { %v2832_v32 = vld [vmem:[#allocation2 + $0x48] sm:$0xff]  ;;  %384 = vst [vmem:[#allocation2 + $0x141] sm:$0xff] %v297_v41  ;;  %966 = vmatpush.msrb.mxu3 %v941_v61  ;;  %v1295_v29 = vld [vmem:[#allocation2 + $0x3a] sm:$0xff] }
  0x56   : > { %625 = vmatmul.f32.gmra.mxu1 %v2769_v8  ;;  %518 = vmatmul.f32.gmra.mxu0 %v2764_v6  ;;  %367 = vst [vmem:[#allocation2 + $0x79] sm:$0xff] %v2869_v46  ;;  %v415_v56 = vld [vmem:[#allocation2 + $0x120] sm:$0xff]  ;;  %v714_v54 = vld [vmem:[#allocation2 + $0xa] sm:$0xff] }
  0x57   : > { %v2853_v40 = vld [vmem:[#allocation2 + $0x50] sm:$0xff]  ;;  %385 = vst [vmem:[#allocation2 + $0x151] sm:$0xff] %v298_v49  ;;  %775 = vmatpush.msrb.mxu2 %v746_v18  ;;  %1162 = vmatpush.msrb.mxu0 %v1131_v37 }
  0x58   : > { %368 = vst [vmem:[#allocation2 + $0x81] sm:$0xff] %v2890_v55  ;;  %v416_v2 = vld [vmem:[#allocation2 + $0x128] sm:$0xff] }
  0x59   : > { %v2874_v48 = vld [vmem:[#allocation2 + $0x60] sm:$0xff]  ;;  %386 = vst [vmem:[#allocation2 + $0x159] sm:$0xff] %v299_v58  ;;  %776 = vmatpush.msrb.mxu2 %v745_v27 }
  0x5a   : > { %369 = vst [vmem:[#allocation2 + $0x91] sm:$0xff] %v2911_v1  ;;  %v417_v13 = vld [vmem:[#allocation2 + $0x138] sm:$0xff] }
  0x5b   : > { %673 = vmatmul.f32.gmra.mxu3 %v410_v15  ;;  %569 = vmatmul.f32.gmra.mxu2 %v292_v0  ;;  %v2895_v57 = vld [vmem:[#allocation2 + $0x68] sm:$0xff]  ;;  %v1328_v0 = vld [vmem:[%s3695_s2 + $0x2a0] sm:$0xff]  ;;  %387 = vst [vmem:[#allocation2 + $0x169] sm:$0xff] %v300_v4 }
  0x5c   : > { %1351 = vmatpush.msrb.mxu1 %v1328_v0  ;;  %370 = vst [vmem:[#allocation2 + $0x99] sm:$0xff] %v2932_v12  ;;  %v1292_v0 = vld [vmem:[#allocation2 + $0x1a] sm:$0xff] }
  0x5d   : > { %v2916_v3 = vld [vmem:[#allocation2 + $0x78] sm:$0xff]  ;;  %372 = vst [vmem:[#allocation2 + $0xb1] sm:$0xff] %v2976_v34 }
  0x5e   : > { %628 = vmatmul.f32.gmra.mxu1 %v2790_v16  ;;  %521 = vmatmul.f32.gmra.mxu0 %v2785_v14  ;;  %v419_v35 = vld [vmem:[#allocation2 + $0x150] sm:$0xff] }
  0x5f   : > { %1352 = vmatpush.msrb.mxu1 %v1327_v11  ;;  %v2937_v15 = vld [vmem:[#allocation2 + $0x80] sm:$0xff] }
  0x60   : > { %v420_v42 = vld [vmem:[#allocation2 + $0x158] sm:$0xff]  ;;  %v1293_v11 = vld [vmem:[#allocation2 + $0x22] sm:$0xff] }
  0x61   : > { %1353 = vmatpush.msrb.mxu1 %v1326_v21  ;;  %v2958_v26 = vld [vmem:[#allocation2 + $0x90] sm:$0xff]  ;;  %v1917_v21 = vld [vmem:[%s3695_s2 + $0x468] sm:$0xff] }
  0x62   : > { %v421_v52 = vld [vmem:[#allocation2 + $0x168] sm:$0xff] }
  0x63   : > { %676 = vmatmul.f32.gmra.mxu3 %v411_v23  ;;  %572 = vmatmul.f32.gmra.mxu2 %v293_v9  ;;  %v940_v9 = vld [vmem:[%s3695_s2 + $0x190] sm:$0xff]  ;;  %v2953_v23 = vld [vmem:[%s2552_s23 + $0x60] sm:$0xff]  ;;  %v2981_v36 = vld [vmem:[#allocation2 + $0x98] sm:$0xff] }
  0x64   : > { %967 = vmatpush.msrb.mxu3 %v940_v9  ;;  %371 = vst [vmem:[#allocation2 + $0xa9] sm:$0xff] %v2953_v23  ;;  %v1531_v9 = vld [vmem:[%s3695_s2 + $0x368] sm:$0xff] }
  0x66   : > { %631 = vmatmul.f32.gmra.mxu1 %v2811_v24  ;;  %524 = vmatmul.f32.gmra.mxu0 %v2806_v22 }
  0x67   : > { %968 = vmatpush.msrb.mxu3 %v939_v19  ;;  %v1294_v19 = vld [vmem:[#allocation2 + $0x32] sm:$0xff] }
  0x69   : > { %969 = vmatpush.msrb.mxu3 %v938_v28 }
  0x6b   : > { %679 = vmatmul.f32.gmra.mxu3 %v412_v31  ;;  %575 = vmatmul.f32.gmra.mxu2 %v294_v17  ;;  %v301_v17 = vld [vmem:[%s2552_s23 + $0xe8] sm:$0xff] }
  0x6c   : > { %388 = vst [vmem:[#allocation2 + $0x171] sm:$0xff] %v301_v17  ;;  %v1325_v31 = vld [vmem:[%s3695_s2 + $0x288] sm:$0xff] }
  0x6d   : > { %1354 = vmatpush.msrb.mxu1 %v1325_v31  ;;  %v2994_v44 = vld [vmem:[#allocation2 + $0xa8] sm:$0xff] }
  0x6e   : > { %634 = vmatmul.f32.gmra.mxu1 %v2832_v32  ;;  %527 = vmatmul.f32.gmra.mxu0 %v2827_v30 }
  0x73   : > { %682 = vmatmul.f32.gmra.mxu3 %v413_v39  ;;  %578 = vmatmul.f32.gmra.mxu2 %v295_v25  ;;  %v418_v25 = vld [vmem:[#allocation2 + $0x140] sm:$0xff]  ;;  %v1726_v39 = vld [vmem:[%s3695_s2 + $0x3f8] sm:$0xff]  ;;  %v422_v63 = vld [vmem:[#allocation2 + $0x170] sm:$0xff] }
  0x74   : > { %1727 = vmatpush.msra.mxu3 %v1726_v39 }
  0x76   : > { %637 = vmatmul.f32.gmra.mxu1 %v2853_v40  ;;  %530 = vmatmul.f32.gmra.mxu0 %v2848_v38 }
  0x7b   : > { %685 = vmatmul.f32.gmra.mxu3 %v414_v47  ;;  %581 = vmatmul.f32.gmra.mxu2 %v296_v33  ;;  %v1533_v33 = vld [vmem:[%s3695_s2 + $0x378] sm:$0xff] }
  0x7c   : > { %1534 = vmatpush.msra.mxu2 %v1533_v33  ;;  %v1919_v47 = vld [vmem:[%s3695_s2 + $0x478] sm:$0xff] }
  0x7d   : > { %1920 = vmatpush.msra.mxu0 %v1919_v47 }
  0x7e   : > { %640 = vmatmul.f32.gmra.mxu1 %v2874_v48  ;;  %533 = vmatmul.f32.gmra.mxu0 %v2869_v46 }
  0x7f   : > { %1535 = vmatpush.msra.mxu2 %v1532_v51  ;;  %v1529_v51 = vld [vmem:[%s3695_s2 + $0x358] sm:$0xff] }
  0x81   : > { %1536 = vmatpush.msra.mxu2 %v1531_v9 }
  0x83   : > { %688 = vmatmul.f32.gmra.mxu3 %v415_v56  ;;  %584 = vmatmul.f32.gmra.mxu2 %v297_v41  ;;  %v1324_v41 = vld [vmem:[%s3695_s2 + $0x280] sm:$0xff]  ;;  %v3011_v56 = vld [vmem:[#allocation2 + $0xb0] sm:$0xff] }
  0x84   : > { %1355 = vmatpush.msrb.mxu1 %v1324_v41  ;;  %v1296_v41 = vld [vmem:[#allocation2 + $0x4a] sm:$0xff] }
  0x86   : > { %643 = vmatmul.f32.gmra.mxu1 %v2895_v57  ;;  %536 = vmatmul.f32.gmra.mxu0 %v2890_v55 }
  0x87   : > { %2153 = vmatpush.msra.mxu1 %v2148_v50 }
  0x8b   : > { %691 = vmatmul.f32.gmra.mxu3 %v416_v2  ;;  %587 = vmatmul.f32.gmra.mxu2 %v298_v49 }
  0x8e   : > { %646 = vmatmul.f32.gmra.mxu1 %v2916_v3  ;;  %539 = vmatmul.f32.gmra.mxu0 %v2911_v1 }
  0x93   : > { %694 = vmatmul.f32.gmra.mxu3 %v417_v13  ;;  %590 = vmatmul.f32.gmra.mxu2 %v299_v58 }
  0x96   : > { %649 = vmatmul.f32.gmra.mxu1 %v2937_v15  ;;  %542 = vmatmul.f32.gmra.mxu0 %v2932_v12 }
  0x9b   : > { %697 = vmatmul.f32.gmra.mxu3 %v418_v25  ;;  %593 = vmatmul.f32.gmra.mxu2 %v300_v4  ;;  %v1918_v4 = vld [vmem:[%s3695_s2 + $0x470] sm:$0xff] }
  0x9c   : > { %1921 = vmatpush.msra.mxu0 %v1918_v4  ;;  %v1298_v4 = vld [vmem:[#allocation2 + $0x62] sm:$0xff] }
  0x9e   : > { %652 = vmatmul.f32.gmra.mxu1 %v2958_v26  ;;  %545 = vmatmul.f32.gmra.mxu0 %v2953_v23 }
  0x9f   : > { %1922 = vmatpush.msra.mxu0 %v1917_v21 }
  0xa3   : > { %700 = vmatmul.f32.gmra.mxu3 %v419_v35  ;;  %596 = vmatmul.f32.gmra.mxu2 %v301_v17 }
  0xa6   : > { %655 = vmatmul.f32.gmra.mxu1 %v2981_v36  ;;  %548 = vmatmul.f32.gmra.mxu0 %v2976_v34 }
  0xab   : > { %703 = vmatmul.f32.gmra.mxu3 %v420_v42  ;;  %777 = vmatmul.f32.vlgmr.msrb.gmra.mxu2 %v713_v43  ;;  %v2996_v45 = vpop.f32.mrf.mxu0  ;;  %v1916_v43 = vld [vmem:[%s3695_s2 + $0x460] sm:$0xff] }
  0xac   : > { %v3020_v61 = vpop.f32.mrf.mxu1  ;;  %1923 = vmatpush.msra.mxu0 %v1916_v43  ;;  %v1301_v43 = vld [vmem:[#allocation2 + $0x82] sm:$0xff] }
  0xae   : > { %658 = vmatmul.f32.gmra.mxu1 %v2994_v44  ;;  %v3002_v49 = vpop.f32.mrf.mxu2  ;;  %1163 = vmatmul.f32.vlgmr.msrb.gmra.mxu0 %v2715_v53  ;;  %v1725_v53 = vld [vmem:[%s3695_s2 + $0x3f0] sm:$0xff] }
  0xaf   : > { %1728 = vmatpush.msra.mxu3 %v1725_v53  ;;  %v3042_v17 = vpop.f32.mrf.mxu3 }
  0xb3   : > { %706 = vmatmul.f32.gmra.mxu3 %v421_v52  ;;  %780 = vmatmul.f32.gmra.mxu2 %v714_v54  ;;  %v3013_v58 = vpop.f32.mrf.mxu0  ;;  %v1297_v52 = vld [vmem:[#allocation2 + $0x52] sm:$0xff] }
  0xb4   : > { %v3034_v10 = vpop.f32.mrf.mxu1 }
  0xb6   : > { %661 = vmatmul.f32.gmra.mxu1 %v3011_v56  ;;  %v555_v59 = vpop.f32.mrf.mxu2  ;;  %1166 = vmatmul.f32.gmra.mxu0 %v2738_v60  ;;  %v2147_v60 = vld [vmem:[%s3697_s4 + $0x70] sm:$0xff] }
  0xb7   : > { %2154 = vmatpush.msra.mxu1 %v2147_v60  ;;  %v1915_v60 = vld [vmem:[%s3695_s2 + $0x458] sm:$0xff] }
  0xb8   : > { %1924 = vmatpush.msra.mxu0 %v1915_v60 }
  0xbb   : > { %709 = vmatmul.f32.gmra.mxu3 %v422_v63  ;;  %783 = vmatmul.f32.gmra.mxu2 %v1292_v0  ;;  %v3022_v2 = vpop.f32.mrf.mxu0 }
  0xbe   : > { %1356 = vmatmul.f32.vlgmr.msrb.gmra.mxu1 %v1292_v0  ;;  %v558_v7 = vpop.f32.mrf.mxu2  ;;  %1169 = vmatmul.f32.gmra.mxu0 %v2744_v62  ;;  %v1724_v62 = vld [vmem:[%s3695_s2 + $0x3e8] sm:$0xff] }
  0xbf   : > { %1729 = vmatpush.msra.mxu3 %v1724_v62  ;;  %v1528_v62 = vld [vmem:[%s3695_s2 + $0x350] sm:$0xff] }
  0xc3   : > { %970 = vmatmul.f32.vlgmr.msrb.gmra.mxu3 %v2761_v5  ;;  %786 = vmatmul.f32.gmra.mxu2 %v1293_v11  ;;  %v3037_v13 = vpop.f32.mrf.mxu0 }
  0xc6   : > { %1359 = vmatmul.f32.gmra.mxu1 %v1293_v11  ;;  %v561_v18 = vpop.f32.mrf.mxu2  ;;  %1172 = vmatmul.f32.gmra.mxu0 %v2764_v6  ;;  %v2146_v6 = vld [vmem:[%s3697_s4 + $0x68] sm:$0xff] }
  0xc7   : > { %2155 = vmatpush.msra.mxu1 %v2146_v6 }
  0xcb   : > { %973 = vmatmul.f32.gmra.mxu3 %v2769_v8  ;;  %v3046_v20 = vpop.f32.mrf.mxu1  ;;  %789 = vmatmul.f32.gmra.mxu2 %v1294_v19  ;;  %v3048_v5 = vpop.f32.mrf.mxu0  ;;  %v1530_v8 = vld [vmem:[%s3695_s2 + $0x360] sm:$0xff] }
  0xcc   : > { %1537 = vmatpush.msra.mxu2 %v1530_v8  ;;  %v1300_v8 = vld [vmem:[#allocation2 + $0x7a] sm:$0xff] }
  0xce   : > { %v668_v25 = vpop.f32.mrf.mxu3  ;;  %1362 = vmatmul.f32.gmra.mxu1 %v1294_v19  ;;  %v564_v27 = vpop.f32.mrf.mxu2  ;;  %1175 = vmatmul.f32.gmra.mxu0 %v2785_v14  ;;  %v1723_v14 = vld [vmem:[%s3695_s2 + $0x3e0] sm:$0xff] }
  0xcf   : > { %v3054_v28 = vadd.f32 %v668_v25, %v555_v59  ;;  %1730 = vmatpush.msra.mxu3 %v1723_v14  ;;  %1538 = vmatpush.msra.mxu2 %v1529_v51  ;;  %v1914_v14 = vld [vmem:[%s3695_s2 + $0x450] sm:$0xff] }
  0xd0   : > { %1925 = vmatpush.msra.mxu0 %v1914_v14  ;;  %v1113_v14 = vld [vmem:[#allocation2 + $0xc1] sm:$0xff] }
  0xd1   : > { %1539 = vmatpush.msra.mxu2 %v1528_v62 }
  0xd3   : > { %976 = vmatmul.f32.gmra.mxu3 %v2790_v16  ;;  %v3063_v31 = vpop.f32.mrf.mxu1  ;;  %792 = vmatmul.f32.gmra.mxu2 %v1295_v29  ;;  %v3065_v33 = vpop.f32.mrf.mxu0 }
  0xd6   : > { %v671_v35 = vpop.f32.mrf.mxu3  ;;  %1365 = vmatmul.f32.gmra.mxu1 %v1295_v29  ;;  %v567_v37 = vpop.f32.mrf.mxu2  ;;  %1178 = vmatmul.f32.gmra.mxu0 %v2806_v22 }
  0xd7   : > { %v3071_v39 = vadd.f32 %v671_v35, %v558_v7 }
  0xdb   : > { %979 = vmatmul.f32.gmra.mxu3 %v2811_v24  ;;  %v3074_v16 = vpop.f32.mrf.mxu1  ;;  %795 = vmatmul.f32.gmra.mxu2 %v1296_v41  ;;  %v3076_v42 = vpop.f32.mrf.mxu0  ;;  %v2145_v24 = vld [vmem:[%s3697_s4 + $0x60] sm:$0xff] }
  0xdc   : > { %2156 = vmatpush.msra.mxu1 %v2145_v24 }
  0xde   : > { %v674_v47 = vpop.f32.mrf.mxu3  ;;  %1368 = vmatmul.f32.gmra.mxu1 %v1296_v41  ;;  %v570_v50 = vpop.f32.mrf.mxu2  ;;  %1181 = vmatmul.f32.gmra.mxu0 %v2827_v30  ;;  %v1722_v30 = vld [vmem:[%s3695_s2 + $0x3d8] sm:$0xff]  ;;  %v1527_v41 = vld [vmem:[%s3695_s2 + $0x348] sm:$0xff] }
  0xdf   : > { %v3082_v22 = vadd.f32 %v674_v47, %v561_v18  ;;  %1731 = vmatpush.msra.mxu3 %v1722_v30  ;;  %v1299_v18 = vld [vmem:[#allocation2 + $0x6a] sm:$0xff]  ;;  %1540 = vmatpush.msra.mxu2 %v1527_v41  ;;  %v1302_v30 = vld [vmem:[#allocation2 + $0x92] sm:$0xff] }
  0xe3   : > { %982 = vmatmul.f32.gmra.mxu3 %v2832_v32  ;;  %v3091_v54 = vpop.f32.mrf.mxu1  ;;  %798 = vmatmul.f32.gmra.mxu2 %v1297_v52  ;;  %v3093_v53 = vpop.f32.mrf.mxu0 }
  0xe6   : > { %v677_v59 = vpop.f32.mrf.mxu3  ;;  %1371 = vmatmul.f32.gmra.mxu1 %v1297_v52  ;;  %v573_v63 = vpop.f32.mrf.mxu2  ;;  %1184 = vmatmul.f32.gmra.mxu0 %v2848_v38 }
  0xe7   : > { %v3099_v0 = vadd.f32 %v677_v59, %v564_v27 }
  0xeb   : > { %985 = vmatmul.f32.gmra.mxu3 %v2853_v40  ;;  %v3102_v32 = vpop.f32.mrf.mxu1  ;;  %801 = vmatmul.f32.gmra.mxu2 %v1298_v4  ;;  %v3104_v7 = vpop.f32.mrf.mxu0  ;;  %v2144_v40 = vld [vmem:[%s3697_s4 + $0x58] sm:$0xff] }
  0xec   : > { %2157 = vmatpush.msra.mxu1 %v2144_v40 }
  0xee   : > { %v680_v9 = vpop.f32.mrf.mxu3  ;;  %1374 = vmatmul.f32.gmra.mxu1 %v1298_v4  ;;  %v576_v11 = vpop.f32.mrf.mxu2  ;;  %1187 = vmatmul.f32.gmra.mxu0 %v2869_v46  ;;  %v1721_v46 = vld [vmem:[%s3695_s2 + $0x3d0] sm:$0xff] }
  0xef   : > { %v3110_v38 = vadd.f32 %v680_v9, %v567_v37  ;;  %1732 = vmatpush.msra.mxu3 %v1721_v46  ;;  %v1526_v9 = vld [vmem:[%s3695_s2 + $0x340] sm:$0xff] }
  0xf0   : > { %1541 = vmatpush.msra.mxu2 %v1526_v9  ;;  %v1306_v9 = vld [vmem:[#allocation2 + $0xc2] sm:$0xff] }
  0xf3   : > { %988 = vmatmul.f32.gmra.mxu3 %v2874_v48  ;;  %v3119_v19 = vpop.f32.mrf.mxu1  ;;  %804 = vmatmul.f32.gmra.mxu2 %v1299_v18  ;;  %v3121_v21 = vpop.f32.mrf.mxu0 }
  0xf6   : > { %v683_v25 = vpop.f32.mrf.mxu3  ;;  %1377 = vmatmul.f32.gmra.mxu1 %v1299_v18  ;;  %v579_v27 = vpop.f32.mrf.mxu2  ;;  %1190 = vmatmul.f32.gmra.mxu0 %v2890_v55 }
  0xf7   : > { %v3127_v6 = vadd.f32 %v683_v25, %v570_v50 }
  0xfb   : > { %991 = vmatmul.f32.gmra.mxu3 %v2895_v57  ;;  %v3130_v48 = vpop.f32.mrf.mxu1  ;;  %807 = vmatmul.f32.gmra.mxu2 %v1300_v8  ;;  %v3132_v29 = vpop.f32.mrf.mxu0  ;;  %v2143_v57 = vld [vmem:[%s3697_s4 + $0x50] sm:$0xff] }
  0xfc   : > { %2158 = vmatpush.msra.mxu1 %v2143_v57 }
  0xfe   : > { %v686_v35 = vpop.f32.mrf.mxu3  ;;  %1380 = vmatmul.f32.gmra.mxu1 %v1300_v8  ;;  %v582_v37 = vpop.f32.mrf.mxu2  ;;  %1193 = vmatmul.f32.gmra.mxu0 %v2911_v1  ;;  %v1720_v1 = vld [vmem:[%s3695_s2 + $0x3c8] sm:$0xff] }
  0xff   : > { %v3138_v55 = vadd.f32 %v686_v35, %v573_v63  ;;  %1733 = vmatpush.msra.mxu3 %v1720_v1  ;;  %v1913_v63 = vld [vmem:[%s3695_s2 + $0x448] sm:$0xff]  ;;  %v1912_v35 = vld [vmem:[%s3695_s2 + $0x440] sm:$0xff] }
 0x100   : > { %1926 = vmatpush.msra.mxu0 %v1913_v63 }
 0x102   : > { %1927 = vmatpush.msra.mxu0 %v1912_v35  ;;  %v920_v35 = vld [vmem:[#allocation2 + $0xc0] sm:$0xff] }
 0x103   : > { %994 = vmatmul.f32.gmra.mxu3 %v2916_v3  ;;  %v3147_v47 = vpop.f32.mrf.mxu1  ;;  %810 = vmatmul.f32.gmra.mxu2 %v1301_v43  ;;  %v3149_v50 = vpop.f32.mrf.mxu0 }
 0x106   : > { %v689_v24 = vpop.f32.mrf.mxu3  ;;  %1383 = vmatmul.f32.gmra.mxu1 %v1301_v43  ;;  %v585_v51 = vpop.f32.mrf.mxu2  ;;  %1196 = vmatmul.f32.gmra.mxu0 %v2932_v12  ;;  %v1305_v43 = vld [vmem:[#allocation2 + $0xb2] sm:$0xff] }
 0x107   : > { %v3155_v52 = vadd.f32 %v689_v24, %v576_v11  ;;  %v1303_v11 = vld [vmem:[#allocation2 + $0x9a] sm:$0xff] }
 0x10b   : > { %997 = vmatmul.f32.gmra.mxu3 %v2937_v15  ;;  %v3158_v3 = vpop.f32.mrf.mxu1  ;;  %813 = vmatmul.f32.gmra.mxu2 %v1302_v30  ;;  %v3160_v59 = vpop.f32.mrf.mxu0  ;;  %v2142_v15 = vld [vmem:[%s3697_s4 + $0x48] sm:$0xff] }
 0x10c   : > { %2159 = vmatpush.msra.mxu1 %v2142_v15 }
 0x10e   : > { %v692_v4 = vpop.f32.mrf.mxu3  ;;  %1386 = vmatmul.f32.gmra.mxu1 %v1302_v30  ;;  %v588_v60 = vpop.f32.mrf.mxu2  ;;  %1199 = vmatmul.f32.gmra.mxu0 %v2953_v23  ;;  %v1719_v23 = vld [vmem:[%s3695_s2 + $0x3c0] sm:$0xff]  ;;  %v1718_v30 = vld [vmem:[%s3695_s2 + $0x3b8] sm:$0xff] }
 0x10f   : > { %v3166_v12 = vadd.f32 %v692_v4, %v579_v27  ;;  %1734 = vmatpush.msra.mxu3 %v1719_v23  ;;  %v1304_v27 = vld [vmem:[#allocation2 + $0xaa] sm:$0xff]  ;;  %v1115_v23 = vld [vmem:[#allocation2 + $0xd9] sm:$0xff] }
 0x111   : > { %1735 = vmatpush.msra.mxu3 %v1718_v30  ;;  %v1717_v30 = vld [vmem:[%s3695_s2 + $0x3b0] sm:$0xff] }
 0x113   : > { %1000 = vmatmul.f32.gmra.mxu3 %v2958_v26  ;;  %v3175_v40 = vpop.f32.mrf.mxu1  ;;  %816 = vmatmul.f32.gmra.mxu2 %v1303_v11  ;;  %v3177_v62 = vpop.f32.mrf.mxu0 }
 0x114   : > { %1736 = vmatpush.msra.mxu3 %v1717_v30 }
 0x116   : > { %v695_v18 = vpop.f32.mrf.mxu3  ;;  %1389 = vmatmul.f32.gmra.mxu1 %v1303_v11  ;;  %v591_v46 = vpop.f32.mrf.mxu2  ;;  %1202 = vmatmul.f32.gmra.mxu0 %v2976_v34 }
 0x117   : > { %v3183_v25 = vadd.f32 %v695_v18, %v582_v37  ;;  %v1525_v37 = vld [vmem:[%s3695_s2 + $0x338] sm:$0xff] }
 0x118   : > { %1542 = vmatpush.msra.mxu2 %v1525_v37  ;;  %v1911_v18 = vld [vmem:[%s3695_s2 + $0x438] sm:$0xff] }
 0x119   : > { %1928 = vmatpush.msra.mxu0 %v1911_v18  ;;  %v1308_v18 = vld [vmem:[#allocation2 + $0xda] sm:$0xff] }
 0x11b   : > { %1003 = vmatmul.f32.gmra.mxu3 %v2981_v36  ;;  %v3186_v26 = vpop.f32.mrf.mxu1  ;;  %819 = vmatmul.f32.gmra.mxu2 %v1304_v27  ;;  %v3188_v8 = vpop.f32.mrf.mxu0  ;;  %v2141_v36 = vld [vmem:[%s3697_s4 + $0x40] sm:$0xff] }
 0x11c   : > { %2160 = vmatpush.msra.mxu1 %v2141_v36  ;;  %v1307_v36 = vld [vmem:[#allocation2 + $0xca] sm:$0xff] }
 0x11e   : > { %v698_v57 = vpop.f32.mrf.mxu3  ;;  %1392 = vmatmul.f32.gmra.mxu1 %v1304_v27  ;;  %v594_v41 = vpop.f32.mrf.mxu2  ;;  %1205 = vmatmul.f32.gmra.mxu0 %v1113_v14  ;;  %v2140_v27 = vld [vmem:[%s3697_s4 + $0x38] sm:$0xff] }
 0x11f   : > { %v3193_v34 = vadd.f32 %v698_v57, %v585_v51  ;;  %v1114_v51 = vld [vmem:[#allocation2 + $0xc9] sm:$0xff]  ;;  %2161 = vmatpush.msra.mxu1 %v2140_v27 }
 0x120   : > { %v1524_v57 = vld [vmem:[%s3695_s2 + $0x330] sm:$0xff] }
 0x121   : > { %1543 = vmatpush.msra.mxu2 %v1524_v57  ;;  %v1910_v57 = vld [vmem:[%s3695_s2 + $0x430] sm:$0xff] }
 0x122   : > { %1929 = vmatpush.msra.mxu0 %v1910_v57  ;;  %v1523_v57 = vld [vmem:[%s3695_s2 + $0x328] sm:$0xff] }
 0x123   : > { %1006 = vmatmul.f32.gmra.mxu3 %v2994_v44  ;;  %v3202_v1 = vpop.f32.mrf.mxu1  ;;  %822 = vmatmul.f32.gmra.mxu2 %v1305_v43  ;;  %v3204_v24 = vpop.f32.mrf.mxu0 }
 0x124   : > { %1544 = vmatpush.msra.mxu2 %v1523_v57 }
 0x126   : > { %v701_v63 = vpop.f32.mrf.mxu3  ;;  %1395 = vmatmul.f32.gmra.mxu1 %v1305_v43  ;;  %v597_v4 = vpop.f32.mrf.mxu2  ;;  %1208 = vmatmul.f32.gmra.mxu0 %v1114_v51  ;;  %v1116_v51 = vld [vmem:[#allocation2 + $0xe1] sm:$0xff] }
 0x127   : > { %v3209_v15 = vadd.f32 %v701_v63, %v588_v60 }
 0x129   : > { %3700 = vst [vmem:[#allocation3_spill] sm:$0xff] %v3209_v15  ;;  %v1309_v15 = vld [vmem:[#allocation2 + $0xe2] sm:$0xff] }
 0x12b   : > { %1009 = vmatmul.f32.gmra.mxu3 %v3011_v56  ;;  %v3212_v44 = vpop.f32.mrf.mxu1  ;;  %825 = vmatmul.f32.gmra.mxu2 %v1306_v9  ;;  %v3214_v11 = vpop.f32.mrf.mxu0 }
 0x12e   : > { %v704_v60 = vpop.f32.mrf.mxu3  ;;  %1398 = vmatmul.f32.gmra.mxu1 %v1306_v9  ;;  %v778_v14 = vpop.f32.mrf.mxu2  ;;  %1211 = vmatmul.f32.gmra.mxu0 %v1115_v23  ;;  %v921_v23 = vld [vmem:[#allocation2 + $0xc8] sm:$0xff] }
 0x12f   : > { %v3222_v56 = vadd.f32 %v704_v60, %v591_v46 }
 0x131   : > { %3701 = vst [vmem:[#allocation4_spill] sm:$0xff] %v3222_v56  ;;  %v618_v56 = vadd.f32 %v3020_v61, %v2996_v45  ;;  %v627_v45 = vadd.f32 %v3063_v31, %v3037_v13  ;;  %v1119_v31 = vld [vmem:[#allocation2 + $0x109] sm:$0xff] }
 0x133   : > { %1012 = vmatmul.f32.gmra.mxu3 %v920_v35  ;;  %v3227_v37 = vpop.f32.mrf.mxu1  ;;  %828 = vmatmul.f32.gmra.mxu2 %v1307_v36  ;;  %v3229_v43 = vpop.f32.mrf.mxu0  ;;  %v1117_v35 = vld [vmem:[#allocation2 + $0xf1] sm:$0xff] }
 0x136   : > { %v707_v46 = vpop.f32.mrf.mxu3  ;;  %1401 = vmatmul.f32.gmra.mxu1 %v1307_v36  ;;  %v781_v63 = vpop.f32.mrf.mxu2  ;;  %1214 = vmatmul.f32.gmra.mxu0 %v1116_v51  ;;  %v2139_v36 = vld [vmem:[%s3697_s4 + $0x30] sm:$0xff] }
 0x137   : > { %v3234_v9 = vadd.f32 %v707_v46, %v594_v41  ;;  %v624_v41 = vadd.f32 %v3046_v20, %v3022_v2  ;;  %2162 = vmatpush.msra.mxu1 %v2139_v36  ;;  %v874_v2 = vadd.f32 %v778_v14, %v618_v56  ;;  %v923_v14 = vld [vmem:[#allocation2 + $0xe0] sm:$0xff]  ;;  %v621_v56 = vadd.f32 %v3034_v10, %v3013_v58  ;;  %v2138_v58 = vld [vmem:[%s3697_s4 + $0x28] sm:$0xff] }
 0x138   : > { %v630_v10 = vadd.f32 %v3074_v16, %v3048_v5 }
 0x139   : > { %3702 = vst [vmem:[#allocation5_spill] sm:$0xff] %v3234_v9  ;;  %v922_v9 = vld [vmem:[#allocation2 + $0xd8] sm:$0xff]  ;;  %2163 = vmatpush.msra.mxu1 %v2138_v58  ;;  %v1312_v58 = vld [vmem:[#allocation2 + $0x10a] sm:$0xff] }
 0x13b   : > { %1015 = vmatmul.f32.gmra.mxu3 %v921_v23  ;;  %v1357_v27 = vpop.f32.mrf.mxu1  ;;  %831 = vmatmul.f32.gmra.mxu2 %v1308_v18  ;;  %v3236_v60 = vpop.f32.mrf.mxu0 }
 0x13e   : > { %v710_v51 = vpop.f32.mrf.mxu3  ;;  %1404 = vmatmul.f32.gmra.mxu1 %v1308_v18  ;;  %v784_v30 = vpop.f32.mrf.mxu2  ;;  %1217 = vmatmul.f32.gmra.mxu0 %v1117_v35  ;;  %v1118_v35 = vld [vmem:[#allocation2 + $0xf9] sm:$0xff] }
 0x13f   : > { %v3246_v46 = vadd.f32 %v710_v51, %v597_v4  ;;  %v876_v23 = vadd.f32 %v784_v30, %v624_v41  ;;  %v1716_v4 = vld [vmem:[%s3695_s2 + $0x3a8] sm:$0xff]  ;;  %v1310_v30 = vld [vmem:[#allocation2 + $0xf2] sm:$0xff] }
 0x140   : > { %1737 = vmatpush.msra.mxu3 %v1716_v4  ;;  %v875_v4 = vadd.f32 %v781_v63, %v621_v56  ;;  %v1715_v56 = vld [vmem:[%s3695_s2 + $0x3a0] sm:$0xff] }
 0x141   : > { %3703 = vst [vmem:[#allocation6_spill] sm:$0xff] %v3246_v46 }
 0x142   : > { %1738 = vmatpush.msra.mxu3 %v1715_v56  ;;  %v1313_v56 = vld [vmem:[#allocation2 + $0x112] sm:$0xff] }
 0x143   : > { %1018 = vmatmul.f32.gmra.mxu3 %v922_v9  ;;  %v1360_v20 = vpop.f32.mrf.mxu1  ;;  %834 = vmatmul.f32.gmra.mxu2 %v1309_v15  ;;  %v3253_v18 = vpop.f32.mrf.mxu0 }
 0x146   : > { %v971_v61 = vpop.f32.mrf.mxu3  ;;  %1407 = vmatmul.f32.gmra.mxu1 %v1309_v15  ;;  %v787_v36 = vpop.f32.mrf.mxu2  ;;  %1220 = vmatmul.f32.gmra.mxu0 %v1118_v35  ;;  %v1909_v15 = vld [vmem:[%s3695_s2 + $0x428] sm:$0xff]  ;;  %v924_v35 = vld [vmem:[#allocation2 + $0xf0] sm:$0xff] }
 0x147   : > { %v1067_v41 = vadd.f32 %v971_v61, %v874_v2  ;;  %v877_v9 = vadd.f32 %v787_v36, %v627_v45  ;;  %1930 = vmatpush.msra.mxu0 %v1909_v15  ;;  %v1522_v61 = vld [vmem:[%s3695_s2 + $0x320] sm:$0xff] }
 0x148   : > { %v1311_v36 = vld [vmem:[#allocation2 + $0xfa] sm:$0xff]  ;;  %1545 = vmatpush.msra.mxu2 %v1522_v61  ;;  %v926_v61 = vld [vmem:[#allocation2 + $0x108] sm:$0xff] }
 0x149   : > { %v1260_v51 = vadd.f32 %v3214_v11, %v1067_v41 }
 0x14b   : > { %v3263_v57 = vadd.f32 %v1357_v27, %v1260_v51  ;;  %1021 = vmatmul.f32.gmra.mxu3 %v923_v14  ;;  %v1363_v46 = vpop.f32.mrf.mxu1  ;;  %837 = vmatmul.f32.gmra.mxu2 %v1310_v30  ;;  %v3265_v13 = vpop.f32.mrf.mxu0  ;;  %v1120_v14 = vld [vmem:[#allocation2 + $0x111] sm:$0xff] }
 0x14e   : > { %v974_v11 = vpop.f32.mrf.mxu3  ;;  %1410 = vmatmul.f32.gmra.mxu1 %v1310_v30  ;;  %v790_v63 = vpop.f32.mrf.mxu2  ;;  %1223 = vmatmul.f32.gmra.mxu0 %v1119_v31  ;;  %v925_v31 = vld [vmem:[#allocation2 + $0xf8] sm:$0xff] }
 0x14f   : > { %v1068_v27 = vadd.f32 %v974_v11, %v875_v4  ;;  %v878_v2 = vadd.f32 %v790_v63, %v630_v10 }
 0x151   : > { %v1261_v45 = vadd.f32 %v3229_v43, %v1068_v27  ;;  %v633_v43 = vadd.f32 %v3091_v54, %v3065_v33  ;;  %v1121_v27 = vld [vmem:[#allocation2 + $0x121] sm:$0xff] }
 0x152   : > { %v1908_v33 = vld [vmem:[%s3695_s2 + $0x420] sm:$0xff] }
 0x153   : > { %v3279_v41 = vadd.f32 %v1360_v20, %v1261_v45  ;;  %1024 = vmatmul.f32.gmra.mxu3 %v924_v35  ;;  %v1366_v5 = vpop.f32.mrf.mxu1  ;;  %840 = vmatmul.f32.gmra.mxu2 %v1311_v36  ;;  %v3281_v16 = vpop.f32.mrf.mxu0  ;;  %v2137_v54 = vld [vmem:[%s3697_s4 + $0x20] sm:$0xff] }
 0x154   : > { %1931 = vmatpush.msra.mxu0 %v1908_v33  ;;  %2164 = vmatpush.msra.mxu1 %v2137_v54 }
 0x156   : > { %v977_v51 = vpop.f32.mrf.mxu3  ;;  %1413 = vmatmul.f32.gmra.mxu1 %v1311_v36  ;;  %v793_v30 = vpop.f32.mrf.mxu2  ;;  %1226 = vmatmul.f32.gmra.mxu0 %v1120_v14  ;;  %v1521_v14 = vld [vmem:[%s3695_s2 + $0x318] sm:$0xff] }
 0x157   : > { %v1069_v20 = vadd.f32 %v977_v51, %v876_v23  ;;  %v879_v4 = vadd.f32 %v793_v30, %v633_v43  ;;  %1546 = vmatpush.msra.mxu2 %v1521_v14  ;;  %v1122_v51 = vld [vmem:[#allocation2 + $0x129] sm:$0xff] }
 0x158   : > { %v1520_v14 = vld [vmem:[%s3695_s2 + $0x310] sm:$0xff] }
 0x159   : > { %v1262_v15 = vadd.f32 %v3236_v60, %v1069_v20  ;;  %v636_v60 = vadd.f32 %v3102_v32, %v3076_v42  ;;  %1547 = vmatpush.msra.mxu2 %v1520_v14 }
 0x15b   : > { %v3289_v10 = vadd.f32 %v1363_v46, %v1262_v15  ;;  %1027 = vmatmul.f32.gmra.mxu3 %v925_v31  ;;  %v1369_v11 = vpop.f32.mrf.mxu1  ;;  %843 = vmatmul.f32.gmra.mxu2 %v1312_v58  ;;  %v3291_v63 = vpop.f32.mrf.mxu0  ;;  %v927_v15 = vld [vmem:[#allocation2 + $0x110] sm:$0xff] }
 0x15e   : > { %v980_v46 = vpop.f32.mrf.mxu3  ;;  %1416 = vmatmul.f32.gmra.mxu1 %v1312_v58  ;;  %v796_v23 = vpop.f32.mrf.mxu2  ;;  %1229 = vmatmul.f32.gmra.mxu0 %v1121_v27  ;;  %v1314_v27 = vld [vmem:[#allocation2 + $0x122] sm:$0xff] }
 0x15f   : > { %v1070_v35 = vadd.f32 %v980_v46, %v877_v9  ;;  %v880_v45 = vadd.f32 %v796_v23, %v636_v60  ;;  %v1714_v9 = vld [vmem:[%s3695_s2 + $0x398] sm:$0xff] }
 0x160   : > { %1739 = vmatpush.msra.mxu3 %v1714_v9  ;;  %v1123_v46 = vld [vmem:[#allocation2 + $0x139] sm:$0xff]  ;;  %v1124_v9 = vld [vmem:[#allocation2 + $0x141] sm:$0xff] }
 0x161   : > { %v1263_v36 = vadd.f32 %v3253_v18, %v1070_v35  ;;  %v639_v18 = vadd.f32 %v3119_v19, %v3093_v53  ;;  %v1907_v53 = vld [vmem:[%s3695_s2 + $0x418] sm:$0xff] }
 0x162   : > { %1932 = vmatpush.msra.mxu0 %v1907_v53  ;;  %v2136_v19 = vld [vmem:[%s3697_s4 + $0x18] sm:$0xff] }
 0x163   : > { %v3305_v43 = vadd.f32 %v1366_v5, %v1263_v36  ;;  %1030 = vmatmul.f32.gmra.mxu3 %v926_v61  ;;  %v1372_v42 = vpop.f32.mrf.mxu1  ;;  %846 = vmatmul.f32.gmra.mxu2 %v1313_v56  ;;  %v3307_v32 = vpop.f32.mrf.mxu0  ;;  %v928_v61 = vld [vmem:[#allocation2 + $0x120] sm:$0xff] }
 0x164   : > { %2165 = vmatpush.msra.mxu1 %v2136_v19  ;;  %v1125_v19 = vld [vmem:[#allocation2 + $0x151] sm:$0xff] }
 0x166   : > { %v983_v30 = vpop.f32.mrf.mxu3  ;;  %1419 = vmatmul.f32.gmra.mxu1 %v1313_v56  ;;  %v799_v20 = vpop.f32.mrf.mxu2  ;;  %1232 = vmatmul.f32.gmra.mxu0 %v1122_v51  ;;  %v1315_v56 = vld [vmem:[#allocation2 + $0x12a] sm:$0xff] }
 0x167   : > { %v1071_v5 = vadd.f32 %v983_v30, %v878_v2  ;;  %v881_v31 = vadd.f32 %v799_v20, %v639_v18 }
 0x169   : > { %v1264_v58 = vadd.f32 %v3265_v13, %v1071_v5  ;;  %v642_v13 = vadd.f32 %v3130_v48, %v3104_v7  ;;  %v929_v5 = vld [vmem:[#allocation2 + $0x128] sm:$0xff] }
 0x16b   : > { %v3315_v33 = vadd.f32 %v1369_v11, %v1264_v58  ;;  %1033 = vmatmul.f32.gmra.mxu3 %v927_v15  ;;  %v1375_v54 = vpop.f32.mrf.mxu1  ;;  %849 = vmatmul.f32.gmra.mxu2 %v1314_v27  ;;  %v3317_v60 = vpop.f32.mrf.mxu0  ;;  %v1316_v58 = vld [vmem:[#allocation2 + $0x13a] sm:$0xff] }
 0x16e   : > { %v986_v2 = vpop.f32.mrf.mxu3  ;;  %1422 = vmatmul.f32.gmra.mxu1 %v1314_v27  ;;  %v802_v11 = vpop.f32.mrf.mxu2  ;;  %1235 = vmatmul.f32.gmra.mxu0 %v1123_v46 }
 0x16f   : > { %v1072_v23 = vadd.f32 %v986_v2, %v879_v4  ;;  %v882_v35 = vadd.f32 %v802_v11, %v642_v13  ;;  %v1713_v4 = vld [vmem:[%s3695_s2 + $0x390] sm:$0xff]  ;;  %v930_v11 = vld [vmem:[#allocation2 + $0x138] sm:$0xff] }
 0x170   : > { %1740 = vmatpush.msra.mxu3 %v1713_v4 }
 0x171   : > { %v1265_v36 = vadd.f32 %v3281_v16, %v1072_v23  ;;  %v645_v16 = vadd.f32 %v3147_v47, %v3121_v21  ;;  %v1906_v21 = vld [vmem:[%s3695_s2 + $0x410] sm:$0xff] }
 0x172   : > { %1933 = vmatpush.msra.mxu0 %v1906_v21  ;;  %v2135_v47 = vld [vmem:[%s3697_s4 + $0x10] sm:$0xff] }
 0x173   : > { %v3331_v51 = vadd.f32 %v1372_v42, %v1265_v36  ;;  %1036 = vmatmul.f32.gmra.mxu3 %v928_v61  ;;  %v1378_v7 = vpop.f32.mrf.mxu1  ;;  %852 = vmatmul.f32.gmra.mxu2 %v1315_v56  ;;  %v3333_v48 = vpop.f32.mrf.mxu0  ;;  %v1519_v61 = vld [vmem:[%s3695_s2 + $0x308] sm:$0xff] }
 0x174   : > { %2166 = vmatpush.msra.mxu1 %v2135_v47  ;;  %v1317_v36 = vld [vmem:[#allocation2 + $0x142] sm:$0xff]  ;;  %1548 = vmatpush.msra.mxu2 %v1519_v61  ;;  %v1128_v61 = vld [vmem:[#allocation2 + $0x171] sm:$0xff] }
 0x176   : > { %v989_v18 = vpop.f32.mrf.mxu3  ;;  %1425 = vmatmul.f32.gmra.mxu1 %v1315_v56  ;;  %v805_v30 = vpop.f32.mrf.mxu2  ;;  %1238 = vmatmul.f32.gmra.mxu0 %v1124_v9  ;;  %v1126_v56 = vld [vmem:[#allocation2 + $0x159] sm:$0xff] }
 0x177   : > { %v1073_v42 = vadd.f32 %v989_v18, %v880_v45  ;;  %v883_v20 = vadd.f32 %v805_v30, %v645_v16  ;;  %v931_v18 = vld [vmem:[#allocation2 + $0x140] sm:$0xff] }
 0x179   : > { %v1266_v15 = vadd.f32 %v3291_v63, %v1073_v42  ;;  %v648_v63 = vadd.f32 %v3158_v3, %v3132_v29  ;;  %v1318_v42 = vld [vmem:[#allocation2 + $0x152] sm:$0xff] }
 0x17b   : > { %v3341_v27 = vadd.f32 %v1375_v54, %v1266_v15  ;;  %1039 = vmatmul.f32.gmra.mxu3 %v929_v5  ;;  %v1381_v46 = vpop.f32.mrf.mxu1  ;;  %855 = vmatmul.f32.gmra.mxu2 %v1316_v58  ;;  %v3343_v53 = vpop.f32.mrf.mxu0 }
 0x17e   : > { %v992_v45 = vpop.f32.mrf.mxu3  ;;  %1428 = vmatmul.f32.gmra.mxu1 %v1316_v58  ;;  %v808_v54 = vpop.f32.mrf.mxu2  ;;  %1241 = vmatmul.f32.gmra.mxu0 %v1125_v19  ;;  %v1127_v19 = vld [vmem:[#allocation2 + $0x169] sm:$0xff] }
 0x17f   : > { %v1074_v13 = vadd.f32 %v992_v45, %v881_v31  ;;  %v3353_v2 = vadd.f32 %v808_v54, %v648_v63  ;;  %v1712_v31 = vld [vmem:[%s3695_s2 + $0x388] sm:$0xff]  ;;  %v932_v45 = vld [vmem:[#allocation2 + $0x150] sm:$0xff] }
 0x180   : > { %1741 = vmatpush.msra.mxu3 %v1712_v31 }
 0x181   : > { %v1267_v23 = vadd.f32 %v3307_v32, %v1074_v13  ;;  %v651_v32 = vadd.f32 %v3175_v40, %v3149_v50  ;;  %v1905_v50 = vld [vmem:[%s3695_s2 + $0x408] sm:$0xff]  ;;  %v1518_v13 = vld [vmem:[%s3695_s2 + $0x300] sm:$0xff] }
 0x182   : > { %1934 = vmatpush.msra.mxu0 %v1905_v50  ;;  %v2134_v40 = vld [vmem:[%s3697_s4 + $0x8] sm:$0xff]  ;;  %1549 = vmatpush.msra.mxu2 %v1518_v13  ;;  %v935_v13 = vld [vmem:[#allocation2 + $0x170] sm:$0xff] }
 0x183   : > { %v3359_v14 = vadd.f32 %v1378_v7, %v1267_v23  ;;  %1042 = vmatmul.f32.gmra.mxu3 %v930_v11  ;;  %v1384_v29 = vpop.f32.mrf.mxu1  ;;  %858 = vmatmul.f32.gmra.mxu2 %v1317_v36  ;;  %v3361_v3 = vpop.f32.mrf.mxu0  ;;  %v1319_v11 = vld [vmem:[#allocation2 + $0x15a] sm:$0xff] }
 0x184   : > { %2167 = vmatpush.msra.mxu1 %v2134_v40  ;;  %v934_v40 = vld [vmem:[#allocation2 + $0x168] sm:$0xff] }
 0x186   : > { %v995_v9 = vpop.f32.mrf.mxu3  ;;  %1431 = vmatmul.f32.gmra.mxu1 %v1317_v36  ;;  %v811_v4 = vpop.f32.mrf.mxu2  ;;  %1244 = vmatmul.f32.gmra.mxu0 %v1126_v56  ;;  %v657_v36 = vadd.f32 %v3202_v1, %v3177_v62  ;;  %v1904_v62 = vld [vmem:[%s3695_s2 + $0x400] sm:$0xff] }
 0x187   : > { %v1075_v7 = vadd.f32 %v995_v9, %v882_v35  ;;  %v885_v16 = vadd.f32 %v811_v4, %v651_v32  ;;  %v302_v35 = vld [vmem:[%s2552_s23 + $0xf0] sm:$0xff]  ;;  %v933_v9 = vld [vmem:[#allocation2 + $0x158] sm:$0xff]  ;;  %v2133_v1 = vld [vmem:[%s3697_s4] sm:$0xff]  ;;  %1935 = vmatpush.msra.mxu0 %v1904_v62 }
 0x188   : > { %389 = vst [vmem:[#allocation2 + $0x181] sm:$0xff] %v302_v35  ;;  %2168 = vmatpush.msra.mxu1 %v2133_v1  ;;  %v1873_v1 = vld [vmem:[#allocation2 + $0x3a] sm:$0xff] }
 0x189   : > { %v1268_v30 = vadd.f32 %v3317_v60, %v1075_v7  ;;  %v654_v60 = vadd.f32 %v3186_v26, %v3160_v59  ;;  %v1320_v7 = vld [vmem:[#allocation2 + $0x16a] sm:$0xff] }
 0x18b   : > { %v3369_v5 = vadd.f32 %v1381_v46, %v1268_v30  ;;  %1045 = vmatmul.f32.gmra.mxu3 %v931_v18  ;;  %v1387_v15 = vpop.f32.mrf.mxu1  ;;  %861 = vmatmul.f32.gmra.mxu2 %v1318_v42  ;;  %v3371_v58 = vpop.f32.mrf.mxu0 }
 0x18e   : > { %v998_v46 = vpop.f32.mrf.mxu3  ;;  %1434 = vmatmul.f32.gmra.mxu1 %v1318_v42  ;;  %v814_v21 = vpop.f32.mrf.mxu2  ;;  %1247 = vmatmul.f32.gmra.mxu0 %v1127_v19 }
 0x18f   : > { %v1076_v47 = vadd.f32 %v998_v46, %v883_v20  ;;  %v886_v63 = vadd.f32 %v814_v21, %v654_v60  ;;  %v1711_v20 = vld [vmem:[%s3695_s2 + $0x380] sm:$0xff]  ;;  %v1321_v46 = vld [vmem:[#allocation2 + $0x172] sm:$0xff] }
 0x190   : > { %1742 = vmatpush.msra.mxu3 %v1711_v20 }
 0x191   : > { %v1269_v54 = vadd.f32 %v3333_v48, %v1076_v47  ;;  %v303_v48 = vld [vmem:[%s2552_s23 + $0xf8] sm:$0xff] }
 0x192   : > { %390 = vst [vmem:[#allocation2 + $0x189] sm:$0xff] %v303_v48 }
 0x193   : > { %v3386_v23 = vadd.f32 %v1384_v29, %v1269_v54  ;;  %1048 = vmatmul.f32.gmra.mxu3 %v932_v45  ;;  %v1390_v59 = vpop.f32.mrf.mxu1  ;;  %864 = vmatmul.f32.gmra.mxu2 %v1319_v11  ;;  %v3388_v26 = vpop.f32.mrf.mxu0  ;;  %v663_v54 = vadd.f32 %v3227_v37, %v3204_v24  ;;  %v666_v24 = vadd.f32 %v3042_v17, %v3002_v49 }
 0x196   : > { %v1001_v56 = vpop.f32.mrf.mxu3  ;;  %1437 = vmatmul.f32.gmra.mxu1 %v1319_v11  ;;  %v817_v29 = vpop.f32.mrf.mxu2  ;;  %1250 = vmatmul.f32.gmra.mxu0 %v1128_v61  ;;  %v1486_v11 = vld [vmem:[#allocation2 + $0x30] sm:$0xff] }
 0x197   : > { %v1077_v31 = vadd.f32 %v1001_v56, %v3353_v2  ;;  %v887_v32 = vadd.f32 %v817_v29, %v657_v36  ;;  %v1872_v56 = vld [vmem:[#allocation2 + $0x32] sm:$0xff] }
 0x199   : > { %v1270_v4 = vadd.f32 %v3343_v53, %v1077_v31  ;;  %v660_v53 = vadd.f32 %v3212_v44, %v3188_v8  ;;  %v1322_v20 = vld [vmem:[#allocation2 + $0x182] sm:$0xff] }
 0x19a   : > { %v936_v31 = vld [vmem:[#allocation2 + $0x180] sm:$0xff] }
 0x19b   : > { %v3398_v18 = vadd.f32 %v1387_v15, %v1270_v4  ;;  %1051 = vmatmul.f32.gmra.mxu3 %v933_v9  ;;  %v1393_v30 = vpop.f32.mrf.mxu1  ;;  %867 = vmatmul.f32.gmra.mxu2 %v1320_v7  ;;  %v3400_v42 = vpop.f32.mrf.mxu0  ;;  %v1487_v9 = vld [vmem:[#allocation2 + $0x38] sm:$0xff] }
 0x19e   : > { %v1004_v2 = vpop.f32.mrf.mxu3  ;;  %1440 = vmatmul.f32.gmra.mxu1 %v1320_v7  ;;  %v820_v15 = vpop.f32.mrf.mxu2  ;;  %1253 = vmatmul.f32.gmra.mxu0 %v302_v35 }
 0x19f   : > { %v1078_v19 = vadd.f32 %v1004_v2, %v885_v16  ;;  %v888_v50 = vadd.f32 %v820_v15, %v660_v53  ;;  %v937_v2 = vld [vmem:[#allocation2 + $0x188] sm:$0xff] }
 0x1a1   : > { %v1271_v60 = vadd.f32 %v3361_v3, %v1078_v19 }
 0x1a3   : > { %v3411_v21 = vadd.f32 %v1390_v59, %v1271_v60  ;;  %1054 = vmatmul.f32.gmra.mxu3 %v934_v40  ;;  %v1396_v47 = vpop.f32.mrf.mxu1  ;;  %870 = vmatmul.f32.gmra.mxu2 %v1321_v46  ;;  %v1209_v45 = vpop.f32.mrf.mxu0  ;;  %v2101_v60 = vld [vmem:[%s3428_s7] sm:$0xff] }
 0x1a6   : > { %v1007_v8 = vpop.f32.mrf.mxu3  ;;  %1443 = vmatmul.f32.gmra.mxu1 %v1321_v46  ;;  %v823_v44 = vpop.f32.mrf.mxu2  ;;  %1256 = vmatmul.f32.gmra.mxu0 %v303_v48  ;;  %v1874_v46 = vld [vmem:[#allocation2 + $0x4a] sm:$0xff] }
 0x1a7   : > { %v1079_v35 = vadd.f32 %v1007_v8, %v886_v63  ;;  %v889_v16 = vadd.f32 %v823_v44, %v663_v54  ;;  %v1679_v44 = vld [vmem:[#allocation2 + $0x31] sm:$0xff] }
 0x1a9   : > { %v1272_v3 = vadd.f32 %v3371_v58, %v1079_v35  ;;  %v1489_v35 = vld [vmem:[#allocation2 + $0x50] sm:$0xff] }
 0x1ab   : > { %v3416_v61 = vadd.f32 %v1393_v30, %v1272_v3  ;;  %1057 = vmatmul.f32.gmra.mxu3 %v935_v13  ;;  %v1399_v59 = vpop.f32.mrf.mxu1  ;;  %1550 = vmatmul.f32.vlgmr.msra.gmra.mxu2 %v1486_v11  ;;  %v1212_v36 = vpop.f32.mrf.mxu0  ;;  %v1323_v30 = vld [vmem:[#allocation2 + $0x18a] sm:$0xff] }
 0x1ac   : > { %v2102_v3 = vld [vmem:[%s3428_s7 + $0x8] sm:$0xff] }
 0x1ae   : > { %v1010_v37 = vpop.f32.mrf.mxu3  ;;  %1446 = vmatmul.f32.gmra.mxu1 %v1322_v20  ;;  %v826_v48 = vpop.f32.mrf.mxu2  ;;  %1936 = vmatmul.f32.vlgmr.msra.gmra.mxu0 %v1872_v56  ;;  %v1875_v20 = vld [vmem:[#allocation2 + $0x52] sm:$0xff] }
 0x1af   : > { %v1080_v63 = vadd.f32 %v1010_v37, %v887_v32  ;;  %v890_v29 = vadd.f32 %v826_v48, %v666_v24  ;;  %v1490_v48 = vld [vmem:[#allocation2 + $0x60] sm:$0xff] }
 0x1b1   : > { %v1273_v58 = vadd.f32 %v3388_v26, %v1080_v63  ;;  %v1488_v26 = vld [vmem:[#allocation2 + $0x48] sm:$0xff] }
 0x1b3   : > { %v3421_v4 = vadd.f32 %v1396_v47, %v1273_v58  ;;  %1060 = vmatmul.f32.gmra.mxu3 %v936_v31  ;;  %v1402_v7 = vpop.f32.mrf.mxu1  ;;  %1553 = vmatmul.f32.gmra.mxu2 %v1487_v9  ;;  %v1215_v62 = vpop.f32.mrf.mxu0  ;;  %v2103_v9 = vld [vmem:[%s3428_s7 + $0x10] sm:$0xff] }
 0x1b6   : > { %v1013_v49 = vpop.f32.mrf.mxu3  ;;  %1449 = vmatmul.f32.gmra.mxu1 %v1323_v30  ;;  %v829_v17 = vpop.f32.mrf.mxu2  ;;  %1939 = vmatmul.f32.gmra.mxu0 %v1873_v1 }
 0x1b7   : > { %v1081_v53 = vadd.f32 %v1013_v49, %v888_v50  ;;  %v891_v32 = vadd.f32 %v829_v17, %v3054_v28  ;;  %v1491_v17 = vld [vmem:[#allocation2 + $0x68] sm:$0xff] }
 0x1b9   : > { %v1274_v15 = vadd.f32 %v3400_v42, %v1081_v53 }
 0x1bb   : > { %v3431_v19 = vadd.f32 %v1399_v59, %v1274_v15  ;;  %1063 = vmatmul.f32.gmra.mxu3 %v937_v2  ;;  %v1405_v40 = vpop.f32.mrf.mxu1  ;;  %1556 = vmatmul.f32.gmra.mxu2 %v1488_v26  ;;  %v1218_v50 = vpop.f32.mrf.mxu0  ;;  %v2104_v26 = vld [vmem:[%s3428_s7 + $0x18] sm:$0xff] }
 0x1be   : > { %v1016_v28 = vpop.f32.mrf.mxu3  ;;  %2169 = vmatmul.f32.vlgmr.msra.gmra.mxu1 %v2101_v60  ;;  %v832_v47 = vpop.f32.mrf.mxu2  ;;  %1942 = vmatmul.f32.gmra.mxu0 %v1874_v46 }
 0x1bf   : > { %v1082_v54 = vadd.f32 %v1016_v28, %v889_v16  ;;  %v892_v8 = vadd.f32 %v832_v47, %v3071_v39  ;;  %v1680_v39 = vld [vmem:[#allocation2 + $0x39] sm:$0xff] }
 0x1c0   : > { %v1492_v47 = vld [vmem:[#allocation2 + $0x78] sm:$0xff] }
 0x1c1   : > { %v1275_v13 = vadd.f32 %v1209_v45, %v1082_v54 }
 0x1c3   : > { %v3435_v42 = vadd.f32 %v1402_v7, %v1275_v13  ;;  %1743 = vmatmul.f32.vlgmr.msra.gmra.mxu3 %v1679_v44  ;;  %v1408_v11 = vpop.f32.mrf.mxu1  ;;  %1559 = vmatmul.f32.gmra.mxu2 %v1489_v35  ;;  %v1221_v59 = vpop.f32.mrf.mxu0  ;;  %v1876_v7 = vld [vmem:[#allocation2 + $0x62] sm:$0xff] }
 0x1c4   : > { %v2105_v35 = vld [vmem:[%s3428_s7 + $0x20] sm:$0xff] }
 0x1c6   : > { %v1019_v56 = vpop.f32.mrf.mxu3  ;;  %2172 = vmatmul.f32.gmra.mxu1 %v2102_v3  ;;  %v835_v24 = vpop.f32.mrf.mxu2  ;;  %1945 = vmatmul.f32.gmra.mxu0 %v1875_v20 }
 0x1c7   : > { %v1083_v37 = vadd.f32 %v1019_v56, %v890_v29  ;;  %v893_v16 = vadd.f32 %v835_v24, %v3082_v22  ;;  %v1681_v22 = vld [vmem:[#allocation2 + $0x49] sm:$0xff]  ;;  %v1493_v24 = vld [vmem:[#allocation2 + $0x80] sm:$0xff] }
 0x1c9   : > { %v1276_v63 = vadd.f32 %v1212_v36, %v1083_v37 }
 0x1cb   : > { %v3439_v45 = vadd.f32 %v1405_v40, %v1276_v63  ;;  %1746 = vmatmul.f32.gmra.mxu3 %v1680_v39  ;;  %v1411_v31 = vpop.f32.mrf.mxu1  ;;  %1562 = vmatmul.f32.gmra.mxu2 %v1490_v48  ;;  %v1224_v58 = vpop.f32.mrf.mxu0  ;;  %v1877_v40 = vld [vmem:[#allocation2 + $0x6a] sm:$0xff] }
 0x1cc   : > { %v2106_v48 = vld [vmem:[%s3428_s7 + $0x28] sm:$0xff] }
 0x1ce   : > { %v1022_v30 = vpop.f32.mrf.mxu3  ;;  %2175 = vmatmul.f32.gmra.mxu1 %v2103_v9  ;;  %v838_v1 = vpop.f32.mrf.mxu2  ;;  %1948 = vmatmul.f32.gmra.mxu0 %v1876_v7 }
 0x1cf   : > { %v1084_v49 = vadd.f32 %v1022_v30, %v891_v32  ;;  %v894_v29 = vadd.f32 %v838_v1, %v3099_v0  ;;  %v1682_v0 = vld [vmem:[#allocation2 + $0x51] sm:$0xff] }
 0x1d0   : > { %v1494_v1 = vld [vmem:[#allocation2 + $0x90] sm:$0xff] }
 0x1d1   : > { %v1277_v53 = vadd.f32 %v1215_v62, %v1084_v49 }
 0x1d3   : > { %v3443_v36 = vadd.f32 %v1408_v11, %v1277_v53  ;;  %1749 = vmatmul.f32.gmra.mxu3 %v1681_v22  ;;  %v1414_v2 = vpop.f32.mrf.mxu1  ;;  %1565 = vmatmul.f32.gmra.mxu2 %v1491_v17  ;;  %v1227_v15 = vpop.f32.mrf.mxu0  ;;  %v1878_v11 = vld [vmem:[#allocation2 + $0x7a] sm:$0xff]  ;;  %v2107_v17 = vld [vmem:[%s3428_s7 + $0x30] sm:$0xff] }
 0x1d6   : > { %v1025_v60 = vpop.f32.mrf.mxu3  ;;  %2178 = vmatmul.f32.gmra.mxu1 %v2104_v26  ;;  %v841_v46 = vpop.f32.mrf.mxu2  ;;  %1951 = vmatmul.f32.gmra.mxu0 %v1877_v40 }
 0x1d7   : > { %v1085_v28 = vadd.f32 %v1025_v60, %v892_v8  ;;  %v895_v32 = vadd.f32 %v841_v46, %v3110_v38  ;;  %v1683_v38 = vld [vmem:[#allocation2 + $0x61] sm:$0xff]  ;;  %v1495_v46 = vld [vmem:[#allocation2 + $0x98] sm:$0xff] }
 0x1d9   : > { %v1278_v54 = vadd.f32 %v1218_v50, %v1085_v28 }
 0x1db   : > { %v3447_v62 = vadd.f32 %v1411_v31, %v1278_v54  ;;  %1752 = vmatmul.f32.gmra.mxu3 %v1682_v0  ;;  %v1417_v44 = vpop.f32.mrf.mxu1  ;;  %1568 = vmatmul.f32.gmra.mxu2 %v1492_v47  ;;  %v1230_v13 = vpop.f32.mrf.mxu0  ;;  %v1879_v31 = vld [vmem:[#allocation2 + $0x82] sm:$0xff]  ;;  %v2108_v47 = vld [vmem:[%s3428_s7 + $0x38] sm:$0xff] }
 0x1de   : > { %v1028_v3 = vpop.f32.mrf.mxu3  ;;  %2181 = vmatmul.f32.gmra.mxu1 %v2105_v35  ;;  %v844_v20 = vpop.f32.mrf.mxu2  ;;  %1954 = vmatmul.f32.gmra.mxu0 %v1878_v11 }
 0x1df   : > { %v1086_v56 = vadd.f32 %v1028_v3, %v893_v16  ;;  %v896_v8 = vadd.f32 %v844_v20, %v3127_v6  ;;  %v1684_v6 = vld [vmem:[#allocation2 + $0x69] sm:$0xff] }
 0x1e0   : > { %v1496_v20 = vld [vmem:[#allocation2 + $0xa8] sm:$0xff] }
 0x1e1   : > { %v1279_v37 = vadd.f32 %v1221_v59, %v1086_v56 }
 0x1e3   : > { %v3451_v50 = vadd.f32 %v1414_v2, %v1279_v37  ;;  %1755 = vmatmul.f32.gmra.mxu3 %v1683_v38  ;;  %v1420_v39 = vpop.f32.mrf.mxu1  ;;  %1571 = vmatmul.f32.gmra.mxu2 %v1493_v24  ;;  %v1233_v63 = vpop.f32.mrf.mxu0  ;;  %v1880_v2 = vld [vmem:[#allocation2 + $0x92] sm:$0xff]  ;;  %v2109_v24 = vld [vmem:[%s3428_s7 + $0x40] sm:$0xff] }
 0x1e6   : > { %v1031_v9 = vpop.f32.mrf.mxu3  ;;  %2184 = vmatmul.f32.gmra.mxu1 %v2106_v48  ;;  %v847_v7 = vpop.f32.mrf.mxu2  ;;  %1957 = vmatmul.f32.gmra.mxu0 %v1879_v31 }
 0x1e7   : > { %v1087_v30 = vadd.f32 %v1031_v9, %v894_v29  ;;  %v897_v16 = vadd.f32 %v847_v7, %v3138_v55  ;;  %v1685_v55 = vld [vmem:[#allocation2 + $0x79] sm:$0xff]  ;;  %v1497_v7 = vld [vmem:[#allocation2 + $0xb0] sm:$0xff] }
 0x1e9   : > { %v1280_v49 = vadd.f32 %v1224_v58, %v1087_v30 }
 0x1eb   : > { %v3455_v59 = vadd.f32 %v1417_v44, %v1280_v49  ;;  %1758 = vmatmul.f32.gmra.mxu3 %v1684_v6  ;;  %v1423_v22 = vpop.f32.mrf.mxu1  ;;  %1574 = vmatmul.f32.gmra.mxu2 %v1494_v1  ;;  %v1236_v53 = vpop.f32.mrf.mxu0  ;;  %v1881_v44 = vld [vmem:[#allocation2 + $0x9a] sm:$0xff]  ;;  %v2110_v1 = vld [vmem:[%s3428_s7 + $0x48] sm:$0xff] }
 0x1ee   : > { %v1034_v26 = vpop.f32.mrf.mxu3  ;;  %2187 = vmatmul.f32.gmra.mxu1 %v2107_v17  ;;  %v850_v40 = vpop.f32.mrf.mxu2  ;;  %1960 = vmatmul.f32.gmra.mxu0 %v1880_v2 }
 0x1ef   : > { %v1088_v60 = vadd.f32 %v1034_v26, %v895_v32  ;;  %v898_v29 = vadd.f32 %v850_v40, %v3155_v52  ;;  %v1686_v52 = vld [vmem:[#allocation2 + $0x81] sm:$0xff] }
 0x1f0   : > { %v1498_v40 = vld [vmem:[#allocation2 + $0xc0] sm:$0xff] }
 0x1f1   : > { %v1281_v28 = vadd.f32 %v1227_v15, %v1088_v60 }
 0x1f3   : > { %v3459_v58 = vadd.f32 %v1420_v39, %v1281_v28  ;;  %1761 = vmatmul.f32.gmra.mxu3 %v1685_v55  ;;  %v1426_v0 = vpop.f32.mrf.mxu1  ;;  %1577 = vmatmul.f32.gmra.mxu2 %v1495_v46  ;;  %v1239_v54 = vpop.f32.mrf.mxu0  ;;  %v1882_v39 = vld [vmem:[#allocation2 + $0xaa] sm:$0xff] }
 0x1f4   : > { %v2111_v46 = vld [vmem:[%s3428_s7 + $0x50] sm:$0xff] }
 0x1f6   : > { %v1037_v35 = vpop.f32.mrf.mxu3  ;;  %2190 = vmatmul.f32.gmra.mxu1 %v2108_v47  ;;  %v853_v11 = vpop.f32.mrf.mxu2  ;;  %1963 = vmatmul.f32.gmra.mxu0 %v1881_v44 }
 0x1f7   : > { %v1089_v3 = vadd.f32 %v1037_v35, %v896_v8  ;;  %v899_v32 = vadd.f32 %v853_v11, %v3166_v12  ;;  %v1687_v12 = vld [vmem:[#allocation2 + $0x91] sm:$0xff] }
 0x1f9   : > { %v1282_v56 = vadd.f32 %v1230_v13, %v1089_v3  ;;  %v1499_v3 = vld [vmem:[#allocation2 + $0xc8] sm:$0xff] }
 0x1fb   : > { %v3463_v15 = vadd.f32 %v1423_v22, %v1282_v56  ;;  %1764 = vmatmul.f32.gmra.mxu3 %v1686_v52  ;;  %v1429_v38 = vpop.f32.mrf.mxu1  ;;  %1580 = vmatmul.f32.gmra.mxu2 %v1496_v20  ;;  %v1242_v37 = vpop.f32.mrf.mxu0  ;;  %v1883_v22 = vld [vmem:[#allocation2 + $0xb2] sm:$0xff] }
 0x1fc   : > { %v2112_v56 = vld [vmem:[%s3428_s7 + $0x58] sm:$0xff] }
 0x1fe   : > { %v1040_v48 = vpop.f32.mrf.mxu3  ;;  %2193 = vmatmul.f32.gmra.mxu1 %v2109_v24  ;;  %v856_v31 = vpop.f32.mrf.mxu2  ;;  %1966 = vmatmul.f32.gmra.mxu0 %v1882_v39  ;;  %v1885_v24 = vld [vmem:[#allocation2 + $0xca] sm:$0xff] }
 0x1ff   : > { %v1090_v9 = vadd.f32 %v1040_v48, %v897_v16  ;;  %v900_v8 = vadd.f32 %v856_v31, %v3183_v25  ;;  %v1688_v25 = vld [vmem:[#allocation2 + $0x99] sm:$0xff] }
 0x201   : > { %v1283_v30 = vadd.f32 %v1233_v63, %v1090_v9 }
 0x203   : > { %v3467_v13 = vadd.f32 %v1426_v0, %v1283_v30  ;;  %1767 = vmatmul.f32.gmra.mxu3 %v1687_v12  ;;  %v1432_v6 = vpop.f32.mrf.mxu1  ;;  %1583 = vmatmul.f32.gmra.mxu2 %v1497_v7  ;;  %v1245_v49 = vpop.f32.mrf.mxu0  ;;  %v1884_v0 = vld [vmem:[#allocation2 + $0xc2] sm:$0xff]  ;;  %v1690_v12 = vld [vmem:[#allocation2 + $0xb1] sm:$0xff] }
 0x204   : > { %v1500_v7 = vld [vmem:[#allocation2 + $0xd8] sm:$0xff] }
 0x206   : > { %v1043_v17 = vpop.f32.mrf.mxu3  ;;  %2196 = vmatmul.f32.gmra.mxu1 %v2110_v1  ;;  %v859_v2 = vpop.f32.mrf.mxu2  ;;  %1969 = vmatmul.f32.gmra.mxu0 %v1883_v22  ;;  %v2113_v1 = vld [vmem:[%s3428_s7 + $0x60] sm:$0xff] }
 0x207   : > { %v1091_v26 = vadd.f32 %v1043_v17, %v898_v29  ;;  %v901_v16 = vadd.f32 %v859_v2, %v3193_v34  ;;  %v3704_v29 = vld [vmem:[#allocation3_spill] sm:$0xff]  ;;  %v1886_v17 = vld [vmem:[#allocation2 + $0xda] sm:$0xff] }
 0x208   : > { %v1689_v34 = vld [vmem:[#allocation2 + $0xa9] sm:$0xff] }
 0x209   : > { %v1284_v60 = vadd.f32 %v1236_v53, %v1091_v26 }
 0x20b   : > { %v3471_v63 = vadd.f32 %v1429_v38, %v1284_v60  ;;  %1770 = vmatmul.f32.gmra.mxu3 %v1688_v25  ;;  %v1435_v55 = vpop.f32.mrf.mxu1  ;;  %1586 = vmatmul.f32.gmra.mxu2 %v1498_v40  ;;  %v1248_v28 = vpop.f32.mrf.mxu0  ;;  %v1691_v60 = vld [vmem:[#allocation2 + $0xc1] sm:$0xff] }
 0x20e   : > { %v1046_v47 = vpop.f32.mrf.mxu3  ;;  %2199 = vmatmul.f32.gmra.mxu1 %v2111_v46  ;;  %v862_v44 = vpop.f32.mrf.mxu2  ;;  %1972 = vmatmul.f32.gmra.mxu0 %v1884_v0  ;;  %v1501_v46 = vld [vmem:[#allocation2 + $0xe0] sm:$0xff] }
 0x20f   : > { %v1092_v35 = vadd.f32 %v1046_v47, %v899_v32  ;;  %v902_v11 = vadd.f32 %v862_v44, %v3704_v29  ;;  %v3705_v32 = vld [vmem:[#allocation4_spill] sm:$0xff]  ;;  %v2114_v47 = vld [vmem:[%s3428_s7 + $0x68] sm:$0xff] }
 0x211   : > { %v1285_v52 = vadd.f32 %v1239_v54, %v1092_v35  ;;  %v1887_v35 = vld [vmem:[#allocation2 + $0xe2] sm:$0xff] }
 0x213   : > { %v3475_v53 = vadd.f32 %v1432_v6, %v1285_v52  ;;  %1773 = vmatmul.f32.gmra.mxu3 %v1689_v34  ;;  %v1438_v20 = vpop.f32.mrf.mxu1  ;;  %1589 = vmatmul.f32.gmra.mxu2 %v1499_v3  ;;  %v1251_v38 = vpop.f32.mrf.mxu0 }
 0x216   : > { %v1049_v39 = vpop.f32.mrf.mxu3  ;;  %2202 = vmatmul.f32.gmra.mxu1 %v2112_v56  ;;  %v865_v48 = vpop.f32.mrf.mxu2  ;;  %1975 = vmatmul.f32.gmra.mxu0 %v1885_v24  ;;  %v1692_v56 = vld [vmem:[#allocation2 + $0xc9] sm:$0xff] }
 0x217   : > { %v1093_v31 = vadd.f32 %v1049_v39, %v900_v8  ;;  %v903_v9 = vadd.f32 %v865_v48, %v3705_v32  ;;  %v3706_v8 = vld [vmem:[#allocation5_spill] sm:$0xff]  ;;  %v1502_v24 = vld [vmem:[#allocation2 + $0xf0] sm:$0xff] }
 0x218   : > { %v2115_v48 = vld [vmem:[%s3428_s7 + $0x70] sm:$0xff] }
 0x219   : > { %v1286_v30 = vadd.f32 %v1242_v37, %v1093_v31  ;;  %v1888_v32 = vld [vmem:[#allocation2 + $0xf2] sm:$0xff] }
 0x21b   : > { %v3479_v54 = vadd.f32 %v1435_v55, %v1286_v30  ;;  %1776 = vmatmul.f32.gmra.mxu3 %v1690_v12  ;;  %v1441_v6 = vpop.f32.mrf.mxu1  ;;  %1592 = vmatmul.f32.gmra.mxu2 %v1500_v7  ;;  %v1254_v22 = vpop.f32.mrf.mxu0 }
 0x21e   : > { %v1052_v2 = vpop.f32.mrf.mxu3  ;;  %2205 = vmatmul.f32.gmra.mxu1 %v2113_v1  ;;  %v868_v26 = vpop.f32.mrf.mxu2  ;;  %1978 = vmatmul.f32.gmra.mxu0 %v1886_v17  ;;  %v1503_v1 = vld [vmem:[#allocation2 + $0xf8] sm:$0xff] }
 0x21f   : > { %v1094_v25 = vadd.f32 %v1052_v2, %v901_v16  ;;  %v904_v40 = vadd.f32 %v868_v26, %v3706_v8  ;;  %v3707_v16 = vld [vmem:[#allocation6_spill] sm:$0xff] }
 0x221   : > { %v1287_v0 = vadd.f32 %v1245_v49, %v1094_v25  ;;  %v1889_v25 = vld [vmem:[#allocation2 + $0xfa] sm:$0xff] }
 0x223   : > { %v3483_v37 = vadd.f32 %v1438_v20, %v1287_v0  ;;  %1779 = vmatmul.f32.gmra.mxu3 %v1691_v60  ;;  %v1444_v55 = vpop.f32.mrf.mxu1  ;;  %1595 = vmatmul.f32.gmra.mxu2 %v1501_v46  ;;  %v1257_v44 = vpop.f32.mrf.mxu0  ;;  %v1694_v0 = vld [vmem:[#allocation2 + $0xe1] sm:$0xff] }
 0x226   : > { %v1055_v29 = vpop.f32.mrf.mxu3  ;;  %2208 = vmatmul.f32.gmra.mxu1 %v2114_v47  ;;  %v871_v34 = vpop.f32.mrf.mxu2  ;;  %1981 = vmatmul.f32.gmra.mxu0 %v1887_v35  ;;  %v1504_v47 = vld [vmem:[#allocation2 + $0x108] sm:$0xff] }
 0x227   : > { %v1095_v3 = vadd.f32 %v1055_v29, %v902_v11  ;;  %v905_v52 = vadd.f32 %v871_v34, %v3707_v16  ;;  %v1693_v11 = vld [vmem:[#allocation2 + $0xd9] sm:$0xff]  ;;  %v1890_v34 = vld [vmem:[#allocation2 + $0x10a] sm:$0xff] }
 0x229   : > { %v1288_v39 = vadd.f32 %v1248_v28, %v1095_v3 }
 0x22b   : > { %v3487_v49 = vadd.f32 %v1441_v6, %v1288_v39  ;;  %1782 = vmatmul.f32.gmra.mxu3 %v1692_v56  ;;  %v1447_v20 = vpop.f32.mrf.mxu1  ;;  %1598 = vmatmul.f32.gmra.mxu2 %v1502_v24  ;;  %v1937_v31 = vpop.f32.mrf.mxu0  ;;  %v2116_v6 = vld [vmem:[%s3428_s7 + $0x78] sm:$0xff] }
 0x22c   : > { %v1695_v24 = vld [vmem:[#allocation2 + $0xf1] sm:$0xff] }
 0x22e   : > { %v1058_v12 = vpop.f32.mrf.mxu3  ;;  %2211 = vmatmul.f32.gmra.mxu1 %v2115_v48  ;;  %v1551_v7 = vpop.f32.mrf.mxu2  ;;  %1984 = vmatmul.f32.gmra.mxu0 %v1888_v32  ;;  %v2118_v32 = vld [vmem:[%s3428_s7 + $0x88] sm:$0xff] }
 0x22f   : > { %v1096_v30 = vadd.f32 %v1058_v12, %v903_v9 }
 0x231   : > { %v1289_v17 = vadd.f32 %v1251_v38, %v1096_v30  ;;  %v1891_v30 = vld [vmem:[#allocation2 + $0x112] sm:$0xff] }
 0x233   : > { %v3490_v2 = vadd.f32 %v1444_v55, %v1289_v17  ;;  %1785 = vmatmul.f32.gmra.mxu3 %v1693_v11  ;;  %v1450_v28 = vpop.f32.mrf.mxu1  ;;  %1601 = vmatmul.f32.gmra.mxu2 %v1503_v1  ;;  %v1940_v26 = vpop.f32.mrf.mxu0  ;;  %v2117_v55 = vld [vmem:[%s3428_s7 + $0x80] sm:$0xff] }
 0x234   : > { %v3507_v11 = vld [vmem:[%s3698_s5] ss:$0 sm:$0xff] }
 0x235   : > { %v1506_v17 = vld [vmem:[#allocation2 + $0x120] sm:$0xff] }
 0x236   : > { %v1061_v8 = vpop.f32.mrf.mxu3  ;;  %2214 = vmatmul.f32.gmra.mxu1 %v2116_v6  ;;  %v1554_v60 = vpop.f32.mrf.mxu2  ;;  %1987 = vmatmul.f32.gmra.mxu0 %v1889_v25 }
 0x237   : > { %v1097_v46 = vadd.f32 %v1061_v8, %v904_v40  ;;  %v1505_v40 = vld [vmem:[#allocation2 + $0x110] sm:$0xff]  ;;  %v1648_v8 = vadd.f32 %v1554_v60, %v3279_v41 }
 0x238   : > { %v1697_v60 = vld [vmem:[#allocation2 + $0x109] sm:$0xff] }
 0x239   : > { %v1290_v9 = vadd.f32 %v1254_v22, %v1097_v46  ;;  %v1647_v22 = vadd.f32 %v1551_v7, %v3263_v57  ;;  %v3512_v57 = vld [vmem:[%s3696_s3] ss:$0 sm:$0xff] }
 0x23a   : > { %v1696_v7 = vld [vmem:[#allocation2 + $0xf9] sm:$0xff] }
 0x23b   : > { %v3493_v35 = vadd.f32 %v1447_v20, %v1290_v9  ;;  %1788 = vmatmul.f32.gmra.mxu3 %v1694_v0  ;;  %v2170_v38 = vpop.f32.mrf.mxu1  ;;  %1604 = vmatmul.f32.gmra.mxu2 %v1504_v47  ;;  %v3496_v29 = vpop.f32.mrf.mxu0  ;;  %v2119_v0 = vld [vmem:[%s3428_s7 + $0x90] sm:$0xff]  ;;  %v1892_v9 = vld [vmem:[#allocation2 + $0x122] sm:$0xff] }
 0x23c   : > { %v2171_v6 = vadd.f32 %v3507_v11, %v2170_v38 }
 0x23e   : > { %v1064_v3 = vpop.f32.mrf.mxu3  ;;  %2217 = vmatmul.f32.gmra.mxu1 %v2117_v55  ;;  %v1557_v16 = vpop.f32.mrf.mxu2  ;;  %1990 = vmatmul.f32.gmra.mxu0 %v1890_v34  ;;  %v1507_v34 = vld [vmem:[#allocation2 + $0x128] sm:$0xff] }
 0x23f   : > { %v1098_v56 = vadd.f32 %v1064_v3, %v905_v52 }
 0x241   : > { %v1291_v39 = vadd.f32 %v1257_v44, %v1098_v56 }
 0x243   : > { %v3498_v48 = vadd.f32 %v1450_v28, %v1291_v39  ;;  %1791 = vmatmul.f32.gmra.mxu3 %v1695_v24  ;;  %v2173_v20 = vpop.f32.mrf.mxu1  ;;  %1607 = vmatmul.f32.gmra.mxu2 %v1505_v40  ;;  %v3502_v12 = vpop.f32.mrf.mxu0  ;;  %v1649_v40 = vadd.f32 %v1557_v16, %v3289_v10 }
 0x244   : > { %v2174_v56 = vadd.f32 %v3507_v11, %v2173_v20  ;;  %v1698_v20 = vld [vmem:[#allocation2 + $0x111] sm:$0xff] }
 0x246   : > { %v1744_v52 = vpop.f32.mrf.mxu3  ;;  %2220 = vmatmul.f32.gmra.mxu1 %v2118_v32  ;;  %v1560_v44 = vpop.f32.mrf.mxu2  ;;  %1993 = vmatmul.f32.gmra.mxu0 %v1891_v30  ;;  %v1893_v30 = vld [vmem:[#allocation2 + $0x12a] sm:$0xff] }
 0x247   : > { %v1840_v1 = vadd.f32 %v1744_v52, %v1647_v22  ;;  %v2120_v22 = vld [vmem:[%s3428_s7 + $0x98] sm:$0xff] }
 0x249   : > { %v2033_v28 = vadd.f32 %v1937_v31, %v1840_v1 }
 0x24b   : > { %v2069_v25 = vadd.f32 %v3512_v57, %v2033_v28  ;;  %1794 = vmatmul.f32.gmra.mxu3 %v1696_v7  ;;  %v2176_v46 = vpop.f32.mrf.mxu1  ;;  %1610 = vmatmul.f32.gmra.mxu2 %v1506_v17  ;;  %v3518_v47 = vpop.f32.mrf.mxu0  ;;  %v1508_v17 = vld [vmem:[#allocation2 + $0x138] sm:$0xff] }
 0x24c   : > { %v2177_v10 = vadd.f32 %v3507_v11, %v2176_v46  ;;  %v1699_v46 = vld [vmem:[#allocation2 + $0x121] sm:$0xff] }
 0x24d   : > { %v2266_v31 = vadd.f32 %v2171_v6, %v2069_v25  ;;  %v1650_v6 = vadd.f32 %v1560_v44, %v3305_v43 }
 0x24e   : > { %v1747_v38 = vpop.f32.mrf.mxu3  ;;  %2223 = vmatmul.f32.gmra.mxu1 %v2119_v0  ;;  %v1563_v55 = vpop.f32.mrf.mxu2  ;;  %1996 = vmatmul.f32.gmra.mxu0 %v1892_v9  ;;  %v1894_v9 = vld [vmem:[#allocation2 + $0x13a] sm:$0xff] }
 0x24f   : > { %2298 = vst [vmem:[%s3524_s14] sm:$0xff] %v2266_v31  ;;  %v1841_v41 = vadd.f32 %v1747_v38, %v1648_v8  ;;  %v2121_v8 = vld [vmem:[%s3428_s7 + $0xa0] sm:$0xff] }
 0x251   : > { %v2034_v3 = vadd.f32 %v1940_v26, %v1841_v41 }
 0x253   : > { %v2070_v24 = vadd.f32 %v3512_v57, %v2034_v3  ;;  %1797 = vmatmul.f32.gmra.mxu3 %v1697_v60  ;;  %v2179_v39 = vpop.f32.mrf.mxu1  ;;  %1613 = vmatmul.f32.gmra.mxu2 %v1507_v34  ;;  %v3531_v32 = vpop.f32.mrf.mxu0  ;;  %v1509_v60 = vld [vmem:[#allocation2 + $0x140] sm:$0xff]  ;;  %v1651_v3 = vadd.f32 %v1563_v55, %v3315_v33 }
 0x254   : > { %v2180_v43 = vadd.f32 %v3507_v11, %v2179_v39  ;;  %v1700_v39 = vld [vmem:[#allocation2 + $0x129] sm:$0xff] }
 0x255   : > { %v2267_v52 = vadd.f32 %v2174_v56, %v2070_v24  ;;  %v2122_v24 = vld [vmem:[%s3428_s7 + $0xa8] sm:$0xff] }
 0x256   : > { %v1750_v1 = vpop.f32.mrf.mxu3  ;;  %2226 = vmatmul.f32.gmra.mxu1 %v2120_v22  ;;  %v1566_v7 = vpop.f32.mrf.mxu2  ;;  %1999 = vmatmul.f32.gmra.mxu0 %v1893_v30  ;;  %v1895_v22 = vld [vmem:[#allocation2 + $0x142] sm:$0xff] }
 0x257   : > { %2299 = vst [vmem:[%s3524_s14 + $0x8] sm:$0xff] %v2267_v52  ;;  %v1842_v26 = vadd.f32 %v1750_v1, %v1649_v40 }
 0x259   : > { %v2035_v28 = vadd.f32 %v3496_v29, %v1842_v26  ;;  %v1510_v26 = vld [vmem:[#allocation2 + $0x150] sm:$0xff] }
 0x25b   : > { %v2071_v16 = vadd.f32 %v3512_v57, %v2035_v28  ;;  %1800 = vmatmul.f32.gmra.mxu3 %v1698_v20  ;;  %v2182_v25 = vpop.f32.mrf.mxu1  ;;  %1616 = vmatmul.f32.gmra.mxu2 %v1508_v17  ;;  %v3539_v0 = vpop.f32.mrf.mxu0  ;;  %v1652_v17 = vadd.f32 %v1566_v7, %v3331_v51 }
 0x25c   : > { %v2183_v33 = vadd.f32 %v3507_v11, %v2182_v25  ;;  %v1701_v25 = vld [vmem:[#allocation2 + $0x139] sm:$0xff] }
 0x25d   : > { %v2268_v31 = vadd.f32 %v2177_v10, %v2071_v16  ;;  %v2123_v10 = vld [vmem:[%s3428_s7 + $0xb0] sm:$0xff] }
 0x25e   : > { %v1753_v38 = vpop.f32.mrf.mxu3  ;;  %2229 = vmatmul.f32.gmra.mxu1 %v2121_v8  ;;  %v1569_v41 = vpop.f32.mrf.mxu2  ;;  %2002 = vmatmul.f32.gmra.mxu0 %v1894_v9 }
 0x25f   : > { %2300 = vst [vmem:[%s3524_s14 + $0x10] sm:$0xff] %v2268_v31  ;;  %v1843_v29 = vadd.f32 %v1753_v38, %v1650_v6  ;;  %v1896_v6 = vld [vmem:[#allocation2 + $0x152] sm:$0xff] }
 0x260   : > { %v1511_v38 = vld [vmem:[#allocation2 + $0x158] sm:$0xff] }
 0x261   : > { %v2036_v34 = vadd.f32 %v3502_v12, %v1843_v29 }
 0x263   : > { %v2072_v44 = vadd.f32 %v3512_v57, %v2036_v34  ;;  %1803 = vmatmul.f32.gmra.mxu3 %v1699_v46  ;;  %v2185_v56 = vpop.f32.mrf.mxu1  ;;  %1619 = vmatmul.f32.gmra.mxu2 %v1509_v60  ;;  %v3547_v40 = vpop.f32.mrf.mxu0  ;;  %v1653_v46 = vadd.f32 %v1569_v41, %v3341_v27  ;;  %v2124_v34 = vld [vmem:[%s3428_s7 + $0xb8] sm:$0xff] }
 0x264   : > { %v2186_v51 = vadd.f32 %v3507_v11, %v2185_v56  ;;  %v1702_v56 = vld [vmem:[#allocation2 + $0x141] sm:$0xff] }
 0x265   : > { %v2269_v30 = vadd.f32 %v2180_v43, %v2072_v44  ;;  %v1897_v44 = vld [vmem:[#allocation2 + $0x15a] sm:$0xff] }
 0x266   : > { %v1756_v52 = vpop.f32.mrf.mxu3  ;;  %2232 = vmatmul.f32.gmra.mxu1 %v2122_v24  ;;  %v1572_v1 = vpop.f32.mrf.mxu2  ;;  %2005 = vmatmul.f32.gmra.mxu0 %v1895_v22 }
 0x267   : > { %2301 = vst [vmem:[%s3524_s14 + $0x18] sm:$0xff] %v2269_v30  ;;  %v1844_v12 = vadd.f32 %v1756_v52, %v1651_v3  ;;  %v1512_v30 = vld [vmem:[#allocation2 + $0x168] sm:$0xff] }
 0x269   : > { %v2037_v20 = vadd.f32 %v3518_v47, %v1844_v12  ;;  %v1654_v12 = vadd.f32 %v1572_v1, %v3359_v14 }
 0x26b   : > { %v2073_v55 = vadd.f32 %v3512_v57, %v2037_v20  ;;  %1806 = vmatmul.f32.gmra.mxu3 %v1700_v39  ;;  %v2188_v28 = vpop.f32.mrf.mxu1  ;;  %1622 = vmatmul.f32.gmra.mxu2 %v1510_v26  ;;  %v3555_v16 = vpop.f32.mrf.mxu0  ;;  %v2125_v26 = vld [vmem:[%s3428_s7 + $0xc0] sm:$0xff] }
 0x26c   : > { %v2189_v27 = vadd.f32 %v3507_v11, %v2188_v28  ;;  %v1703_v28 = vld [vmem:[#allocation2 + $0x151] sm:$0xff] }
 0x26d   : > { %v2270_v8 = vadd.f32 %v2183_v33, %v2073_v55  ;;  %v1898_v33 = vld [vmem:[#allocation2 + $0x16a] sm:$0xff] }
 0x26e   : > { %v1759_v9 = vpop.f32.mrf.mxu3  ;;  %2235 = vmatmul.f32.gmra.mxu1 %v2123_v10  ;;  %v1575_v31 = vpop.f32.mrf.mxu2  ;;  %2008 = vmatmul.f32.gmra.mxu0 %v1896_v6  ;;  %v1513_v6 = vld [vmem:[#allocation2 + $0x170] sm:$0xff] }
 0x26f   : > { %2302 = vst [vmem:[%s3524_s14 + $0x20] sm:$0xff] %v2270_v8  ;;  %v1845_v47 = vadd.f32 %v1759_v9, %v1652_v17  ;;  %v1655_v9 = vadd.f32 %v1575_v31, %v3369_v5 }
 0x271   : > { %v2038_v29 = vadd.f32 %v3531_v32, %v1845_v47 }
 0x273   : > { %v2074_v7 = vadd.f32 %v3512_v57, %v2038_v29  ;;  %1809 = vmatmul.f32.gmra.mxu3 %v1701_v25  ;;  %v2191_v60 = vpop.f32.mrf.mxu1  ;;  %1625 = vmatmul.f32.gmra.mxu2 %v1511_v38  ;;  %v3563_v43 = vpop.f32.mrf.mxu0  ;;  %v2126_v25 = vld [vmem:[%s3428_s7 + $0xc8] sm:$0xff]  ;;  %v1899_v29 = vld [vmem:[#allocation2 + $0x172] sm:$0xff] }
 0x274   : > { %v2192_v14 = vadd.f32 %v3507_v11, %v2191_v60  ;;  %v1704_v60 = vld [vmem:[#allocation2 + $0x159] sm:$0xff] }
 0x275   : > { %v2271_v3 = vadd.f32 %v2186_v51, %v2074_v7 }
 0x276   : > { %v1762_v24 = vpop.f32.mrf.mxu3  ;;  %2238 = vmatmul.f32.gmra.mxu1 %v2124_v34  ;;  %v1578_v22 = vpop.f32.mrf.mxu2  ;;  %2011 = vmatmul.f32.gmra.mxu0 %v1897_v44  ;;  %v1514_v34 = vld [vmem:[#allocation2 + $0x180] sm:$0xff] }
 0x277   : > { %2303 = vst [vmem:[%s3524_s14 + $0x28] sm:$0xff] %v2271_v3  ;;  %v1846_v32 = vadd.f32 %v1762_v24, %v1653_v46  ;;  %v1656_v3 = vadd.f32 %v1578_v22, %v3386_v23 }
 0x279   : > { %v2039_v52 = vadd.f32 %v3539_v0, %v1846_v32  ;;  %v2127_v32 = vld [vmem:[%s3428_s7 + $0xd0] sm:$0xff] }
 0x27b   : > { %v2075_v41 = vadd.f32 %v3512_v57, %v2039_v52  ;;  %1812 = vmatmul.f32.gmra.mxu3 %v1702_v56  ;;  %v2194_v39 = vpop.f32.mrf.mxu1  ;;  %1628 = vmatmul.f32.gmra.mxu2 %v1512_v30  ;;  %v3571_v20 = vpop.f32.mrf.mxu0  ;;  %v1900_v30 = vld [vmem:[#allocation2 + $0x182] sm:$0xff] }
 0x27c   : > { %v2195_v5 = vadd.f32 %v3507_v11, %v2194_v39  ;;  %v1515_v39 = vld [vmem:[#allocation2 + $0x188] sm:$0xff] }
 0x27d   : > { %v2272_v55 = vadd.f32 %v2189_v27, %v2075_v41 }
 0x27e   : > { %v1765_v17 = vpop.f32.mrf.mxu3  ;;  %2241 = vmatmul.f32.gmra.mxu1 %v2125_v26  ;;  %v1581_v10 = vpop.f32.mrf.mxu2  ;;  %2014 = vmatmul.f32.gmra.mxu0 %v1898_v33 }
 0x27f   : > { %2304 = vst [vmem:[%s3524_s14 + $0x30] sm:$0xff] %v2272_v55  ;;  %v1847_v0 = vadd.f32 %v1765_v17, %v1654_v12  ;;  %v1705_v12 = vld [vmem:[#allocation2 + $0x169] sm:$0xff]  ;;  %v1657_v33 = vadd.f32 %v1581_v10, %v3398_v18  ;;  %v2128_v17 = vld [vmem:[%s3428_s7 + $0xd8] sm:$0xff] }
 0x280   : > { %v2456_v10 = vld [vmem:[#allocation2 + $0x171] sm:$0xff] }
 0x281   : > { %v2040_v8 = vadd.f32 %v3547_v40, %v1847_v0 }
 0x283   : > { %v2076_v1 = vadd.f32 %v3512_v57, %v2040_v8  ;;  %1815 = vmatmul.f32.gmra.mxu3 %v1703_v28  ;;  %v2197_v47 = vpop.f32.mrf.mxu1  ;;  %1631 = vmatmul.f32.gmra.mxu2 %v1513_v6  ;;  %v3579_v38 = vpop.f32.mrf.mxu0  ;;  %v1901_v28 = vld [vmem:[#allocation2 + $0x18a] sm:$0xff] }
 0x284   : > { %v2198_v23 = vadd.f32 %v3507_v11, %v2197_v47 }
 0x285   : > { %v2273_v51 = vadd.f32 %v2192_v14, %v2076_v1 }
 0x286   : > { %v1768_v7 = vpop.f32.mrf.mxu3  ;;  %2244 = vmatmul.f32.gmra.mxu1 %v2126_v25  ;;  %v1584_v46 = vpop.f32.mrf.mxu2  ;;  %2017 = vmatmul.f32.gmra.mxu0 %v1899_v29  ;;  %v2129_v29 = vld [vmem:[%s3428_s7 + $0xe0] sm:$0xff] }
 0x287   : > { %2305 = vst [vmem:[%s3524_s14 + $0x38] sm:$0xff] %v2273_v51  ;;  %v1848_v40 = vadd.f32 %v1768_v7, %v1655_v9  ;;  %v1658_v47 = vadd.f32 %v1584_v46, %v3411_v21  ;;  %v2457_v51 = vld [vmem:[#allocation2] sm:$0xff] }
 0x289   : > { %v2041_v44 = vadd.f32 %v3555_v16, %v1848_v40  ;;  %v1902_v40 = vld [vmem:[#allocation2 + $0x19a] sm:$0xff] }
 0x28b   : > { %v2077_v31 = vadd.f32 %v3512_v57, %v2041_v44  ;;  %1818 = vmatmul.f32.gmra.mxu3 %v1704_v60  ;;  %v2200_v24 = vpop.f32.mrf.mxu1  ;;  %1634 = vmatmul.f32.gmra.mxu2 %v1514_v34  ;;  %v3587_v56 = vpop.f32.mrf.mxu0 }
 0x28c   : > { %v2201_v9 = vadd.f32 %v3507_v11, %v2200_v24 }
 0x28d   : > { %v2274_v52 = vadd.f32 %v2195_v5, %v2077_v31  ;;  %v1707_v5 = vld [vmem:[#allocation2 + $0x181] sm:$0xff] }
 0x28e   : > { %v1771_v27 = vpop.f32.mrf.mxu3  ;;  %2247 = vmatmul.f32.gmra.mxu1 %v2127_v32  ;;  %v1587_v41 = vpop.f32.mrf.mxu2  ;;  %2020 = vmatmul.f32.gmra.mxu0 %v1900_v30  ;;  %v2130_v32 = vld [vmem:[%s3428_s7 + $0xe8] sm:$0xff] }
 0x28f   : > { %2306 = vst [vmem:[%s3524_s14 + $0x40] sm:$0xff] %v2274_v52  ;;  %v1849_v16 = vadd.f32 %v1771_v27, %v1656_v3  ;;  %v1659_v3 = vadd.f32 %v1587_v41, %v3416_v61  ;;  %v1903_v52 = vld [vmem:[#allocation2 + $0x1a2] sm:$0xff] }
 0x291   : > { %v2042_v26 = vadd.f32 %v3563_v43, %v1849_v16 }
 0x293   : > { %v2078_v22 = vadd.f32 %v3512_v57, %v2042_v26  ;;  %1821 = vmatmul.f32.gmra.mxu3 %v1705_v12  ;;  %v2203_v55 = vpop.f32.mrf.mxu1  ;;  %1637 = vmatmul.f32.gmra.mxu2 %v1515_v39  ;;  %v1976_v0 = vpop.f32.mrf.mxu0  ;;  %v1708_v39 = vld [vmem:[#allocation2 + $0x189] sm:$0xff] }
 0x294   : > { %v2204_v21 = vadd.f32 %v3507_v11, %v2203_v55 }
 0x295   : > { %v2275_v6 = vadd.f32 %v2198_v23, %v2078_v22 }
 0x296   : > { %v1774_v8 = vpop.f32.mrf.mxu3  ;;  %2250 = vmatmul.f32.gmra.mxu1 %v2128_v17  ;;  %v1590_v14 = vpop.f32.mrf.mxu2  ;;  %2023 = vmatmul.f32.gmra.mxu0 %v1901_v28 }
 0x297   : > { %2307 = vst [vmem:[%s3524_s14 + $0x48] sm:$0xff] %v2275_v6  ;;  %v1850_v43 = vadd.f32 %v1774_v8, %v1657_v33  ;;  %v1660_v41 = vadd.f32 %v1590_v14, %v3421_v4  ;;  %v2131_v33 = vld [vmem:[%s3428_s7 + $0xf0] sm:$0xff] }
 0x299   : > { %v2043_v1 = vadd.f32 %v3571_v20, %v1850_v43  ;;  %v1709_v43 = vld [vmem:[#allocation2 + $0x199] sm:$0xff] }
 0x29b   : > { %v2079_v18 = vadd.f32 %v3512_v57, %v2043_v1  ;;  %1824 = vmatmul.f32.gmra.mxu3 %v2456_v10  ;;  %v2206_v25 = vpop.f32.mrf.mxu1  ;;  %1640 = vmatmul.f32.gmra.mxu2 %v2457_v51  ;;  %v1979_v7 = vpop.f32.mrf.mxu0 }
 0x29c   : > { %v2207_v23 = vadd.f32 %v3507_v11, %v2206_v25 }
 0x29d   : > { %v2276_v60 = vadd.f32 %v2201_v9, %v2079_v18  ;;  %v2132_v18 = vld [vmem:[%s3428_s7 + $0xf8] sm:$0xff] }
 0x29e   : > { %v1777_v34 = vpop.f32.mrf.mxu3  ;;  %2253 = vmatmul.f32.gmra.mxu1 %v2129_v29  ;;  %v1593_v20 = vpop.f32.mrf.mxu2  ;;  %2026 = vmatmul.f32.gmra.mxu0 %v1902_v40  ;;  %v1710_v40 = vld [vmem:[#allocation2 + $0x1a1] sm:$0xff] }
 0x29f   : > { %2308 = vst [vmem:[%s3524_s14 + $0x50] sm:$0xff] %v2276_v60  ;;  %v1851_v44 = vadd.f32 %v1777_v34, %v1658_v47  ;;  %v1661_v4 = vadd.f32 %v1593_v20, %v3431_v19 }
 0x2a1   : > { %v2044_v31 = vadd.f32 %v3579_v38, %v1851_v44 }
 0x2a3   : > { %v2080_v46 = vadd.f32 %v3512_v57, %v2044_v31  ;;  %1827 = vmatmul.f32.gmra.mxu3 %v1707_v5  ;;  %v2209_v24 = vpop.f32.mrf.mxu1  ;;  %1643 = vmatmul.f32.gmra.mxu2 %v2457_v51  ;;  %v1982_v30 = vpop.f32.mrf.mxu0 }
 0x2a4   : > { %v2210_v1 = vadd.f32 %v3507_v11, %v2209_v24 }
 0x2a5   : > { %v2277_v27 = vadd.f32 %v2204_v21, %v2080_v46 }
 0x2a6   : > { %v1780_v16 = vpop.f32.mrf.mxu3  ;;  %2256 = vmatmul.f32.gmra.mxu1 %v2130_v32  ;;  %v1596_v12 = vpop.f32.mrf.mxu2  ;;  %2029 = vmatmul.f32.gmra.mxu0 %v1903_v52 }
 0x2a7   : > { %2309 = vst [vmem:[%s3524_s14 + $0x58] sm:$0xff] %v2277_v27  ;;  %v1852_v38 = vadd.f32 %v1780_v16, %v1659_v3  ;;  %v1662_v44 = vadd.f32 %v1596_v12, %v3435_v42 }
 0x2a9   : > { %v2045_v26 = vadd.f32 %v3587_v56, %v1852_v38 }
 0x2ab   : > { %v2081_v61 = vadd.f32 %v3512_v57, %v2045_v26  ;;  %1830 = vmatmul.f32.gmra.mxu3 %v1708_v39  ;;  %v2212_v22 = vpop.f32.mrf.mxu1  ;;  %v1985_v55 = vpop.f32.mrf.mxu0 }
 0x2ad   : > { %v2278_v17 = vadd.f32 %v2207_v23, %v2081_v61 }
 0x2ae   : > { %v1783_v28 = vpop.f32.mrf.mxu3  ;;  %2259 = vmatmul.f32.gmra.mxu1 %v2131_v33  ;;  %v1599_v6 = vpop.f32.mrf.mxu2 }
 0x2af   : > { %2310 = vst [vmem:[%s3524_s14 + $0x60] sm:$0xff] %v2278_v17  ;;  %v1853_v8 = vadd.f32 %v1783_v28, %v1660_v41  ;;  %v1663_v32 = vadd.f32 %v1599_v6, %v3439_v45 }
 0x2b1   : > { %v2046_v56 = vadd.f32 %v1976_v0, %v1853_v8  ;;  %v2213_v0 = vadd.f32 %v3507_v11, %v2212_v22 }
 0x2b3   : > { %v2082_v9 = vadd.f32 %v3512_v57, %v2046_v56  ;;  %1833 = vmatmul.f32.gmra.mxu3 %v1709_v43  ;;  %v2215_v14 = vpop.f32.mrf.mxu1  ;;  %v1988_v10 = vpop.f32.mrf.mxu0 }
 0x2b4   : > { %v2216_v24 = vadd.f32 %v3507_v11, %v2215_v14 }
 0x2b5   : > { %v2279_v47 = vadd.f32 %v2210_v1, %v2082_v9 }
 0x2b6   : > { %v1786_v25 = vpop.f32.mrf.mxu3  ;;  %2262 = vmatmul.f32.gmra.mxu1 %v2132_v18  ;;  %v1602_v29 = vpop.f32.mrf.mxu2 }
 0x2b7   : > { %2311 = vst [vmem:[%s3524_s14 + $0x68] sm:$0xff] %v2279_v47  ;;  %v1854_v51 = vadd.f32 %v1786_v25, %v1661_v4 }
 0x2b9   : > { %v2047_v60 = vadd.f32 %v1979_v7, %v1854_v51 }
 0x2bb   : > { %v2083_v34 = vadd.f32 %v3512_v57, %v2047_v60  ;;  %1836 = vmatmul.f32.gmra.mxu3 %v1710_v40  ;;  %v2218_v19 = vpop.f32.mrf.mxu1  ;;  %v1991_v20 = vpop.f32.mrf.mxu0 }
 0x2bc   : > { %v2219_v26 = vadd.f32 %v3507_v11, %v2218_v19 }
 0x2bd   : > { %v2280_v5 = vadd.f32 %v2213_v0, %v2083_v34 }
 0x2be   : > { %v1789_v31 = vpop.f32.mrf.mxu3  ;;  %v1605_v21 = vpop.f32.mrf.mxu2 }
 0x2bf   : > { %2312 = vst [vmem:[%s3524_s14 + $0x70] sm:$0xff] %v2280_v5  ;;  %v1855_v46 = vadd.f32 %v1789_v31, %v1662_v44 }
 0x2c1   : > { %v2048_v3 = vadd.f32 %v1982_v30, %v1855_v46  ;;  %v1664_v30 = vadd.f32 %v1602_v29, %v3443_v36 }
 0x2c3   : > { %v2084_v7 = vadd.f32 %v3512_v57, %v2048_v3  ;;  %v2221_v52 = vpop.f32.mrf.mxu1  ;;  %v1994_v16 = vpop.f32.mrf.mxu0 }
 0x2c4   : > { %v2222_v6 = vadd.f32 %v3507_v11, %v2221_v52 }
 0x2c5   : > { %v2281_v27 = vadd.f32 %v2216_v24, %v2084_v7 }
 0x2c6   : > { %v1792_v42 = vpop.f32.mrf.mxu3  ;;  %v1608_v12 = vpop.f32.mrf.mxu2 }
 0x2c7   : > { %2313 = vst [vmem:[%s3524_s14 + $0x78] sm:$0xff] %v2281_v27  ;;  %v1856_v38 = vadd.f32 %v1792_v42, %v1663_v32 }
 0x2c9   : > { %v2049_v39 = vadd.f32 %v1985_v55, %v1856_v38  ;;  %v1665_v55 = vadd.f32 %v1605_v21, %v3447_v62 }
 0x2cb   : > { %v2085_v23 = vadd.f32 %v3512_v57, %v2049_v39  ;;  %v2224_v61 = vpop.f32.mrf.mxu1  ;;  %v1997_v17 = vpop.f32.mrf.mxu0 }
 0x2cc   : > { %v2225_v14 = vadd.f32 %v3507_v11, %v2224_v61 }
 0x2cd   : > { %v2282_v41 = vadd.f32 %v2219_v26, %v2085_v23 }
 0x2ce   : > { %v1795_v22 = vpop.f32.mrf.mxu3  ;;  %v1611_v45 = vpop.f32.mrf.mxu2 }
 0x2cf   : > { %2314 = vst [vmem:[%s3524_s14 + $0x80] sm:$0xff] %v2282_v41  ;;  %v1857_v33 = vadd.f32 %v1795_v22, %v1664_v30  ;;  %v1667_v44 = vadd.f32 %v1611_v45, %v3455_v59 }
 0x2d1   : > { %v2050_v28 = vadd.f32 %v1988_v10, %v1857_v33  ;;  %v1666_v10 = vadd.f32 %v1608_v12, %v3451_v50 }
 0x2d3   : > { %v2086_v8 = vadd.f32 %v3512_v57, %v2050_v28  ;;  %v2227_v43 = vpop.f32.mrf.mxu1  ;;  %v2000_v18 = vpop.f32.mrf.mxu0 }
 0x2d4   : > { %v2228_v0 = vadd.f32 %v3507_v11, %v2227_v43 }
 0x2d5   : > { %v2283_v56 = vadd.f32 %v2222_v6, %v2086_v8 }
 0x2d6   : > { %v1798_v1 = vpop.f32.mrf.mxu3  ;;  %v1614_v36 = vpop.f32.mrf.mxu2 }
 0x2d7   : > { %2315 = vst [vmem:[%s3524_s14 + $0x88] sm:$0xff] %v2283_v56  ;;  %v1858_v9 = vadd.f32 %v1798_v1, %v1665_v55  ;;  %v1668_v7 = vadd.f32 %v1614_v36, %v3459_v58 }
 0x2d9   : > { %v2051_v4 = vadd.f32 %v1991_v20, %v1858_v9 }
 0x2db   : > { %v2087_v47 = vadd.f32 %v3512_v57, %v2051_v4  ;;  %v2230_v25 = vpop.f32.mrf.mxu1  ;;  %v2003_v20 = vpop.f32.mrf.mxu0 }
 0x2dc   : > { %v2231_v3 = vadd.f32 %v3507_v11, %v2230_v25 }
 0x2dd   : > { %v2284_v29 = vadd.f32 %v2225_v14, %v2087_v47 }
 0x2de   : > { %v1801_v51 = vpop.f32.mrf.mxu3  ;;  %v1617_v62 = vpop.f32.mrf.mxu2 }
 0x2df   : > { %2316 = vst [vmem:[%s3524_s14 + $0x90] sm:$0xff] %v2284_v29  ;;  %v1859_v40 = vadd.f32 %v1801_v51, %v1666_v10  ;;  %v1669_v26 = vadd.f32 %v1617_v62, %v3463_v15 }
 0x2e1   : > { %v2052_v60 = vadd.f32 %v1994_v16, %v1859_v40 }
 0x2e3   : > { %v2088_v34 = vadd.f32 %v3512_v57, %v2052_v60  ;;  %v2233_v19 = vpop.f32.mrf.mxu1  ;;  %v2006_v27 = vpop.f32.mrf.mxu0 }
 0x2e4   : > { %v2234_v12 = vadd.f32 %v3507_v11, %v2233_v19 }
 0x2e5   : > { %v2285_v5 = vadd.f32 %v2228_v0, %v2088_v34 }
 0x2e6   : > { %v1804_v31 = vpop.f32.mrf.mxu3  ;;  %v1620_v21 = vpop.f32.mrf.mxu2 }
 0x2e7   : > { %2317 = vst [vmem:[%s3524_s14 + $0x98] sm:$0xff] %v2285_v5  ;;  %v1860_v50 = vadd.f32 %v1804_v31, %v1667_v44 }
 0x2e9   : > { %v2053_v46 = vadd.f32 %v1997_v17, %v1860_v50  ;;  %v1670_v17 = vadd.f32 %v1620_v21, %v3467_v13 }
 0x2eb   : > { %v2089_v24 = vadd.f32 %v3512_v57, %v2053_v46  ;;  %v2236_v32 = vpop.f32.mrf.mxu1  ;;  %v2009_v41 = vpop.f32.mrf.mxu0 }
 0x2ec   : > { %v2237_v45 = vadd.f32 %v3507_v11, %v2236_v32 }
 0x2ed   : > { %v2286_v52 = vadd.f32 %v2231_v3, %v2089_v24 }
 0x2ee   : > { %v1807_v59 = vpop.f32.mrf.mxu3  ;;  %v1623_v38 = vpop.f32.mrf.mxu2 }
 0x2ef   : > { %2318 = vst [vmem:[%s3524_s14 + $0xa0] sm:$0xff] %v2286_v52  ;;  %v1861_v16 = vadd.f32 %v1807_v59, %v1668_v7  ;;  %v1671_v9 = vadd.f32 %v1623_v38, %v3471_v63 }
 0x2f1   : > { %v2054_v42 = vadd.f32 %v2000_v18, %v1861_v16 }
 0x2f3   : > { %v2090_v39 = vadd.f32 %v3512_v57, %v2054_v42  ;;  %v2239_v23 = vpop.f32.mrf.mxu1  ;;  %v2012_v1 = vpop.f32.mrf.mxu0 }
 0x2f4   : > { %v2240_v56 = vadd.f32 %v3507_v11, %v2239_v23 }
 0x2f5   : > { %v2287_v30 = vadd.f32 %v2234_v12, %v2090_v39 }
 0x2f6   : > { %v1810_v61 = vpop.f32.mrf.mxu3  ;;  %v1626_v6 = vpop.f32.mrf.mxu2 }
 0x2f7   : > { %2319 = vst [vmem:[%s3524_s14 + $0xa8] sm:$0xff] %v2287_v30  ;;  %v1862_v58 = vadd.f32 %v1810_v61, %v1669_v26  ;;  %v1672_v51 = vadd.f32 %v1626_v6, %v3475_v53 }
 0x2f9   : > { %v2055_v22 = vadd.f32 %v2003_v20, %v1862_v58 }
 0x2fb   : > { %v2091_v33 = vadd.f32 %v3512_v57, %v2055_v22  ;;  %v2242_v28 = vpop.f32.mrf.mxu1  ;;  %v2015_v62 = vpop.f32.mrf.mxu0 }
 0x2fc   : > { %v2243_v25 = vadd.f32 %v3507_v11, %v2242_v28 }
 0x2fd   : > { %v2288_v8 = vadd.f32 %v2237_v45, %v2091_v33 }
 0x2fe   : > { %v1813_v55 = vpop.f32.mrf.mxu3  ;;  %v1629_v13 = vpop.f32.mrf.mxu2 }
 0x2ff   : > { %2320 = vst [vmem:[%s3524_s14 + $0xb0] sm:$0xff] %v2288_v8  ;;  %v1863_v15 = vadd.f32 %v1813_v55, %v1670_v17  ;;  %v1673_v5 = vadd.f32 %v1629_v13, %v3479_v54 }
 0x301   : > { %v2056_v43 = vadd.f32 %v2006_v27, %v1863_v15 }
 0x303   : > { %v2092_v36 = vadd.f32 %v3512_v57, %v2056_v43  ;;  %v2245_v4 = vpop.f32.mrf.mxu1  ;;  %v2018_v50 = vpop.f32.mrf.mxu0 }
 0x304   : > { %v2246_v19 = vadd.f32 %v3507_v11, %v2245_v4 }
 0x305   : > { %v2289_v14 = vadd.f32 %v2240_v56, %v2092_v36 }
 0x306   : > { %v1816_v18 = vpop.f32.mrf.mxu3  ;;  %v1632_v34 = vpop.f32.mrf.mxu2 }
 0x307   : > { %2321 = vst [vmem:[%s3524_s14 + $0xb8] sm:$0xff] %v2289_v14  ;;  %v1864_v47 = vadd.f32 %v1816_v18, %v1671_v9  ;;  %v1674_v52 = vadd.f32 %v1632_v34, %v3483_v37 }
 0x309   : > { %v2057_v10 = vadd.f32 %v2009_v41, %v1864_v47 }
 0x30b   : > { %v2093_v29 = vadd.f32 %v3512_v57, %v2057_v10  ;;  %v2248_v40 = vpop.f32.mrf.mxu1  ;;  %v2021_v54 = vpop.f32.mrf.mxu0 }
 0x30c   : > { %v2249_v24 = vadd.f32 %v3507_v11, %v2248_v40 }
 0x30d   : > { %v2290_v60 = vadd.f32 %v2243_v25, %v2093_v29 }
 0x30e   : > { %v1819_v0 = vpop.f32.mrf.mxu3  ;;  %v1635_v7 = vpop.f32.mrf.mxu2 }
 0x30f   : > { %2322 = vst [vmem:[%s3524_s14 + $0xc0] sm:$0xff] %v2290_v60  ;;  %v1865_v63 = vadd.f32 %v1819_v0, %v1672_v51  ;;  %v1675_v26 = vadd.f32 %v1635_v7, %v3487_v49 }
 0x311   : > { %v2058_v44 = vadd.f32 %v2012_v1, %v1865_v63 }
 0x313   : > { %v2094_v20 = vadd.f32 %v3512_v57, %v2058_v44  ;;  %v2251_v53 = vpop.f32.mrf.mxu1  ;;  %v2024_v22 = vpop.f32.mrf.mxu0 }
 0x314   : > { %v2252_v38 = vadd.f32 %v3507_v11, %v2251_v53 }
 0x315   : > { %v2291_v31 = vadd.f32 %v2246_v19, %v2094_v20 }
 0x316   : > { %v1822_v21 = vpop.f32.mrf.mxu3  ;;  %v1638_v23 = vpop.f32.mrf.mxu2 }
 0x317   : > { %2323 = vst [vmem:[%s3524_s14 + $0xc8] sm:$0xff] %v2291_v31  ;;  %v1866_v46 = vadd.f32 %v1822_v21, %v1673_v5  ;;  %v1676_v17 = vadd.f32 %v1638_v23, %v3490_v2 }
 0x319   : > { %v2059_v3 = vadd.f32 %v2015_v62, %v1866_v46 }
 0x31b   : > { %v2095_v32 = vadd.f32 %v3512_v57, %v2059_v3  ;;  %v2254_v42 = vpop.f32.mrf.mxu1  ;;  %v2027_v1 = vpop.f32.mrf.mxu0 }
 0x31c   : > { %v2255_v41 = vadd.f32 %v3507_v11, %v2254_v42 }
 0x31d   : > { %v2292_v27 = vadd.f32 %v2249_v24, %v2095_v32 }
 0x31e   : > { %v1825_v59 = vpop.f32.mrf.mxu3  ;;  %v1641_v8 = vpop.f32.mrf.mxu2 }
 0x31f   : > { %2324 = vst [vmem:[%s3524_s14 + $0xd0] sm:$0xff] %v2292_v27  ;;  %v1867_v16 = vadd.f32 %v1825_v59, %v1674_v52  ;;  %v1677_v56 = vadd.f32 %v1641_v8, %v3493_v35 }
 0x321   : > { %v2060_v12 = vadd.f32 %v2018_v50, %v1867_v16 }
 0x323   : > { %v2096_v39 = vadd.f32 %v3512_v57, %v2060_v12  ;;  %v2257_v45 = vpop.f32.mrf.mxu1  ;;  %v2030_v29 = vpop.f32.mrf.mxu0 }
 0x324   : > { %v2258_v15 = vadd.f32 %v3507_v11, %v2257_v45 }
 0x325   : > { %v2293_v30 = vadd.f32 %v2252_v38, %v2096_v39 }
 0x326   : > { %v1828_v61 = vpop.f32.mrf.mxu3  ;;  %v1644_v2 = vpop.f32.mrf.mxu2 }
 0x327   : > { %2325 = vst [vmem:[%s3524_s14 + $0xd8] sm:$0xff] %v2293_v30  ;;  %v1868_v58 = vadd.f32 %v1828_v61, %v1675_v26  ;;  %v1678_v10 = vadd.f32 %v1644_v2, %v3498_v48 }
 0x329   : > { %v2061_v37 = vadd.f32 %v2021_v54, %v1868_v58 }
 0x32b   : > { %v2097_v33 = vadd.f32 %v3512_v57, %v2061_v37  ;;  %v2260_v36 = vpop.f32.mrf.mxu1 }
 0x32c   : > { %v2261_v13 = vadd.f32 %v3507_v11, %v2260_v36 }
 0x32d   : > { %v2294_v28 = vadd.f32 %v2255_v41, %v2097_v33 }
 0x32e   : > { %v1831_v6 = vpop.f32.mrf.mxu3 }
 0x32f   : > { %2326 = vst [vmem:[%s3524_s14 + $0xe0] sm:$0xff] %v2294_v28  ;;  %v1869_v49 = vadd.f32 %v1831_v6, %v1676_v17 }
 0x331   : > { %v2062_v55 = vadd.f32 %v2024_v22, %v1869_v49 }
 0x333   : > { %v2098_v43 = vadd.f32 %v3512_v57, %v2062_v55  ;;  %v2263_v35 = vpop.f32.mrf.mxu1 }
 0x334   : > { %v2264_v60 = vadd.f32 %v3507_v11, %v2263_v35 }
 0x335   : > { %v2295_v9 = vadd.f32 %v2258_v15, %v2098_v43 }
 0x336   : > { %v1834_v4 = vpop.f32.mrf.mxu3 }
 0x337   : > { %2327 = vst [vmem:[%s3524_s14 + $0xe8] sm:$0xff] %v2295_v9  ;;  %v1870_v14 = vadd.f32 %v1834_v4, %v1677_v56 }
 0x339   : > { %v2063_v18 = vadd.f32 %v2027_v1, %v1870_v14 }
 0x33b   : > { %v2099_v47 = vadd.f32 %v3512_v57, %v2063_v18 }
 0x33d   : > { %v2296_v25 = vadd.f32 %v2261_v13, %v2099_v47 }
 0x33e   : > { %v1837_v51 = vpop.f32.mrf.mxu3 }
 0x33f   : > { %2328 = vst [vmem:[%s3524_s14 + $0xf0] sm:$0xff] %v2296_v25  ;;  %v1871_v62 = vadd.f32 %v1837_v51, %v1678_v10 }
 0x341   : > { %v2064_v40 = vadd.f32 %v2030_v29, %v1871_v62 }
 0x343   : > { %v2100_v0 = vadd.f32 %v3512_v57, %v2064_v40 }
 0x345   : > { %v2297_v63 = vadd.f32 %v2264_v60, %v2100_v0 }
 0x347   : > { %2329 = vst [vmem:[%s3524_s14 + $0xf8] sm:$0xff] %v2297_v63 }
 0x348 PF: > { %s16_s21 = sadd.s32 1, %s2464_s21  }
 0x349   : > { %p13_p4 = scmp.ge.s32.totalorder %s16_s21, 4  }
 0x34b   :  { %15 = sbr.rel (!%p13_p4) target bundleno = 1 (0x1), region = 79 }

</bundles_post_ra>
